<compile_context>
chip_gen: v6e
topology: v6e:2x2x1
jax: 0.10.0
libtpu: 0.0.40
codegen_flags: <defaults>
</compile_context>

<pallas_src>
import functools

import jax
import jax.numpy as jnp
from jax.experimental import pallas as pl
from jax.experimental.pallas import tpu as pltpu

BN_EPS = 1e-5
# Scoped-VMEM budget: big row tiles, still < v7x's 64 MiB physical VMEM.
VMEM_LIMIT_BYTES = 48 * 1024 * 1024
# Row-tile budgets (sweepable; v5e/v6e have 2x the VMEM of v7x and can go larger).
MATMUL_ROW_TILE = 512     # rows per grid step for the transposed-conv GEMM
CONV_ROW_BUDGET = 2048    # ~spatial rows (TH*W) per grid step for the fused conv


def _round_up(x, m):
    return (x + m - 1) // m * m


# ----------------------------- Pallas kernels ------------------------------ #

def _matmul_bias_kernel(x_ref, w_ref, b_ref, o_ref):
    # o = x @ w + b    (x, w bf16 -> MXU; accumulate and add bias in f32)
    o_ref[...] = (
        jnp.dot(x_ref[...], w_ref[...], preferred_element_type=jnp.float32)
        + b_ref[...]
    ).astype(o_ref.dtype)


def _conv3x3_bn_relu_kernel(x_ref, w_ref, scale_ref, shift_ref, o_ref):
    # x_ref:       (TH+2, W+2, Cin)  bf16  -- row tile incl. 1-row/1-col halo
    # w_ref:       (3, 3, Cin, Cout) bf16  -- resident across the whole grid
    # scale/shift: (1, Cout)         f32   -- BN scale; BN shift with conv bias folded
    # o_ref:       (TH, W, Cout)
    th, w, cout = o_ref.shape
    cin = x_ref.shape[-1]
    acc = jnp.zeros((th * w, cout), jnp.float32)
    # In-kernel im2col: 9 accumulated MXU dots over the shifted windows.
    for dh in range(3):
        for dw in range(3):
            win = x_ref[dh:dh + th, dw:dw + w, :].reshape(th * w, cin)
            acc = acc + jnp.dot(win, w_ref[dh, dw, :, :],
                                preferred_element_type=jnp.float32)
    y = jnp.maximum(acc * scale_ref[...] + shift_ref[...], 0.0)
    o_ref[...] = y.reshape(th, w, cout).astype(o_ref.dtype)


# ------------------------- ConvTranspose2d(2, s=2) -------------------------- #

def conv_transpose_2x2_s2_nhwc(x_nhwc, weight, bias):
    """ConvTranspose2d(Cin, Cout, 2, stride=2) on an NHWC tensor.

    weight: (Cin, Cout, 2, 2) (PyTorch ConvTranspose2d layout). Returns NHWC f32.
    """
    N, H, W, Cin = x_nhwc.shape
    Cout = weight.shape[1]
    M = N * H * W

    x_rows = x_nhwc.reshape(M, Cin).astype(jnp.bfloat16)
    w_mat = weight.reshape(Cin, Cout * 4).astype(jnp.bfloat16)  # col = co*4 + ki*2 + kj
    b_row = jnp.repeat(bias, 4).reshape(1, Cout * 4).astype(jnp.float32)

    tm = min(MATMUL_ROW_TILE, _round_up(M, 8))
    Mp = _round_up(M, tm)
    if Mp != M:
        x_rows = jnp.pad(x_rows, ((0, Mp - M), (0, 0)))

    cost = pl.CostEstimate(
        flops=2 * Mp * Cin * Cout * 4,
        transcendentals=0,
        bytes_accessed=int(x_rows.size * 2 + w_mat.size * 2 + b_row.size * 4
                           + Mp * Cout * 4 * 4),
    )
    y = pl.pallas_call(
        _matmul_bias_kernel,
        out_shape=jax.ShapeDtypeStruct((Mp, Cout * 4), jnp.float32),
        grid_spec=pltpu.PrefetchScalarGridSpec(
            num_scalar_prefetch=0,
            grid=(Mp // tm,),
            in_specs=[
                pl.BlockSpec((tm, Cin), lambda i: (i, 0)),
                pl.BlockSpec((Cin, Cout * 4), lambda i: (0, 0)),   # resident weights
                pl.BlockSpec((1, Cout * 4), lambda i: (0, 0)),     # resident bias
            ],
            out_specs=pl.BlockSpec((tm, Cout * 4), lambda i: (i, 0)),
        ),
        compiler_params=pltpu.CompilerParams(
            dimension_semantics=("parallel",),
            vmem_limit_bytes=VMEM_LIMIT_BYTES),
        cost_estimate=cost,
    )(x_rows, w_mat, b_row)

    y = y[:M].reshape(N, H, W, Cout, 2, 2)
    y = jnp.transpose(y, (0, 1, 4, 2, 5, 3)).reshape(N, 2 * H, 2 * W, Cout)
    return y


# -------------------- fused Conv3x3 + BN(eval) + ReLU ----------------------- #

def conv3x3_bn_relu_nhwc(x_nhwc, weight, bias, gamma, beta, run_mean, run_var,
                         *, out_dtype=jnp.float32):
    """Conv2d(3x3, pad=1) + BatchNorm2d(eval) + ReLU fused in one Pallas kernel.

    x_nhwc: (N, H, W, Cin); weight: (Cout, Cin, 3, 3). Returns NHWC in `out_dtype`.
    """
    N, H, W, Cin = x_nhwc.shape
    Cout = weight.shape[0]

    TH = max(1, min(H, CONV_ROW_BUDGET // max(W, 1)))
    Hp = _round_up(H, TH)
    n_tiles = Hp // TH

    # Zero-pad (conv halo + H rounding), then gather each row tile with its 2-row
    # halo -> (N, n_tiles, TH+2, W+2, Cin). Only a (TH+2)/TH input blow-up instead
    # of the 9x of a materialized im2col matrix.
    xp = jnp.pad(x_nhwc.astype(jnp.bfloat16),
                 ((0, 0), (1, 1 + Hp - H), (1, 1), (0, 0)))
    ridx = jnp.arange(n_tiles)[:, None] * TH + jnp.arange(TH + 2)[None, :]
    xt = xp[:, ridx]

    w_k = jnp.transpose(weight, (2, 3, 1, 0)).astype(jnp.bfloat16)   # (3,3,Cin,Cout)
    scale = (gamma / jnp.sqrt(run_var + BN_EPS)).astype(jnp.float32)
    shift = (beta + (bias - run_mean) * scale).astype(jnp.float32)   # conv bias folded

    cost = pl.CostEstimate(
        flops=2 * N * Hp * W * 9 * Cin * Cout,
        transcendentals=0,
        bytes_accessed=int(xt.size * 2 + w_k.size * 2 + 2 * Cout * 4
                           + N * Hp * W * Cout * jnp.dtype(out_dtype).itemsize),
    )
    y = pl.pallas_call(
        _conv3x3_bn_relu_kernel,
        out_shape=jax.ShapeDtypeStruct((N, Hp, W, Cout), out_dtype),
        grid_spec=pltpu.PrefetchScalarGridSpec(
            num_scalar_prefetch=0,
            grid=(N, n_tiles),
            in_specs=[
                pl.BlockSpec((pl.Squeezed(), pl.Squeezed(), TH + 2, W + 2, Cin),
                             lambda n, i: (n, i, 0, 0, 0)),
                pl.BlockSpec((3, 3, Cin, Cout), lambda n, i: (0, 0, 0, 0)),
                pl.BlockSpec((1, Cout), lambda n, i: (0, 0)),
                pl.BlockSpec((1, Cout), lambda n, i: (0, 0)),
            ],
            out_specs=pl.BlockSpec((pl.Squeezed(), TH, W, Cout),
                                   lambda n, i: (n, i, 0, 0)),
        ),
        compiler_params=pltpu.CompilerParams(
            dimension_semantics=("parallel", "parallel"),
            vmem_limit_bytes=VMEM_LIMIT_BYTES),
        cost_estimate=cost,
    )(xt, w_k, scale.reshape(1, Cout), shift.reshape(1, Cout))

    return y[:, :H]                                       # (N, H, W, Cout)


def double_conv_forward_nhwc(x_nhwc, p):
    h = conv3x3_bn_relu_nhwc(x_nhwc, p["w1"], p["b1"], p["g1"], p["be1"],
                             p["m1"], p["v1"], out_dtype=jnp.bfloat16)
    return conv3x3_bn_relu_nhwc(h, p["w2"], p["b2"], p["g2"], p["be2"],
                                p["m2"], p["v2"], out_dtype=jnp.float32)


def up_forward(x1, x2, params):
    """Semantics of up.forward (NCHW in / NCHW out).

    Returns (x1_padded, double_conv_output); the PyTorch module returns only the
    first -- the second is returned too so the conv kernels stay live and testable.
    """
    x1_nhwc = jnp.transpose(x1, (0, 2, 3, 1))
    x1u = conv_transpose_2x2_s2_nhwc(x1_nhwc, params["up_w"], params["up_b"])
    diffY = x2.shape[2] - x1u.shape[1]
    diffX = x2.shape[3] - x1u.shape[2]
    x1p = jnp.pad(x1u, ((0, 0),
                        (diffY // 2, diffY - diffY // 2),
                        (diffX // 2, diffX - diffX // 2),
                        (0, 0)))
    x2_nhwc = jnp.transpose(x2, (0, 2, 3, 1))
    xcat = jnp.concatenate([x2_nhwc, x1p], axis=-1)        # channel order [x2, x1]
    conv_nhwc = double_conv_forward_nhwc(xcat, params["dc"])
    return (jnp.transpose(x1p, (0, 3, 1, 2)),
            jnp.transpose(conv_nhwc, (0, 3, 1, 2)))


# ---------------------------- parameter helpers ----------------------------- #

def make_params(key, in_ch, in_ch2, out_ch):
    ks = jax.random.split(key, 14)
    half = in_ch // 2
    return {
        "up_w": 0.1 * jax.random.normal(ks[0], (in_ch, half, 2, 2), jnp.float32),
        "up_b": 0.1 * jax.random.normal(ks[1], (half,), jnp.float32),
        "dc": {
            "w1": 0.1 * jax.random.normal(ks[2], (out_ch, in_ch2, 3, 3), jnp.float32),
            "b1": 0.1 * jax.random.normal(ks[3], (out_ch,), jnp.float32),
            "g1": jax.random.uniform(ks[4], (out_ch,), jnp.float32, 0.5, 1.5),
            "be1": 0.1 * jax.random.normal(ks[5], (out_ch,), jnp.float32),
            "m1": 0.1 * jax.random.normal(ks[6], (out_ch,), jnp.float32),
            "v1": jax.random.uniform(ks[7], (out_ch,), jnp.float32, 0.5, 1.5),
            "w2": 0.1 * jax.random.normal(ks[8], (out_ch, out_ch, 3, 3), jnp.float32),
            "b2": 0.1 * jax.random.normal(ks[9], (out_ch,), jnp.float32),
            "g2": jax.random.uniform(ks[10], (out_ch,), jnp.float32, 0.5, 1.5),
            "be2": 0.1 * jax.random.normal(ks[11], (out_ch,), jnp.float32),
            "m2": 0.1 * jax.random.normal(ks[12], (out_ch,), jnp.float32),
            "v2": jax.random.uniform(ks[13], (out_ch,), jnp.float32, 0.5, 1.5),
        },
    }


# ------------------------------- references --------------------------------- #

def _ref_conv_bn_relu_nchw(x, w, b, g, be, m, v):
    y = jax.lax.conv_general_dilated(
        x, w, window_strides=(1, 1), padding=((1, 1), (1, 1)),
        dimension_numbers=("NCHW", "OIHW", "NCHW"))
    scale = g / jnp.sqrt(v + BN_EPS)
    shift = be + (b - m) * scale
    return jnp.maximum(y * scale[None, :, None, None] + shift[None, :, None, None], 0.0)


# ----------------------------------- main ----------------------------------- #

if __name__ == "__main__":
    key = jax.random.PRNGKey(0)
    k1, k2, kp = jax.random.split(key, 3)

    N = 2
    in_ch = 8                        # channels of x1 (low-res decoder feature)
    skip_ch = 4                      # channels of x2 (skip connection)
    in_ch2 = in_ch // 2 + skip_ch    # = 8, channels after concat
    out_ch = 4
    H1, W1 = 8, 8
    H2, W2 = 16, 16

    x1 = jax.random.normal(k1, (N, in_ch, H1, W1), jnp.float32)
    x2 = jax.random.normal(k2, (N, skip_ch, H2, W2), jnp.float32)
    params = make_params(kp, in_ch, in_ch2, out_ch)

    fwd = jax.jit(functools.partial(up_forward, params=params))
    x1_out, conv_out = fwd(x1, x2)
    jax.block_until_ready((x1_out, conv_out))

    half = in_ch // 2
    assert x1_out.shape == (N, half, H2, W2)
    assert conv_out.shape == (N, out_ch, H2, W2)

    # 1) transposed conv against an f32 einsum reference (kernel uses bf16 operands).
    ref_up = jnp.einsum("nihw,iokl->nohkwl", x1, params["up_w"]).reshape(
        N, half, 2 * H1, 2 * W1) + params["up_b"][None, :, None, None]
    err_up = float(jnp.max(jnp.abs(x1_out - ref_up)))
    assert err_up < 1e-2, f"up mismatch: {err_up}"

    # 2) fused conv/BN/ReLU chain against a plain-XLA f32 reference.
    dc = params["dc"]
    xcat_ref = jnp.concatenate([x2, x1_out], axis=1)
    r = _ref_conv_bn_relu_nchw(xcat_ref, dc["w1"], dc["b1"], dc["g1"], dc["be1"],
                               dc["m1"], dc["v1"])
    r = _ref_conv_bn_relu_nchw(r, dc["w2"], dc["b2"], dc["g2"], dc["be2"],
                               dc["m2"], dc["v2"])
    err_conv = float(jnp.max(jnp.abs(conv_out - r)))
    assert err_conv < 5e-2, f"double_conv mismatch: {err_conv}"

    print("KERNEL_OK")
</pallas_src>

<mosaic_0001>
module attributes {stable_mosaic.version = 11 : i64} {
  func.func @_matmul_bias_kernel(%arg0: i32, %arg1: memref<128x8xbf16, #tpu.memory_space<vmem>>, %arg2: memref<8x16xbf16, #tpu.memory_space<vmem>>, %arg3: memref<1x16xf32, #tpu.memory_space<vmem>>, %arg4: memref<128x16xf32, #tpu.memory_space<vmem>>) attributes {dimension_semantics = [#tpu.dimension_semantics<parallel>], iteration_bounds = array<i64: 1>, scalar_prefetch = 0 : i64, scratch_operands = 0 : i64, tpu.core_type = #tpu.core_type<tc>, window_params = [{transform_indices = @transform_0, window_bounds = array<i64: 128, 8>}, {pipeline_mode = #tpu.pipeline_mode<synchronous>, transform_indices = @transform_1, window_bounds = array<i64: 8, 16>}, {pipeline_mode = #tpu.pipeline_mode<synchronous>, transform_indices = @transform_2, window_bounds = array<i64: 1, 16>}, {transform_indices = @transform_3, window_bounds = array<i64: 128, 16>}]} {
    %c0 = arith.constant 0 : index
    %c0_0 = arith.constant 0 : index
    %0 = vector.load %arg1[%c0, %c0_0] : memref<128x8xbf16, #tpu.memory_space<vmem>>, vector<128x8xbf16>
    %c0_1 = arith.constant 0 : index
    %c0_2 = arith.constant 0 : index
    %1 = vector.load %arg2[%c0_1, %c0_2] : memref<8x16xbf16, #tpu.memory_space<vmem>>, vector<8x16xbf16>
    %cst = arith.constant dense<0.000000e+00> : vector<128x16xf32>
    %2 = tpu.matmul %0, %1, %cst {dimension_numbers = #tpu.dot_dimension_numbers<[1], [0], [0], [1], [0, 0, 1, 1], [], []>} : vector<128x8xbf16>, vector<8x16xbf16>, vector<128x16xf32> -> vector<128x16xf32>
    %c0_3 = arith.constant 0 : index
    %c0_4 = arith.constant 0 : index
    %3 = vector.load %arg3[%c0_3, %c0_4] : memref<1x16xf32, #tpu.memory_space<vmem>>, vector<1x16xf32>
    %4 = vector.broadcast %3 : vector<1x16xf32> to vector<128x16xf32>
    %5 = arith.addf %2, %4 : vector<128x16xf32>
    %c0_5 = arith.constant 0 : index
    %c0_6 = arith.constant 0 : index
    %6 = vector.load %arg4[%c0_5, %c0_6] : memref<128x16xf32, #tpu.memory_space<vmem>>, vector<128x16xf32>
    tpu.vector_store %arg4[%c0_5, %c0_6], %5 {strides = array<i32>} : memref<128x16xf32, #tpu.memory_space<vmem>>, vector<128x16xf32>,
    return
  }
  func.func @transform_0(%arg0: i32) -> (i32, i32) {
    %c0_i32 = arith.constant 0 : i32
    %c0_i32_0 = arith.constant 0 : i32
    return %arg0, %c0_i32 : i32, i32
  }
  func.func @transform_1(%arg0: i32) -> (i32, i32) {
    %c0_i32 = arith.constant 0 : i32
    %c0_i32_0 = arith.constant 0 : i32
    %c0_i32_1 = arith.constant 0 : i32
    return %c0_i32, %c0_i32_0 : i32, i32
  }
  func.func @transform_2(%arg0: i32) -> (i32, i32) {
    %c0_i32 = arith.constant 0 : i32
    %c0_i32_0 = arith.constant 0 : i32
    %c0_i32_1 = arith.constant 0 : i32
    return %c0_i32, %c0_i32_0 : i32, i32
  }
  func.func @transform_3(%arg0: i32) -> (i32, i32) {
    %c0_i32 = arith.constant 0 : i32
    %c0_i32_0 = arith.constant 0 : i32
    return %arg0, %c0_i32 : i32, i32
  }
}

module attributes {stable_mosaic.version = 11 : i64} {
  func.func @_conv3x3_bn_relu_kernel(%arg0: i32, %arg1: i32, %arg2: memref<1x1x18x18x8xbf16, #tpu.memory_space<vmem>>, %arg3: memref<3x3x8x4xbf16, #tpu.memory_space<vmem>>, %arg4: memref<1x4xf32, #tpu.memory_space<vmem>>, %arg5: memref<1x4xf32, #tpu.memory_space<vmem>>, %arg6: memref<1x16x16x4xbf16, #tpu.memory_space<vmem>>) attributes {dimension_semantics = [#tpu.dimension_semantics<parallel>, #tpu.dimension_semantics<parallel>], iteration_bounds = array<i64: 2, 1>, scalar_prefetch = 0 : i64, scratch_operands = 0 : i64, tpu.core_type = #tpu.core_type<tc>, window_params = [{transform_indices = @transform_0, window_bounds = array<i64: 1, 1, 18, 18, 8>}, {pipeline_mode = #tpu.pipeline_mode<synchronous>, transform_indices = @transform_1, window_bounds = array<i64: 3, 3, 8, 4>}, {pipeline_mode = #tpu.pipeline_mode<synchronous>, transform_indices = @transform_2, window_bounds = array<i64: 1, 4>}, {pipeline_mode = #tpu.pipeline_mode<synchronous>, transform_indices = @transform_3, window_bounds = array<i64: 1, 4>}, {transform_indices = @transform_4, window_bounds = array<i64: 1, 16, 16, 4>}]} {
    %cst = arith.constant 0.000000e+00 : f32
    %0 = vector.broadcast %cst : f32 to vector<256x4xf32>
    %c0 = arith.constant 0 : index
    %c0_0 = arith.constant 0 : index
    %c0_1 = arith.constant 0 : index
    %c0_2 = arith.constant 0 : index
    %c0_3 = arith.constant 0 : index
    %1 = vector.load %arg2[%c0, %c0_0, %c0_1, %c0_2, %c0_3] : memref<1x1x18x18x8xbf16, #tpu.memory_space<vmem>>, vector<1x1x16x16x8xbf16>
    %2 = vector.shape_cast %1 : vector<1x1x16x16x8xbf16> to vector<16x16x8xbf16>
    %3 = vector.shape_cast %2 : vector<16x16x8xbf16> to vector<256x8xbf16>
    %c0_4 = arith.constant 0 : index
    %c0_5 = arith.constant 0 : index
    %c0_6 = arith.constant 0 : index
    %c0_7 = arith.constant 0 : index
    %4 = vector.load %arg3[%c0_4, %c0_5, %c0_6, %c0_7] : memref<3x3x8x4xbf16, #tpu.memory_space<vmem>>, vector<1x1x8x4xbf16>
    %5 = vector.shape_cast %4 : vector<1x1x8x4xbf16> to vector<8x4xbf16>
    %cst_8 = arith.constant dense<0.000000e+00> : vector<256x4xf32>
    %6 = tpu.matmul %3, %5, %cst_8 {dimension_numbers = #tpu.dot_dimension_numbers<[1], [0], [0], [1], [0, 0, 1, 1], [], []>} : vector<256x8xbf16>, vector<8x4xbf16>, vector<256x4xf32> -> vector<256x4xf32>
    %7 = arith.addf %0, %6 : vector<256x4xf32>
    %c0_9 = arith.constant 0 : index
    %c0_10 = arith.constant 0 : index
    %c0_11 = arith.constant 0 : index
    %c1 = arith.constant 1 : index
    %c0_12 = arith.constant 0 : index
    %8 = vector.load %arg2[%c0_9, %c0_10, %c0_11, %c1, %c0_12] : memref<1x1x18x18x8xbf16, #tpu.memory_space<vmem>>, vector<1x1x16x16x8xbf16>
    %9 = vector.shape_cast %8 : vector<1x1x16x16x8xbf16> to vector<16x16x8xbf16>
    %10 = vector.shape_cast %9 : vector<16x16x8xbf16> to vector<256x8xbf16>
    %c0_13 = arith.constant 0 : index
    %c1_14 = arith.constant 1 : index
    %c0_15 = arith.constant 0 : index
    %c0_16 = arith.constant 0 : index
    %11 = vector.load %arg3[%c0_13, %c1_14, %c0_15, %c0_16] : memref<3x3x8x4xbf16, #tpu.memory_space<vmem>>, vector<1x1x8x4xbf16>
    %12 = vector.shape_cast %11 : vector<1x1x8x4xbf16> to vector<8x4xbf16>
    %cst_17 = arith.constant dense<0.000000e+00> : vector<256x4xf32>
    %13 = tpu.matmul %10, %12, %cst_17 {dimension_numbers = #tpu.dot_dimension_numbers<[1], [0], [0], [1], [0, 0, 1, 1], [], []>} : vector<256x8xbf16>, vector<8x4xbf16>, vector<256x4xf32> -> vector<256x4xf32>
    %14 = arith.addf %7, %13 : vector<256x4xf32>
    %c0_18 = arith.constant 0 : index
    %c0_19 = arith.constant 0 : index
    %c0_20 = arith.constant 0 : index
    %c2 = arith.constant 2 : index
    %c0_21 = arith.constant 0 : index
    %15 = vector.load %arg2[%c0_18, %c0_19, %c0_20, %c2, %c0_21] : memref<1x1x18x18x8xbf16, #tpu.memory_space<vmem>>, vector<1x1x16x16x8xbf16>
    %16 = vector.shape_cast %15 : vector<1x1x16x16x8xbf16> to vector<16x16x8xbf16>
    %17 = vector.shape_cast %16 : vector<16x16x8xbf16> to vector<256x8xbf16>
    %c0_22 = arith.constant 0 : index
    %c2_23 = arith.constant 2 : index
    %c0_24 = arith.constant 0 : index
    %c0_25 = arith.constant 0 : index
    %18 = vector.load %arg3[%c0_22, %c2_23, %c0_24, %c0_25] : memref<3x3x8x4xbf16, #tpu.memory_space<vmem>>, vector<1x1x8x4xbf16>
    %19 = vector.shape_cast %18 : vector<1x1x8x4xbf16> to vector<8x4xbf16>
    %cst_26 = arith.constant dense<0.000000e+00> : vector<256x4xf32>
    %20 = tpu.matmul %17, %19, %cst_26 {dimension_numbers = #tpu.dot_dimension_numbers<[1], [0], [0], [1], [0, 0, 1, 1], [], []>} : vector<256x8xbf16>, vector<8x4xbf16>, vector<256x4xf32> -> vector<256x4xf32>
    %21 = arith.addf %14, %20 : vector<256x4xf32>
    %c0_27 = arith.constant 0 : index
    %c0_28 = arith.constant 0 : index
    %c1_29 = arith.constant 1 : index
    %c0_30 = arith.constant 0 : index
    %c0_31 = arith.constant 0 : index
    %22 = vector.load %arg2[%c0_27, %c0_28, %c1_29, %c0_30, %c0_31] : memref<1x1x18x18x8xbf16, #tpu.memory_space<vmem>>, vector<1x1x16x16x8xbf16>
    %23 = vector.shape_cast %22 : vector<1x1x16x16x8xbf16> to vector<16x16x8xbf16>
    %24 = vector.shape_cast %23 : vector<16x16x8xbf16> to vector<256x8xbf16>
    %c1_32 = arith.constant 1 : index
    %c0_33 = arith.constant 0 : index
    %c0_34 = arith.constant 0 : index
    %c0_35 = arith.constant 0 : index
    %25 = vector.load %arg3[%c1_32, %c0_33, %c0_34, %c0_35] : memref<3x3x8x4xbf16, #tpu.memory_space<vmem>>, vector<1x1x8x4xbf16>
    %26 = vector.shape_cast %25 : vector<1x1x8x4xbf16> to vector<8x4xbf16>
    %cst_36 = arith.constant dense<0.000000e+00> : vector<256x4xf32>
    %27 = tpu.matmul %24, %26, %cst_36 {dimension_numbers = #tpu.dot_dimension_numbers<[1], [0], [0], [1], [0, 0, 1, 1], [], []>} : vector<256x8xbf16>, vector<8x4xbf16>, vector<256x4xf32> -> vector<256x4xf32>
    %28 = arith.addf %21, %27 : vector<256x4xf32>
    %c0_37 = arith.constant 0 : index
    %c0_38 = arith.constant 0 : index
    %c1_39 = arith.constant 1 : index
    %c1_40 = arith.constant 1 : index
    %c0_41 = arith.constant 0 : index
    %29 = vector.load %arg2[%c0_37, %c0_38, %c1_39, %c1_40, %c0_41] : memref<1x1x18x18x8xbf16, #tpu.memory_space<vmem>>, vector<1x1x16x16x8xbf16>
    %30 = vector.shape_cast %29 : vector<1x1x16x16x8xbf16> to vector<16x16x8xbf16>
    %31 = vector.shape_cast %30 : vector<16x16x8xbf16> to vector<256x8xbf16>
    %c1_42 = arith.constant 1 : index
    %c1_43 = arith.constant 1 : index
    %c0_44 = arith.constant 0 : index
    %c0_45 = arith.constant 0 : index
    %32 = vector.load %arg3[%c1_42, %c1_43, %c0_44, %c0_45] : memref<3x3x8x4xbf16, #tpu.memory_space<vmem>>, vector<1x1x8x4xbf16>
    %33 = vector.shape_cast %32 : vector<1x1x8x4xbf16> to vector<8x4xbf16>
    %cst_46 = arith.constant dense<0.000000e+00> : vector<256x4xf32>
    %34 = tpu.matmul %31, %33, %cst_46 {dimension_numbers = #tpu.dot_dimension_numbers<[1], [0], [0], [1], [0, 0, 1, 1], [], []>} : vector<256x8xbf16>, vector<8x4xbf16>, vector<256x4xf32> -> vector<256x4xf32>
    %35 = arith.addf %28, %34 : vector<256x4xf32>
    %c0_47 = arith.constant 0 : index
    %c0_48 = arith.constant 0 : index
    %c1_49 = arith.constant 1 : index
    %c2_50 = arith.constant 2 : index
    %c0_51 = arith.constant 0 : index
    %36 = vector.load %arg2[%c0_47, %c0_48, %c1_49, %c2_50, %c0_51] : memref<1x1x18x18x8xbf16, #tpu.memory_space<vmem>>, vector<1x1x16x16x8xbf16>
    %37 = vector.shape_cast %36 : vector<1x1x16x16x8xbf16> to vector<16x16x8xbf16>
    %38 = vector.shape_cast %37 : vector<16x16x8xbf16> to vector<256x8xbf16>
    %c1_52 = arith.constant 1 : index
    %c2_53 = arith.constant 2 : index
    %c0_54 = arith.constant 0 : index
    %c0_55 = arith.constant 0 : index
    %39 = vector.load %arg3[%c1_52, %c2_53, %c0_54, %c0_55] : memref<3x3x8x4xbf16, #tpu.memory_space<vmem>>, vector<1x1x8x4xbf16>
    %40 = vector.shape_cast %39 : vector<1x1x8x4xbf16> to vector<8x4xbf16>
    %cst_56 = arith.constant dense<0.000000e+00> : vector<256x4xf32>
    %41 = tpu.matmul %38, %40, %cst_56 {dimension_numbers = #tpu.dot_dimension_numbers<[1], [0], [0], [1], [0, 0, 1, 1], [], []>} : vector<256x8xbf16>, vector<8x4xbf16>, vector<256x4xf32> -> vector<256x4xf32>
    %42 = arith.addf %35, %41 : vector<256x4xf32>
    %c0_57 = arith.constant 0 : index
    %c0_58 = arith.constant 0 : index
    %c2_59 = arith.constant 2 : index
    %c0_60 = arith.constant 0 : index
    %c0_61 = arith.constant 0 : index
    %43 = vector.load %arg2[%c0_57, %c0_58, %c2_59, %c0_60, %c0_61] : memref<1x1x18x18x8xbf16, #tpu.memory_space<vmem>>, vector<1x1x16x16x8xbf16>
    %44 = vector.shape_cast %43 : vector<1x1x16x16x8xbf16> to vector<16x16x8xbf16>
    %45 = vector.shape_cast %44 : vector<16x16x8xbf16> to vector<256x8xbf16>
    %c2_62 = arith.constant 2 : index
    %c0_63 = arith.constant 0 : index
    %c0_64 = arith.constant 0 : index
    %c0_65 = arith.constant 0 : index
    %46 = vector.load %arg3[%c2_62, %c0_63, %c0_64, %c0_65] : memref<3x3x8x4xbf16, #tpu.memory_space<vmem>>, vector<1x1x8x4xbf16>
    %47 = vector.shape_cast %46 : vector<1x1x8x4xbf16> to vector<8x4xbf16>
    %cst_66 = arith.constant dense<0.000000e+00> : vector<256x4xf32>
    %48 = tpu.matmul %45, %47, %cst_66 {dimension_numbers = #tpu.dot_dimension_numbers<[1], [0], [0], [1], [0, 0, 1, 1], [], []>} : vector<256x8xbf16>, vector<8x4xbf16>, vector<256x4xf32> -> vector<256x4xf32>
    %49 = arith.addf %42, %48 : vector<256x4xf32>
    %c0_67 = arith.constant 0 : index
    %c0_68 = arith.constant 0 : index
    %c2_69 = arith.constant 2 : index
    %c1_70 = arith.constant 1 : index
    %c0_71 = arith.constant 0 : index
    %50 = vector.load %arg2[%c0_67, %c0_68, %c2_69, %c1_70, %c0_71] : memref<1x1x18x18x8xbf16, #tpu.memory_space<vmem>>, vector<1x1x16x16x8xbf16>
    %51 = vector.shape_cast %50 : vector<1x1x16x16x8xbf16> to vector<16x16x8xbf16>
    %52 = vector.shape_cast %51 : vector<16x16x8xbf16> to vector<256x8xbf16>
    %c2_72 = arith.constant 2 : index
    %c1_73 = arith.constant 1 : index
    %c0_74 = arith.constant 0 : index
    %c0_75 = arith.constant 0 : index
    %53 = vector.load %arg3[%c2_72, %c1_73, %c0_74, %c0_75] : memref<3x3x8x4xbf16, #tpu.memory_space<vmem>>, vector<1x1x8x4xbf16>
    %54 = vector.shape_cast %53 : vector<1x1x8x4xbf16> to vector<8x4xbf16>
    %cst_76 = arith.constant dense<0.000000e+00> : vector<256x4xf32>
    %55 = tpu.matmul %52, %54, %cst_76 {dimension_numbers = #tpu.dot_dimension_numbers<[1], [0], [0], [1], [0, 0, 1, 1], [], []>} : vector<256x8xbf16>, vector<8x4xbf16>, vector<256x4xf32> -> vector<256x4xf32>
    %56 = arith.addf %49, %55 : vector<256x4xf32>
    %c0_77 = arith.constant 0 : index
    %c0_78 = arith.constant 0 : index
    %c2_79 = arith.constant 2 : index
    %c2_80 = arith.constant 2 : index
    %c0_81 = arith.constant 0 : index
    %57 = vector.load %arg2[%c0_77, %c0_78, %c2_79, %c2_80, %c0_81] : memref<1x1x18x18x8xbf16, #tpu.memory_space<vmem>>, vector<1x1x16x16x8xbf16>
    %58 = vector.shape_cast %57 : vector<1x1x16x16x8xbf16> to vector<16x16x8xbf16>
    %59 = vector.shape_cast %58 : vector<16x16x8xbf16> to vector<256x8xbf16>
    %c2_82 = arith.constant 2 : index
    %c2_83 = arith.constant 2 : index
    %c0_84 = arith.constant 0 : index
    %c0_85 = arith.constant 0 : index
    %60 = vector.load %arg3[%c2_82, %c2_83, %c0_84, %c0_85] : memref<3x3x8x4xbf16, #tpu.memory_space<vmem>>, vector<1x1x8x4xbf16>
    %61 = vector.shape_cast %60 : vector<1x1x8x4xbf16> to vector<8x4xbf16>
    %cst_86 = arith.constant dense<0.000000e+00> : vector<256x4xf32>
    %62 = tpu.matmul %59, %61, %cst_86 {dimension_numbers = #tpu.dot_dimension_numbers<[1], [0], [0], [1], [0, 0, 1, 1], [], []>} : vector<256x8xbf16>, vector<8x4xbf16>, vector<256x4xf32> -> vector<256x4xf32>
    %63 = arith.addf %56, %62 : vector<256x4xf32>
    %c0_87 = arith.constant 0 : index
    %c0_88 = arith.constant 0 : index
    %64 = vector.load %arg4[%c0_87, %c0_88] : memref<1x4xf32, #tpu.memory_space<vmem>>, vector<1x4xf32>
    %65 = vector.broadcast %64 : vector<1x4xf32> to vector<256x4xf32>
    %66 = arith.mulf %63, %65 : vector<256x4xf32>
    %c0_89 = arith.constant 0 : index
    %c0_90 = arith.constant 0 : index
    %67 = vector.load %arg5[%c0_89, %c0_90] : memref<1x4xf32, #tpu.memory_space<vmem>>, vector<1x4xf32>
    %68 = vector.broadcast %67 : vector<1x4xf32> to vector<256x4xf32>
    %69 = arith.addf %66, %68 : vector<256x4xf32>
    %cst_91 = arith.constant 0.000000e+00 : f32
    %70 = vector.broadcast %cst_91 : f32 to vector<256x4xf32>
    %71 = arith.maximumf %69, %70 : vector<256x4xf32>
    %72 = vector.shape_cast %71 : vector<256x4xf32> to vector<16x16x4xf32>
    %73 = arith.truncf %72 : vector<16x16x4xf32> to vector<16x16x4xbf16>
    %c0_92 = arith.constant 0 : index
    %c0_93 = arith.constant 0 : index
    %c0_94 = arith.constant 0 : index
    %c0_95 = arith.constant 0 : index
    %74 = vector.load %arg6[%c0_92, %c0_93, %c0_94, %c0_95] : memref<1x16x16x4xbf16, #tpu.memory_space<vmem>>, vector<1x16x16x4xbf16>
    %75 = vector.shape_cast %74 : vector<1x16x16x4xbf16> to vector<16x16x4xbf16>
    %76 = vector.shape_cast %73 : vector<16x16x4xbf16> to vector<1x16x16x4xbf16>
    tpu.vector_store %arg6[%c0_92, %c0_93, %c0_94, %c0_95], %76 {strides = array<i32>} : memref<1x16x16x4xbf16, #tpu.memory_space<vmem>>, vector<1x16x16x4xbf16>,
    return
  }
  func.func @transform_0(%arg0: i32, %arg1: i32) -> (i32, i32, i32, i32, i32) {
    %c0_i32 = arith.constant 0 : i32
    %c0_i32_0 = arith.constant 0 : i32
    %c0_i32_1 = arith.constant 0 : i32
    %c0_i32_2 = arith.constant 0 : i32
    return %arg0, %arg1, %c0_i32, %c0_i32_0, %c0_i32_1 : i32, i32, i32, i32, i32
  }
  func.func @transform_1(%arg0: i32, %arg1: i32) -> (i32, i32, i32, i32) {
    %c0_i32 = arith.constant 0 : i32
    %c0_i32_0 = arith.constant 0 : i32
    %c0_i32_1 = arith.constant 0 : i32
    %c0_i32_2 = arith.constant 0 : i32
    %c0_i32_3 = arith.constant 0 : i32
    return %c0_i32, %c0_i32_0, %c0_i32_1, %c0_i32_2 : i32, i32, i32, i32
  }
  func.func @transform_2(%arg0: i32, %arg1: i32) -> (i32, i32) {
    %c0_i32 = arith.constant 0 : i32
    %c0_i32_0 = arith.constant 0 : i32
    %c0_i32_1 = arith.constant 0 : i32
    return %c0_i32, %c0_i32_0 : i32, i32
  }
  func.func @transform_3(%arg0: i32, %arg1: i32) -> (i32, i32) {
    %c0_i32 = arith.constant 0 : i32
    %c0_i32_0 = arith.constant 0 : i32
    %c0_i32_1 = arith.constant 0 : i32
    return %c0_i32, %c0_i32_0 : i32, i32
  }
  func.func @transform_4(%arg0: i32, %arg1: i32) -> (i32, i32, i32, i32) {
    %c0_i32 = arith.constant 0 : i32
    %c0_i32_0 = arith.constant 0 : i32
    %c0_i32_1 = arith.constant 0 : i32
    return %arg0, %arg1, %c0_i32, %c0_i32_0 : i32, i32, i32, i32
  }
}

module attributes {stable_mosaic.version = 11 : i64} {
  func.func @_conv3x3_bn_relu_kernel(%arg0: i32, %arg1: i32, %arg2: memref<1x1x18x18x4xbf16, #tpu.memory_space<vmem>>, %arg3: memref<3x3x4x4xbf16, #tpu.memory_space<vmem>>, %arg4: memref<1x4xf32, #tpu.memory_space<vmem>>, %arg5: memref<1x4xf32, #tpu.memory_space<vmem>>, %arg6: memref<1x16x16x4xf32, #tpu.memory_space<vmem>>) attributes {dimension_semantics = [#tpu.dimension_semantics<parallel>, #tpu.dimension_semantics<parallel>], iteration_bounds = array<i64: 2, 1>, scalar_prefetch = 0 : i64, scratch_operands = 0 : i64, tpu.core_type = #tpu.core_type<tc>, window_params = [{transform_indices = @transform_0, window_bounds = array<i64: 1, 1, 18, 18, 4>}, {pipeline_mode = #tpu.pipeline_mode<synchronous>, transform_indices = @transform_1, window_bounds = array<i64: 3, 3, 4, 4>}, {pipeline_mode = #tpu.pipeline_mode<synchronous>, transform_indices = @transform_2, window_bounds = array<i64: 1, 4>}, {pipeline_mode = #tpu.pipeline_mode<synchronous>, transform_indices = @transform_3, window_bounds = array<i64: 1, 4>}, {transform_indices = @transform_4, window_bounds = array<i64: 1, 16, 16, 4>}]} {
    %cst = arith.constant 0.000000e+00 : f32
    %0 = vector.broadcast %cst : f32 to vector<256x4xf32>
    %c0 = arith.constant 0 : index
    %c0_0 = arith.constant 0 : index
    %c0_1 = arith.constant 0 : index
    %c0_2 = arith.constant 0 : index
    %c0_3 = arith.constant 0 : index
    %1 = vector.load %arg2[%c0, %c0_0, %c0_1, %c0_2, %c0_3] : memref<1x1x18x18x4xbf16, #tpu.memory_space<vmem>>, vector<1x1x16x16x4xbf16>
    %2 = vector.shape_cast %1 : vector<1x1x16x16x4xbf16> to vector<16x16x4xbf16>
    %3 = vector.shape_cast %2 : vector<16x16x4xbf16> to vector<256x4xbf16>
    %c0_4 = arith.constant 0 : index
    %c0_5 = arith.constant 0 : index
    %c0_6 = arith.constant 0 : index
    %c0_7 = arith.constant 0 : index
    %4 = vector.load %arg3[%c0_4, %c0_5, %c0_6, %c0_7] : memref<3x3x4x4xbf16, #tpu.memory_space<vmem>>, vector<1x1x4x4xbf16>
    %5 = vector.shape_cast %4 : vector<1x1x4x4xbf16> to vector<4x4xbf16>
    %cst_8 = arith.constant dense<0.000000e+00> : vector<256x4xf32>
    %6 = tpu.matmul %3, %5, %cst_8 {dimension_numbers = #tpu.dot_dimension_numbers<[1], [0], [0], [1], [0, 0, 1, 1], [], []>} : vector<256x4xbf16>, vector<4x4xbf16>, vector<256x4xf32> -> vector<256x4xf32>
    %7 = arith.addf %0, %6 : vector<256x4xf32>
    %c0_9 = arith.constant 0 : index
    %c0_10 = arith.constant 0 : index
    %c0_11 = arith.constant 0 : index
    %c1 = arith.constant 1 : index
    %c0_12 = arith.constant 0 : index
    %8 = vector.load %arg2[%c0_9, %c0_10, %c0_11, %c1, %c0_12] : memref<1x1x18x18x4xbf16, #tpu.memory_space<vmem>>, vector<1x1x16x16x4xbf16>
    %9 = vector.shape_cast %8 : vector<1x1x16x16x4xbf16> to vector<16x16x4xbf16>
    %10 = vector.shape_cast %9 : vector<16x16x4xbf16> to vector<256x4xbf16>
    %c0_13 = arith.constant 0 : index
    %c1_14 = arith.constant 1 : index
    %c0_15 = arith.constant 0 : index
    %c0_16 = arith.constant 0 : index
    %11 = vector.load %arg3[%c0_13, %c1_14, %c0_15, %c0_16] : memref<3x3x4x4xbf16, #tpu.memory_space<vmem>>, vector<1x1x4x4xbf16>
    %12 = vector.shape_cast %11 : vector<1x1x4x4xbf16> to vector<4x4xbf16>
    %cst_17 = arith.constant dense<0.000000e+00> : vector<256x4xf32>
    %13 = tpu.matmul %10, %12, %cst_17 {dimension_numbers = #tpu.dot_dimension_numbers<[1], [0], [0], [1], [0, 0, 1, 1], [], []>} : vector<256x4xbf16>, vector<4x4xbf16>, vector<256x4xf32> -> vector<256x4xf32>
    %14 = arith.addf %7, %13 : vector<256x4xf32>
    %c0_18 = arith.constant 0 : index
    %c0_19 = arith.constant 0 : index
    %c0_20 = arith.constant 0 : index
    %c2 = arith.constant 2 : index
    %c0_21 = arith.constant 0 : index
    %15 = vector.load %arg2[%c0_18, %c0_19, %c0_20, %c2, %c0_21] : memref<1x1x18x18x4xbf16, #tpu.memory_space<vmem>>, vector<1x1x16x16x4xbf16>
    %16 = vector.shape_cast %15 : vector<1x1x16x16x4xbf16> to vector<16x16x4xbf16>
    %17 = vector.shape_cast %16 : vector<16x16x4xbf16> to vector<256x4xbf16>
    %c0_22 = arith.constant 0 : index
    %c2_23 = arith.constant 2 : index
    %c0_24 = arith.constant 0 : index
    %c0_25 = arith.constant 0 : index
    %18 = vector.load %arg3[%c0_22, %c2_23, %c0_24, %c0_25] : memref<3x3x4x4xbf16, #tpu.memory_space<vmem>>, vector<1x1x4x4xbf16>
    %19 = vector.shape_cast %18 : vector<1x1x4x4xbf16> to vector<4x4xbf16>
    %cst_26 = arith.constant dense<0.000000e+00> : vector<256x4xf32>
    %20 = tpu.matmul %17, %19, %cst_26 {dimension_numbers = #tpu.dot_dimension_numbers<[1], [0], [0], [1], [0, 0, 1, 1], [], []>} : vector<256x4xbf16>, vector<4x4xbf16>, vector<256x4xf32> -> vector<256x4xf32>
    %21 = arith.addf %14, %20 : vector<256x4xf32>
    %c0_27 = arith.constant 0 : index
    %c0_28 = arith.constant 0 : index
    %c1_29 = arith.constant 1 : index
    %c0_30 = arith.constant 0 : index
    %c0_31 = arith.constant 0 : index
    %22 = vector.load %arg2[%c0_27, %c0_28, %c1_29, %c0_30, %c0_31] : memref<1x1x18x18x4xbf16, #tpu.memory_space<vmem>>, vector<1x1x16x16x4xbf16>
    %23 = vector.shape_cast %22 : vector<1x1x16x16x4xbf16> to vector<16x16x4xbf16>
    %24 = vector.shape_cast %23 : vector<16x16x4xbf16> to vector<256x4xbf16>
    %c1_32 = arith.constant 1 : index
    %c0_33 = arith.constant 0 : index
    %c0_34 = arith.constant 0 : index
    %c0_35 = arith.constant 0 : index
    %25 = vector.load %arg3[%c1_32, %c0_33, %c0_34, %c0_35] : memref<3x3x4x4xbf16, #tpu.memory_space<vmem>>, vector<1x1x4x4xbf16>
    %26 = vector.shape_cast %25 : vector<1x1x4x4xbf16> to vector<4x4xbf16>
    %cst_36 = arith.constant dense<0.000000e+00> : vector<256x4xf32>
    %27 = tpu.matmul %24, %26, %cst_36 {dimension_numbers = #tpu.dot_dimension_numbers<[1], [0], [0], [1], [0, 0, 1, 1], [], []>} : vector<256x4xbf16>, vector<4x4xbf16>, vector<256x4xf32> -> vector<256x4xf32>
    %28 = arith.addf %21, %27 : vector<256x4xf32>
    %c0_37 = arith.constant 0 : index
    %c0_38 = arith.constant 0 : index
    %c1_39 = arith.constant 1 : index
    %c1_40 = arith.constant 1 : index
    %c0_41 = arith.constant 0 : index
    %29 = vector.load %arg2[%c0_37, %c0_38, %c1_39, %c1_40, %c0_41] : memref<1x1x18x18x4xbf16, #tpu.memory_space<vmem>>, vector<1x1x16x16x4xbf16>
    %30 = vector.shape_cast %29 : vector<1x1x16x16x4xbf16> to vector<16x16x4xbf16>
    %31 = vector.shape_cast %30 : vector<16x16x4xbf16> to vector<256x4xbf16>
    %c1_42 = arith.constant 1 : index
    %c1_43 = arith.constant 1 : index
    %c0_44 = arith.constant 0 : index
    %c0_45 = arith.constant 0 : index
    %32 = vector.load %arg3[%c1_42, %c1_43, %c0_44, %c0_45] : memref<3x3x4x4xbf16, #tpu.memory_space<vmem>>, vector<1x1x4x4xbf16>
    %33 = vector.shape_cast %32 : vector<1x1x4x4xbf16> to vector<4x4xbf16>
    %cst_46 = arith.constant dense<0.000000e+00> : vector<256x4xf32>
    %34 = tpu.matmul %31, %33, %cst_46 {dimension_numbers = #tpu.dot_dimension_numbers<[1], [0], [0], [1], [0, 0, 1, 1], [], []>} : vector<256x4xbf16>, vector<4x4xbf16>, vector<256x4xf32> -> vector<256x4xf32>
    %35 = arith.addf %28, %34 : vector<256x4xf32>
    %c0_47 = arith.constant 0 : index
    %c0_48 = arith.constant 0 : index
    %c1_49 = arith.constant 1 : index
    %c2_50 = arith.constant 2 : index
    %c0_51 = arith.constant 0 : index
    %36 = vector.load %arg2[%c0_47, %c0_48, %c1_49, %c2_50, %c0_51] : memref<1x1x18x18x4xbf16, #tpu.memory_space<vmem>>, vector<1x1x16x16x4xbf16>
    %37 = vector.shape_cast %36 : vector<1x1x16x16x4xbf16> to vector<16x16x4xbf16>
    %38 = vector.shape_cast %37 : vector<16x16x4xbf16> to vector<256x4xbf16>
    %c1_52 = arith.constant 1 : index
    %c2_53 = arith.constant 2 : index
    %c0_54 = arith.constant 0 : index
    %c0_55 = arith.constant 0 : index
    %39 = vector.load %arg3[%c1_52, %c2_53, %c0_54, %c0_55] : memref<3x3x4x4xbf16, #tpu.memory_space<vmem>>, vector<1x1x4x4xbf16>
    %40 = vector.shape_cast %39 : vector<1x1x4x4xbf16> to vector<4x4xbf16>
    %cst_56 = arith.constant dense<0.000000e+00> : vector<256x4xf32>
    %41 = tpu.matmul %38, %40, %cst_56 {dimension_numbers = #tpu.dot_dimension_numbers<[1], [0], [0], [1], [0, 0, 1, 1], [], []>} : vector<256x4xbf16>, vector<4x4xbf16>, vector<256x4xf32> -> vector<256x4xf32>
    %42 = arith.addf %35, %41 : vector<256x4xf32>
    %c0_57 = arith.constant 0 : index
    %c0_58 = arith.constant 0 : index
    %c2_59 = arith.constant 2 : index
    %c0_60 = arith.constant 0 : index
    %c0_61 = arith.constant 0 : index
    %43 = vector.load %arg2[%c0_57, %c0_58, %c2_59, %c0_60, %c0_61] : memref<1x1x18x18x4xbf16, #tpu.memory_space<vmem>>, vector<1x1x16x16x4xbf16>
    %44 = vector.shape_cast %43 : vector<1x1x16x16x4xbf16> to vector<16x16x4xbf16>
    %45 = vector.shape_cast %44 : vector<16x16x4xbf16> to vector<256x4xbf16>
    %c2_62 = arith.constant 2 : index
    %c0_63 = arith.constant 0 : index
    %c0_64 = arith.constant 0 : index
    %c0_65 = arith.constant 0 : index
    %46 = vector.load %arg3[%c2_62, %c0_63, %c0_64, %c0_65] : memref<3x3x4x4xbf16, #tpu.memory_space<vmem>>, vector<1x1x4x4xbf16>
    %47 = vector.shape_cast %46 : vector<1x1x4x4xbf16> to vector<4x4xbf16>
    %cst_66 = arith.constant dense<0.000000e+00> : vector<256x4xf32>
    %48 = tpu.matmul %45, %47, %cst_66 {dimension_numbers = #tpu.dot_dimension_numbers<[1], [0], [0], [1], [0, 0, 1, 1], [], []>} : vector<256x4xbf16>, vector<4x4xbf16>, vector<256x4xf32> -> vector<256x4xf32>
    %49 = arith.addf %42, %48 : vector<256x4xf32>
    %c0_67 = arith.constant 0 : index
    %c0_68 = arith.constant 0 : index
    %c2_69 = arith.constant 2 : index
    %c1_70 = arith.constant 1 : index
    %c0_71 = arith.constant 0 : index
    %50 = vector.load %arg2[%c0_67, %c0_68, %c2_69, %c1_70, %c0_71] : memref<1x1x18x18x4xbf16, #tpu.memory_space<vmem>>, vector<1x1x16x16x4xbf16>
    %51 = vector.shape_cast %50 : vector<1x1x16x16x4xbf16> to vector<16x16x4xbf16>
    %52 = vector.shape_cast %51 : vector<16x16x4xbf16> to vector<256x4xbf16>
    %c2_72 = arith.constant 2 : index
    %c1_73 = arith.constant 1 : index
    %c0_74 = arith.constant 0 : index
    %c0_75 = arith.constant 0 : index
    %53 = vector.load %arg3[%c2_72, %c1_73, %c0_74, %c0_75] : memref<3x3x4x4xbf16, #tpu.memory_space<vmem>>, vector<1x1x4x4xbf16>
    %54 = vector.shape_cast %53 : vector<1x1x4x4xbf16> to vector<4x4xbf16>
    %cst_76 = arith.constant dense<0.000000e+00> : vector<256x4xf32>
    %55 = tpu.matmul %52, %54, %cst_76 {dimension_numbers = #tpu.dot_dimension_numbers<[1], [0], [0], [1], [0, 0, 1, 1], [], []>} : vector<256x4xbf16>, vector<4x4xbf16>, vector<256x4xf32> -> vector<256x4xf32>
    %56 = arith.addf %49, %55 : vector<256x4xf32>
    %c0_77 = arith.constant 0 : index
    %c0_78 = arith.constant 0 : index
    %c2_79 = arith.constant 2 : index
    %c2_80 = arith.constant 2 : index
    %c0_81 = arith.constant 0 : index
    %57 = vector.load %arg2[%c0_77, %c0_78, %c2_79, %c2_80, %c0_81] : memref<1x1x18x18x4xbf16, #tpu.memory_space<vmem>>, vector<1x1x16x16x4xbf16>
    %58 = vector.shape_cast %57 : vector<1x1x16x16x4xbf16> to vector<16x16x4xbf16>
    %59 = vector.shape_cast %58 : vector<16x16x4xbf16> to vector<256x4xbf16>
    %c2_82 = arith.constant 2 : index
    %c2_83 = arith.constant 2 : index
    %c0_84 = arith.constant 0 : index
    %c0_85 = arith.constant 0 : index
    %60 = vector.load %arg3[%c2_82, %c2_83, %c0_84, %c0_85] : memref<3x3x4x4xbf16, #tpu.memory_space<vmem>>, vector<1x1x4x4xbf16>
    %61 = vector.shape_cast %60 : vector<1x1x4x4xbf16> to vector<4x4xbf16>
    %cst_86 = arith.constant dense<0.000000e+00> : vector<256x4xf32>
    %62 = tpu.matmul %59, %61, %cst_86 {dimension_numbers = #tpu.dot_dimension_numbers<[1], [0], [0], [1], [0, 0, 1, 1], [], []>} : vector<256x4xbf16>, vector<4x4xbf16>, vector<256x4xf32> -> vector<256x4xf32>
    %63 = arith.addf %56, %62 : vector<256x4xf32>
    %c0_87 = arith.constant 0 : index
    %c0_88 = arith.constant 0 : index
    %64 = vector.load %arg4[%c0_87, %c0_88] : memref<1x4xf32, #tpu.memory_space<vmem>>, vector<1x4xf32>
    %65 = vector.broadcast %64 : vector<1x4xf32> to vector<256x4xf32>
    %66 = arith.mulf %63, %65 : vector<256x4xf32>
    %c0_89 = arith.constant 0 : index
    %c0_90 = arith.constant 0 : index
    %67 = vector.load %arg5[%c0_89, %c0_90] : memref<1x4xf32, #tpu.memory_space<vmem>>, vector<1x4xf32>
    %68 = vector.broadcast %67 : vector<1x4xf32> to vector<256x4xf32>
    %69 = arith.addf %66, %68 : vector<256x4xf32>
    %cst_91 = arith.constant 0.000000e+00 : f32
    %70 = vector.broadcast %cst_91 : f32 to vector<256x4xf32>
    %71 = arith.maximumf %69, %70 : vector<256x4xf32>
    %72 = vector.shape_cast %71 : vector<256x4xf32> to vector<16x16x4xf32>
    %c0_92 = arith.constant 0 : index
    %c0_93 = arith.constant 0 : index
    %c0_94 = arith.constant 0 : index
    %c0_95 = arith.constant 0 : index
    %73 = vector.load %arg6[%c0_92, %c0_93, %c0_94, %c0_95] : memref<1x16x16x4xf32, #tpu.memory_space<vmem>>, vector<1x16x16x4xf32>
    %74 = vector.shape_cast %73 : vector<1x16x16x4xf32> to vector<16x16x4xf32>
    %75 = vector.shape_cast %72 : vector<16x16x4xf32> to vector<1x16x16x4xf32>
    tpu.vector_store %arg6[%c0_92, %c0_93, %c0_94, %c0_95], %75 {strides = array<i32>} : memref<1x16x16x4xf32, #tpu.memory_space<vmem>>, vector<1x16x16x4xf32>,
    return
  }
  func.func @transform_0(%arg0: i32, %arg1: i32) -> (i32, i32, i32, i32, i32) {
    %c0_i32 = arith.constant 0 : i32
    %c0_i32_0 = arith.constant 0 : i32
    %c0_i32_1 = arith.constant 0 : i32
    %c0_i32_2 = arith.constant 0 : i32
    return %arg0, %arg1, %c0_i32, %c0_i32_0, %c0_i32_1 : i32, i32, i32, i32, i32
  }
  func.func @transform_1(%arg0: i32, %arg1: i32) -> (i32, i32, i32, i32) {
    %c0_i32 = arith.constant 0 : i32
    %c0_i32_0 = arith.constant 0 : i32
    %c0_i32_1 = arith.constant 0 : i32
    %c0_i32_2 = arith.constant 0 : i32
    %c0_i32_3 = arith.constant 0 : i32
    return %c0_i32, %c0_i32_0, %c0_i32_1, %c0_i32_2 : i32, i32, i32, i32
  }
  func.func @transform_2(%arg0: i32, %arg1: i32) -> (i32, i32) {
    %c0_i32 = arith.constant 0 : i32
    %c0_i32_0 = arith.constant 0 : i32
    %c0_i32_1 = arith.constant 0 : i32
    return %c0_i32, %c0_i32_0 : i32, i32
  }
  func.func @transform_3(%arg0: i32, %arg1: i32) -> (i32, i32) {
    %c0_i32 = arith.constant 0 : i32
    %c0_i32_0 = arith.constant 0 : i32
    %c0_i32_1 = arith.constant 0 : i32
    return %c0_i32, %c0_i32_0 : i32, i32
  }
  func.func @transform_4(%arg0: i32, %arg1: i32) -> (i32, i32, i32, i32) {
    %c0_i32 = arith.constant 0 : i32
    %c0_i32_0 = arith.constant 0 : i32
    %c0_i32_1 = arith.constant 0 : i32
    return %arg0, %arg1, %c0_i32, %c0_i32_0 : i32, i32, i32, i32
  }
}

</mosaic_0001>

<bundles_post_ra>
// kernel: up_forward.3
= control target key start
LH: loop header
LB: loop body
LE: loop exit
PB: predicated region body
PF: predicated region fallthrough
CT: control target
= control target key end

     0   :  { %vm104_vm0 = vcmask 1043456   ;;  %vm79_vm1 = vcmask 64512   ;;  %vm205_vm2 = vcmask 130048   ;;  %s404_s1 = inlined_call_operand.vmem [shape: bf16[8,16], index: 1, kind: input, shape index: {}]   ;;  %s405_s0 = inlined_call_operand.vmem [shape: bf16[128,8], index: 0, kind: input, shape index: {}]   ;;  %s406_s2 = inlined_call_operand.vmem [shape: f32[1,16], index: 2, kind: input, shape index: {}]   ;;  %s407_s3 = inlined_call_operand.vmem [shape: f32[128,16], index: 3, kind: output, shape index: {}]  }
   0x1   :  { %v31_v0 = vld [vmem:[%s404_s1] sm:$0xf]  ;;  %v276_v4 = vld [vmem:[%s405_s0 + $0x8] sm:$0xff]   ;;  %v278_v6 = vld [vmem:[%s405_s0 + $0x10] sm:$0xff]  }
   0x2   :  { %272 = vmatprep.subr.msk.bf16.mxu0 %vm104_vm0, %v31_v0  ;;  %273 = vmatprep.subr.msk.bf16.mxu1 %vm104_vm0, %v31_v0  ;;  %v106_v1 = vsel %vm104_vm0, %v31_v0, 0  ;;  %v274_v2 = vld [vmem:[%s405_s0] sm:$0xff]   ;;  %v277_v5 = vld [vmem:[%s405_s0 + $0x28] sm:$0xff]   ;;  %v279_v7 = vld [vmem:[%s405_s0 + $0x30] sm:$0xff]  }
   0x3   :  { %253 = vmatpush3.bf16.msra.mxu0 %v106_v1  ;;  %271 = vmatpush3.bf16.msra.mxu1 %v106_v1  ;;  %v275_v3 = vld [vmem:[%s405_s0 + $0x20] sm:$0xff]   ;;  %v280_v8 = vld [vmem:[%s405_s0 + $0x18] sm:$0xff]  }
   0x4   :  { %254 = vmatprep.mubr.msk.bf16.mxu0 %vm79_vm1, %v274_v2  ;;  %262 = vmatprep.mubr.msk.bf16.mxu1 %vm79_vm1, %v275_v3  ;;  %v281_v9 = vld [vmem:[%s405_s0 + $0x38] sm:$0xff]   ;;  %v226_v10 = vld [vmem:[%s406_s2] ss:$0 sm:$0xff] }
   0x6   :  { %255 = vmatmul.mubr.msk.bf16.vlgmr.msra.gmra.mxu0 %vm79_vm1, %v276_v4  ;;  %263 = vmatmul.mubr.msk.bf16.vlgmr.msra.gmra.mxu1 %vm79_vm1, %v277_v5 }
   0x7   :  { %258 = vmatprep.mubr.msk.bf16.mxu0 %vm79_vm1, %v278_v6  ;;  %266 = vmatprep.mubr.msk.bf16.mxu1 %vm79_vm1, %v279_v7 }
   0xe   :  { %259 = vmatmul.mubr.msk.bf16.gmra.mxu0 %vm79_vm1, %v280_v8  ;;  %267 = vmatmul.mubr.msk.bf16.gmra.mxu1 %vm79_vm1, %v281_v9 }
  0xc6   :  { %v256_v11 = vpop.f32.mrf.mxu0  ;;  %v264_v13 = vpop.f32.mrf.mxu1 }
  0xc7   :  { %v151_v12 = vadd.f32 %v256_v11, %v226_v10  ;;  %v183_v14 = vadd.f32 %v264_v13, %v226_v10 }
  0xc8   :  { %v142_v15 = vpop.f32.mrf.mxu0  ;;  %v174_v17 = vpop.f32.mrf.mxu1 }
  0xc9   :  { %208 = vst.msk [vmem:[%s407_s3 + $0x10] sm:$0xff] %vm205_vm2, %v151_v12  ;;  %v143_v16 = vadd.f32 %v226_v10, %v142_v15  ;;  %216 = vst.msk [vmem:[%s407_s3 + $0x50] sm:$0xff] %vm205_vm2, %v183_v14  ;;  %v175_v18 = vadd.f32 %v226_v10, %v174_v17 }
  0xca   :  { %v257_v19 = vpop.f32.mrf.mxu0  ;;  %v265_v21 = vpop.f32.mrf.mxu1 }
  0xcb   :  { %206 = vst.msk [vmem:[%s407_s3] sm:$0xff] %vm205_vm2, %v143_v16  ;;  %v154_v20 = vadd.f32 %v257_v19, %v226_v10  ;;  %214 = vst.msk [vmem:[%s407_s3 + $0x40] sm:$0xff] %vm205_vm2, %v175_v18  ;;  %v186_v22 = vadd.f32 %v265_v21, %v226_v10 }
  0xcc   :  { %v145_v23 = vpop.f32.mrf.mxu0  ;;  %v177_v25 = vpop.f32.mrf.mxu1 }
  0xcd   :  { %209 = vst.msk [vmem:[%s407_s3 + $0x18] sm:$0xff] %vm205_vm2, %v154_v20  ;;  %v146_v24 = vadd.f32 %v226_v10, %v145_v23  ;;  %217 = vst.msk [vmem:[%s407_s3 + $0x58] sm:$0xff] %vm205_vm2, %v186_v22  ;;  %v178_v26 = vadd.f32 %v226_v10, %v177_v25 }
  0xce   :  { %v260_v27 = vpop.f32.mrf.mxu0  ;;  %v268_v29 = vpop.f32.mrf.mxu1 }
  0xcf   :  { %207 = vst.msk [vmem:[%s407_s3 + $0x8] sm:$0xff] %vm205_vm2, %v146_v24  ;;  %v167_v28 = vadd.f32 %v260_v27, %v226_v10  ;;  %215 = vst.msk [vmem:[%s407_s3 + $0x48] sm:$0xff] %vm205_vm2, %v178_v26  ;;  %v199_v30 = vadd.f32 %v268_v29, %v226_v10 }
  0xd0   :  { %v158_v31 = vpop.f32.mrf.mxu0  ;;  %v190_v33 = vpop.f32.mrf.mxu1 }
  0xd1   :  { %212 = vst.msk [vmem:[%s407_s3 + $0x30] sm:$0xff] %vm205_vm2, %v167_v28  ;;  %v159_v32 = vadd.f32 %v226_v10, %v158_v31  ;;  %220 = vst.msk [vmem:[%s407_s3 + $0x70] sm:$0xff] %vm205_vm2, %v199_v30  ;;  %v191_v34 = vadd.f32 %v226_v10, %v190_v33 }
  0xd2   :  { %v261_v35 = vpop.f32.mrf.mxu0  ;;  %v269_v37 = vpop.f32.mrf.mxu1 }
  0xd3   :  { %210 = vst.msk [vmem:[%s407_s3 + $0x20] sm:$0xff] %vm205_vm2, %v159_v32  ;;  %v170_v36 = vadd.f32 %v261_v35, %v226_v10  ;;  %218 = vst.msk [vmem:[%s407_s3 + $0x60] sm:$0xff] %vm205_vm2, %v191_v34  ;;  %v202_v38 = vadd.f32 %v269_v37, %v226_v10 }
  0xd4   :  { %v161_v39 = vpop.f32.mrf.mxu0  ;;  %v193_v41 = vpop.f32.mrf.mxu1 }
  0xd5   :  { %213 = vst.msk [vmem:[%s407_s3 + $0x38] sm:$0xff] %vm205_vm2, %v170_v36  ;;  %v162_v40 = vadd.f32 %v226_v10, %v161_v39  ;;  %221 = vst.msk [vmem:[%s407_s3 + $0x78] sm:$0xff] %vm205_vm2, %v202_v38  ;;  %v194_v42 = vadd.f32 %v226_v10, %v193_v41 }
  0xd7   :  { %211 = vst.msk [vmem:[%s407_s3 + $0x28] sm:$0xff] %vm205_vm2, %v162_v40  ;;  %219 = vst.msk [vmem:[%s407_s3 + $0x68] sm:$0xff] %vm205_vm2, %v194_v42 }

// kernel: up_forward.4
= control target key start
LH: loop header
LB: loop body
LE: loop exit
PB: predicated region body
PF: predicated region fallthrough
CT: control target
= control target key end

     0   :  { %s6372_s15 = smov 0   ;;  %s6374_s16 = smov 0   ;;  %s9102_s0 = inlined_call_operand.vmem [shape: bf16[2,1,18,18,8], index: 0, kind: input, shape index: {}]   ;;  %s9103_s1 = inlined_call_operand.vmem [shape: bf16[3,3,8,4], index: 1, kind: input, shape index: {}]   ;;  %s9104_s2 = inlined_call_operand.vmem [shape: f32[1,4], index: 2, kind: input, shape index: {}]   ;;  %s9105_s3 = inlined_call_operand.vmem [shape: f32[1,4], index: 3, kind: input, shape index: {}]   ;;  %s9106_s4 = inlined_call_operand.vmem [shape: bf16[2,16,16,4], index: 4, kind: output, shape index: {}]  }
   0x1   :  { %s6376_s17 = smov 0  }
   0x2 LB: > { %s26_s18 = sadd.s32 1, %s6341_s16  ;;  %p5168_p0 = scmp.ge.s32.totalorder %s6345_s17, 1  ;;  %s6345_s17 = sphi %s6376_s17, %s14_s17   ;;  %s6341_s16 = sphi %s6374_s16, %s9384_s16   ;;  %s6337_s15 = sphi %s6372_s15, %s9383_s15  }
   0x3   : > { %p28_p1 = scmp.ge.s32.totalorder %s26_s18, 2  ;;  %p182_p2 = scmp.lt.s32.totalorder %s6345_s17, 3 }
   0x5   : > { %s9386_s18 = smov (%p28_p1, %s26_s18), 0  ;;  %p183_p3 = pnand %p5168_p0, %p182_p2 }
   0x7   : > { %186 = sbr.rel (%p183_p3) target bundleno = 561 (0x231), region = 36 }
   0xc   : > { %v5172_v0 = vld [vmem:[%s9103_s1 + $0x4] sm:$0xf]  ;;  %vm773_vm0 = vcmask 1043456   ;;  %p217_p4 = scmp.lt.s32.totalorder %s6337_s15, 1  ;;  %v270_v2 = vld [vmem:[%s9103_s1] sm:$0xf] }
   0xd   : > { %6239 = vmatprep.subr.msk.bf16.mxu1 %vm773_vm0, %v5172_v0  ;;  %6238 = vmatprep.subr.msk.bf16.mxu0 %vm773_vm0, %v5172_v0  ;;  %v775_v1 = vsel %vm773_vm0, %v5172_v0, 0  ;;  %v5253_v3 = vld [vmem:[%s9103_s1 + $0x8] sm:$0xf]  ;;  %vm287_vm1 = vsmask.f32 3328  ;;  %v6413_v4 = vsel %vm773_vm0, %v270_v2, 0 }
   0xe   : > { %6237 = vmatpush3.bf16.msra.mxu1 %v775_v1  ;;  %5931 = vmatpush3.bf16.msra.mxu0 %v775_v1  ;;  %s9388_s15 = smov (!%p217_p4, %s6337_s15), 1  ;;  %vm288_vm2 = vsmask.f32 7440  ;;  %vm724_vm3 = vcmask 64512   ;;  %v6439_v16 = vsel %vm773_vm0, %v5253_v3, 0  ;;  %vm1278_vm5 = vcmask 1042432  }
   0xf   : > { %6240 = vmatprep.subr.msk.bf16.mxu1 %vm773_vm0, %v270_v2  ;;  %6241 = vmatprep.subr.msk.bf16.mxu0 %vm773_vm0, %v5253_v3  ;;  %s6248_s25 = smul.u32 216, %s9388_s15  ;;  %vm6454_vm4 = vmor %vm287_vm1, %vm288_vm2  ;;  %vm1279_vm6 = vcmask 1046532   ;;  %s5744_s23 = sshll.u32 %s9388_s15, 7  ;;  %vm5035_vm8 = vcmask 27648  }
  0x10   : > { %vm6740_vm7 = vmor %vm1278_vm5, %vm1279_vm6 }
  0x11   : > { %s6410_s28 = scalar_lea.vmem %s9102_s0, %s6248_s25  ;;  %s8897_s25 = scalar_lea.vmem %s9106_s4, %s5744_s23 }
  0x12   : > { %v6416_v5 = vld [vmem:[%s6410_s28] sm:$0xf]  ;;  %v6419_v6 = vld [vmem:[%s6410_s28 + $0x4] sm:$0xf]  ;;  %v6422_v7 = vld [vmem:[%s6410_s28 + $0x8] sm:$0x1] }
  0x13   : > { %v291_v8 = vshrl.u32 %v6416_v5, 16  ;;  %v294_v9 = vshll.u32 %v6416_v5, 16  ;;  %v300_v10 = vshll.u32 %v6419_v6, 16  ;;  %v304_v11 = vshrl.u32 %v6419_v6, 16  ;;  %v6429_v12 = vld [vmem:[%s6410_s28 + $0x60] sm:$0xf] }
  0x14   : > { %v310_v13 = vshll.u32 %v6422_v7, 16  ;;  %v6433_v14 = vld [vmem:[%s6410_s28 + $0x64] sm:$0xf]  ;;  %v6436_v15 = vld [vmem:[%s6410_s28 + $0x68] sm:$0x1]  ;;  %v483_v22 = vshrl.u32 %v6429_v12, 16 }
  0x15   : > { %v293_v17 = vrot.slane %v291_v8, 4  ;;  %v296_v18 = vrot.slane %v294_v9, 5  ;;  %v302_v19 = vrot.slane %v300_v10, 5  ;;  %v306_v20 = vrot.slane %v304_v11, 4  ;;  %v6447_v29 = vld [vmem:[%s6410_s28 + $0xc] sm:$0xf] }
  0x16   : > { %v312_v21 = vrot.slane %v310_v13, 5  ;;  %v486_v23 = vshll.u32 %v6429_v12, 16  ;;  %v492_v24 = vshll.u32 %v6433_v14, 16  ;;  %v496_v27 = vshrl.u32 %v6433_v14, 16  ;;  %v6450_v30 = vld [vmem:[%s6410_s28 + $0x10] sm:$0xf] }
  0x17   : > { %v297_v25 = vor.u32 %v296_v18, %v293_v17  ;;  %v307_v26 = vor.u32 %v306_v20, %v302_v19  ;;  %v502_v28 = vshll.u32 %v6436_v15, 16  ;;  %v485_v33 = vrot.slane %v483_v22, 4  ;;  %v6460_v41 = vld [vmem:[%s6410_s28 + $0x14] sm:$0x1]  ;;  %v6471_v53 = vld [vmem:[%s6410_s28 + $0x6c] sm:$0xf] }
  0x18   : > { %v488_v34 = vrot.slane %v486_v23, 5  ;;  %v494_v35 = vrot.slane %v492_v24, 5  ;;  %v498_v38 = vrot.slane %v496_v27, 4  ;;  %v315_v42 = vshrl.u32 %v6447_v29, 16  ;;  %v6475_v58 = vld [vmem:[%s6410_s28 + $0x70] sm:$0xf] }
  0x19   : > { %v298_v36 = vrot.slane %v297_v25, 4  ;;  %v308_v37 = vrot.slane %v307_v26, 4  ;;  %v504_v39 = vrot.slane %v502_v28, 5  ;;  %v318_v43 = vshll.u32 %v6447_v29, 16  ;;  %v6483_v63 = vld [vmem:[%s6410_s28 + $0x74] sm:$0x1] }
  0x1a   : > { %v489_v40 = vor.u32 %v488_v34, %v485_v33  ;;  %v324_v44 = vshll.u32 %v6450_v30, 16  ;;  %v499_v47 = vor.u32 %v498_v38, %v494_v35  ;;  %v328_v48 = vshrl.u32 %v6450_v30, 16  ;;  %v6489_v8 = vld [vmem:[%s6410_s28 + $0x18] sm:$0xf]  ;;  %v6502_v25 = vld [vmem:[%s6410_s28 + $0x20] sm:$0x1] }
  0x1b   : > { %v303_v45 = vsel %vm6454_vm4, %v298_v36, %v302_v19  ;;  %v313_v46 = vsel %vm6454_vm4, %v308_v37, %v312_v21  ;;  %v317_v51 = vrot.slane %v315_v42, 4  ;;  %v320_v52 = vrot.slane %v318_v43, 5  ;;  %v6496_v21 = vld [vmem:[%s6410_s28 + $0x1c] sm:$0xf] }
  0x1c   : > { %v5173_v49 = vcombine.low %v303_v45, %v313_v46  ;;  %v490_v50 = vrot.slane %v489_v40, 4  ;;  %v500_v54 = vrot.slane %v499_v47, 4  ;;  %v326_v55 = vrot.slane %v324_v44, 5  ;;  %v6515_v40 = vld [vmem:[%s9103_s1 + $0x10] sm:$0xf] }
  0x1d   : > { %v330_v56 = vrot.slane %v328_v48, 4  ;;  %v334_v57 = vshll.u32 %v6460_v41, 16  ;;  %v321_v60 = vor.u32 %v320_v52, %v317_v51  ;;  %v507_v3 = vshrl.u32 %v6471_v53, 16  ;;  %v6520_v46 = vld [vmem:[%s6410_s28 + $0x7c] sm:$0xf] }
  0x1e   : > { %5932 = vmatprep.mubr.msk.bf16.mxu0 %vm724_vm3, %v5173_v49  ;;  %v495_v59 = vsel %vm6454_vm4, %v490_v50, %v494_v35  ;;  %v505_v0 = vsel %vm6454_vm4, %v500_v54, %v504_v39  ;;  %v510_v11 = vshll.u32 %v6471_v53, 16  ;;  %v516_v13 = vshll.u32 %v6475_v58, 16  ;;  %v6509_v35 = vld [vmem:[%s6410_s28 + $0x78] sm:$0xf] }
  0x1f   : > { %v331_v1 = vor.u32 %v330_v56, %v326_v55  ;;  %v336_v2 = vrot.slane %v334_v57, 5  ;;  %v5181_v9 = vcombine.low %v495_v59, %v505_v0  ;;  %v322_v10 = vrot.slane %v321_v60, 4  ;;  %v6527_v56 = vld [vmem:[%s6410_s28 + $0x80] sm:$0x1] }
  0x20   : > { %v509_v18 = vrot.slane %v507_v3, 4  ;;  %v520_v19 = vshrl.u32 %v6475_v58, 16  ;;  %v526_v20 = vshll.u32 %v6483_v63, 16  ;;  %v512_v23 = vrot.slane %v510_v11, 5  ;;  %9142 = vst [vmem:[#allocation2_spill] sm:$0xff] %v6527_v56 }
  0x21   : > { %v332_v17 = vrot.slane %v331_v1, 4  ;;  %5948 = vmatprep.mubr.msk.bf16.mxu1 %vm724_vm3, %v5181_v9  ;;  %v327_v22 = vsel %vm6454_vm4, %v322_v10, %v326_v55  ;;  %v518_v24 = vrot.slane %v516_v13, 5  ;;  %v339_v26 = vshrl.u32 %v6489_v8, 16  ;;  %v6533_v1 = vld [vmem:[%s6410_s28 + $0x24] sm:$0xf] }
  0x22   : > { %v522_v28 = vrot.slane %v520_v19, 4  ;;  %v528_v33 = vrot.slane %v526_v20, 5  ;;  %v342_v34 = vshll.u32 %v6489_v8, 16  ;;  %v513_v37 = vor.u32 %v512_v23, %v509_v18  ;;  %v6541_v10 = vld [vmem:[%s6410_s28 + $0x28] sm:$0xf] }
  0x23   : > { %v337_v27 = vsel %vm6454_vm4, %v332_v17, %v336_v2  ;;  %v341_v38 = vrot.slane %v339_v26, 4  ;;  %v348_v39 = vshll.u32 %v6496_v21, 16  ;;  %v352_v44 = vshrl.u32 %v6496_v21, 16  ;;  %v6547_v19 = vld [vmem:[%s9103_s1 + $0xc] sm:$0xf] }
  0x24   : > { %v5174_v36 = vcombine.low %v327_v22, %v337_v27  ;;  %v523_v42 = vor.u32 %v522_v28, %v518_v24  ;;  %v344_v43 = vrot.slane %v342_v34, 5  ;;  %v358_v45 = vshll.u32 %v6502_v25, 16 }
  0x25   : > { %v514_v47 = vrot.slane %v513_v37, 4  ;;  %v350_v48 = vrot.slane %v348_v39, 5  ;;  %v531_v49 = vshrl.u32 %v6509_v35, 16  ;;  %v534_v50 = vshll.u32 %v6509_v35, 16 }
  0x26   : > { %5933 = vmatmul.mubr.msk.bf16.vlgmr.msra.gmra.mxu0 %vm724_vm3, %v5174_v36  ;;  %v524_v51 = vrot.slane %v523_v42, 4  ;;  %v345_v52 = vor.u32 %v344_v43, %v341_v38  ;;  %v354_v54 = vrot.slane %v352_v44, 4  ;;  %v360_v55 = vrot.slane %v358_v45, 5  ;;  %v6559_v36 = vld [vmem:[%s6410_s28 + $0x84] sm:$0xf] }
  0x27   : > { %5999 = vmatpush3.bf16.msra.mxu0 %v6439_v16  ;;  %v519_v57 = vsel %vm6454_vm4, %v514_v47, %v518_v24  ;;  %v533_v59 = vrot.slane %v531_v49, 4  ;;  %v536_v60 = vrot.slane %v534_v50, 5  ;;  %v540_v0 = vshll.u32 %v6520_v46, 16  ;;  %v6552_v24 = vld [vmem:[%s6410_s28 + $0x2c] sm:$0x1] }
  0x28   : > { %6243 = vmatprep.subr.msk.bf16.mxu0 %vm773_vm0, %v6515_v40  ;;  %v529_v16 = vsel %vm6454_vm4, %v524_v51, %v528_v33  ;;  %v346_v2 = vrot.slane %v345_v52, 4  ;;  %v355_v3 = vor.u32 %v354_v54, %v350_v48  ;;  %v544_v9 = vshrl.u32 %v6520_v46, 16  ;;  %v6566_v43 = vld [vmem:[%s6410_s28 + $0x88] sm:$0xf]  ;;  %v6574_v51 = vld [vmem:[%s6410_s28 + $0x8c] sm:$0x1] }
  0x29   : > { %v5182_v11 = vcombine.low %v519_v57, %v529_v16  ;;  %v537_v13 = vor.u32 %v536_v60, %v533_v59  ;;  %v542_v17 = vrot.slane %v540_v0, 5  ;;  %v550_v18 = vshll.u32 %v6527_v56, 16  ;;  %9143 = vst [vmem:[#allocation3_spill] sm:$0xff] %v6574_v51  ;;  %v6582_v60 = vld [vmem:[%s6410_s28 + $0x30] sm:$0xf] }
  0x2a   : > { %v351_v20 = vsel %vm6454_vm4, %v346_v2, %v350_v48  ;;  %v356_v22 = vrot.slane %v355_v3, 4  ;;  %v546_v23 = vrot.slane %v544_v9, 4  ;;  %v363_v26 = vshrl.u32 %v6533_v1, 16  ;;  %v6587_v9 = vld [vmem:[%s6410_s28 + $0x34] sm:$0xf] }
  0x2b   : > { %5949 = vmatmul.mubr.msk.bf16.vlgmr.msra.gmra.mxu1 %vm724_vm3, %v5182_v11  ;;  %v538_v27 = vrot.slane %v537_v13, 4  ;;  %v552_v28 = vrot.slane %v550_v18, 5  ;;  %v366_v33 = vshll.u32 %v6533_v1, 16  ;;  %v372_v34 = vshll.u32 %v6541_v10, 16 }
  0x2c   : > { %5965 = vmatpush3.bf16.msra.mxu1 %v6413_v4  ;;  %v361_v37 = vsel %vm6454_vm4, %v356_v22, %v360_v55  ;;  %v547_v38 = vor.u32 %v546_v23, %v542_v17  ;;  %v365_v39 = vrot.slane %v363_v26, 4  ;;  %v376_v42 = vshrl.u32 %v6541_v10, 16 }
  0x2d   : > { %v5175_v44 = vcombine.low %v351_v20, %v361_v37  ;;  %v543_v45 = vsel %vm6454_vm4, %v538_v27, %v542_v17  ;;  %v368_v47 = vrot.slane %v366_v33, 5  ;;  %v374_v48 = vrot.slane %v372_v34, 5  ;;  %6242 = vmatprep.subr.msk.bf16.mxu1 %vm773_vm0, %v6547_v19  ;;  %v6595_v33 = vld [vmem:[%s6410_s28 + $0x38] sm:$0x1] }
  0x2e   : > { %v548_v4 = vrot.slane %v547_v38, 4  ;;  %v378_v49 = vrot.slane %v376_v42, 4  ;;  %v382_v50 = vshll.u32 %v6552_v24, 16  ;;  %v555_v52 = vshrl.u32 %v6559_v36, 16  ;;  %v6600_v38 = vld [vmem:[%s6410_s28 + $0x90] sm:$0xf] }
  0x2f   : > { %5936 = vmatprep.mubr.msk.bf16.mxu0 %vm724_vm3, %v5175_v44  ;;  %v369_v54 = vor.u32 %v368_v47, %v365_v39  ;;  %v558_v55 = vshll.u32 %v6559_v36, 16  ;;  %v564_v57 = vshll.u32 %v6566_v43, 16  ;;  %v568_v59 = vshrl.u32 %v6566_v43, 16  ;;  %9144 = vst [vmem:[#allocation4_spill] sm:$0xff] %v6600_v38  ;;  %v6605_v47 = vld [vmem:[%s6410_s28 + $0x94] sm:$0xf] }
  0x30   : > { %v553_v0 = vsel %vm6454_vm4, %v548_v4, %v552_v28  ;;  %v379_v16 = vor.u32 %v378_v49, %v374_v48  ;;  %v384_v2 = vrot.slane %v382_v50, 5  ;;  %v557_v3 = vrot.slane %v555_v52, 4  ;;  %9145 = vst [vmem:[#allocation5_spill] sm:$0xff] %v6605_v47 }
  0x31   : > { %v5183_v11 = vcombine.low %v543_v45, %v553_v0  ;;  %v370_v13 = vrot.slane %v369_v54, 4  ;;  %v560_v17 = vrot.slane %v558_v55, 5  ;;  %v566_v18 = vrot.slane %v564_v57, 5 }
  0x32   : > { %v380_v20 = vrot.slane %v379_v16, 4  ;;  %v570_v22 = vrot.slane %v568_v59, 4  ;;  %v574_v23 = vshll.u32 %v6574_v51, 16  ;;  %v387_v26 = vshrl.u32 %v6582_v60, 16  ;;  %v6614_v16 = vld [vmem:[%s6410_s28 + $0x98] sm:$0x1] }
  0x33   : > { %5952 = vmatprep.mubr.msk.bf16.mxu1 %vm724_vm3, %v5183_v11  ;;  %v375_v27 = vsel %vm6454_vm4, %v370_v13, %v374_v48  ;;  %v561_v28 = vor.u32 %v560_v17, %v557_v3  ;;  %v390_v34 = vshll.u32 %v6582_v60, 16  ;;  %v396_v37 = vshll.u32 %v6587_v9, 16  ;;  %9146 = vst [vmem:[#allocation6_spill] sm:$0xff] %v6614_v16  ;;  %v6619_v11 = vld [vmem:[%s6410_s28 + $0x3c] sm:$0xf] }
  0x34   : > { %v385_v39 = vsel %vm6454_vm4, %v380_v20, %v384_v2  ;;  %v571_v42 = vor.u32 %v570_v22, %v566_v18  ;;  %v576_v44 = vrot.slane %v574_v23, 5  ;;  %v389_v45 = vrot.slane %v387_v26, 4  ;;  %v6624_v23 = vld [vmem:[%s6410_s28 + $0x40] sm:$0xf]  ;;  %v1231_v51 = vld [vmem:[%s6410_s28 + $0xc] sm:$0xe] }
  0x35   : > { %v5176_v48 = vcombine.low %v375_v27, %v385_v39  ;;  %v562_v4 = vrot.slane %v561_v28, 4  ;;  %v392_v49 = vrot.slane %v390_v34, 5  ;;  %v398_v50 = vrot.slane %v396_v37, 5 }
  0x36   : > { %v572_v52 = vrot.slane %v571_v42, 4  ;;  %v400_v54 = vshrl.u32 %v6587_v9, 16  ;;  %v406_v55 = vshll.u32 %v6595_v33, 16  ;;  %v579_v57 = vshrl.u32 %v6600_v38, 16 }
  0x37   : > { %5937 = vmatmul.mubr.msk.bf16.gmra.mxu0 %vm724_vm3, %v5176_v48  ;;  %v567_v59 = vsel %vm6454_vm4, %v562_v4, %v566_v18  ;;  %v393_v0 = vor.u32 %v392_v49, %v389_v45  ;;  %v582_v2 = vshll.u32 %v6600_v38, 16  ;;  %v588_v3 = vshll.u32 %v6605_v47, 16  ;;  %v6633_v48 = vld [vmem:[%s6410_s28 + $0x44] sm:$0x1] }
  0x38   : > { %v577_v13 = vsel %vm6454_vm4, %v572_v52, %v576_v44  ;;  %v402_v17 = vrot.slane %v400_v54, 4  ;;  %v408_v20 = vrot.slane %v406_v55, 5  ;;  %v581_v22 = vrot.slane %v579_v57, 4  ;;  %v6638_v52 = vld [vmem:[%s6410_s28 + $0x9c] sm:$0xf] }
  0x39   : > { %v5184_v18 = vcombine.low %v567_v59, %v577_v13  ;;  %v394_v26 = vrot.slane %v393_v0, 4  ;;  %v584_v27 = vrot.slane %v582_v2, 5  ;;  %v590_v28 = vrot.slane %v588_v3, 5  ;;  %9147 = vst [vmem:[#allocation7_spill] sm:$0xff] %v6638_v52  ;;  %v6642_v13 = vld [vmem:[%s6410_s28 + $0xa0] sm:$0xf] }
  0x3a   : > { %v403_v34 = vor.u32 %v402_v17, %v398_v50  ;;  %v592_v37 = vshrl.u32 %v6605_v47, 16  ;;  %v598_v39 = vshll.u32 %v6614_v16, 16  ;;  %v411_v42 = vshrl.u32 %v6619_v11, 16  ;;  %9148 = vst [vmem:[#allocation8_spill] sm:$0xff] %v6642_v13 }
  0x3b   : > { %5953 = vmatmul.mubr.msk.bf16.gmra.mxu1 %vm724_vm3, %v5184_v18  ;;  %v399_v44 = vsel %vm6454_vm4, %v394_v26, %v398_v50  ;;  %v585_v45 = vor.u32 %v584_v27, %v581_v22  ;;  %v414_v4 = vshll.u32 %v6619_v11, 16  ;;  %v420_v49 = vshll.u32 %v6624_v23, 16  ;;  %v6648_v26 = vld [vmem:[%s6410_s28 + $0xa4] sm:$0x1] }
  0x3c   : > { %v404_v54 = vrot.slane %v403_v34, 4  ;;  %v594_v55 = vrot.slane %v592_v37, 4  ;;  %v600_v57 = vrot.slane %v598_v39, 5  ;;  %v413_v59 = vrot.slane %v411_v42, 4  ;;  %9149 = vst [vmem:[#allocation9_spill] sm:$0xff] %v6648_v26 }
  0x3d   : > { %v586_v0 = vrot.slane %v585_v45, 4  ;;  %v416_v2 = vrot.slane %v414_v4, 5  ;;  %v422_v3 = vrot.slane %v420_v49, 5  ;;  %v424_v50 = vshrl.u32 %v6624_v23, 16  ;;  %v6652_v34 = vld [vmem:[%s6410_s28 + $0x48] sm:$0xf] }
  0x3e   : > { %v409_v17 = vsel %vm6454_vm4, %v404_v54, %v408_v20  ;;  %v595_v22 = vor.u32 %v594_v55, %v590_v28  ;;  %v430_v18 = vshll.u32 %v6633_v48, 16  ;;  %v603_v27 = vshrl.u32 %v6638_v52, 16 }
  0x3f   : > { %v5177_v37 = vcombine.low %v399_v44, %v409_v17  ;;  %v591_v39 = vsel %vm6454_vm4, %v586_v0, %v590_v28  ;;  %v417_v42 = vor.u32 %v416_v2, %v413_v59  ;;  %v426_v45 = vrot.slane %v424_v50, 4  ;;  %v6661_v17 = vld [vmem:[%s6410_s28 + $0x4c] sm:$0xf]  ;;  %v6667_v2 = vld [vmem:[%s6410_s28 + $0x50] sm:$0x1] }
  0x40   : > { %v596_v4 = vrot.slane %v595_v22, 4  ;;  %v432_v49 = vrot.slane %v430_v18, 5  ;;  %v605_v20 = vrot.slane %v603_v27, 4  ;;  %v606_v54 = vshll.u32 %v6638_v52, 16 }
  0x41   : > { %5940 = vmatprep.mubr.msk.bf16.mxu0 %vm724_vm3, %v5177_v37  ;;  %v418_v55 = vrot.slane %v417_v42, 4  ;;  %v427_v62 = vor.u32 %v426_v45, %v422_v3  ;;  %v612_v32 = vshll.u32 %v6642_v13, 16  ;;  %v616_v44 = vshrl.u32 %v6642_v13, 16  ;;  %v6673_v42 = vld [vmem:[%s6410_s28 + $0xa8] sm:$0xf] }
  0x42   : > { %v601_v28 = vsel %vm6454_vm4, %v596_v4, %v600_v57  ;;  %v608_v59 = vrot.slane %v606_v54, 5  ;;  %v622_v0 = vshll.u32 %v6648_v26, 16  ;;  %v435_v50 = vshrl.u32 %v6652_v34, 16  ;;  %9150 = vst [vmem:[#allocation10_spill] sm:$0xff] %v6673_v42 }
  0x43   : > { %v5185_v22 = vcombine.low %v591_v39, %v601_v28  ;;  %v423_v18 = vsel %vm6454_vm4, %v418_v55, %v422_v3  ;;  %v428_v27 = vrot.slane %v427_v62, 4  ;;  %v614_v37 = vrot.slane %v612_v32, 5 }
  0x44   : > { %v609_v45 = vor.u32 %v608_v59, %v605_v20  ;;  %v618_v61 = vrot.slane %v616_v44, 4  ;;  %v624_v57 = vrot.slane %v622_v0, 5  ;;  %v437_v4 = vrot.slane %v435_v50, 4  ;;  %v6683_v44 = vld [vmem:[%s6410_s28 + $0xac] sm:$0xf] }
  0x45   : > { %5956 = vmatprep.mubr.msk.bf16.mxu1 %vm724_vm3, %v5185_v22  ;;  %v433_v54 = vsel %vm6454_vm4, %v428_v27, %v432_v49  ;;  %v438_v39 = vshll.u32 %v6652_v34, 16  ;;  %v444_v28 = vshll.u32 %v6661_v17, 16  ;;  %v448_v62 = vshrl.u32 %v6661_v17, 16  ;;  %9151 = vst [vmem:[#allocation11_spill] sm:$0xff] %v6683_v44  ;;  %v6686_v22 = vld [vmem:[%s6410_s28 + $0xb0] sm:$0x1] }
  0x46   : > { %v5178_v3 = vcombine.low %v423_v18, %v433_v54  ;;  %v610_v32 = vrot.slane %v609_v45, 4  ;;  %v619_v55 = vor.u32 %v618_v61, %v614_v37  ;;  %v454_v20 = vshll.u32 %v6667_v2, 16  ;;  %9152 = vst [vmem:[#allocation12_spill] sm:$0xff] %v6686_v22 }
  0x47   : > { %v440_v59 = vrot.slane %v438_v39, 5  ;;  %v446_v0 = vrot.slane %v444_v28, 5  ;;  %v450_v50 = vrot.slane %v448_v62, 4  ;;  %v627_v49 = vshrl.u32 %v6673_v42, 16  ;;  %v6695_v62 = vld [vmem:[%s6410_s28 + $0x54] sm:$0xf] }
  0x48   : > { %5941 = vmatmul.mubr.msk.bf16.gmra.mxu0 %vm724_vm3, %v5178_v3  ;;  %v615_v18 = vsel %vm6454_vm4, %v610_v32, %v614_v37  ;;  %v620_v27 = vrot.slane %v619_v55, 4  ;;  %v456_v61 = vrot.slane %v454_v20, 5  ;;  %v630_v45 = vshll.u32 %v6673_v42, 16  ;;  %v6702_v55 = vld [vmem:[%s6410_s28 + $0x58] sm:$0xf] }
  0x49   : > { %v441_v54 = vor.u32 %v440_v59, %v437_v4  ;;  %v451_v56 = vor.u32 %v450_v50, %v446_v0  ;;  %v629_v39 = vrot.slane %v627_v49, 4  ;;  %v636_v28 = vshll.u32 %v6683_v44, 16  ;;  %v6705_v49 = vld [vmem:[%s6410_s28 + $0x5c] sm:$0x1] }
  0x4a   : > { %v625_v3 = vsel %vm6454_vm4, %v620_v27, %v624_v57  ;;  %v632_v26 = vrot.slane %v630_v45, 5  ;;  %v640_v37 = vshrl.u32 %v6683_v44, 16  ;;  %v646_v32 = vshll.u32 %v6686_v22, 16  ;;  %v1230_v22 = vld [vmem:[%s6410_s28] sm:$0xe] }
  0x4b   : > { %v5186_v4 = vcombine.low %v615_v18, %v625_v3  ;;  %v442_v20 = vrot.slane %v441_v54, 4  ;;  %v452_v59 = vrot.slane %v451_v56, 4  ;;  %v638_v50 = vrot.slane %v636_v28, 5  ;;  %v6716_v54 = vld [vmem:[%s6410_s28 + $0xb4] sm:$0xf] }
  0x4c   : > { %v633_v42 = vor.u32 %v632_v26, %v629_v39  ;;  %v642_v52 = vrot.slane %v640_v37, 4  ;;  %v648_v13 = vrot.slane %v646_v32, 5  ;;  %v459_v57 = vshrl.u32 %v6695_v62, 16  ;;  %9153 = vst [vmem:[#allocation13_spill] sm:$0xff] %v6716_v54  ;;  %v6719_v37 = vld [vmem:[%s6410_s28 + $0xb8] sm:$0xf] }
  0x4d   : > { %5957 = vmatmul.mubr.msk.bf16.gmra.mxu1 %vm724_vm3, %v5186_v4  ;;  %v447_v27 = vsel %vm6454_vm4, %v442_v20, %v446_v0  ;;  %v457_v18 = vsel %vm6454_vm4, %v452_v59, %v456_v61  ;;  %v462_v56 = vshll.u32 %v6695_v62, 16  ;;  %v468_v45 = vshll.u32 %v6702_v55, 16  ;;  %v6724_v61 = vld [vmem:[%s6410_s28 + $0xbc] sm:$0x1] }
  0x4e   : > { %v5179_v26 = vcombine.low %v447_v27, %v457_v18  ;;  %v634_v39 = vrot.slane %v633_v42, 4  ;;  %v643_v28 = vor.u32 %v642_v52, %v638_v50  ;;  %v461_v3 = vrot.slane %v459_v57, 4 }
  0x4f   : > { %v464_v32 = vrot.slane %v462_v56, 5  ;;  %v470_v4 = vrot.slane %v468_v45, 5  ;;  %v472_v0 = vshrl.u32 %v6702_v55, 16  ;;  %v478_v20 = vshll.u32 %v6705_v49, 16 }
  0x50   : > { %5944 = vmatprep.mubr.msk.bf16.mxu0 %vm724_vm3, %v5179_v26  ;;  %v639_v59 = vsel %vm6454_vm4, %v634_v39, %v638_v50  ;;  %v644_v27 = vrot.slane %v643_v28, 4  ;;  %v651_v52 = vshrl.u32 %v6716_v54, 16  ;;  %v654_v42 = vshll.u32 %v6716_v54, 16 }
  0x51   : > { %v465_v57 = vor.u32 %v464_v32, %v461_v3  ;;  %v474_v18 = vrot.slane %v472_v0, 4  ;;  %v480_v56 = vrot.slane %v478_v20, 5  ;;  %v660_v45 = vshll.u32 %v6719_v37, 16 }
  0x52   : > { %v649_v44 = vsel %vm6454_vm4, %v644_v27, %v648_v13  ;;  %v653_v16 = vrot.slane %v651_v52, 4  ;;  %v656_v26 = vrot.slane %v654_v42, 5  ;;  %v664_v38 = vshrl.u32 %v6719_v37, 16 }
  0x53   : > { %v5187_v50 = vcombine.low %v639_v59, %v649_v44  ;;  %v466_v39 = vrot.slane %v465_v57, 4  ;;  %v475_v28 = vor.u32 %v474_v18, %v470_v4  ;;  %v662_v47 = vrot.slane %v660_v45, 5  ;;  %v1232_v57 = vld [vmem:[%s6410_s28 + $0x18] sm:$0xe] }
  0x54   : > { %v657_v54 = vor.u32 %v656_v26, %v653_v16  ;;  %v666_v3 = vrot.slane %v664_v38, 4  ;;  %v670_v32 = vshll.u32 %v6724_v61, 16  ;;  %v5237_v13 = vrot.slane %v1230_v22, 9 }
  0x55   : > { %5960 = vmatprep.mubr.msk.bf16.mxu1 %vm724_vm3, %v5187_v50  ;;  %v471_v44 = vsel %vm6454_vm4, %v466_v39, %v470_v4  ;;  %v476_v20 = vrot.slane %v475_v28, 4  ;;  %v1283_v59 = vrot.slane %v6419_v6, 5  ;;  %v5206_v38 = vcombine.low %v6447_v29, %v6450_v30 }
  0x56   : > { %v658_v16 = vrot.slane %v657_v54, 4  ;;  %v667_v27 = vor.u32 %v666_v3, %v662_v47  ;;  %v672_v52 = vrot.slane %v670_v32, 5  ;;  %v5238_v42 = vrot.slane %v1231_v51, 9 }
  0x57   : > { %v481_v18 = vsel %vm6454_vm4, %v476_v20, %v480_v56  ;;  %v1284_v22 = vsel %vm6740_vm7, %v5237_v13, %v1283_v59  ;;  %v1285_v45 = vrot.slane %v1283_v59, 4  ;;  %v9156_v4 = vrot.slane %v6450_v30, 5 }
  0x58   : > { %v5180_v50 = vcombine.low %v471_v44, %v481_v18  ;;  %v663_v54 = vsel %vm6454_vm4, %v658_v16, %v662_v47  ;;  %v668_v39 = vrot.slane %v667_v27, 4  ;;  %v5205_v51 = vcombine.low %v6416_v5, %v6419_v6  ;;  %v1233_v27 = vld [vmem:[%s6410_s28 + $0x24] sm:$0xe] }
  0x59   : > { %v1292_v26 = vrot.slane %v9156_v4, 4  ;;  %v9157_v28 = vrot.slane %v6422_v7, 5  ;;  %v9158_v3 = vmov %v9156_v4  ;;  %v5207_v13 = vcombine.low %v6489_v8, %v6496_v21  ;;  %v1235_v4 = vld [vmem:[%s6410_s28 + $0x3c] sm:$0xe] }
  0x5a   : > { %v1291_v32 = vsel %vm6740_vm7, %v5238_v42, %v9158_v3  ;;  %v5239_v44 = vrot.slane %v1232_v57, 9  ;;  %5945 = vmatmul.mubr.msk.bf16.gmra.mxu0 %vm724_vm3, %v5180_v50  ;;  %v673_v47 = vsel %vm6454_vm4, %v668_v39, %v672_v52  ;;  %v9159_v6 = vrot.slane %v6460_v41, 5  ;;  %v1234_v42 = vld [vmem:[%s6410_s28 + $0x30] sm:$0xe]  ;;  %v1236_v39 = vld [vmem:[%s6410_s28 + $0x48] sm:$0xe] }
  0x5b   : > { %v1287_v56 = vsel %vm6740_vm7, %v1285_v45, %v9157_v28  ;;  %v1297_v20 = vrot.slane %v6496_v21, 5  ;;  %v5188_v59 = vcombine.low %v663_v54, %v673_v47  ;;  %v1300_v16 = vrot.slane %v6502_v25, 5  ;;  %v1237_v47 = vld [vmem:[%s6410_s28 + $0x54] sm:$0xe]  ;;  %v7035_v21 = vld [vmem:[%s6410_s28 + $0x2c] sm:$0x1] }
  0x5c   : > { %v5254_v5 = vcombine.low %v1284_v22, %v1287_v56  ;;  %v1294_v7 = vsel %vm6740_vm7, %v1292_v26, %v9159_v6  ;;  %v1851_v52 = vsel %vm773_vm0, %v6547_v19, 0  ;;  %v1304_v18 = vrot.slane %v6541_v10, 5 }
  0x5d   : > { %v1298_v41 = vsel %vm6740_vm7, %v5239_v44, %v1297_v20  ;;  %v1299_v57 = vrot.slane %v1297_v20, 4  ;;  %5961 = vmatmul.mubr.msk.bf16.gmra.mxu1 %vm724_vm3, %v5188_v59  ;;  %v5255_v22 = vcombine.low %v1291_v32, %v1294_v7  ;;  %v2577_v25 = vsel %vm773_vm0, %v6515_v40, 0 }
  0x5e   : > { %6000 = vmatprep.mubr.msk.bf16.mxu0 %vm724_vm3, %v5254_v5  ;;  %v1311_v45 = vrot.slane %v6587_v9, 5  ;;  %5966 = vmatprep.mubr.msk.bf16.mxu1 %vm724_vm3, %v5205_v51  ;;  %v5240_v26 = vrot.slane %v1233_v27, 9  ;;  %v1307_v50 = vrot.slane %v6552_v24, 5  ;;  %v5241_v54 = vrot.slane %v1234_v42, 9  ;;  %v6807_v24 = vld [vmem:[%s9103_s1 + $0x18] sm:$0xf] }
  0x5f   : > { %v1301_v19 = vsel %vm6740_vm7, %v1299_v57, %v1300_v16  ;;  %v1306_v56 = vrot.slane %v1304_v18, 4  ;;  %v1314_v32 = vrot.slane %v6595_v33, 5  ;;  %v5242_v44 = vrot.slane %v1235_v4, 9 }
  0x60   : > { %v5256_v28 = vcombine.low %v1298_v41, %v1301_v19  ;;  %v1313_v3 = vrot.slane %v1311_v45, 4  ;;  %v1318_v40 = vrot.slane %v6624_v23, 5  ;;  %v1342_v5 = vrot.slane %v6436_v15, 5 }
  0x61   : > { %v1321_v51 = vrot.slane %v6633_v48, 5  ;;  %v5243_v6 = vrot.slane %v1236_v39, 9  ;;  %v1325_v7 = vrot.slane %v6661_v17, 5  ;;  %v5208_v33 = vcombine.low %v6533_v1, %v6541_v10  ;;  %v1238_v1 = vld [vmem:[%s6410_s28 + $0x60] sm:$0xe] }
  0x62   : > { %6001 = vmatmul.mubr.msk.bf16.vlgmr.msra.gmra.mxu0 %vm724_vm3, %v5255_v22  ;;  %v1305_v20 = vsel %vm6740_vm7, %v5240_v26, %v1304_v18  ;;  %v1320_v59 = vrot.slane %v1318_v40, 4  ;;  %v1328_v16 = vrot.slane %v6667_v2, 5  ;;  %v1308_v48 = vsel %vm6740_vm7, %v1306_v56, %v1307_v50  ;;  %v6835_v22 = vld [vmem:[%s9103_s1 + $0x14] sm:$0xf]  ;;  %v6860_v50 = vld [vmem:[%s6410_s28 + $0x6c] sm:$0xe] }
  0x63   : > { %6067 = vmatpush3.bf16.msra.mxu0 %v2577_v25  ;;  %6004 = vmatprep.mubr.msk.bf16.mxu0 %vm724_vm3, %v5256_v28  ;;  %v1312_v27 = vsel %vm6740_vm7, %v5241_v54, %v1311_v45  ;;  %v1315_v42 = vsel %vm6740_vm7, %v1313_v3, %v1314_v32  ;;  %v1327_v41 = vrot.slane %v1325_v7, 4  ;;  %v6825_v10 = vsel %vm6740_vm7, %v5242_v44, %v1318_v40  ;;  %v1241_v39 = vld [vmem:[%s6410_s28 + $0x84] sm:$0xe]  ;;  %v6889_v44 = vld [vmem:[%s6410_s28 + $0x78] sm:$0xe] }
  0x64   : > { %v6829_v2 = vsel %vm6740_vm7, %v5243_v6, %v1325_v7  ;;  %v5244_v57 = vrot.slane %v1237_v47, 9  ;;  %v1332_v18 = vrot.slane %v6702_v55, 5  ;;  %6245 = vmatprep.subr.msk.bf16.mxu0 %vm773_vm0, %v6807_v24  ;;  %v6845_v25 = vsel %vm6740_vm7, %v1320_v59, %v1321_v51  ;;  %v1242_v40 = vld [vmem:[%s6410_s28 + $0x90] sm:$0xe] }
  0x65   : > { %5967 = vmatmul.mubr.msk.bf16.vlgmr.msra.gmra.mxu1 %vm724_vm3, %v5206_v38  ;;  %v6849_v45 = vsel %vm6740_vm7, %v1327_v41, %v1328_v16  ;;  %v1335_v4 = vrot.slane %v6705_v49, 5  ;;  %v1339_v19 = vrot.slane %v6433_v14, 5  ;;  %v5257_v29 = vcombine.low %v1305_v20, %v1308_v48  ;;  %v9160_v48 = vld [vmem:[#allocation3_spill] sm:$0xff] }
  0x66   : > { %6033 = vmatpush3.bf16.msra.mxu1 %v1851_v52  ;;  %5970 = vmatprep.mubr.msk.bf16.mxu1 %vm724_vm3, %v5207_v13  ;;  %v5209_v30 = vcombine.low %v6582_v60, %v6587_v9  ;;  %v1334_v38 = vrot.slane %v1332_v18, 4  ;;  %v5245_v26 = vrot.slane %v1238_v1, 9  ;;  %v5258_v49 = vcombine.low %v1312_v27, %v1315_v42  ;;  %v1243_v42 = vld [vmem:[%s6410_s28 + $0x9c] sm:$0xe] }
  0x67   : > { %v5210_v52 = vcombine.low %v6619_v11, %v6624_v23  ;;  %v5211_v8 = vcombine.low %v6652_v34, %v6661_v17  ;;  %6244 = vmatprep.subr.msk.bf16.mxu1 %vm773_vm0, %v6835_v22  ;;  %v5259_v60 = vcombine.low %v6825_v10, %v6845_v25  ;;  %v5260_v9 = vcombine.low %v6829_v2, %v6849_v45  ;;  %v9161_v10 = vld [vmem:[#allocation5_spill] sm:$0xff]  ;;  %v9162_v2 = vld [vmem:[#allocation4_spill] sm:$0xff] }
  0x68   : > { %v1341_v54 = vrot.slane %v1339_v19, 4  ;;  %v6879_v28 = vsel %vm6740_vm7, %v5244_v57, %v1332_v18  ;;  %v6883_v56 = vsel %vm6740_vm7, %v1334_v38, %v1335_v4  ;;  %v5246_v32 = vrot.slane %v6860_v50, 9  ;;  %v1244_v18 = vld [vmem:[%s6410_s28 + $0xa8] sm:$0xe]  ;;  %v9164_v38 = vld [vmem:[#allocation8_spill] sm:$0xff] }
  0x69   : > { %v6895_v47 = vsel %vm6740_vm7, %v5245_v26, %v1339_v19  ;;  %v1346_v51 = vrot.slane %v6475_v58, 5  ;;  %v1349_v6 = vrot.slane %v6483_v63, 5  ;;  %v5248_v59 = vrot.slane %v1241_v39, 9  ;;  %v9163_v19 = vld [vmem:[#allocation6_spill] sm:$0xff]  ;;  %v9165_v26 = vld [vmem:[#allocation7_spill] sm:$0xff] }
  0x6a   : > { %6005 = vmatmul.mubr.msk.bf16.gmra.mxu0 %vm724_vm3, %v5257_v29  ;;  %v1360_v16 = vrot.slane %v6566_v43, 5  ;;  %v1363_v27 = vrot.slane %v9160_v48, 5  ;;  %v5261_v41 = vcombine.low %v6879_v28, %v6883_v56  ;;  %v6913_v63 = vsel %vm6740_vm7, %v1341_v54, %v1342_v5  ;;  %v9167_v48 = vld [vmem:[#allocation11_spill] sm:$0xff] }
  0x6b   : > { %6008 = vmatprep.mubr.msk.bf16.mxu0 %vm724_vm3, %v5258_v49  ;;  %v5247_v1 = vrot.slane %v6889_v44, 9  ;;  %v5249_v4 = vrot.slane %v1242_v40, 9  ;;  %v1367_v15 = vrot.slane %v9161_v10, 5  ;;  %v1348_v5 = vrot.slane %v1346_v51, 4  ;;  %v5351_v57 = vld [vmem:[%s6410_s28 + $0xc] sm:$0xf] }
  0x6c   : > { %v6922_v25 = vsel %vm6740_vm7, %v5248_v59, %v1360_v16  ;;  %v1362_v45 = vrot.slane %v1360_v16, 4  ;;  %v1370_v29 = vrot.slane %v9163_v19, 5  ;;  %v5250_v49 = vrot.slane %v1243_v42, 9  ;;  %v9166_v59 = vld [vmem:[#allocation9_spill] sm:$0xff]  ;;  %v9168_v42 = vld [vmem:[#allocation10_spill] sm:$0xff] }
  0x6d   : > { %5971 = vmatmul.mubr.msk.bf16.gmra.mxu1 %vm724_vm3, %v5208_v33  ;;  %v1353_v33 = vrot.slane %v6520_v46, 5  ;;  %v6936_v39 = vsel %vm6740_vm7, %v5249_v4, %v1367_v15  ;;  %v1369_v44 = vrot.slane %v1367_v15, 4  ;;  %v1374_v40 = vrot.slane %v9164_v38, 5  ;;  %v9169_v15 = vld [vmem:[#allocation12_spill] sm:$0xff] }
  0x6e   : > { %5974 = vmatprep.mubr.msk.bf16.mxu1 %vm724_vm3, %v5209_v30  ;;  %v6932_v54 = vsel %vm6740_vm7, %v1362_v45, %v1363_v27  ;;  %v1377_v16 = vrot.slane %v9166_v59, 5  ;;  %v5251_v45 = vrot.slane %v1244_v18, 9  ;;  %v1381_v4 = vrot.slane %v9167_v48, 5 }
  0x6f   : > { %v6946_v27 = vsel %vm6740_vm7, %v1369_v44, %v1370_v29  ;;  %v1384_v50 = vrot.slane %v9169_v15, 5  ;;  %v6956_v19 = vsel %vm6740_vm7, %v5250_v49, %v1374_v40  ;;  %v1376_v7 = vrot.slane %v1374_v40, 4  ;;  %v9170_v29 = vld [vmem:[#allocation13_spill] sm:$0xff]  ;;  %v9171_v15 = vld [vmem:[#allocation2_spill] sm:$0xff]  ;;  %v6971_v49 = vld [vmem:[%s6410_s28 + $0x10] sm:$0xf] }
  0x70   : > { %v6963_v18 = vsel %vm6740_vm7, %v5246_v32, %v1346_v51  ;;  %v6968_v59 = vsel %vm6740_vm7, %v5251_v45, %v1381_v4  ;;  %v1383_v30 = vrot.slane %v1381_v4, 4  ;;  %v5354_v40 = vld [vmem:[%s6410_s28 + $0x18] sm:$0xf]  ;;  %v1355_v20 = vrot.slane %v1353_v33, 4 }
  0x71   : > { %v2095_v44 = vshrl.u32 %v5351_v57, 16  ;;  %v2098_v32 = vshll.u32 %v5351_v57, 16  ;;  %v5262_v51 = vcombine.low %v6895_v47, %v6913_v63  ;;  %v6986_v45 = vsel %vm6740_vm7, %v1348_v5, %v1349_v6  ;;  %v1245_v57 = vld [vmem:[%s6410_s28 + $0xb4] sm:$0xe]  ;;  %v7007_v47 = vld [vmem:[%s6410_s28 + $0x14] sm:$0x1] }
  0x72   : > { %6009 = vmatmul.mubr.msk.bf16.gmra.mxu0 %vm724_vm3, %v5259_v60  ;;  %v1356_v60 = vrot.slane %v9171_v15, 5  ;;  %v7001_v11 = vsel %vm6740_vm7, %v5247_v1, %v1353_v33  ;;  %v2104_v6 = vshll.u32 %v6971_v49, 16  ;;  %v5355_v63 = vld [vmem:[%s6410_s28 + $0x1c] sm:$0xf]  ;;  %v2108_v17 = vshrl.u32 %v6971_v49, 16 }
  0x73   : > { %6012 = vmatprep.mubr.msk.bf16.mxu0 %vm724_vm3, %v5260_v9  ;;  %v6976_v9 = vsel %vm6740_vm7, %v1376_v7, %v1377_v16  ;;  %v6992_v7 = vsel %vm6740_vm7, %v1383_v30, %v1384_v50  ;;  %v2097_v5 = vrot.slane %v2095_v44, 4  ;;  %v2100_v34 = vrot.slane %v2098_v32, 5  ;;  %v5357_v15 = vld [vmem:[%s6410_s28 + $0x24] sm:$0xf]  ;;  %v7020_v44 = vld [vmem:[%s6410_s28 + $0x28] sm:$0xf] }
  0x74   : > { %v2119_v50 = vshrl.u32 %v5354_v40, 16  ;;  %v1357_v1 = vsel %vm6740_vm7, %v1355_v20, %v1356_v60  ;;  %v5252_v33 = vrot.slane %v1245_v57, 9  ;;  %v7015_v30 = vrot.slane %v2104_v6, 5 }
  0x75   : > { %5975 = vmatmul.mubr.msk.bf16.gmra.mxu1 %vm724_vm3, %v5210_v52  ;;  %v1388_v52 = vrot.slane %v6719_v37, 5  ;;  %v2122_v16 = vshll.u32 %v5354_v40, 16  ;;  %v1391_v23 = vrot.slane %v6724_v61, 5  ;;  %v2110_v4 = vrot.slane %v2108_v17, 4 }
  0x76   : > { %5978 = vmatprep.mubr.msk.bf16.mxu1 %vm724_vm3, %v5211_v8  ;;  %v5356_v8 = vld [vmem:[%s6410_s28 + $0x20] sm:$0x1]  ;;  %v2121_v3 = vrot.slane %v2119_v50, 4  ;;  %v2128_v13 = vshll.u32 %v5355_v63, 16  ;;  %v2114_v20 = vshll.u32 %v7007_v47, 16  ;;  %v2132_v57 = vshrl.u32 %v5355_v63, 16 }
  0x77   : > { %v1390_v32 = vrot.slane %v1388_v52, 4  ;;  %v2124_v60 = vrot.slane %v2122_v16, 5  ;;  %v5263_v61 = vcombine.low %v6963_v18, %v6986_v45  ;;  %v5264_v40 = vcombine.low %v7001_v11, %v1357_v1 }
  0x78   : > { %v2101_v6 = vor.u32 %v2100_v34, %v2097_v5  ;;  %v7031_v17 = vrot.slane %v2128_v13, 5  ;;  %v2111_v28 = vor.u32 %v2110_v4, %v7015_v30  ;;  %v2138_v50 = vshll.u32 %v5356_v8, 16  ;;  %v7058_v5 = vld [vmem:[%s6410_s28 + $0x34] sm:$0xf] }
  0x79   : > { %v2125_v56 = vor.u32 %v2124_v60, %v2121_v3  ;;  %v7043_v18 = vsel %vm6740_vm7, %v5252_v33, %v1388_v52  ;;  %v2143_v13 = vshrl.u32 %v5357_v15, 16  ;;  %v2146_v45 = vshll.u32 %v5357_v15, 16  ;;  %v5360_v52 = vld [vmem:[%s6410_s28 + $0x30] sm:$0xf] }
  0x7a   : > { %6013 = vmatmul.mubr.msk.bf16.gmra.mxu0 %vm724_vm3, %v5261_v41  ;;  %v2134_v41 = vrot.slane %v2132_v57, 4  ;;  %v2152_v11 = vshll.u32 %v7020_v44, 16  ;;  %v9173_v3 = vcombine.low %v6429_v12, %v6433_v14  ;;  %v7052_v4 = vsel %vm6740_vm7, %v1390_v32, %v1391_v23 }
  0x7b   : > { %6016 = vmatprep.mubr.msk.bf16.mxu0 %vm724_vm3, %v5262_v51  ;;  %v9172_v51 = vcombine.low %v6695_v62, %v6702_v55  ;;  %v2116_v62 = vrot.slane %v2114_v20, 5  ;;  %v2156_v63 = vshrl.u32 %v7020_v44, 16  ;;  %v2102_v34 = vrot.slane %v2101_v6, 4 }
  0x7c   : > { %v2135_v55 = vor.u32 %v2134_v41, %v7031_v17  ;;  %v2145_v8 = vrot.slane %v2143_v13, 4  ;;  %v2148_v1 = vrot.slane %v2146_v45, 5  ;;  %v7060_v33 = vrot.slane %v2152_v11, 5  ;;  %v7066_v41 = vld [vmem:[%s6410_s28 + $0x38] sm:$0x1] }
  0x7d   : > { %5979 = vmatmul.mubr.msk.bf16.gmra.mxu1 %vm724_vm3, %v9172_v51  ;;  %v2112_v12 = vrot.slane %v2111_v28, 4  ;;  %v2126_v14 = vrot.slane %v2125_v56, 4  ;;  %v2140_v16 = vrot.slane %v2138_v50, 5  ;;  %v2158_v23 = vrot.slane %v2156_v63, 4  ;;  %v5363_v13 = vld [vmem:[%s6410_s28 + $0x3c] sm:$0xf] }
  0x7e   : > { %5982 = vmatprep.mubr.msk.bf16.mxu1 %vm724_vm3, %v9173_v3  ;;  %v2136_v15 = vrot.slane %v2135_v55, 4  ;;  %v2162_v32 = vshll.u32 %v7035_v21, 16  ;;  %v2167_v20 = vshrl.u32 %v5360_v52, 16  ;;  %v2170_v60 = vshll.u32 %v5360_v52, 16 }
  0x7f   : > { %v2149_v57 = vor.u32 %v2148_v1, %v2145_v8  ;;  %v2159_v6 = vor.u32 %v2158_v23, %v7060_v33  ;;  %v2176_v28 = vshll.u32 %v7058_v5, 16  ;;  %v2180_v56 = vshrl.u32 %v7058_v5, 16  ;;  %v5366_v8 = vld [vmem:[%s6410_s28 + $0x48] sm:$0xf]  ;;  %v7093_v1 = vld [vmem:[%s6410_s28 + $0x4c] sm:$0xf] }
  0x80   : > { %v2169_v50 = vrot.slane %v2167_v20, 4  ;;  %v2172_v51 = vrot.slane %v2170_v60, 5  ;;  %v9174_v3 = vcombine.low %v6471_v53, %v6475_v58  ;;  %v5269_v55 = vcombine.low %v7043_v18, %v7052_v4 }
  0x81   : > { %v7072_v45 = vrot.slane %v2176_v28, 5  ;;  %v2182_v11 = vrot.slane %v2180_v56, 4  ;;  %v2117_v63 = vsel %vm6454_vm4, %v2112_v12, %v2116_v62  ;;  %v2131_v52 = vsel %vm6454_vm4, %v2126_v14, %v7031_v17 }
  0x82   : > { %6017 = vmatmul.mubr.msk.bf16.gmra.mxu0 %vm724_vm3, %v5263_v61  ;;  %v7075_v61 = vld [vmem:[%s6410_s28 + $0x40] sm:$0xf]  ;;  %v9175_v53 = vcombine.low %v6509_v35, %v6520_v46  ;;  %v2141_v58 = vsel %vm6454_vm4, %v2136_v15, %v2140_v16  ;;  %v2150_v23 = vrot.slane %v2149_v57, 4  ;;  %v2173_v20 = vor.u32 %v2172_v51, %v2169_v50  ;;  %v7127_v50 = vld [vmem:[%s6410_s28 + $0x44] sm:$0x1] }
  0x83   : > { %6020 = vmatprep.mubr.msk.bf16.mxu0 %vm724_vm3, %v5264_v40  ;;  %v2107_v40 = vsel %vm6454_vm4, %v2102_v34, %v7015_v30  ;;  %v2160_v30 = vrot.slane %v2159_v6, 4  ;;  %v2164_v34 = vrot.slane %v2162_v32, 5  ;;  %v2186_v62 = vshll.u32 %v7066_v41, 16  ;;  %v5369_v51 = vld [vmem:[%s6410_s28 + $0x54] sm:$0xf] }
  0x84   : > { %v2191_v12 = vshrl.u32 %v5363_v13, 16  ;;  %v2194_v17 = vshll.u32 %v5363_v13, 16  ;;  %v7104_v14 = vsel %vm773_vm0, %v6835_v22, 0  ;;  %v2183_v35 = vor.u32 %v2182_v11, %v7072_v45 }
  0x85   : > { %5983 = vmatmul.mubr.msk.bf16.gmra.mxu1 %vm724_vm3, %v9174_v3  ;;  %v2200_v46 = vshll.u32 %v7075_v61, 16  ;;  %v2204_v16 = vshrl.u32 %v7075_v61, 16  ;;  %v7109_v15 = vcombine.low %v2107_v40, %v2117_v63  ;;  %v7113_v32 = vsel %vm773_vm0, %v6807_v24, 0  ;;  %v7136_v40 = vld [vmem:[%s6410_s28 + $0x58] sm:$0xf] }
  0x86   : > { %5986 = vmatprep.mubr.msk.bf16.mxu1 %vm724_vm3, %v9175_v53  ;;  %v2215_v60 = vshrl.u32 %v5366_v8, 16  ;;  %v2218_v57 = vshll.u32 %v5366_v8, 16  ;;  %v9176_v6 = vcombine.low %v6922_v25, %v6932_v54  ;;  %v7119_v22 = vcombine.low %v2131_v52, %v2141_v58  ;;  %v7141_v8 = vld [vmem:[%s6410_s28 + $0x50] sm:$0x1] }
  0x87   : > { %v2155_v28 = vsel %vm6454_vm4, %v2150_v23, %v7060_v33  ;;  %v2165_v56 = vsel %vm6454_vm4, %v2160_v30, %v2164_v34  ;;  %v2224_v24 = vshll.u32 %v7093_v1, 16  ;;  %v9177_v25 = vcombine.low %v6936_v39, %v6946_v27  ;;  %v5372_v34 = vld [vmem:[%s6410_s28 + $0x60] sm:$0xf] }
  0x88   : > { %v2174_v54 = vrot.slane %v2173_v20, 4  ;;  %v2188_v13 = vrot.slane %v2186_v62, 5  ;;  %v2193_v11 = vrot.slane %v2191_v12, 4  ;;  %v2196_v3 = vrot.slane %v2194_v17, 5 }
  0x89   : > { %v2184_v33 = vrot.slane %v2183_v35, 4  ;;  %v7138_v63 = vrot.slane %v2200_v46, 5  ;;  %v2206_v52 = vrot.slane %v2204_v16, 4  ;;  %v2228_v53 = vshrl.u32 %v7093_v1, 16  ;;  %v7158_v35 = vld [vmem:[%s6410_s28 + $0x5c] sm:$0x1] }
  0x8a   : > { %6021 = vmatmul.mubr.msk.bf16.gmra.mxu0 %vm724_vm3, %v9176_v6  ;;  %v9178_v39 = vcombine.low %v6559_v36, %v6566_v43  ;;  %v2217_v27 = vrot.slane %v2215_v60, 4  ;;  %v2220_v58 = vrot.slane %v2218_v57, 5  ;;  %v2239_v23 = vshrl.u32 %v5369_v51, 16 }
  0x8b   : > { %6024 = vmatprep.mubr.msk.bf16.mxu0 %vm724_vm3, %v9177_v25  ;;  %v2242_v30 = vshll.u32 %v5369_v51, 16  ;;  %v9179_v20 = vcombine.low %v9162_v2, %v9161_v10  ;;  %v7153_v62 = vcombine.low %v2155_v28, %v2165_v56  ;;  %v7155_v12 = vrot.slane %v2224_v24, 5  ;;  %v7171_v28 = vld [vmem:[%s6410_s28 + $0x64] sm:$0xf] }
  0x8c   : > { %v2230_v17 = vrot.slane %v2228_v53, 4  ;;  %v2248_v36 = vshll.u32 %v7136_v40, 16  ;;  %v2210_v43 = vshll.u32 %v7127_v50, 16  ;;  %v2241_v46 = vrot.slane %v2239_v23, 4 }
  0x8d   : > { %5987 = vmatmul.mubr.msk.bf16.gmra.mxu1 %vm724_vm3, %v9178_v39  ;;  %v2244_v16 = vrot.slane %v2242_v30, 5  ;;  %v2252_v60 = vshrl.u32 %v7136_v40, 16  ;;  %v2179_v10 = vsel %vm6454_vm4, %v2174_v54, %v7072_v45  ;;  %v2189_v2 = vsel %vm6454_vm4, %v2184_v33, %v2188_v13  ;;  %v7193_v30 = vld [vmem:[%s6410_s28 + $0x68] sm:$0x1] }
  0x8e   : > { %5990 = vmatprep.mubr.msk.bf16.mxu1 %vm724_vm3, %v9179_v20  ;;  %v2197_v57 = vor.u32 %v2196_v3, %v2193_v11  ;;  %v7168_v6 = vrot.slane %v2248_v36, 5  ;;  %v2207_v56 = vor.u32 %v2206_v52, %v7138_v63  ;;  %v2221_v24 = vor.u32 %v2220_v58, %v2217_v27  ;;  %v5375_v3 = vld [vmem:[%s6410_s28 + $0x6c] sm:$0xf]  ;;  %v7190_v27 = vld [vmem:[%s6410_s28 + $0x70] sm:$0xf] }
  0x8f   : > { %v2234_v51 = vshll.u32 %v7141_v8, 16  ;;  %v2254_v25 = vrot.slane %v2252_v60, 4  ;;  %v9180_v53 = vcombine.low %v6956_v19, %v6976_v9  ;;  %v2231_v45 = vor.u32 %v2230_v17, %v7155_v12 }
  0x90   : > { %v2245_v54 = vor.u32 %v2244_v16, %v2241_v46  ;;  %v2263_v13 = vshrl.u32 %v5372_v34, 16  ;;  %v2266_v11 = vshll.u32 %v5372_v34, 16  ;;  %v9181_v33 = vcombine.low %v6968_v59, %v6992_v7  ;;  %v5378_v16 = vld [vmem:[%s6410_s28 + $0x78] sm:$0xf] }
  0x91   : > { %v2255_v52 = vor.u32 %v2254_v25, %v7168_v6  ;;  %v2258_v39 = vshll.u32 %v7158_v35, 16  ;;  %v2272_v19 = vshll.u32 %v7171_v28, 16  ;;  %v2276_v9 = vshrl.u32 %v7171_v28, 16 }
  0x92   : > { %6025 = vmatmul.mubr.msk.bf16.gmra.mxu0 %vm724_vm3, %v9180_v53  ;;  %v2198_v58 = vrot.slane %v2197_v57, 4  ;;  %v2212_v23 = vrot.slane %v2210_v43, 5  ;;  %v2265_v34 = vrot.slane %v2263_v13, 4  ;;  %v2268_v20 = vrot.slane %v2266_v11, 5 }
  0x93   : > { %6028 = vmatprep.mubr.msk.bf16.mxu0 %vm724_vm3, %v9181_v33  ;;  %v9182_v59 = vcombine.low %v9165_v26, %v9164_v38  ;;  %v7199_v7 = vcombine.low %v2179_v10, %v2189_v2  ;;  %v2208_v17 = vrot.slane %v2207_v56, 4  ;;  %v2222_v36 = vrot.slane %v2221_v24, 4  ;;  %v7209_v2 = vld [vmem:[%s6410_s28 + $0x7c] sm:$0xf] }
  0x94   : > { %v7201_v46 = vrot.slane %v2272_v19, 5  ;;  %v9183_v43 = vcombine.low %v9168_v42, %v9167_v48  ;;  %v2232_v60 = vrot.slane %v2231_v45, 4  ;;  %v2236_v57 = vrot.slane %v2234_v51, 5  ;;  %9184 = vst [vmem:[#allocation3_spill] sm:$0xff] %v7209_v2  ;;  %v5381_v19 = vld [vmem:[%s6410_s28 + $0x84] sm:$0xf] }
  0x95   : > { %5991 = vmatmul.mubr.msk.bf16.gmra.mxu1 %vm724_vm3, %v9182_v59  ;;  %v2246_v25 = vrot.slane %v2245_v54, 4  ;;  %v2278_v38 = vrot.slane %v2276_v9, 4  ;;  %v2256_v26 = vrot.slane %v2255_v52, 4  ;;  %v2260_v53 = vrot.slane %v2258_v39, 5 }
  0x96   : > { %5994 = vmatprep.mubr.msk.bf16.mxu1 %vm724_vm3, %v9183_v43  ;;  %v2269_v13 = vor.u32 %v2268_v20, %v2265_v34  ;;  %v2287_v10 = vshrl.u32 %v5375_v3, 16  ;;  %v2203_v56 = vsel %vm6454_vm4, %v2198_v58, %v7138_v63  ;;  %v2290_v24 = vshll.u32 %v5375_v3, 16  ;;  %v6289_v63 = vld [vmem:[%s6410_s28 + $0xc] sm:$0xff]   ;;  %v7243_v34 = vld [vmem:[%s6410_s28 + $0x88] sm:$0xf] }
  0x97   : > { %v2296_v48 = vshll.u32 %v7190_v27, 16  ;;  %v2300_v42 = vshrl.u32 %v7190_v27, 16  ;;  %v2213_v51 = vsel %vm6454_vm4, %v2208_v17, %v2212_v23  ;;  %v2227_v45 = vsel %vm6454_vm4, %v2222_v36, %v7155_v12  ;;  %9185 = vst [vmem:[#allocation5_spill] sm:$0xff] %v7243_v34  ;;  %v7252_v36 = vld [vmem:[%s6410_s28 + $0x74] sm:$0x1] }
  0x98   : > { %v2279_v54 = vor.u32 %v2278_v38, %v7201_v46  ;;  %v2282_v11 = vshll.u32 %v7193_v30, 16  ;;  %v2237_v3 = vsel %vm6454_vm4, %v2232_v60, %v2236_v57  ;;  %v2251_v33 = vsel %vm6454_vm4, %v2246_v25, %v7168_v6  ;;  %9187 = vst [vmem:[#allocation4_spill] sm:$0xff] %v7252_v36  ;;  %v7262_v38 = vld [vmem:[%s6410_s28 + $0x80] sm:$0x1] }
  0x99   : > { %v2311_v52 = vshrl.u32 %v5378_v16, 16  ;;  %v2314_v12 = vshll.u32 %v5378_v16, 16  ;;  %v2261_v18 = vsel %vm6454_vm4, %v2256_v26, %v2260_v53  ;;  %v2270_v4 = vrot.slane %v2269_v13, 4  ;;  %9188 = vst [vmem:[#allocation6_spill] sm:$0xff] %v7262_v38  ;;  %v7265_v26 = vld [vmem:[%s6410_s28 + $0x8c] sm:$0x1] }
  0x9a   : > { %6029 = vmatmul.mubr.msk.bf16.gmra.mxu0 %vm724_vm3, %v5269_v55  ;;  %v2289_v55 = vrot.slane %v2287_v10, 4  ;;  %v2320_v39 = vshll.u32 %v7209_v2, 16  ;;  %v2292_v9 = vrot.slane %v2290_v24, 5  ;;  %v7239_v58 = vrot.slane %v2296_v48, 5  ;;  %9189 = vst [vmem:[#allocation8_spill] sm:$0xff] %v7265_v26  ;;  %v6290_v10 = vld [vmem:[%s6410_s28 + $0x18] sm:$0xff]  }
  0x9b   : > { %6068 = vmatprep.mubr.msk.bf16.mxu0 %vm724_vm3, %v7109_v15  ;;  %v2302_v23 = vrot.slane %v2300_v42, 4  ;;  %v2324_v6 = vshrl.u32 %v7209_v2, 16  ;;  %v9186_v15 = vcombine.low %v9170_v29, %v6719_v37  ;;  %v7249_v20 = vcombine.low %v2203_v56, %v2213_v51  ;;  %v5384_v51 = vld [vmem:[%s6410_s28 + $0x90] sm:$0xf] }
  0x9c   : > { %v2280_v59 = vrot.slane %v2279_v54, 4  ;;  %v2284_v17 = vrot.slane %v2282_v11, 5  ;;  %v2313_v16 = vrot.slane %v2311_v52, 4  ;;  %v2316_v43 = vrot.slane %v2314_v12, 5 }
  0x9d   : > { %5995 = vmatmul.mubr.msk.bf16.gmra.mxu1 %vm724_vm3, %v9186_v15  ;;  %v7255_v60 = vrot.slane %v2320_v39, 5  ;;  %v2326_v57 = vrot.slane %v2324_v6, 4  ;;  %v2335_v25 = vshrl.u32 %v5381_v19, 16  ;;  %v7257_v37 = vcombine.low %v2227_v45, %v2237_v3  ;;  %v7276_v45 = vld [vmem:[%s6410_s28 + $0x94] sm:$0xf] }
  0x9e   : > { %6034 = vmatprep.mubr.msk.bf16.mxu1 %vm724_vm3, %v6289_v63  ;;  %v7259_v29 = vcombine.low %v2251_v33, %v2261_v18  ;;  %v2338_v53 = vshll.u32 %v5381_v19, 16  ;;  %v2344_v13 = vshll.u32 %v7243_v34, 16  ;;  %v2275_v56 = vsel %vm6454_vm4, %v2270_v4, %v7201_v46  ;;  %9190 = vst [vmem:[#allocation7_spill] sm:$0xff] %v7276_v45  ;;  %v7284_v33 = vld [vmem:[%s9103_s1 + $0x20] sm:$0xf]  ;;  %v6291_v46 = vld [vmem:[%s6410_s28 + $0x24] sm:$0xff]  }
  0x9f   : > { %v2293_v24 = vor.u32 %v2292_v9, %v2289_v55  ;;  %v2303_v48 = vor.u32 %v2302_v23, %v7239_v58  ;;  %v2306_v42 = vshll.u32 %v7252_v36, 16  ;;  %v2337_v54 = vrot.slane %v2335_v25, 4  ;;  %9191 = vst [vmem:[#allocation9_spill] sm:$0xff] %v7284_v33 }
  0xa0   : > { %v2340_v11 = vrot.slane %v2338_v53, 5  ;;  %v7278_v63 = vrot.slane %v2344_v13, 5  ;;  %v2348_v3 = vshrl.u32 %v7243_v34, 16  ;;  %v2285_v52 = vsel %vm6454_vm4, %v2280_v59, %v2284_v17 }
  0xa1   : > { %v2317_v12 = vor.u32 %v2316_v43, %v2313_v16  ;;  %v2327_v18 = vor.u32 %v2326_v57, %v7255_v60  ;;  %v2330_v4 = vshll.u32 %v7262_v38, 16  ;;  %v2359_v19 = vshrl.u32 %v5384_v51, 16  ;;  %v7318_v57 = vld [vmem:[%s6410_s28 + $0xa0] sm:$0xf] }
  0xa2   : > { %6069 = vmatmul.mubr.msk.bf16.vlgmr.msra.gmra.mxu0 %vm724_vm3, %v7119_v22  ;;  %v2341_v55 = vor.u32 %v2340_v11, %v2337_v54  ;;  %v2350_v39 = vrot.slane %v2348_v3, 4  ;;  %v2362_v9 = vshll.u32 %v5384_v51, 16  ;;  %v5387_v22 = vld [vmem:[%s6410_s28 + $0x9c] sm:$0xf]  ;;  %v7297_v23 = vrot.slane %v2293_v24, 4  ;;  %9193 = vst [vmem:[#allocation10_spill] sm:$0xff] %v7318_v57 }
  0xa3   : > { %6135 = vmatpush3.bf16.msra.mxu0 %v7113_v32  ;;  %6072 = vmatprep.mubr.msk.bf16.mxu0 %vm724_vm3, %v7153_v62  ;;  %v7299_v6 = vrot.slane %v2306_v42, 5  ;;  %v2354_v15 = vshll.u32 %v7265_v26, 16  ;;  %v2368_v59 = vshll.u32 %v7276_v45, 16  ;;  %v7306_v32 = vld [vmem:[%s9103_s1 + $0x1c] sm:$0xf]  ;;  %v7311_v62 = vcombine.low %v2275_v56, %v2285_v52 }
  0xa4   : > { %9192 = vst [vmem:[#allocation11_spill] sm:$0xff] %v7306_v32  ;;  %6247 = vmatprep.subr.msk.bf16.mxu0 %vm773_vm0, %v7284_v33  ;;  %v7313_v17 = vrot.slane %v2303_v48, 4  ;;  %v2351_v16 = vor.u32 %v2350_v39, %v7278_v63  ;;  %v2372_v43 = vshrl.u32 %v7276_v45, 16  ;;  %v7322_v25 = vrot.slane %v2317_v12, 4  ;;  %v7331_v56 = vld [vmem:[%s6410_s28 + $0x98] sm:$0x1] }
  0xa5   : > { %6035 = vmatmul.mubr.msk.bf16.vlgmr.msra.gmra.mxu1 %vm724_vm3, %v6290_v10  ;;  %v7324_v53 = vrot.slane %v2327_v18, 4  ;;  %v7326_v13 = vrot.slane %v2330_v4, 5  ;;  %v7328_v10 = vrot.slane %v2341_v55, 4  ;;  %9194 = vst [vmem:[#allocation12_spill] sm:$0xff] %v7331_v56  ;;  %v2361_v24 = vrot.slane %v2359_v19, 4  ;;  %v6293_v19 = vld [vmem:[%s6410_s28 + $0x3c] sm:$0xff]  }
  0xa6   : > { %6101 = vmatpush3.bf16.msra.mxu1 %v7104_v14  ;;  %6038 = vmatprep.mubr.msk.bf16.mxu1 %vm724_vm3, %v6291_v46  ;;  %v2364_v48 = vrot.slane %v2362_v9, 5  ;;  %v2383_v42 = vshrl.u32 %v5387_v22, 16  ;;  %v2386_v51 = vshll.u32 %v5387_v22, 16  ;;  %v6292_v14 = vld [vmem:[%s6410_s28 + $0x30] sm:$0xff]   ;;  %v7340_v11 = vrot.slane %v2354_v15, 5 }
  0xa7   : > { %6246 = vmatprep.subr.msk.bf16.mxu1 %vm773_vm0, %v7306_v32  ;;  %v7342_v3 = vrot.slane %v2368_v59, 5  ;;  %v2392_v46 = vshll.u32 %v7318_v57, 16  ;;  %v5390_v52 = vld [vmem:[%s6410_s28 + $0xa8] sm:$0xf]  ;;  %v7346_v12 = vrot.slane %v2351_v16, 4  ;;  %v2374_v18 = vrot.slane %v2372_v43, 4 }
  0xa8   : > { %v2378_v4 = vshll.u32 %v7331_v56, 16  ;;  %v2396_v55 = vshrl.u32 %v7318_v57, 16  ;;  %v7351_v39 = vld [vmem:[%s6410_s28 + $0xac] sm:$0xf]  ;;  %v2365_v59 = vor.u32 %v2364_v48, %v2361_v24  ;;  %v7375_v16 = vld [vmem:[%s6410_s28 + $0xa4] sm:$0x1] }
  0xa9   : > { %9195 = vst [vmem:[#allocation13_spill] sm:$0xff] %v7351_v39  ;;  %9196 = vst [vmem:[#allocation2_spill] sm:$0xff] %v7375_v16  ;;  %v2385_v43 = vrot.slane %v2383_v42, 4  ;;  %v2388_v22 = vrot.slane %v2386_v51, 5  ;;  %v2407_v54 = vshrl.u32 %v5390_v52, 16  ;;  %v7377_v9 = vrot.slane %v2392_v46, 5 }
  0xaa   : > { %6073 = vmatmul.mubr.msk.bf16.gmra.mxu0 %vm724_vm3, %v7199_v7  ;;  %v2398_v32 = vrot.slane %v2396_v55, 4  ;;  %v2410_v15 = vshll.u32 %v5390_v52, 16  ;;  %v2416_v33 = vshll.u32 %v7351_v39, 16  ;;  %v5393_v57 = vld [vmem:[%s6410_s28 + $0xb4] sm:$0xf]  ;;  %v2375_v24 = vor.u32 %v2374_v18, %v7342_v3 }
  0xab   : > { %6076 = vmatprep.mubr.msk.bf16.mxu0 %vm724_vm3, %v7249_v20  ;;  %v2357_v20 = vsel %vm6454_vm4, %v7346_v12, %v7340_v11  ;;  %v7387_v48 = vrot.slane %v2378_v4, 5  ;;  %v7390_v42 = vld [vmem:[%s6410_s28 + $0xb0] sm:$0x1]  ;;  %v2409_v51 = vrot.slane %v2407_v54, 4  ;;  %v7393_v46 = vld [vmem:[%s6410_s28 + $0xb8] sm:$0xf]  ;;  %v2389_v18 = vor.u32 %v2388_v22, %v2385_v43 }
  0xac   : > { %9197 = vst [vmem:[#allocation14_spill] sm:$0xff] %v7390_v42  ;;  %9198 = vst [vmem:[#allocation15_spill] sm:$0xff] %v7393_v46  ;;  %v2412_v52 = vrot.slane %v2410_v15, 5  ;;  %v7397_v55 = vrot.slane %v2416_v33, 5  ;;  %v2420_v11 = vshrl.u32 %v7351_v39, 16  ;;  %v7400_v12 = vrot.slane %v2365_v59, 4 }
  0xad   : > { %6039 = vmatmul.mubr.msk.bf16.gmra.mxu1 %vm724_vm3, %v6292_v14  ;;  %v2402_v14 = vshll.u32 %v7375_v16, 16  ;;  %v7403_v4 = vld [vmem:[%s6410_s28 + $0xbc] sm:$0x1]  ;;  %v2431_v54 = vshrl.u32 %v5393_v57, 16  ;;  %v2434_v7 = vshll.u32 %v5393_v57, 16  ;;  %v2399_v56 = vor.u32 %v2398_v32, %v7377_v9  ;;  %v6294_v16 = vld [vmem:[%s6410_s28 + $0x48] sm:$0xff]  }
  0xae   : > { %6042 = vmatprep.mubr.msk.bf16.mxu1 %vm724_vm3, %v6293_v19  ;;  %v2422_v45 = vrot.slane %v2420_v11, 4  ;;  %v2426_v19 = vshll.u32 %v7390_v42, 16  ;;  %v2440_v15 = vshll.u32 %v7393_v46, 16  ;;  %v5396_v33 = vld [vmem:[%s6410_s28 + $0xc0] sm:$0xf]  ;;  %v2413_v26 = vor.u32 %v2412_v52, %v2409_v51  ;;  %v6295_v57 = vld [vmem:[%s6410_s28 + $0x54] sm:$0xff]  }
  0xaf   : > { %v2433_v39 = vrot.slane %v2431_v54, 4  ;;  %v2436_v34 = vrot.slane %v2434_v7, 5  ;;  %v2444_v59 = vshrl.u32 %v7393_v46, 16  ;;  %v7412_v22 = vld [vmem:[%s6410_s28 + $0xc4] sm:$0xf]  ;;  %v2376_v43 = vrot.slane %v2375_v24, 4 }
  0xb0   : > { %v2404_v32 = vrot.slane %v2402_v14, 5  ;;  %v2423_v11 = vor.u32 %v2422_v45, %v7397_v55  ;;  %v2442_v42 = vrot.slane %v2440_v15, 5  ;;  %v2450_v7 = vshll.u32 %v7403_v4, 16  ;;  %v7424_v45 = vld [vmem:[%s6410_s28 + $0xc8] sm:$0x1] }
  0xb1   : > { %v2437_v51 = vor.u32 %v2436_v34, %v2433_v39  ;;  %v2446_v52 = vrot.slane %v2444_v59, 4  ;;  %v2455_v54 = vshrl.u32 %v5396_v33, 16  ;;  %v2390_v46 = vrot.slane %v2389_v18, 4 }
  0xb2   : > { %6077 = vmatmul.mubr.msk.bf16.gmra.mxu0 %vm724_vm3, %v7257_v37  ;;  %v2400_v38 = vrot.slane %v2399_v56, 4  ;;  %v2458_v2 = vshll.u32 %v5396_v33, 16  ;;  %v2464_v37 = vshll.u32 %v7412_v22, 16  ;;  %v2414_v24 = vrot.slane %v2413_v26, 4 }
  0xb3   : > { %6080 = vmatprep.mubr.msk.bf16.mxu0 %vm724_vm3, %v7259_v29  ;;  %v2428_v14 = vrot.slane %v2426_v19, 5  ;;  %v2447_v36 = vor.u32 %v2446_v52, %v2442_v42  ;;  %v2457_v15 = vrot.slane %v2455_v54, 4  ;;  %v2424_v34 = vrot.slane %v2423_v11, 4 }
  0xb4   : > { %v2460_v29 = vrot.slane %v2458_v2, 5  ;;  %v7427_v39 = vrot.slane %v2464_v37, 5  ;;  %v2468_v56 = vshrl.u32 %v7412_v22, 16  ;;  %v9199_v26 = vsel %vm6454_vm4, %v7313_v17, %v7299_v6 }
  0xb5   : > { %6043 = vmatmul.mubr.msk.bf16.gmra.mxu1 %vm724_vm3, %v6294_v16  ;;  %v9200_v16 = vsel %vm6454_vm4, %v7297_v23, %v7239_v58  ;;  %v2438_v19 = vrot.slane %v2437_v51, 4  ;;  %v2448_v33 = vrot.slane %v2447_v36, 4  ;;  %v2452_v2 = vrot.slane %v2450_v7, 5  ;;  %v6296_v23 = vld [vmem:[%s6410_s28 + $0x60] sm:$0xff]  }
  0xb6   : > { %6046 = vmatprep.mubr.msk.bf16.mxu1 %vm724_vm3, %v6295_v57  ;;  %v5408_v18 = vcombine.low %v9200_v16, %v9199_v26  ;;  %v9201_v59 = vsel %vm6454_vm4, %v7324_v53, %v7326_v13  ;;  %v9202_v6 = vsel %vm6454_vm4, %v7322_v25, %v7255_v60  ;;  %v2461_v57 = vor.u32 %v2460_v29, %v2457_v15  ;;  %v5434_v13 = vld [vmem:[%s6410_s28 + $0x24] sm:$0xe]  ;;  %v5437_v26 = vld [vmem:[%s6410_s28 + $0x48] sm:$0xe] }
  0xb7   : > { %v5409_v17 = vcombine.low %v9202_v6, %v9201_v59  ;;  %v2470_v11 = vrot.slane %v2468_v56, 4  ;;  %v2474_v58 = vshll.u32 %v7424_v45, 16  ;;  %v9203_v36 = vsel %vm6454_vm4, %v7328_v10, %v7278_v63  ;;  %v6297_v63 = vld [vmem:[%s6410_s28 + $0x6c] sm:$0xff]   ;;  %v5438_v6 = vld [vmem:[%s6410_s28 + $0x54] sm:$0xe] }
  0xb8   : > { %v5410_v51 = vcombine.low %v9203_v36, %v2357_v20  ;;  %v2371_v53 = vsel %vm6454_vm4, %v7400_v12, %v7342_v3  ;;  %v2381_v60 = vsel %vm6454_vm4, %v2376_v43, %v7387_v48  ;;  %v2395_v25 = vsel %vm6454_vm4, %v2390_v46, %v7377_v9  ;;  %v7480_v12 = vld [vmem:[%s6410_s28 + $0xc] sm:$0xe] }
  0xb9   : > { %v2405_v10 = vsel %vm6454_vm4, %v2400_v38, %v2404_v32  ;;  %v2419_v3 = vsel %vm6454_vm4, %v2414_v24, %v7397_v55  ;;  %v2429_v20 = vsel %vm6454_vm4, %v2424_v34, %v2428_v14  ;;  %v2471_v48 = vor.u32 %v2470_v11, %v7427_v39  ;;  %v5435_v55 = vld [vmem:[%s6410_s28 + $0x30] sm:$0xe]  ;;  %v5436_v14 = vld [vmem:[%s6410_s28 + $0x3c] sm:$0xe] }
  0xba   : > { %6081 = vmatmul.mubr.msk.bf16.gmra.mxu0 %vm724_vm3, %v7311_v62  ;;  %v2443_v62 = vsel %vm6454_vm4, %v2438_v19, %v2442_v42  ;;  %v2453_v38 = vsel %vm6454_vm4, %v2448_v33, %v2452_v2  ;;  %v7487_v9 = vrot.slane %v2461_v57, 4  ;;  %v2838_v46 = vrot.slane %v6971_v49, 5  ;;  %v6298_v57 = vld [vmem:[%s6410_s28 + $0x78] sm:$0xff]  }
  0xbb   : > { %6084 = vmatprep.mubr.msk.bf16.mxu0 %vm724_vm3, %v5408_v18  ;;  %v7491_v43 = vcombine.low %v2371_v53, %v2381_v60  ;;  %v7493_v32 = vrot.slane %v2471_v48, 4  ;;  %v7495_v52 = vrot.slane %v2474_v58, 5  ;;  %v5450_v7 = vrot.slane %v5434_v13, 9  ;;  %v6299_v53 = vld [vmem:[%s6410_s28 + $0x84] sm:$0xff]   ;;  %v5439_v13 = vld [vmem:[%s6410_s28 + $0x60] sm:$0xe] }
  0xbc   : > { %v7498_v54 = vcombine.low %v2395_v25, %v2405_v10  ;;  %v7500_v42 = vcombine.low %v2419_v3, %v2429_v20  ;;  %v5448_v37 = vrot.slane %v7480_v12, 9  ;;  %v2852_v24 = vrot.slane %v7020_v44, 5  ;;  %v6305_v49 = vld [vmem:[%s6410_s28 + $0x18] sm:$0xff]  }
  0xbd   : > { %6047 = vmatmul.mubr.msk.bf16.gmra.mxu1 %vm724_vm3, %v6296_v23  ;;  %v7506_v15 = vcombine.low %v2443_v62, %v2453_v38  ;;  %v2841_v34 = vrot.slane %v7007_v47, 5  ;;  %v2855_v29 = vrot.slane %v7035_v21, 5  ;;  %v5451_v56 = vrot.slane %v5435_v55, 9  ;;  %v5441_v55 = vld [vmem:[%s6410_s28 + $0x78] sm:$0xe] }
  0xbe   : > { %6050 = vmatprep.mubr.msk.bf16.mxu1 %vm724_vm3, %v6297_v63  ;;  %v2467_v16 = vsel %vm6454_vm4, %v7487_v9, %v7427_v39  ;;  %v7517_v44 = vrot.slane %v2838_v46, 4  ;;  %v7521_v18 = vsel %vm6740_vm7, %v5450_v7, %v2852_v24  ;;  %v2854_v19 = vrot.slane %v2852_v24, 4 }
  0xbf   : > { %v2477_v21 = vsel %vm6454_vm4, %v7493_v32, %v7495_v52  ;;  %v2859_v33 = vrot.slane %v7058_v5, 5  ;;  %v2862_v2 = vrot.slane %v7066_v41, 5  ;;  %v5452_v59 = vrot.slane %v5436_v14, 9  ;;  %v6304_v52 = vld [vmem:[%s6410_s28 + $0xc0] sm:$0xff]  }
  0xc0   : > { %v7533_v11 = vsel %vm6740_vm7, %v2854_v19, %v2855_v29  ;;  %v2866_v58 = vrot.slane %v7075_v61, 5  ;;  %v2869_v23 = vrot.slane %v7127_v50, 5  ;;  %v5453_v36 = vrot.slane %v5437_v26, 9  ;;  %v5442_v19 = vld [vmem:[%s6410_s28 + $0x84] sm:$0xe] }
  0xc1   : > { %v5467_v5 = vcombine.low %v7521_v18, %v7533_v11  ;;  %v7543_v41 = vsel %vm6740_vm7, %v5451_v56, %v2859_v33  ;;  %v2861_v60 = vrot.slane %v2859_v33, 4  ;;  %v2873_v25 = vrot.slane %v7093_v1, 5 }
  0xc2   : > { %6085 = vmatmul.mubr.msk.bf16.gmra.mxu0 %vm724_vm3, %v5409_v17  ;;  %v7550_v61 = vsel %vm6740_vm7, %v5452_v59, %v2866_v58  ;;  %v2868_v50 = vrot.slane %v2866_v58, 4  ;;  %v2876_v17 = vrot.slane %v7141_v8, 5  ;;  %v5454_v63 = vrot.slane %v5438_v6, 9  ;;  %v9204_v59 = vld [vmem:[#allocation4_spill] sm:$0xff] }
  0xc3   : > { %6088 = vmatprep.mubr.msk.bf16.mxu0 %vm724_vm3, %v5410_v51  ;;  %v7555_v10 = vsel %vm6740_vm7, %v2861_v60, %v2862_v2  ;;  %v7559_v3 = vsel %vm6740_vm7, %v5453_v36, %v2873_v25  ;;  %v2875_v1 = vrot.slane %v2873_v25, 4  ;;  %v2880_v20 = vrot.slane %v7136_v40, 5  ;;  %v5440_v51 = vld [vmem:[%s6410_s28 + $0x6c] sm:$0xe]  ;;  %v6300_v58 = vld [vmem:[%s6410_s28 + $0x90] sm:$0xff]  }
  0xc4   : > { %v5468_v48 = vcombine.low %v7543_v41, %v7555_v10  ;;  %v7568_v8 = vsel %vm6740_vm7, %v2868_v50, %v2869_v23  ;;  %v2883_v62 = vrot.slane %v7158_v35, 5  ;;  %v5455_v38 = vrot.slane %v5439_v13, 9  ;;  %v9205_v36 = vld [vmem:[#allocation3_spill] sm:$0xff]  ;;  %v5443_v60 = vld [vmem:[%s6410_s28 + $0x90] sm:$0xe]  ;;  %v9206_v50 = vld [vmem:[#allocation6_spill] sm:$0xff] }
  0xc5   : > { %6051 = vmatmul.mubr.msk.bf16.gmra.mxu1 %vm724_vm3, %v6298_v57  ;;  %v5469_v40 = vcombine.low %v7550_v61, %v7568_v8  ;;  %v7577_v7 = vsel %vm6740_vm7, %v2875_v1, %v2876_v17  ;;  %v7581_v24 = vsel %vm6740_vm7, %v5454_v63, %v2880_v20  ;;  %v2882_v14 = vrot.slane %v2880_v20, 4 }
  0xc6   : > { %6054 = vmatprep.mubr.msk.bf16.mxu1 %vm724_vm3, %v6299_v53  ;;  %v5470_v35 = vcombine.low %v7559_v3, %v7577_v7  ;;  %v2887_v29 = vrot.slane %v7171_v28, 5  ;;  %v2890_v56 = vrot.slane %v7193_v30, 5  ;;  %v5456_v26 = vrot.slane %v5440_v51, 9  ;;  %v9207_v51 = vld [vmem:[#allocation5_spill] sm:$0xff]  ;;  %v5574_v3 = vld [vmem:[%s6410_s28 + $0x48] sm:$0xf] }
  0xc7   : > { %v7590_v33 = vsel %vm6740_vm7, %v2882_v14, %v2883_v62  ;;  %v2894_v2 = vrot.slane %v7190_v27, 5  ;;  %v2897_v6 = vrot.slane %v9204_v59, 5  ;;  %v5457_v57 = vrot.slane %v5441_v55, 9  ;;  %v6301_v27 = vld [vmem:[%s6410_s28 + $0x9c] sm:$0xff]   ;;  %v9215_v55 = vld [vmem:[#allocation15_spill] sm:$0xff] }
  0xc8   : > { %v5471_v23 = vcombine.low %v7581_v24, %v7590_v33  ;;  %v7599_v28 = vsel %vm6740_vm7, %v5455_v38, %v2887_v29  ;;  %v2889_v30 = vrot.slane %v2887_v29, 4  ;;  %v2901_v53 = vrot.slane %v9205_v36, 5  ;;  %v5444_v38 = vld [vmem:[%s6410_s28 + $0x9c] sm:$0xe]  ;;  %v9210_v36 = vld [vmem:[#allocation12_spill] sm:$0xff] }
  0xc9   : > { %v7608_v25 = vsel %vm6740_vm7, %v5456_v26, %v2894_v2  ;;  %v2896_v13 = vrot.slane %v2894_v2, 4  ;;  %v2904_v17 = vrot.slane %v9206_v50, 5  ;;  %v5458_v63 = vrot.slane %v5442_v19, 9  ;;  %v5445_v26 = vld [vmem:[%s6410_s28 + $0xa8] sm:$0xe] }
  0xca   : > { %6089 = vmatmul.mubr.msk.bf16.gmra.mxu0 %vm724_vm3, %v7491_v43  ;;  %v7615_v1 = vsel %vm6740_vm7, %v2889_v30, %v2890_v56  ;;  %v7619_v43 = vsel %vm6740_vm7, %v5457_v57, %v2901_v53  ;;  %v2903_v20 = vrot.slane %v2901_v53, 4  ;;  %v2908_v62 = vrot.slane %v9207_v51, 5  ;;  %v5447_v57 = vld [vmem:[%s6410_s28 + $0xc0] sm:$0xe]  ;;  %v6302_v19 = vld [vmem:[%s6410_s28 + $0xa8] sm:$0xff]  }
  0xcb   : > { %6092 = vmatprep.mubr.msk.bf16.mxu0 %vm724_vm3, %v7498_v54  ;;  %v7627_v14 = vsel %vm6740_vm7, %v2896_v13, %v2897_v6  ;;  %v9208_v54 = vld [vmem:[#allocation8_spill] sm:$0xff]  ;;  %v5459_v56 = vrot.slane %v5443_v60, 9  ;;  %v2918_v53 = vrot.slane %v9210_v36, 5  ;;  %v5460_v60 = vrot.slane %v5444_v38, 9  ;;  %v9213_v38 = vld [vmem:[#allocation13_spill] sm:$0xff] }
  0xcc   : > { %v2911_v29 = vrot.slane %v9208_v54, 5  ;;  %v7636_v2 = vsel %vm6740_vm7, %v2903_v20, %v2904_v17  ;;  %v7640_v59 = vsel %vm6740_vm7, %v5458_v63, %v2908_v62  ;;  %v2910_v6 = vrot.slane %v2908_v62, 4  ;;  %v5446_v13 = vld [vmem:[%s6410_s28 + $0xb4] sm:$0xe]  ;;  %v9211_v17 = vld [vmem:[#allocation10_spill] sm:$0xff] }
  0xcd   : > { %6055 = vmatmul.mubr.msk.bf16.gmra.mxu1 %vm724_vm3, %v6300_v58  ;;  %v9209_v58 = vld [vmem:[#allocation7_spill] sm:$0xff]  ;;  %v2922_v63 = vrot.slane %v9211_v17, 5  ;;  %v9212_v20 = vld [vmem:[#allocation2_spill] sm:$0xff]  ;;  %v5461_v62 = vrot.slane %v5445_v26, 9  ;;  %v2929_v36 = vrot.slane %v9213_v38, 5  ;;  %v5462_v26 = vrot.slane %v5446_v13, 9 }
  0xce   : > { %6058 = vmatprep.mubr.msk.bf16.mxu1 %vm724_vm3, %v6301_v27  ;;  %v2915_v30 = vrot.slane %v9209_v58, 5  ;;  %v7650_v50 = vsel %vm6740_vm7, %v2910_v6, %v2911_v29  ;;  %v2925_v51 = vrot.slane %v9212_v20, 5  ;;  %v9214_v17 = vld [vmem:[#allocation14_spill] sm:$0xff]  ;;  %v6303_v27 = vld [vmem:[%s6410_s28 + $0xb4] sm:$0xff]   ;;  %v2842_v39 = vsel %vm6740_vm7, %v7517_v44, %v2841_v34  ;;  %v7867_v7 = vld [vmem:[%s6410_s28 + $0x4c] sm:$0xf] }
  0xcf   : > { %v7665_v29 = vsel %vm6740_vm7, %v5460_v60, %v2922_v63  ;;  %v2924_v6 = vrot.slane %v2922_v63, 4  ;;  %v2932_v20 = vrot.slane %v9214_v17, 5  ;;  %v2931_v38 = vrot.slane %v2929_v36, 4  ;;  %v6322_v44 = vld [vmem:[%s6410_s28 + $0x20] sm:$0x1] }
  0xd0   : > { %v7658_v54 = vsel %vm6740_vm7, %v5459_v56, %v2915_v30  ;;  %v2917_v58 = vrot.slane %v2915_v30, 4  ;;  %v7677_v30 = vsel %vm6740_vm7, %v5461_v62, %v2929_v36  ;;  %v2936_v60 = vrot.slane %v9215_v55, 5 }
  0xd1   : > { %v5463_v63 = vrot.slane %v5447_v57, 9  ;;  %v7693_v55 = vsel %vm6740_vm7, %v2931_v38, %v2932_v20  ;;  %v2943_v57 = vrot.slane %v7412_v22, 5  ;;  %v2839_v22 = vsel %vm6740_vm7, %v5448_v37, %v2838_v46  ;;  %v6307_v38 = vld [vmem:[%s6410_s28 + $0x30] sm:$0xff]  }
  0xd2   : > { %6093 = vmatmul.mubr.msk.bf16.gmra.mxu0 %vm724_vm3, %v7500_v42  ;;  %v7673_v56 = vsel %vm6740_vm7, %v2917_v58, %v2918_v53  ;;  %v7686_v42 = vsel %vm6740_vm7, %v2924_v6, %v2925_v51  ;;  %v2939_v53 = vrot.slane %v7403_v4, 5  ;;  %v2938_v58 = vrot.slane %v2936_v60, 4 }
  0xd3   : > { %6096 = vmatprep.mubr.msk.bf16.mxu0 %vm724_vm3, %v7506_v15  ;;  %v7697_v15 = vsel %vm6740_vm7, %v5462_v26, %v2936_v60  ;;  %v2946_v51 = vrot.slane %v7424_v45, 5  ;;  %v5433_v45 = vld [vmem:[%s6410_s28 + $0x18] sm:$0xe]  ;;  %v7737_v9 = vsel %vm6740_vm7, %v5463_v63, %v2943_v57  ;;  %v2945_v46 = vrot.slane %v2943_v57, 4  ;;  %v6306_v26 = vld [vmem:[%s6410_s28 + $0x24] sm:$0xff]  }
  0xd4   : > { %v7725_v32 = vsel %vm6740_vm7, %v2938_v58, %v2939_v53  ;;  %v5449_v37 = vrot.slane %v5433_v45, 9  ;;  %v5465_v34 = vcombine.low %v2839_v22, %v2842_v39  ;;  %v9216_v60 = vld [vmem:[#allocation9_spill] sm:$0xff] }
  0xd5   : > { %6059 = vmatmul.mubr.msk.bf16.gmra.mxu1 %vm724_vm3, %v6302_v19  ;;  %v5415_v19 = vcombine.low %v2467_v16, %v2477_v21  ;;  %v7742_v47 = vsel %vm6740_vm7, %v2945_v46, %v2946_v51  ;;  %v2848_v21 = vrot.slane %v6322_v44, 5  ;;  %v4602_v53 = vsel %vm773_vm0, %v9216_v60, 0  ;;  %v5562_v63 = vld [vmem:[%s6410_s28 + $0x18] sm:$0xf]  ;;  %v5563_v57 = vld [vmem:[%s6410_s28 + $0x1c] sm:$0xf] }
  0xd6   : > { %6062 = vmatprep.mubr.msk.bf16.mxu1 %vm724_vm3, %v6303_v27  ;;  %v6321_v27 = vld [vmem:[%s6410_s28 + $0x1c] sm:$0xf]  ;;  %v5565_v51 = vld [vmem:[%s6410_s28 + $0x24] sm:$0xf]  ;;  %v3650_v45 = vshrl.u32 %v5562_v63, 16  ;;  %v3659_v39 = vshll.u32 %v5563_v57, 16 }
  0xd7   : > { %v2845_v36 = vrot.slane %v6321_v27, 5  ;;  %v3653_v27 = vshll.u32 %v5562_v63, 16  ;;  %v3674_v46 = vshrl.u32 %v5565_v51, 16  ;;  %v6309_v44 = vld [vmem:[%s6410_s28 + $0x48] sm:$0xff]   ;;  %v5643_v60 = vld [vmem:[%s6410_s28 + $0x18] sm:$0xe] }
  0xd8   : > { %v7783_v63 = vld [vmem:[%s6410_s28 + $0x2c] sm:$0x1] }
  0xd9   : > { %v2847_v16 = vrot.slane %v2845_v36, 4  ;;  %v2846_v17 = vsel %vm6740_vm7, %v5449_v37, %v2845_v36  ;;  %v7767_v36 = vld [vmem:[%s6410_s28 + $0x28] sm:$0xf]  ;;  %v6308_v37 = vld [vmem:[%s6410_s28 + $0x3c] sm:$0xff]   ;;  %v3676_v18 = vrot.slane %v3674_v46, 4 }
  0xda   : > { %6097 = vmatmul.mubr.msk.bf16.gmra.mxu0 %vm724_vm3, %v5415_v19  ;;  %v9217_v19 = vld [vmem:[#allocation11_spill] sm:$0xff] }
  0xdb   : > { %6136 = vmatprep.mubr.msk.bf16.mxu0 %vm724_vm3, %v6305_v49  ;;  %v2849_v20 = vsel %vm6740_vm7, %v2847_v16, %v2848_v21  ;;  %v4132_v22 = vsel %vm773_vm0, %v9217_v19, 0  ;;  %v3663_v49 = vshrl.u32 %v5563_v57, 16  ;;  %v3687_v16 = vshrl.u32 %v7767_v36, 16  ;;  %v5564_v21 = vld [vmem:[%s6410_s28 + $0x20] sm:$0x1] }
  0xdc   : > { %v5466_v58 = vcombine.low %v2846_v17, %v2849_v20  ;;  %v3652_v17 = vrot.slane %v3650_v45, 4  ;;  %v3655_v20 = vrot.slane %v3653_v27, 5  ;;  %v5568_v19 = vld [vmem:[%s6410_s28 + $0x30] sm:$0xf]  ;;  %v3669_v45 = vshll.u32 %v5564_v21, 16 }
  0xdd   : > { %6063 = vmatmul.mubr.msk.bf16.gmra.mxu1 %vm724_vm3, %v6304_v52  ;;  %v3677_v52 = vshll.u32 %v5565_v51, 16  ;;  %v3689_v51 = vrot.slane %v3687_v16, 4  ;;  %v5659_v27 = vrot.slane %v5643_v60, 9  ;;  %v4396_v46 = vrot.slane %v5564_v21, 5  ;;  %v5644_v16 = vld [vmem:[%s6410_s28 + $0x24] sm:$0xe] }
  0xde   : > { %6102 = vmatprep.mubr.msk.bf16.mxu1 %vm724_vm3, %v5465_v34  ;;  %v3683_v34 = vshll.u32 %v7767_v36, 16  ;;  %v6310_v21 = vld [vmem:[%s6410_s28 + $0x54] sm:$0xff]   ;;  %v3701_v10 = vshll.u32 %v5568_v19, 16  ;;  %v6311_v60 = vld [vmem:[%s6410_s28 + $0x60] sm:$0xff]  }
  0xdf   : > { %v3679_v11 = vrot.slane %v3677_v52, 5  ;;  %v3693_v52 = vshll.u32 %v7783_v63, 16 }
  0xe2   : > { %6137 = vmatmul.mubr.msk.bf16.vlgmr.msra.gmra.mxu0 %vm724_vm3, %v6306_v26  ;;  %v7779_v26 = vrot.slane %v3659_v39, 5 }
  0xe3   : > { %6203 = vmatpush3.bf16.msra.mxu0 %v4602_v53  ;;  %6140 = vmatprep.mubr.msk.bf16.mxu0 %vm724_vm3, %v6307_v38  ;;  %v3665_v38 = vrot.slane %v3663_v49, 4  ;;  %v4393_v53 = vrot.slane %v5563_v57, 5  ;;  %v7793_v57 = vld [vmem:[%s6410_s28 + $0x34] sm:$0xf] }
  0xe5   : > { %6103 = vmatmul.mubr.msk.bf16.vlgmr.msra.gmra.mxu1 %vm724_vm3, %v5466_v58  ;;  %v7788_v58 = vrot.slane %v3683_v34, 5  ;;  %v3666_v39 = vor.u32 %v3665_v38, %v7779_v26  ;;  %v4395_v49 = vrot.slane %v4393_v53, 4  ;;  %v3680_v34 = vor.u32 %v3679_v11, %v3676_v18 }
  0xe6   : > { %6169 = vmatpush3.bf16.msra.mxu1 %v4132_v22  ;;  %6106 = vmatprep.mubr.msk.bf16.mxu1 %vm724_vm3, %v5467_v5  ;;  %v7786_v5 = vpop.f32.mrf.mxu0  ;;  %v3656_v22 = vor.u32 %v3655_v20, %v3652_v17  ;;  %v3698_v17 = vshrl.u32 %v5568_v19, 16  ;;  %v3711_v38 = vshrl.u32 %v7793_v57, 16  ;;  %v7818_v61 = vsel %vm6740_vm7, %v5659_v27, %v4393_v53  ;;  %v5571_v19 = vld [vmem:[%s6410_s28 + $0x3c] sm:$0xf] }
  0xe7   : > { %v3690_v41 = vor.u32 %v3689_v51, %v7788_v58  ;;  %v3667_v8 = vrot.slane %v3666_v39, 4  ;;  %v3695_v11 = vrot.slane %v3693_v52, 5  ;;  %v5660_v51 = vrot.slane %v5644_v16, 9  ;;  %v7832_v39 = vld [vmem:[%s6410_s28 + $0x38] sm:$0x1] }
  0xe8   : > { %v7810_v20 = vpop.f32.mrf.mxu0  ;;  %v3657_v18 = vrot.slane %v3656_v22, 4  ;;  %v3681_v12 = vrot.slane %v3680_v34, 4  ;;  %v4403_v22 = vrot.slane %v7783_v63, 5  ;;  %v3713_v52 = vrot.slane %v3711_v38, 4 }
  0xe9   : > { %v3691_v27 = vrot.slane %v3690_v41, 4  ;;  %v3722_v34 = vshrl.u32 %v5571_v19, 16  ;;  %v3725_v16 = vshll.u32 %v5571_v19, 16  ;;  %v7845_v41 = vld [vmem:[%s6410_s28 + $0x40] sm:$0xf] }
  0xea   : > { %6141 = vmatmul.mubr.msk.bf16.gmra.mxu0 %vm724_vm3, %v6308_v37  ;;  %v7829_v53 = vpop.f32.mrf.mxu0  ;;  %v3662_v63 = vsel %vm6454_vm4, %v3657_v18, %v7779_v26  ;;  %v3686_v26 = vsel %vm6454_vm4, %v3681_v12, %v7788_v58  ;;  %v5645_v18 = vld [vmem:[%s6410_s28 + $0x30] sm:$0xe]  ;;  %v3731_v24 = vshll.u32 %v7845_v41, 16  ;;  %v3735_v33 = vshrl.u32 %v7845_v41, 16 }
  0xeb   : > { %6144 = vmatprep.mubr.msk.bf16.mxu0 %vm724_vm3, %v6309_v44  ;;  %v7801_v37 = vpop.f32.mrf.mxu1  ;;  %v4400_v44 = vrot.slane %v7767_v36, 5  ;;  %v3671_v36 = vrot.slane %v3669_v45, 5  ;;  %v3700_v45 = vrot.slane %v3698_v17, 4  ;;  %v3696_v58 = vsel %vm6454_vm4, %v3691_v27, %v3695_v11 }
  0xec   : > { %9218 = vst [vmem:[#allocation4_spill] sm:$0xff] %v7801_v37  ;;  %v7874_v12 = vpop.f32.mrf.mxu0  ;;  %v3727_v19 = vrot.slane %v3725_v16, 5  ;;  %v3759_v11 = vshrl.u32 %v7867_v7, 16 }
  0xed   : > { %6107 = vmatmul.mubr.msk.bf16.gmra.mxu1 %vm724_vm3, %v5468_v48  ;;  %v3707_v48 = vshll.u32 %v7793_v57, 16  ;;  %v7825_v6 = vpop.f32.mrf.mxu1  ;;  %v4402_v4 = vrot.slane %v4400_v44, 4  ;;  %v3672_v17 = vsel %vm6454_vm4, %v3667_v8, %v3671_v36  ;;  %v4407_v36 = vrot.slane %v7793_v57, 5  ;;  %v6313_v8 = vld [vmem:[%s6410_s28 + $0x78] sm:$0xff]  }
  0xee   : > { %6110 = vmatprep.mubr.msk.bf16.mxu1 %vm724_vm3, %v5469_v40  ;;  %v7822_v40 = vsel %vm6740_vm7, %v4395_v49, %v4396_v46  ;;  %9219 = vst [vmem:[#allocation3_spill] sm:$0xff] %v7825_v6  ;;  %v3703_v49 = vrot.slane %v3701_v10, 5  ;;  %v7888_v27 = vcombine.low %v3662_v63, %v3672_v17  ;;  %v7890_v57 = vcombine.low %v3686_v26, %v3696_v58  ;;  %v7904_v17 = vld [vmem:[%s6410_s28 + $0x58] sm:$0xf]  ;;  %v7910_v58 = vld [vmem:[%s6410_s28 + $0x44] sm:$0x1] }
  0xef   : > { %v7834_v46 = vrot.slane %v3707_v48, 5  ;;  %v7851_v10 = vpop.f32.mrf.mxu1  ;;  %v7858_v48 = vsel %vm6740_vm7, %v5660_v51, %v4400_v44  ;;  %v7862_v38 = vsel %vm6740_vm7, %v4402_v4, %v4403_v22  ;;  %v3724_v51 = vrot.slane %v3722_v34, 4  ;;  %v5577_v34 = vld [vmem:[%s6410_s28 + $0x54] sm:$0xf] }
  0xf0   : > { %9220 = vst [vmem:[#allocation6_spill] sm:$0xff] %v7851_v10  ;;  %v3704_v44 = vor.u32 %v3703_v49, %v3700_v45  ;;  %v3749_v22 = vshll.u32 %v5574_v3, 16  ;;  %v4409_v13 = vrot.slane %v4407_v36, 4  ;;  %v4410_v63 = vrot.slane %v7832_v39, 5  ;;  %v5646_v49 = vld [vmem:[%s6410_s28 + $0x3c] sm:$0xe] }
  0xf1   : > { %v3714_v4 = vor.u32 %v3713_v52, %v7834_v46  ;;  %v7886_v45 = vpop.f32.mrf.mxu1  ;;  %v5661_v52 = vrot.slane %v5645_v18, 9  ;;  %v3728_v18 = vor.u32 %v3727_v19, %v3724_v51  ;;  %v9223_v6 = vcombine.low %v7599_v28, %v7615_v1 }
  0xf2   : > { %6145 = vmatmul.mubr.msk.bf16.gmra.mxu0 %vm724_vm3, %v6310_v21  ;;  %v3755_v21 = vshll.u32 %v7867_v7, 16  ;;  %9221 = vst [vmem:[#allocation5_spill] sm:$0xff] %v7886_v45  ;;  %v3751_v45 = vrot.slane %v3749_v22, 5  ;;  %v3770_v51 = vshrl.u32 %v5577_v34, 16  ;;  %v3773_v19 = vshll.u32 %v5577_v34, 16 }
  0xf3   : > { %6148 = vmatprep.mubr.msk.bf16.mxu0 %vm724_vm3, %v6311_v60  ;;  %v3717_v60 = vshll.u32 %v7832_v39, 16  ;;  %v7907_v26 = vrot.slane %v3714_v4, 4  ;;  %v3761_v39 = vrot.slane %v3759_v11, 4  ;;  %v7945_v22 = vsel %vm6740_vm7, %v4409_v13, %v4410_v63 }
  0xf4   : > { %v7915_v10 = vrot.slane %v3755_v21, 5  ;;  %v9225_v21 = vcombine.low %v7608_v25, %v7627_v14  ;;  %v4414_v25 = vrot.slane %v7845_v41, 5  ;;  %v6315_v14 = vld [vmem:[%s6410_s28 + $0x90] sm:$0xff]   ;;  %v5662_v1 = vrot.slane %v5646_v49, 9  ;;  %v5580_v41 = vld [vmem:[%s6410_s28 + $0x60] sm:$0xf] }
  0xf5   : > { %6111 = vmatmul.mubr.msk.bf16.gmra.mxu1 %vm724_vm3, %v5470_v35  ;;  %v6312_v35 = vld [vmem:[%s6410_s28 + $0x6c] sm:$0xff]   ;;  %v7900_v62 = vrot.slane %v3717_v60, 5  ;;  %v3772_v37 = vrot.slane %v3770_v51, 4 }
  0xf6   : > { %6114 = vmatprep.mubr.msk.bf16.mxu1 %vm724_vm3, %v5471_v23  ;;  %v3746_v23 = vshrl.u32 %v5574_v3, 16  ;;  %v7898_v3 = vrot.slane %v3704_v44, 4  ;;  %v3737_v44 = vrot.slane %v3735_v33, 4  ;;  %v3783_v33 = vshrl.u32 %v7904_v17, 16 }
  0xf7   : > { %v7896_v16 = vpop.f32.mrf.mxu0  ;;  %v3762_v13 = vor.u32 %v3761_v39, %v7915_v10  ;;  %v4421_v39 = vrot.slane %v7867_v7, 5  ;;  %v9229_v7 = vcombine.low %v7619_v43, %v7636_v2  ;;  %v9231_v43 = vcombine.low %v7640_v59, %v7650_v50  ;;  %v6316_v2 = vld [vmem:[%s6410_s28 + $0x9c] sm:$0xff]  }
  0xf8   : > { %9222 = vst [vmem:[#allocation8_spill] sm:$0xff] %v7896_v16  ;;  %v3748_v60 = vrot.slane %v3746_v23, 4  ;;  %v6314_v23 = vld [vmem:[%s6410_s28 + $0x84] sm:$0xff]   ;;  %v7972_v16 = vld [vmem:[%s6410_s28 + $0x5c] sm:$0x1]  ;;  %v4428_v59 = vrot.slane %v7904_v17, 5 }
  0xf9   : > { %v7933_v28 = vpop.f32.mrf.mxu0 }
  0xfa   : > { %6149 = vmatmul.mubr.msk.bf16.gmra.mxu0 %vm724_vm3, %v6312_v35  ;;  %v7912_v35 = vrot.slane %v3731_v24, 5  ;;  %v3779_v24 = vshll.u32 %v7904_v17, 16  ;;  %9226 = vst [vmem:[#allocation12_spill] sm:$0xff] %v7933_v28  ;;  %v3775_v28 = vrot.slane %v3773_v19, 5 }
  0xfb   : > { %6152 = vmatprep.mubr.msk.bf16.mxu0 %vm724_vm3, %v6313_v8  ;;  %v7921_v4 = vpop.f32.mrf.mxu1  ;;  %v7924_v8 = vld [vmem:[%s6410_s28 + $0x50] sm:$0x1]  ;;  %v7965_v49 = vpop.f32.mrf.mxu0 }
  0xfc   : > { %9224 = vst [vmem:[#allocation7_spill] sm:$0xff] %v7921_v4  ;;  %v3738_v34 = vor.u32 %v3737_v44, %v7912_v35  ;;  %v7955_v4 = vrot.slane %v3728_v18, 4  ;;  %v7962_v11 = vrot.slane %v3779_v24, 5  ;;  %v3785_v44 = vrot.slane %v3783_v33, 4  ;;  %9228 = vst [vmem:[#allocation2_spill] sm:$0xff] %v7965_v49 }
  0xfd   : > { %6115 = vmatmul.mubr.msk.bf16.gmra.mxu1 %vm724_vm3, %v9223_v6  ;;  %v7941_v6 = vsel %vm6740_vm7, %v5661_v52, %v4407_v36  ;;  %v3752_v36 = vor.u32 %v3751_v45, %v3748_v60  ;;  %v3765_v52 = vshll.u32 %v7924_v8, 16  ;;  %v7960_v63 = vpop.f32.mrf.mxu1  ;;  %v4416_v18 = vrot.slane %v4414_v25, 4  ;;  %v5647_v24 = vld [vmem:[%s6410_s28 + $0x48] sm:$0xe] }
  0xfe   : > { %6118 = vmatprep.mubr.msk.bf16.mxu1 %vm724_vm3, %v9225_v21  ;;  %v3741_v21 = vshll.u32 %v7910_v58, 16  ;;  %9227 = vst [vmem:[#allocation10_spill] sm:$0xff] %v7960_v63  ;;  %v4417_v60 = vrot.slane %v7910_v58, 5  ;;  %v3739_v51 = vrot.slane %v3738_v34, 4  ;;  %v3794_v33 = vshrl.u32 %v5580_v41, 16 }
  0xff   : > { %v7978_v63 = vsel %vm6740_vm7, %v5662_v1, %v4414_v25  ;;  %v3753_v45 = vrot.slane %v3752_v36, 4  ;;  %v3763_v49 = vrot.slane %v3762_v13, 4  ;;  %v3767_v58 = vrot.slane %v3765_v52, 5  ;;  %v7993_v36 = vld [vmem:[%s6410_s28 + $0x64] sm:$0xf]  ;;  %v8000_v13 = vpop.f32.mrf.mxu0 }
 0x100   : > { %v3743_v19 = vrot.slane %v3741_v21, 5  ;;  %v3734_v34 = vsel %vm6454_vm4, %v7955_v4, %v7912_v35  ;;  %v3776_v21 = vor.u32 %v3775_v28, %v3772_v37  ;;  %v3786_v1 = vor.u32 %v3785_v44, %v7962_v11  ;;  %9232 = vst [vmem:[#allocation14_spill] sm:$0xff] %v8000_v13  ;;  %v5648_v28 = vld [vmem:[%s6410_s28 + $0x54] sm:$0xe]  ;;  %v6320_v13 = vld [vmem:[%s6410_s28 + $0xcc] sm:$0xff]  }
 0x101   : > { %v3789_v25 = vshll.u32 %v7972_v16, 16  ;;  %v8004_v52 = vsel %vm6740_vm7, %v4416_v18, %v4417_v60  ;;  %v5663_v35 = vrot.slane %v5647_v24, 9  ;;  %v4423_v37 = vrot.slane %v4421_v39, 4 }
 0x102   : > { %6153 = vmatmul.mubr.msk.bf16.gmra.mxu0 %vm724_vm3, %v6314_v23  ;;  %v3797_v23 = vshll.u32 %v5580_v41, 16  ;;  %v4424_v4 = vrot.slane %v7924_v8, 5  ;;  %v6317_v41 = vld [vmem:[%s6410_s28 + $0xa8] sm:$0xff]   ;;  %v3744_v44 = vsel %vm6454_vm4, %v3739_v51, %v3743_v19  ;;  %v3796_v50 = vrot.slane %v3794_v33, 4 }
 0x103   : > { %6156 = vmatprep.mubr.msk.bf16.mxu0 %vm724_vm3, %v6315_v14  ;;  %v7984_v14 = vpop.f32.mrf.mxu1  ;;  %v3768_v18 = vsel %vm6454_vm4, %v3763_v49, %v3767_v58  ;;  %v3803_v60 = vshll.u32 %v7993_v36, 16  ;;  %v3807_v8 = vshrl.u32 %v7993_v36, 16  ;;  %v3787_v51 = vrot.slane %v3786_v1, 4  ;;  %v8022_v33 = vld [vmem:[%s6410_s28 + $0x68] sm:$0x1] }
 0x104   : > { %9230 = vst [vmem:[#allocation13_spill] sm:$0xff] %v7984_v14  ;;  %v3777_v14 = vrot.slane %v3776_v21, 4  ;;  %v3791_v17 = vrot.slane %v3789_v25, 5  ;;  %v5664_v19 = vrot.slane %v5648_v28, 9  ;;  %v9235_v49 = vsel %vm6454_vm4, %v7907_v26, %v7900_v62  ;;  %v5583_v25 = vld [vmem:[%s6410_s28 + $0x6c] sm:$0xf] }
 0x105   : > { %6119 = vmatmul.mubr.msk.bf16.gmra.mxu1 %vm724_vm3, %v9229_v7  ;;  %v3799_v7 = vrot.slane %v3797_v23, 5  ;;  %v8019_v24 = vpop.f32.mrf.mxu1  ;;  %v8043_v21 = vsel %vm6740_vm7, %v5663_v35, %v4421_v39  ;;  %v8047_v1 = vsel %vm6740_vm7, %v4423_v37, %v4424_v4  ;;  %v8050_v62 = vcombine.low %v3734_v34, %v3744_v44  ;;  %v5649_v4 = vld [vmem:[%s6410_s28 + $0x60] sm:$0xe]  ;;  %v5589_v44 = vld [vmem:[%s6410_s28 + $0x84] sm:$0xf] }
 0x106   : > { %6122 = vmatprep.mubr.msk.bf16.mxu1 %vm724_vm3, %v9231_v43  ;;  %v3758_v43 = vsel %vm6454_vm4, %v3753_v45, %v7915_v10  ;;  %9233 = vst [vmem:[#allocation15_spill] sm:$0xff] %v8019_v24  ;;  %v9236_v45 = vsel %vm6454_vm4, %v7898_v3, %v7834_v46  ;;  %v4430_v46 = vrot.slane %v4428_v59, 4  ;;  %v4431_v3 = vrot.slane %v7972_v16, 5 }
 0x107   : > { %v8037_v23 = vcombine.low %v9236_v45, %v9235_v49  ;;  %9237 = vst [vmem:[#allocation11_spill] sm:$0xff] %v8050_v62  ;;  %v3800_v26 = vor.u32 %v3799_v7, %v3796_v50  ;;  %v8057_v28 = vcombine.low %v3758_v43, %v3768_v18  ;;  %v8059_v39 = vrot.slane %v3803_v60, 5 }
 0x108   : > { %v8025_v10 = vpop.f32.mrf.mxu0  ;;  %v8061_v35 = vrot.slane %v3807_v8, 4  ;;  %v3813_v37 = vshll.u32 %v8022_v33, 16  ;;  %v9239_v34 = vcombine.low %v7658_v54, %v7673_v56  ;;  %v3782_v50 = vsel %vm6454_vm4, %v3777_v14, %v7962_v11  ;;  %v5586_v54 = vld [vmem:[%s6410_s28 + $0x78] sm:$0xf] }
 0x109   : > { %9234 = vst [vmem:[#allocation9_spill] sm:$0xff] %v8025_v10  ;;  %9238 = vst [vmem:[#allocation16_spill] sm:$0xff] %v8057_v28  ;;  %v3792_v7 = vsel %vm6454_vm4, %v3787_v51, %v3791_v17  ;;  %v8081_v43 = vsel %vm6740_vm7, %v5664_v19, %v4428_v59  ;;  %v9241_v56 = vcombine.low %v7665_v29, %v7686_v42  ;;  %v3818_v60 = vshrl.u32 %v5583_v25, 16  ;;  %v8093_v51 = vld [vmem:[%s6410_s28 + $0x7c] sm:$0xf]  ;;  %v6319_v59 = vld [vmem:[%s6410_s28 + $0xc0] sm:$0xff]  }
 0x10a   : > { %6157 = vmatmul.mubr.msk.bf16.gmra.mxu0 %vm724_vm3, %v6316_v2  ;;  %v8055_v2 = vld [vmem:[%s6410_s28 + $0x70] sm:$0xf]  ;;  %v8088_v18 = vpop.f32.mrf.mxu0  ;;  %v3821_v8 = vshll.u32 %v5583_v25, 16  ;;  %v8098_v17 = vsel %vm6740_vm7, %v4430_v46, %v4431_v3  ;;  %v8100_v29 = vrot.slane %v3800_v26, 4  ;;  %v5665_v42 = vrot.slane %v5649_v4, 9 }
 0x10b   : > { %6160 = vmatprep.mubr.msk.bf16.mxu0 %vm724_vm3, %v6317_v41  ;;  %v6318_v41 = vld [vmem:[%s6410_s28 + $0xb4] sm:$0xff]   ;;  %9242 = vst [vmem:[#allocation18_spill] sm:$0xff] %v8088_v18  ;;  %v3827_v11 = vshll.u32 %v8055_v2, 16  ;;  %v3831_v14 = vshrl.u32 %v8055_v2, 16  ;;  %v4435_v19 = vrot.slane %v7993_v36, 5  ;;  %v8103_v49 = vcombine.low %v3782_v50, %v3792_v7 }
 0x10c   : > { %v3810_v45 = vor.u32 %v8061_v35, %v8059_v39  ;;  %v8107_v25 = vrot.slane %v3813_v37, 5  ;;  %v3842_v46 = vshrl.u32 %v5586_v54, 16  ;;  %v3845_v3 = vshll.u32 %v5586_v54, 16  ;;  %v8119_v4 = vld [vmem:[%s6410_s28 + $0x88] sm:$0xf]  ;;  %v8122_v35 = vpop.f32.mrf.mxu0 }
 0x10d   : > { %6123 = vmatmul.mubr.msk.bf16.gmra.mxu1 %vm724_vm3, %v9239_v34  ;;  %v8069_v16 = vpop.f32.mrf.mxu1  ;;  %9243 = vst [vmem:[#allocation19_spill] sm:$0xff] %v8103_v49  ;;  %v4438_v34 = vrot.slane %v8022_v33, 5  ;;  %v3851_v36 = vshll.u32 %v8093_v51, 16  ;;  %v3855_v26 = vshrl.u32 %v8093_v51, 16  ;;  %9245 = vst [vmem:[#allocation21_spill] sm:$0xff] %v8122_v35  ;;  %v3820_v33 = vrot.slane %v3818_v60, 4 }
 0x10e   : > { %9240 = vst [vmem:[#allocation17_spill] sm:$0xff] %v8069_v16  ;;  %6126 = vmatprep.mubr.msk.bf16.mxu1 %vm724_vm3, %v9241_v56  ;;  %v8111_v56 = vld [vmem:[%s6410_s28 + $0x74] sm:$0x1]  ;;  %v3823_v37 = vrot.slane %v3821_v8, 5  ;;  %v8124_v50 = vrot.slane %v3827_v11, 5  ;;  %v3833_v7 = vrot.slane %v3831_v14, 4  ;;  %v9246_v54 = vcombine.low %v7677_v30, %v7693_v55  ;;  %v8152_v49 = vpop.f32.mrf.mxu0 }
 0x10f   : > { %v8114_v58 = vpop.f32.mrf.mxu1  ;;  %v4437_v16 = vrot.slane %v4435_v19, 4  ;;  %v8137_v60 = vld [vmem:[%s6410_s28 + $0x80] sm:$0x1]  ;;  %v8140_v8 = vld [vmem:[%s6410_s28 + $0x6c] sm:$0xe]  ;;  %v3866_v11 = vshrl.u32 %v5589_v44, 16 }
 0x110   : > { %9244 = vst [vmem:[#allocation20_spill] sm:$0xff] %v8114_v58  ;;  %v8133_v58 = vsel %vm6740_vm7, %v5665_v42, %v4435_v19  ;;  %v3869_v14 = vshll.u32 %v5589_v44, 16  ;;  %v3879_v24 = vshrl.u32 %v8119_v4, 16  ;;  %v3844_v19 = vrot.slane %v3842_v46, 4  ;;  %9248 = vst [vmem:[#allocation23_spill] sm:$0xff] %v8152_v49 }
 0x111   : > { %v8148_v42 = vpop.f32.mrf.mxu1  ;;  %v3847_v35 = vrot.slane %v3845_v3, 5  ;;  %v8150_v18 = vrot.slane %v3851_v36, 5  ;;  %v3857_v10 = vrot.slane %v3855_v26, 4  ;;  %v9249_v44 = vcombine.low %v7697_v15, %v7725_v32  ;;  %v8171_v32 = vld [vmem:[%s6410_s28 + $0x8c] sm:$0x1] }
 0x112   : > { %6161 = vmatmul.mubr.msk.bf16.gmra.mxu0 %vm724_vm3, %v6318_v41  ;;  %v3837_v41 = vshll.u32 %v8111_v56, 16  ;;  %9247 = vst [vmem:[#allocation22_spill] sm:$0xff] %v8148_v42  ;;  %v3824_v30 = vor.u32 %v3823_v37, %v3820_v33  ;;  %v3834_v55 = vor.u32 %v3833_v7, %v8124_v50  ;;  %v3861_v46 = vshll.u32 %v8137_v60, 16  ;;  %v5651_v33 = vld [vmem:[%s6410_s28 + $0x78] sm:$0xe] }
 0x113   : > { %6164 = vmatprep.mubr.msk.bf16.mxu0 %vm724_vm3, %v6319_v59  ;;  %v3875_v59 = vshll.u32 %v8119_v4, 16  ;;  %v8162_v3 = vrot.slane %v3810_v45, 4  ;;  %v8166_v36 = vsel %vm6740_vm7, %v4437_v16, %v4438_v34  ;;  %v5666_v26 = vrot.slane %v8140_v8, 9  ;;  %v8176_v42 = vpop.f32.mrf.mxu1  ;;  %v5592_v8 = vld [vmem:[%s6410_s28 + $0x90] sm:$0xf] }
 0x114   : > { %v4449_v15 = vrot.slane %v8093_v51, 5  ;;  %v3868_v37 = vrot.slane %v3866_v11, 4  ;;  %v3871_v7 = vrot.slane %v3869_v14, 5  ;;  %9250 = vst [vmem:[#allocation24_spill] sm:$0xff] %v8176_v42  ;;  %v3839_v45 = vrot.slane %v3837_v41, 5 }
 0x115   : > { %6127 = vmatmul.mubr.msk.bf16.gmra.mxu1 %vm724_vm3, %v9246_v54  ;;  %v4442_v54 = vrot.slane %v8055_v2, 5  ;;  %v8174_v2 = vrot.slane %v3875_v59, 5  ;;  %v4445_v49 = vrot.slane %v8111_v56, 5  ;;  %v3848_v16 = vor.u32 %v3847_v35, %v3844_v19  ;;  %v8185_v59 = vld [vmem:[%s6410_s28 + $0x94] sm:$0xf] }
 0x116   : > { %6130 = vmatprep.mubr.msk.bf16.mxu1 %vm724_vm3, %v9249_v44  ;;  %v3881_v44 = vrot.slane %v3879_v24, 4  ;;  %v3858_v34 = vor.u32 %v3857_v10, %v8150_v18  ;;  %v3825_v51 = vrot.slane %v3824_v30, 4  ;;  %v3835_v11 = vrot.slane %v3834_v55, 4 }
 0x117   : > { %v4444_v62 = vrot.slane %v4442_v54, 4  ;;  %v3863_v14 = vrot.slane %v3861_v46, 5  ;;  %v9251_v24 = vcombine.low %v7818_v61, %v7822_v40  ;;  %v5667_v56 = vrot.slane %v5651_v33, 9 }
 0x118   : > { %v4451_v35 = vrot.slane %v4449_v15, 4  ;;  %v4452_v10 = vrot.slane %v8137_v60, 5  ;;  %v3885_v41 = vshll.u32 %v8171_v32, 16  ;;  %v3882_v30 = vor.u32 %v3881_v44, %v8174_v2 }
 0x119   : > { %v3890_v55 = vshrl.u32 %v5592_v8, 16  ;;  %v3893_v46 = vshll.u32 %v5592_v8, 16  ;;  %v9253_v61 = vcombine.low %v7737_v9, %v7742_v47  ;;  %v3849_v40 = vrot.slane %v3848_v16, 4 }
 0x11a   : > { %v8181_v28 = vpop.f32.mrf.mxu0  ;;  %6165 = vmatmul.mubr.msk.bf16.gmra.mxu0 %vm724_vm3, %v6320_v13  ;;  %v3872_v13 = vor.u32 %v3871_v7, %v3868_v37  ;;  %v3859_v33 = vrot.slane %v3858_v34, 4  ;;  %v3899_v60 = vshll.u32 %v8185_v59, 16  ;;  %v3816_v37 = vsel %vm6454_vm4, %v8162_v3, %v8107_v25 }
 0x11b   : > { %6204 = vmatprep.mubr.msk.bf16.mxu0 %vm724_vm3, %v9251_v24  ;;  %v3903_v24 = vshrl.u32 %v8185_v59, 16  ;;  %v3830_v9 = vsel %vm6454_vm4, %v3825_v51, %v8124_v50  ;;  %v8217_v47 = vsel %vm6740_vm7, %v5666_v26, %v4442_v54  ;;  %v8221_v7 = vsel %vm6740_vm7, %v4444_v62, %v4445_v49  ;;  %v5652_v54 = vld [vmem:[%s6410_s28 + $0x84] sm:$0xe]  ;;  %v9292_v31 = vld [vmem:[#allocation24_spill] sm:$0xff] }
 0x11c   : > { %v8193_v19 = vpop.f32.mrf.mxu0  ;;  %v8229_v25 = vsel %vm6740_vm7, %v5667_v56, %v4449_v15  ;;  %v8233_v50 = vsel %vm6740_vm7, %v4451_v35, %v4452_v10  ;;  %v3887_v3 = vrot.slane %v3885_v41, 5  ;;  %v3873_v62 = vrot.slane %v3872_v13, 4  ;;  %v8257_v13 = vld [vmem:[%s6410_s28 + $0x98] sm:$0x1] }
 0x11d   : > { %9252 = vst [vmem:[#allocation25_spill] sm:$0xff] %v8193_v19  ;;  %v8196_v42 = vpop.f32.mrf.mxu1  ;;  %6131 = vmatmul.mubr.msk.bf16.gmra.mxu1 %vm724_vm3, %v9253_v61  ;;  %v3883_v49 = vrot.slane %v3882_v30, 4  ;;  %v3892_v16 = vrot.slane %v3890_v55, 4  ;;  %v3895_v34 = vrot.slane %v3893_v46, 5  ;;  %v3854_v15 = vsel %vm6454_vm4, %v3849_v40, %v8150_v18  ;;  %v5595_v30 = vld [vmem:[%s6410_s28 + $0x9c] sm:$0xf] }
 0x11e   : > { %v8204_v19 = vpop.f32.mrf.mxu0  ;;  %6170 = vmatprep.mubr.msk.bf16.mxu1 %vm724_vm3, %v7888_v27  ;;  %v3840_v27 = vsel %vm6454_vm4, %v3835_v11, %v3839_v45  ;;  %v3864_v45 = vsel %vm6454_vm4, %v3859_v33, %v3863_v14  ;;  %v8245_v51 = vrot.slane %v3899_v60, 5  ;;  %v3905_v11 = vrot.slane %v3903_v24, 4  ;;  %v8288_v24 = vld [vmem:[%s6410_s28 + $0xa0] sm:$0xf] }
 0x11f   : > { %v8223_v44 = vpop.f32.mrf.mxu1  ;;  %v9254_v35 = vcombine.low %v7858_v48, %v7862_v38  ;;  %v5681_v10 = vcombine.low %v8081_v43, %v8098_v17  ;;  %v5682_v41 = vcombine.low %v8133_v58, %v8166_v36  ;;  %v5668_v18 = vrot.slane %v5652_v54, 9 }
 0x120   : > { %v8236_v26 = vpop.f32.mrf.mxu0  ;;  %v4456_v14 = vrot.slane %v8119_v4, 5  ;;  %v9255_v48 = vcombine.low %v7941_v6, %v7945_v22  ;;  %v9256_v38 = vsel %vm6454_vm4, %v8100_v29, %v8059_v39  ;;  %v8273_v61 = vcombine.low %v3830_v9, %v3840_v27  ;;  %v5653_v29 = vld [vmem:[%s6410_s28 + $0x90] sm:$0xe]  ;;  %v9263_v4 = vld [vmem:[#allocation2_spill] sm:$0xff] }
 0x121   : > { %v8238_v8 = vpop.f32.mrf.mxu1  ;;  %v8271_v46 = vcombine.low %v9256_v38, %v3816_v37  ;;  %v8279_v60 = vcombine.low %v3854_v15, %v3864_v45  ;;  %v3878_v6 = vsel %vm6454_vm4, %v3873_v62, %v8174_v2  ;;  %v3888_v22 = vsel %vm6454_vm4, %v3883_v49, %v3887_v3 }
 0x122   : > { %v6002_v56 = vpop.f32.mrf.mxu0  ;;  %6205 = vmatmul.mubr.msk.bf16.vlgmr.msra.gmra.mxu0 %vm724_vm3, %v9254_v35  ;;  %v3896_v39 = vor.u32 %v3895_v34, %v3892_v16  ;;  %v3906_v9 = vor.u32 %v3905_v11, %v8245_v51  ;;  %v3909_v27 = vshll.u32 %v8257_v13, 16  ;;  %v3914_v54 = vshrl.u32 %v5595_v30, 16 }
 0x123   : > { %v8260_v55 = vpop.f32.mrf.mxu1  ;;  %6208 = vmatprep.mubr.msk.bf16.mxu0 %vm724_vm3, %v9255_v48  ;;  %v3917_v15 = vshll.u32 %v5595_v30, 16  ;;  %v8299_v3 = vsel %vm6740_vm7, %v5668_v18, %v4456_v14  ;;  %v4458_v62 = vrot.slane %v4456_v14, 4  ;;  %v4459_v49 = vrot.slane %v8171_v32, 5 }
 0x124   : > { %v1528_v33 = vpop.f32.mrf.mxu0  ;;  %v5669_v16 = vrot.slane %v5653_v29, 9  ;;  %v4463_v34 = vrot.slane %v8185_v59, 5  ;;  %v3923_v11 = vshll.u32 %v8288_v24, 16  ;;  %v3927_v35 = vshrl.u32 %v8288_v24, 16 }
 0x125   : > { %v5968_v37 = vpop.f32.mrf.mxu1  ;;  %6171 = vmatmul.mubr.msk.bf16.vlgmr.msra.gmra.mxu1 %vm724_vm3, %v7890_v57  ;;  %v8308_v48 = vcombine.low %v3878_v6, %v3888_v22  ;;  %v8310_v18 = vrot.slane %v3896_v39, 4  ;;  %v3907_v32 = vrot.slane %v3906_v9, 4  ;;  %v3911_v38 = vrot.slane %v3909_v27, 5  ;;  %v5598_v22 = vld [vmem:[%s6410_s28 + $0xa8] sm:$0xf] }
 0x126   : > { %v1112_v45 = vadd.f32 %v5968_v37, %v7786_v5  ;;  %v6003_v2 = vpop.f32.mrf.mxu0  ;;  %6174 = vmatprep.mubr.msk.bf16.mxu1 %vm724_vm3, %v8037_v23  ;;  %v3916_v29 = vrot.slane %v3914_v54, 4  ;;  %v3919_v59 = vrot.slane %v3917_v15, 5  ;;  %v4466_v6 = vrot.slane %v8257_v13, 5  ;;  %v8336_v27 = vld [vmem:[%s6410_s28 + $0xac] sm:$0xf] }
 0x127   : > { %v1103_v57 = vpop.f32.mrf.mxu1  ;;  %v3929_v9 = vrot.slane %v3927_v35, 4  ;;  %v9260_v35 = vld [vmem:[#allocation8_spill] sm:$0xff] }
 0x128   : > { %v8305_v5 = vadd.f32 %v6002_v56, %v1112_v45  ;;  %v1104_v23 = vadd.f32 %v1103_v57, %v7810_v20  ;;  %v1531_v30 = vpop.f32.mrf.mxu0  ;;  %v9257_v45 = vcombine.low %v7978_v63, %v8004_v52  ;;  %v8321_v20 = vsel %vm6740_vm7, %v4458_v62, %v4459_v49  ;;  %v5654_v62 = vld [vmem:[%s6410_s28 + $0x9c] sm:$0xe] }
 0x129   : > { %v5969_v14 = vpop.f32.mrf.mxu1  ;;  %v4465_v63 = vrot.slane %v4463_v34, 4  ;;  %v8333_v52 = vrot.slane %v3923_v11, 5  ;;  %v4470_v49 = vrot.slane %v8288_v24, 5  ;;  %v3947_v24 = vshll.u32 %v8336_v27, 16 }
 0x12a   : > { %v8312_v37 = vadd.f32 %v1528_v33, %v1104_v23  ;;  %v1115_v40 = vadd.f32 %v5969_v14, %v7829_v53  ;;  %v6006_v56 = vpop.f32.mrf.mxu0  ;;  %6209 = vmatmul.mubr.msk.bf16.gmra.mxu0 %vm724_vm3, %v9257_v45  ;;  %v9258_v33 = vcombine.low %v8043_v21, %v8047_v1  ;;  %v8331_v53 = vsel %vm6740_vm7, %v5669_v16, %v4463_v34  ;;  %v5597_v1 = vld [vmem:[%s6410_s28 + $0xa4] sm:$0x1]  ;;  %v9259_v16 = vld [vmem:[#allocation11_spill] sm:$0xff] }
 0x12b   : > { %v1106_v39 = vpop.f32.mrf.mxu1  ;;  %v3902_v21 = vsel %vm6454_vm4, %v8310_v18, %v8245_v51  ;;  %v3938_v34 = vshrl.u32 %v5598_v22, 16  ;;  %v9261_v51 = vld [vmem:[#allocation16_spill] sm:$0xff]  ;;  %v3951_v18 = vshrl.u32 %v8336_v27, 16 }
 0x12c   : > { %6212 = vmatprep.mubr.msk.bf16.mxu0 %vm724_vm3, %v9258_v33  ;;  %v8338_v54 = vadd.f32 %v6003_v2, %v1115_v40  ;;  %v1107_v13 = vadd.f32 %v1106_v39, %v7874_v12  ;;  %v1544_v15 = vpop.f32.mrf.mxu0  ;;  %v3912_v40 = vsel %vm6454_vm4, %v3907_v32, %v3911_v38  ;;  %v3920_v2 = vor.u32 %v3919_v59, %v3916_v29  ;;  %v9262_v59 = vld [vmem:[#allocation12_spill] sm:$0xff] }
 0x12d   : > { %v5972_v57 = vpop.f32.mrf.mxu1  ;;  %6175 = vmatmul.mubr.msk.bf16.gmra.mxu1 %vm724_vm3, %v9259_v16  ;;  %v3941_v12 = vshll.u32 %v5598_v22, 16  ;;  %v8361_v39 = vsel %vm6740_vm7, %v4465_v63, %v4466_v6  ;;  %v3930_v32 = vor.u32 %v3929_v9, %v8333_v52  ;;  %v3933_v38 = vshll.u32 %v5597_v1, 16 }
 0x12e   : > { %v8352_v11 = vadd.f32 %v1531_v30, %v1107_v13  ;;  %v1128_v23 = vadd.f32 %v5972_v57, %v9260_v35  ;;  %v6007_v14 = vpop.f32.mrf.mxu0  ;;  %6178 = vmatprep.mubr.msk.bf16.mxu1 %vm724_vm3, %v9261_v51  ;;  %v5670_v30 = vrot.slane %v5654_v62, 9  ;;  %v4472_v13 = vrot.slane %v4470_v49, 4 }
 0x12f   : > { %v1119_v45 = vpop.f32.mrf.mxu1  ;;  %v4473_v57 = vrot.slane %v5597_v1, 5  ;;  %v8369_v51 = vrot.slane %v3920_v2, 4  ;;  %v3940_v6 = vrot.slane %v3938_v34, 4  ;;  %v3943_v63 = vrot.slane %v3941_v12, 5  ;;  %v8379_v1 = vld [vmem:[%s6410_s28 + $0xb0] sm:$0x1] }
 0x130   : > { %v8364_v29 = vadd.f32 %v6006_v56, %v1128_v23  ;;  %v1120_v22 = vadd.f32 %v1119_v45, %v9262_v59  ;;  %v1547_v33 = vpop.f32.mrf.mxu0  ;;  %v8381_v23 = vrot.slane %v3947_v24, 5  ;;  %v3953_v2 = vrot.slane %v3951_v18, 4  ;;  %v9264_v12 = vld [vmem:[#allocation14_spill] sm:$0xff] }
 0x131   : > { %v5973_v16 = vpop.f32.mrf.mxu1  ;;  %v8391_v43 = vrot.slane %v3930_v32, 4  ;;  %v8393_v17 = vrot.slane %v3933_v38, 5  ;;  %v8401_v58 = vsel %vm6740_vm7, %v5670_v30, %v4470_v49  ;;  %v8405_v36 = vsel %vm6740_vm7, %v4472_v13, %v4473_v57  ;;  %v8417_v30 = vld [vmem:[%s6410_s28 + $0xb8] sm:$0xf] }
 0x132   : > { %v8371_v9 = vadd.f32 %v1544_v15, %v1120_v22  ;;  %v1131_v62 = vadd.f32 %v5973_v16, %v9263_v4  ;;  %v6010_v56 = vpop.f32.mrf.mxu0  ;;  %6213 = vmatmul.mubr.msk.bf16.gmra.mxu0 %vm724_vm3, %v5681_v10  ;;  %v8387_v15 = vcombine.low %v3902_v21, %v3912_v40  ;;  %v5655_v10 = vld [vmem:[%s6410_s28 + $0xa8] sm:$0xe]  ;;  %v3944_v32 = vor.u32 %v3943_v63, %v3940_v6  ;;  %v9266_v22 = vld [vmem:[#allocation9_spill] sm:$0xff] }
 0x133   : > { %v1122_v45 = vpop.f32.mrf.mxu1  ;;  %6216 = vmatprep.mubr.msk.bf16.mxu0 %vm724_vm3, %v5682_v41  ;;  %v5601_v41 = vld [vmem:[%s6410_s28 + $0xb4] sm:$0xf]  ;;  %v9265_v40 = vld [vmem:[#allocation19_spill] sm:$0xff]  ;;  %v3957_v38 = vshll.u32 %v8379_v1, 16  ;;  %v4477_v49 = vrot.slane %v8336_v27, 5  ;;  %v3954_v16 = vor.u32 %v3953_v2, %v8381_v23  ;;  %v3936_v27 = vsel %vm6454_vm4, %v8391_v43, %v8393_v17 }
 0x134   : > { %v8396_v34 = vadd.f32 %v6007_v14, %v1131_v62  ;;  %v1123_v24 = vadd.f32 %v1122_v45, %v9264_v12  ;;  %v1560_v18 = vpop.f32.mrf.mxu0  ;;  %v5671_v62 = vrot.slane %v5655_v10, 9  ;;  %v3962_v6 = vshrl.u32 %v5601_v41, 16 }
 0x135   : > { %v5976_v21 = vpop.f32.mrf.mxu1  ;;  %6179 = vmatmul.mubr.msk.bf16.gmra.mxu1 %vm724_vm3, %v9265_v40  ;;  %v3965_v63 = vshll.u32 %v5601_v41, 16  ;;  %v3971_v2 = vshll.u32 %v8417_v30, 16  ;;  %v3975_v10 = vshrl.u32 %v8417_v30, 16  ;;  %v5604_v40 = vld [vmem:[%s6410_s28 + $0xc0] sm:$0xf]  ;;  %v3945_v4 = vrot.slane %v3944_v32, 4 }
 0x136   : > { %v8419_v59 = vadd.f32 %v1547_v33, %v1123_v24  ;;  %v1144_v13 = vadd.f32 %v5976_v21, %v9266_v22  ;;  %v6011_v57 = vpop.f32.mrf.mxu0  ;;  %6182 = vmatprep.mubr.msk.bf16.mxu1 %vm724_vm3, %v8271_v46  ;;  %v9268_v24 = vld [vmem:[#allocation18_spill] sm:$0xff]  ;;  %v3959_v43 = vrot.slane %v3957_v38, 5  ;;  %v4479_v17 = vrot.slane %v4477_v49, 4 }
 0x137   : > { %v1135_v45 = vpop.f32.mrf.mxu1  ;;  %v4480_v33 = vrot.slane %v8379_v1, 5  ;;  %v8447_v14 = vsel %vm6740_vm7, %v5671_v62, %v4477_v49  ;;  %v8450_v32 = vld [vmem:[%s6410_s28 + $0xc4] sm:$0xf]  ;;  %v9272_v1 = vcombine.low %v8229_v25, %v8233_v50  ;;  %v8462_v62 = vrot.slane %v3971_v2, 5 }
 0x138   : > { %v8431_v12 = vadd.f32 %v6010_v56, %v1144_v13  ;;  %v1136_v21 = vadd.f32 %v1135_v45, %v9268_v24  ;;  %v1563_v46 = vpop.f32.mrf.mxu0  ;;  %v9270_v56 = vld [vmem:[#allocation21_spill] sm:$0xff]  ;;  %v9271_v45 = vcombine.low %v8217_v47, %v8221_v7  ;;  %v3955_v24 = vrot.slane %v3954_v16, 4  ;;  %v9273_v16 = vld [vmem:[#allocation23_spill] sm:$0xff] }
 0x139   : > { %v5977_v22 = vpop.f32.mrf.mxu1  ;;  %v3986_v47 = vshrl.u32 %v5604_v40, 16  ;;  %v3989_v7 = vshll.u32 %v5604_v40, 16  ;;  %v3950_v25 = vsel %vm6454_vm4, %v3945_v4, %v8381_v23  ;;  %v8471_v50 = vsel %vm6740_vm7, %v4479_v17, %v4480_v33  ;;  %v5656_v40 = vld [vmem:[%s6410_s28 + $0xb4] sm:$0xe] }
 0x13a   : > { %9267 = vst [vmem:[#allocation11_spill] sm:$0xff] %v8431_v12  ;;  %v8438_v35 = vadd.f32 %v1560_v18, %v1136_v21  ;;  %v1147_v41 = vadd.f32 %v5977_v22, %v9270_v56  ;;  %v6014_v13 = vpop.f32.mrf.mxu0  ;;  %6217 = vmatmul.mubr.msk.bf16.gmra.mxu0 %vm724_vm3, %v9271_v45  ;;  %v8457_v18 = vld [vmem:[%s6410_s28 + $0xbc] sm:$0x1]  ;;  %v3964_v21 = vrot.slane %v3962_v6, 4  ;;  %v3967_v22 = vrot.slane %v3965_v63, 5 }
 0x13b   : > { %v1138_v38 = vpop.f32.mrf.mxu1  ;;  %6220 = vmatprep.mubr.msk.bf16.mxu0 %vm724_vm3, %v9272_v1  ;;  %v3999_v6 = vshrl.u32 %v8450_v32, 16  ;;  %v3981_v23 = vshll.u32 %v8457_v18, 16  ;;  %v4484_v17 = vrot.slane %v8417_v30, 5  ;;  %v9274_v1 = vld [vmem:[#allocation25_spill] sm:$0xff] }
 0x13c   : > { %9269 = vst [vmem:[#allocation8_spill] sm:$0xff] %v8438_v35  ;;  %v8459_v56 = vadd.f32 %v6011_v57, %v1147_v41  ;;  %v1139_v45 = vadd.f32 %v1138_v38, %v9273_v16  ;;  %v1576_v49 = vpop.f32.mrf.mxu0  ;;  %v3977_v35 = vrot.slane %v3975_v10, 4  ;;  %v3995_v57 = vshll.u32 %v8450_v32, 16 }
 0x13d   : > { %v5980_v12 = vpop.f32.mrf.mxu1  ;;  %6183 = vmatmul.mubr.msk.bf16.gmra.mxu1 %vm724_vm3, %v8273_v61  ;;  %v3960_v61 = vsel %vm6454_vm4, %v3955_v24, %v3959_v43  ;;  %v3968_v33 = vor.u32 %v3967_v22, %v3964_v21  ;;  %v3988_v41 = vrot.slane %v3986_v47, 4  ;;  %v3991_v38 = vrot.slane %v3989_v7, 5 }
 0x13e   : > { %v8475_v63 = vadd.f32 %v1563_v46, %v1139_v45  ;;  %v1160_v2 = vadd.f32 %v5980_v12, %v8181_v28  ;;  %v6015_v10 = vpop.f32.mrf.mxu0  ;;  %6186 = vmatprep.mubr.msk.bf16.mxu1 %vm724_vm3, %v8279_v60  ;;  %v9275_v60 = vsel %vm6454_vm4, %v8369_v51, %v8333_v52  ;;  %v3978_v24 = vor.u32 %v3977_v35, %v8462_v62 }
 0x13f   : > { %v1151_v4 = vpop.f32.mrf.mxu1  ;;  %v8493_v43 = vcombine.low %v9275_v60, %v3936_v27  ;;  %v8496_v30 = vcombine.low %v3950_v25, %v3960_v61  ;;  %v8500_v22 = vrot.slane %v3995_v57, 5  ;;  %v4001_v47 = vrot.slane %v3999_v6, 4  ;;  %v5606_v27 = vld [vmem:[%s6410_s28 + $0xc8] sm:$0x1] }
 0x140   : > { %v8485_v46 = vadd.f32 %v6014_v13, %v1160_v2  ;;  %v1152_v28 = vadd.f32 %v1151_v4, %v9274_v1  ;;  %v1579_v12 = vpop.f32.mrf.mxu0  ;;  %v5688_v13 = vcombine.low %v8447_v14, %v8471_v50  ;;  %v9276_v52 = vcombine.low %v8299_v3, %v8321_v20  ;;  %v5607_v14 = vld [vmem:[%s6410_s28 + $0xcc] sm:$0xf]  ;;  %v8521_v20 = vld [vmem:[%s6410_s28 + $0xd0] sm:$0xf]  ;;  %v5657_v4 = vld [vmem:[%s6410_s28 + $0xc0] sm:$0xe] }
 0x141   : > { %v5981_v21 = vpop.f32.mrf.mxu1  ;;  %v8509_v35 = vrot.slane %v3981_v23, 5  ;;  %v5672_v51 = vrot.slane %v5656_v40, 9  ;;  %v9277_v50 = vcombine.low %v8331_v53, %v8361_v39  ;;  %v4487_v57 = vrot.slane %v8457_v18, 5 }
 0x142   : > { %v8502_v7 = vadd.f32 %v1576_v49, %v1152_v28  ;;  %v1163_v16 = vadd.f32 %v5981_v21, %v8204_v19  ;;  %v6018_v45 = vpop.f32.mrf.mxu0  ;;  %6221 = vmatmul.mubr.msk.bf16.gmra.mxu0 %vm724_vm3, %v9276_v52  ;;  %v8517_v49 = vrot.slane %v3968_v33, 4  ;;  %v4486_v19 = vrot.slane %v4484_v17, 4 }
 0x143   : > { %v1154_v25 = vpop.f32.mrf.mxu1  ;;  %6224 = vmatprep.mubr.msk.bf16.mxu0 %vm724_vm3, %v9277_v50  ;;  %v3992_v3 = vor.u32 %v3991_v38, %v3988_v41  ;;  %v8526_v23 = vrot.slane %v3978_v24, 4  ;;  %v4491_v53 = vrot.slane %v8450_v32, 5  ;;  %v4002_v33 = vor.u32 %v4001_v47, %v8500_v22 }
 0x144   : > { %v8523_v6 = vadd.f32 %v6015_v10, %v1163_v16  ;;  %v1155_v2 = vadd.f32 %v1154_v25, %v8236_v26  ;;  %v1592_v61 = vpop.f32.mrf.mxu0  ;;  %v4005_v18 = vshll.u32 %v5606_v27, 16  ;;  %v4010_v40 = vshrl.u32 %v5607_v14, 16  ;;  %v9280_v10 = vld [vmem:[#allocation4_spill] sm:$0xff]  ;;  %v9281_v16 = vld [vmem:[#allocation3_spill] sm:$0xff] }
 0x145   : > { %v5984_v39 = vpop.f32.mrf.mxu1  ;;  %6187 = vmatmul.mubr.msk.bf16.gmra.mxu1 %vm724_vm3, %v8308_v48  ;;  %v4013_v41 = vshll.u32 %v5607_v14, 16  ;;  %v4019_v28 = vshll.u32 %v8521_v20, 16  ;;  %v4023_v32 = vshrl.u32 %v8521_v20, 16  ;;  %v4485_v48 = vsel %vm6740_vm7, %v5672_v51, %v4484_v17  ;;  %v9282_v17 = vld [vmem:[#allocation6_spill] sm:$0xff] }
 0x146   : > { %9278 = vst [vmem:[#allocation16_spill] sm:$0xff] %v8523_v6  ;;  %v8533_v38 = vadd.f32 %v1579_v12, %v1155_v2  ;;  %v1176_v1 = vadd.f32 %v5984_v39, %v9280_v10  ;;  %v6019_v26 = vpop.f32.mrf.mxu0  ;;  %6190 = vmatprep.mubr.msk.bf16.mxu1 %vm724_vm3, %v8387_v15  ;;  %v4488_v24 = vsel %vm6740_vm7, %v4486_v19, %v4487_v57  ;;  %v3993_v21 = vrot.slane %v3992_v3, 4 }
 0x147   : > { %v1167_v60 = vpop.f32.mrf.mxu1  ;;  %v5673_v12 = vrot.slane %v5657_v4, 9  ;;  %v4493_v25 = vrot.slane %v4491_v53, 4  ;;  %v4494_v15 = vrot.slane %v5606_v27, 5  ;;  %v4003_v2 = vrot.slane %v4002_v33, 4  ;;  %v5609_v33 = vld [vmem:[%s6410_s28 + $0xd4] sm:$0x1] }
 0x148   : > { %9279 = vst [vmem:[#allocation12_spill] sm:$0xff] %v8533_v38  ;;  %v8544_v47 = vadd.f32 %v6018_v45, %v1176_v1  ;;  %v1168_v52 = vadd.f32 %v1167_v60, %v9281_v16  ;;  %v1595_v14 = vpop.f32.mrf.mxu0  ;;  %v4007_v39 = vrot.slane %v4005_v18, 5  ;;  %v4012_v10 = vrot.slane %v4010_v40, 4  ;;  %v9284_v18 = vld [vmem:[#allocation5_spill] sm:$0xff] }
 0x149   : > { %v5985_v50 = vpop.f32.mrf.mxu1  ;;  %v4015_v38 = vrot.slane %v4013_v41, 5  ;;  %v9283_v45 = vcombine.low %v8401_v58, %v8405_v36  ;;  %v8554_v57 = vrot.slane %v4019_v28, 5  ;;  %v4025_v27 = vrot.slane %v4023_v32, 4 }
 0x14a   : > { %v8547_v6 = vadd.f32 %v1592_v61, %v1168_v52  ;;  %v1179_v51 = vadd.f32 %v5985_v50, %v9282_v17  ;;  %v6022_v19 = vpop.f32.mrf.mxu0  ;;  %v3974_v61 = vsel %vm6454_vm4, %v8517_v49, %v8462_v62  ;;  %v3984_v4 = vsel %vm6454_vm4, %v8526_v23, %v8509_v35  ;;  %v5658_v62 = vld [vmem:[%s6410_s28 + $0xcc] sm:$0xe] }
 0x14b   : > { %6225 = vmatmul.mubr.msk.bf16.gmra.mxu0 %vm724_vm3, %v9283_v45  ;;  %v1170_v3 = vpop.f32.mrf.mxu1  ;;  %v4498_v58 = vrot.slane %v8521_v20, 5  ;;  %v4495_v1 = vsel %vm6740_vm7, %v4493_v25, %v4494_v15  ;;  %v5689_v35 = vcombine.low %v4485_v48, %v4488_v24  ;;  %v3998_v20 = vsel %vm6454_vm4, %v3993_v21, %v8500_v22  ;;  %v9286_v25 = vld [vmem:[#allocation10_spill] sm:$0xff] }
 0x14c   : > { %6228 = vmatprep.mubr.msk.bf16.mxu0 %vm724_vm3, %v5688_v13  ;;  %v8567_v36 = vadd.f32 %v6019_v26, %v1179_v51  ;;  %v1171_v40 = vadd.f32 %v1170_v3, %v9284_v18  ;;  %v1608_v41 = vpop.f32.mrf.mxu0  ;;  %v4492_v13 = vsel %vm6740_vm7, %v5673_v12, %v4491_v53  ;;  %v4008_v23 = vsel %vm6454_vm4, %v4003_v2, %v4007_v39  ;;  %v9285_v53 = vld [vmem:[#allocation7_spill] sm:$0xff] }
 0x14d   : > { %v5988_v49 = vpop.f32.mrf.mxu1  ;;  %6191 = vmatmul.mubr.msk.bf16.gmra.mxu1 %vm724_vm3, %v8493_v43  ;;  %v4016_v26 = vor.u32 %v4015_v38, %v4012_v10  ;;  %v4026_v12 = vor.u32 %v4025_v27, %v8554_v57  ;;  %v4029_v43 = vshll.u32 %v5609_v33, 16  ;;  %v5690_v24 = vcombine.low %v4492_v13, %v4495_v1 }
 0x14e   : > { %v8582_v28 = vadd.f32 %v1595_v14, %v1171_v40  ;;  %v1192_v32 = vadd.f32 %v5988_v49, %v9285_v53  ;;  %v6023_v60 = vpop.f32.mrf.mxu0  ;;  %6194 = vmatprep.mubr.msk.bf16.mxu1 %vm724_vm3, %v8496_v30  ;;  %v5674_v16 = vrot.slane %v5658_v62, 9  ;;  %v4500_v52 = vrot.slane %v4498_v58, 4  ;;  %v9287_v30 = vld [vmem:[#allocation13_spill] sm:$0xff] }
 0x14f   : > { %v1183_v48 = vpop.f32.mrf.mxu1  ;;  %v4501_v22 = vrot.slane %v5609_v33, 5  ;;  %v5624_v50 = vcombine.low %v3974_v61, %v3984_v4  ;;  %v5625_v2 = vcombine.low %v3998_v20, %v4008_v23  ;;  %v4017_v39 = vrot.slane %v4016_v26, 4  ;;  %v9288_v33 = vld [vmem:[#allocation15_spill] sm:$0xff]  ;;  %v9289_v62 = vld [vmem:[#allocation17_spill] sm:$0xff]  ;;  %v9290_v26 = vld [vmem:[#allocation20_spill] sm:$0xff] }
 0x150   : > { %v8588_v21 = vadd.f32 %v6022_v19, %v1192_v32  ;;  %v1184_v38 = vadd.f32 %v1183_v48, %v9286_v25  ;;  %v1611_v14 = vpop.f32.mrf.mxu0  ;;  %v4027_v45 = vrot.slane %v4026_v12, 4  ;;  %v4031_v27 = vrot.slane %v4029_v43, 5  ;;  %v9291_v43 = vld [vmem:[#allocation22_spill] sm:$0xff] }
 0x151   : > { %v5989_v15 = vpop.f32.mrf.mxu1  ;;  %v4499_v19 = vsel %vm6740_vm7, %v5674_v16, %v4498_v58  ;;  %v4502_v61 = vsel %vm6740_vm7, %v4500_v52, %v4501_v22  ;;  %v4022_v13 = vsel %vm6454_vm4, %v4017_v39, %v8554_v57 }
 0x152   : > { %v8591_v10 = vadd.f32 %v1608_v41, %v1184_v38  ;;  %v1195_v17 = vadd.f32 %v5989_v15, %v9287_v30  ;;  %v6026_v51 = vpop.f32.mrf.mxu0  ;;  %v4032_v0 = vsel %vm6454_vm4, %v4027_v45, %v4031_v27 }
 0x153   : > { %6229 = vmatmul.mubr.msk.bf16.gmra.mxu0 %vm724_vm3, %v5689_v35  ;;  %v1186_v3 = vpop.f32.mrf.mxu1  ;;  %v5691_v35 = vcombine.low %v4499_v19, %v4502_v61  ;;  %v5626_v12 = vcombine.low %v4022_v13, %v4032_v0 }
 0x154   : > { %6232 = vmatprep.mubr.msk.bf16.mxu0 %vm724_vm3, %v5690_v24  ;;  %v8600_v4 = vadd.f32 %v6023_v60, %v1195_v17  ;;  %v1187_v18 = vadd.f32 %v1186_v3, %v9288_v33  ;;  %v1624_v40 = vpop.f32.mrf.mxu0 }
 0x155   : > { %v5992_v41 = vpop.f32.mrf.mxu1  ;;  %6195 = vmatmul.mubr.msk.bf16.gmra.mxu1 %vm724_vm3, %v5624_v50 }
 0x156   : > { %v8607_v1 = vadd.f32 %v1611_v14, %v1187_v18  ;;  %v1208_v49 = vadd.f32 %v5992_v41, %v9289_v62  ;;  %v6027_v58 = vpop.f32.mrf.mxu0  ;;  %6198 = vmatprep.mubr.msk.bf16.mxu1 %vm724_vm3, %v5625_v2 }
 0x157   : > { %v1199_v20 = vpop.f32.mrf.mxu1 }
 0x158   : > { %v8613_v23 = vadd.f32 %v6026_v51, %v1208_v49  ;;  %v1200_v53 = vadd.f32 %v1199_v20, %v9290_v26  ;;  %v1627_v32 = vpop.f32.mrf.mxu0 }
 0x159   : > { %v5993_v60 = vpop.f32.mrf.mxu1 }
 0x15a   : > { %v8616_v57 = vadd.f32 %v1624_v40, %v1200_v53  ;;  %v1211_v48 = vadd.f32 %v5993_v60, %v9291_v43  ;;  %v6030_v24 = vpop.f32.mrf.mxu0 }
 0x15b   : > { %6233 = vmatmul.mubr.msk.bf16.gmra.mxu0 %vm724_vm3, %v5691_v35  ;;  %v1202_v16 = vpop.f32.mrf.mxu1 }
 0x15c   : > { %v8620_v52 = vadd.f32 %v6027_v58, %v1211_v48  ;;  %v1203_v22 = vadd.f32 %v1202_v16, %v9292_v31  ;;  %v1640_v25 = vpop.f32.mrf.mxu0 }
 0x15d   : > { %v5996_v38 = vpop.f32.mrf.mxu1  ;;  %6199 = vmatmul.mubr.msk.bf16.gmra.mxu1 %vm724_vm3, %v5626_v12 }
 0x15e   : > { %v8624_v14 = vadd.f32 %v1627_v32, %v1203_v22  ;;  %v1224_v15 = vadd.f32 %v5996_v38, %v8196_v42  ;;  %v6031_v50 = vpop.f32.mrf.mxu0 }
 0x15f   : > { %v1215_v2 = vpop.f32.mrf.mxu1 }
 0x160   : > { %v8627_v39 = vadd.f32 %v6030_v24, %v1224_v15  ;;  %v1216_v30 = vadd.f32 %v1215_v2, %v8223_v44  ;;  %v1643_v17 = vpop.f32.mrf.mxu0 }
 0x161   : > { %v5997_v51 = vpop.f32.mrf.mxu1 }
 0x162   : > { %v8630_v45 = vadd.f32 %v1640_v25, %v1216_v30  ;;  %v1227_v27 = vadd.f32 %v5997_v51, %v8238_v8  ;;  %v6070_v3 = vpop.f32.mrf.mxu0  ;;  %v9293_v30 = vld [vmem:[#allocation11_spill] sm:$0xff] }
 0x163   : > { %v1218_v19 = vpop.f32.mrf.mxu1 }
 0x164   : > { %v8633_v61 = vadd.f32 %v6031_v50, %v1227_v27  ;;  %v1219_v33 = vadd.f32 %v1218_v19, %v8260_v55  ;;  %v2613_v18 = vpop.f32.mrf.mxu0 }
 0x165   : > { %v6036_v42 = vpop.f32.mrf.mxu1 }
 0x166   : > { %v8636_v40 = vadd.f32 %v1643_v17, %v1219_v33  ;;  %v2016_v41 = vadd.f32 %v6036_v42, %v8305_v5  ;;  %v6071_v13 = vpop.f32.mrf.mxu0 }
 0x167   : > { %v1887_v44 = vpop.f32.mrf.mxu1 }
 0x168   : > { %v8639_v62 = vadd.f32 %v6070_v3, %v2016_v41  ;;  %v2014_v49 = vadd.f32 %v1887_v44, %v8312_v37  ;;  %v2616_v58 = vpop.f32.mrf.mxu0  ;;  %v9294_v3 = vld [vmem:[#allocation8_spill] sm:$0xff] }
 0x169   : > { %v6037_v8 = vpop.f32.mrf.mxu1 }
 0x16a   : > { %v8642_v0 = vadd.f32 %v2613_v18, %v2014_v49  ;;  %v2017_v35 = vadd.f32 %v6037_v8, %v8338_v54  ;;  %v6074_v20 = vpop.f32.mrf.mxu0 }
 0x16b   : > { %v1890_v55 = vpop.f32.mrf.mxu1 }
 0x16c   : > { %v8645_v26 = vadd.f32 %v6071_v13, %v2017_v35  ;;  %v2015_v53 = vadd.f32 %v1890_v55, %v8352_v11  ;;  %v2629_v32 = vpop.f32.mrf.mxu0 }
 0x16d   : > { %v6040_v5 = vpop.f32.mrf.mxu1 }
 0x16e   : > { %v8648_v60 = vadd.f32 %v2616_v58, %v2015_v53  ;;  %v2020_v12 = vadd.f32 %v6040_v5, %v8364_v29  ;;  %v6075_v43 = vpop.f32.mrf.mxu0 }
 0x16f   : > { %v1903_v37 = vpop.f32.mrf.mxu1 }
 0x170   : > { %v8651_v48 = vadd.f32 %v6074_v20, %v2020_v12  ;;  %v2018_v24 = vadd.f32 %v1903_v37, %v8371_v9  ;;  %v2632_v16 = vpop.f32.mrf.mxu0 }
 0x171   : > { %v6041_v54 = vpop.f32.mrf.mxu1 }
 0x172   : > { %v8654_v31 = vadd.f32 %v2629_v32, %v2018_v24  ;;  %v2021_v22 = vadd.f32 %v6041_v54, %v8396_v34  ;;  %v6078_v25 = vpop.f32.mrf.mxu0  ;;  %v9296_v54 = vld [vmem:[#allocation12_spill] sm:$0xff] }
 0x173   : > { %v1906_v11 = vpop.f32.mrf.mxu1 }
 0x174   : > { %v8657_v38 = vadd.f32 %v6075_v43, %v2021_v22  ;;  %v2019_v15 = vadd.f32 %v1906_v11, %v8419_v59  ;;  %v2645_v50 = vpop.f32.mrf.mxu0  ;;  %v9295_v43 = vld [vmem:[#allocation16_spill] sm:$0xff] }
 0x175   : > { %v6044_v29 = vpop.f32.mrf.mxu1 }
 0x176   : > { %v8660_v2 = vadd.f32 %v2632_v16, %v2019_v15  ;;  %v2024_v17 = vadd.f32 %v6044_v29, %v9293_v30  ;;  %v6079_v51 = vpop.f32.mrf.mxu0 }
 0x177   : > { %v1919_v9 = vpop.f32.mrf.mxu1 }
 0x178   : > { %v8663_v27 = vadd.f32 %v6078_v25, %v2024_v17  ;;  %v2022_v19 = vadd.f32 %v1919_v9, %v9294_v3  ;;  %v2648_v33 = vpop.f32.mrf.mxu0 }
 0x179   : > { %v6045_v34 = vpop.f32.mrf.mxu1 }
 0x17a   : > { %v8666_v18 = vadd.f32 %v2645_v50, %v2022_v19  ;;  %v2025_v42 = vadd.f32 %v6045_v34, %v8459_v56  ;;  %v6082_v41 = vpop.f32.mrf.mxu0 }
 0x17b   : > { %v1922_v59 = vpop.f32.mrf.mxu1 }
 0x17c   : > { %v8669_v13 = vadd.f32 %v6079_v51, %v2025_v42  ;;  %v2023_v44 = vadd.f32 %v1922_v59, %v8475_v63  ;;  %v2661_v49 = vpop.f32.mrf.mxu0 }
 0x17d   : > { %v6048_v58 = vpop.f32.mrf.mxu1 }
 0x17e   : > { %v8672_v8 = vadd.f32 %v2648_v33, %v2023_v44  ;;  %v2028_v35 = vadd.f32 %v6048_v58, %v8485_v46  ;;  %v6083_v20 = vpop.f32.mrf.mxu0 }
 0x17f   : > { %v1935_v55 = vpop.f32.mrf.mxu1 }
 0x180   : > { %v8675_v53 = vadd.f32 %v6082_v41, %v2028_v35  ;;  %v2026_v32 = vadd.f32 %v1935_v55, %v8502_v7  ;;  %v2664_v5 = vpop.f32.mrf.mxu0 }
 0x181   : > { %v6049_v56 = vpop.f32.mrf.mxu1 }
 0x182   : > { %v8678_v12 = vadd.f32 %v2661_v49, %v2026_v32  ;;  %v2029_v37 = vadd.f32 %v6049_v56, %v9295_v43  ;;  %v6086_v24 = vpop.f32.mrf.mxu0 }
 0x183   : > { %v1938_v63 = vpop.f32.mrf.mxu1 }
 0x184   : > { %v8681_v16 = vadd.f32 %v6083_v20, %v2029_v37  ;;  %v2027_v22 = vadd.f32 %v1938_v63, %v9296_v54  ;;  %v2677_v25 = vpop.f32.mrf.mxu0 }
 0x185   : > { %v6052_v46 = vpop.f32.mrf.mxu1 }
 0x186   : > { %v8684_v11 = vadd.f32 %v2664_v5, %v2027_v22  ;;  %v2032_v15 = vadd.f32 %v6052_v46, %v8544_v47  ;;  %v6087_v50 = vpop.f32.mrf.mxu0 }
 0x187   : > { %v1951_v7 = vpop.f32.mrf.mxu1 }
 0x188   : > { %v8687_v29 = vadd.f32 %v6086_v24, %v2032_v15  ;;  %v2030_v30 = vadd.f32 %v1951_v7, %v8547_v6  ;;  %v2680_v17 = vpop.f32.mrf.mxu0 }
 0x189   : > { %v6053_v51 = vpop.f32.mrf.mxu1 }
 0x18a   : > { %v8690_v9 = vadd.f32 %v2677_v25, %v2030_v30  ;;  %v2033_v3 = vadd.f32 %v6053_v51, %v8567_v36  ;;  %v6090_v19 = vpop.f32.mrf.mxu0 }
 0x18b   : > { %v1954_v33 = vpop.f32.mrf.mxu1 }
 0x18c   : > { %v8693_v34 = vadd.f32 %v6087_v50, %v2033_v3  ;;  %v2031_v42 = vadd.f32 %v1954_v33, %v8582_v28  ;;  %v2693_v41 = vpop.f32.mrf.mxu0 }
 0x18d   : > { %v6056_v47 = vpop.f32.mrf.mxu1 }
 0x18e   : > { %9297 = vst [vmem:[#allocation2_spill] sm:$0xff] %v8693_v34  ;;  %v8696_v59 = vadd.f32 %v2680_v17, %v2031_v42  ;;  %v2036_v44 = vadd.f32 %v6056_v47, %v8588_v21  ;;  %v6091_v49 = vpop.f32.mrf.mxu0 }
 0x18f   : > { %v1967_v6 = vpop.f32.mrf.mxu1 }
 0x190   : > { %9298 = vst [vmem:[#allocation14_spill] sm:$0xff] %v8696_v59  ;;  %v8699_v58 = vadd.f32 %v6090_v19, %v2036_v44  ;;  %v2034_v35 = vadd.f32 %v1967_v6, %v8591_v10  ;;  %v2696_v20 = vpop.f32.mrf.mxu0 }
 0x191   : > { %v6057_v36 = vpop.f32.mrf.mxu1 }
 0x192   : > { %9299 = vst [vmem:[#allocation19_spill] sm:$0xff] %v8699_v58  ;;  %v8702_v55 = vadd.f32 %v2693_v41, %v2034_v35  ;;  %v2037_v32 = vadd.f32 %v6057_v36, %v8600_v4  ;;  %v6094_v5 = vpop.f32.mrf.mxu0 }
 0x193   : > { %v1970_v28 = vpop.f32.mrf.mxu1 }
 0x194   : > { %9300 = vst [vmem:[#allocation9_spill] sm:$0xff] %v8702_v55  ;;  %v8705_v56 = vadd.f32 %v6091_v49, %v2037_v32  ;;  %v2035_v43 = vadd.f32 %v1970_v28, %v8607_v1  ;;  %v2709_v37 = vpop.f32.mrf.mxu0 }
 0x195   : > { %v6060_v21 = vpop.f32.mrf.mxu1 }
 0x196   : > { %9301 = vst [vmem:[#allocation18_spill] sm:$0xff] %v8705_v56  ;;  %v8708_v24 = vadd.f32 %v2696_v20, %v2035_v43  ;;  %v2040_v63 = vadd.f32 %v6060_v21, %v8613_v23  ;;  %v6095_v54 = vpop.f32.mrf.mxu0 }
 0x197   : > { %v1983_v10 = vpop.f32.mrf.mxu1 }
 0x198   : > { %9302 = vst [vmem:[#allocation21_spill] sm:$0xff] %v8708_v24  ;;  %v8711_v22 = vadd.f32 %v6094_v5, %v2040_v63  ;;  %v2038_v25 = vadd.f32 %v1983_v10, %v8616_v57  ;;  %v2712_v46 = vpop.f32.mrf.mxu0 }
 0x199   : > { %v6061_v4 = vpop.f32.mrf.mxu1 }
 0x19a   : > { %9303 = vst [vmem:[#allocation23_spill] sm:$0xff] %v8711_v22  ;;  %v8714_v15 = vadd.f32 %v2709_v37, %v2038_v25  ;;  %v2041_v50 = vadd.f32 %v6061_v4, %v8620_v52  ;;  %v6098_v7 = vpop.f32.mrf.mxu0 }
 0x19b   : > { %v1986_v1 = vpop.f32.mrf.mxu1 }
 0x19c   : > { %9304 = vst [vmem:[#allocation25_spill] sm:$0xff] %v8714_v15  ;;  %v8717_v30 = vadd.f32 %v6095_v54, %v2041_v50  ;;  %v2039_v17 = vadd.f32 %v1986_v1, %v8624_v14  ;;  %v2725_v51 = vpop.f32.mrf.mxu0 }
 0x19d   : > { %v6064_v23 = vpop.f32.mrf.mxu1 }
 0x19e   : > { %9305 = vst [vmem:[#allocation4_spill] sm:$0xff] %v8717_v30  ;;  %v8720_v3 = vadd.f32 %v2712_v46, %v2039_v17  ;;  %v2044_v19 = vadd.f32 %v6064_v23, %v8627_v39  ;;  %v6099_v33 = vpop.f32.mrf.mxu0 }
 0x19f   : > { %v1999_v57 = vpop.f32.mrf.mxu1 }
 0x1a0   : > { %9306 = vst [vmem:[#allocation3_spill] sm:$0xff] %v8720_v3  ;;  %v8723_v42 = vadd.f32 %v6098_v7, %v2044_v19  ;;  %v2042_v41 = vadd.f32 %v1999_v57, %v8630_v45  ;;  %v2728_v47 = vpop.f32.mrf.mxu0 }
 0x1a1   : > { %v6065_v52 = vpop.f32.mrf.mxu1 }
 0x1a2   : > { %9307 = vst [vmem:[#allocation6_spill] sm:$0xff] %v8723_v42  ;;  %v8726_v44 = vadd.f32 %v2725_v51, %v2042_v41  ;;  %v2045_v49 = vadd.f32 %v6065_v52, %v8633_v61  ;;  %v8729_v6 = vpop.f32.mrf.mxu0 }
 0x1a3   : > { %v2002_v14 = vpop.f32.mrf.mxu1 }
 0x1a4   : > { %9308 = vst [vmem:[#allocation5_spill] sm:$0xff] %v8726_v44  ;;  %v8731_v35 = vadd.f32 %v6099_v33, %v2045_v49  ;;  %v2043_v20 = vadd.f32 %v2002_v14, %v8636_v40  ;;  %v8734_v39 = vpop.f32.mrf.mxu0 }
 0x1a5   : > { %v6104_v36 = vpop.f32.mrf.mxu1 }
 0x1a6   : > { %9309 = vst [vmem:[#allocation7_spill] sm:$0xff] %v8731_v35  ;;  %v8736_v32 = vadd.f32 %v2728_v47, %v2043_v20  ;;  %v8738_v5 = vpop.f32.mrf.mxu0 }
 0x1a7   : > { %v3083_v45 = vpop.f32.mrf.mxu1 }
 0x1a8   : > { %9310 = vst [vmem:[#allocation10_spill] sm:$0xff] %v8736_v32  ;;  %v8740_v28 = vpop.f32.mrf.mxu0 }
 0x1a9   : > { %v6105_v43 = vpop.f32.mrf.mxu1 }
 0x1aa   : > { %v8742_v37 = vpop.f32.mrf.mxu0 }
 0x1ab   : > { %v8744_v61 = vpop.f32.mrf.mxu1 }
 0x1ac   : > { %v8746_v21 = vpop.f32.mrf.mxu0 }
 0x1ad   : > { %v8748_v63 = vpop.f32.mrf.mxu1 }
 0x1ae   : > { %v8750_v40 = vpop.f32.mrf.mxu0 }
 0x1af   : > { %v8752_v54 = vpop.f32.mrf.mxu1 }
 0x1b0   : > { %v8754_v10 = vpop.f32.mrf.mxu0 }
 0x1b1   : > { %v8756_v25 = vpop.f32.mrf.mxu1 }
 0x1b2   : > { %v8758_v46 = vpop.f32.mrf.mxu0 }
 0x1b3   : > { %v8760_v4 = vpop.f32.mrf.mxu1 }
 0x1b4   : > { %v8762_v50 = vpop.f32.mrf.mxu0 }
 0x1b5   : > { %v8764_v7 = vpop.f32.mrf.mxu1 }
 0x1b6   : > { %v8766_v1 = vpop.f32.mrf.mxu0 }
 0x1b7   : > { %v8768_v17 = vpop.f32.mrf.mxu1 }
 0x1b8   : > { %v8770_v51 = vpop.f32.mrf.mxu0 }
 0x1b9   : > { %v8772_v23 = vpop.f32.mrf.mxu1 }
 0x1ba   : > { %v8774_v19 = vpop.f32.mrf.mxu0 }
 0x1bb   : > { %v8776_v33 = vpop.f32.mrf.mxu1 }
 0x1bc   : > { %v8778_v57 = vpop.f32.mrf.mxu0 }
 0x1bd   : > { %v8780_v41 = vpop.f32.mrf.mxu1 }
 0x1be   : > { %v8782_v47 = vpop.f32.mrf.mxu0 }
 0x1bf   : > { %v8784_v52 = vpop.f32.mrf.mxu1 }
 0x1c0   : > { %v8786_v49 = vpop.f32.mrf.mxu0 }
 0x1c1   : > { %v8788_v14 = vpop.f32.mrf.mxu1 }
 0x1c2   : > { %v8790_v20 = vpop.f32.mrf.mxu0 }
 0x1c3   : > { %9311 = vst [vmem:[#allocation13_spill] sm:$0xff] %v8790_v20  ;;  %v8792_v32 = vpop.f32.mrf.mxu1 }
 0x1c4   : > { %v8794_v35 = vpop.f32.mrf.mxu0 }
 0x1c5   : > { %9312 = vst [vmem:[#allocation15_spill] sm:$0xff] %v8794_v35  ;;  %v8796_v44 = vpop.f32.mrf.mxu1 }
 0x1c6   : > { %v8798_v42 = vpop.f32.mrf.mxu0 }
 0x1c7   : > { %9313 = vst [vmem:[#allocation17_spill] sm:$0xff] %v8798_v42  ;;  %v8800_v3 = vpop.f32.mrf.mxu1 }
 0x1c8   : > { %v8802_v30 = vpop.f32.mrf.mxu0 }
 0x1c9   : > { %9314 = vst [vmem:[#allocation20_spill] sm:$0xff] %v8802_v30  ;;  %v8804_v15 = vpop.f32.mrf.mxu1 }
 0x1ca   : > { %9315 = vst [vmem:[#allocation22_spill] sm:$0xff] %v8804_v15  ;;  %v8806_v22 = vpop.f32.mrf.mxu0 }
 0x1cb   : > { %9316 = vst [vmem:[#allocation24_spill] sm:$0xff] %v8806_v22  ;;  %v8808_v24 = vpop.f32.mrf.mxu1 }
 0x1cc   : > { %9317 = vst [vmem:[#allocation11_spill] sm:$0xff] %v8808_v24  ;;  %v8810_v56 = vpop.f32.mrf.mxu0 }
 0x1cd   : > { %9318 = vst [vmem:[#allocation8_spill] sm:$0xff] %v8810_v56  ;;  %v8812_v55 = vpop.f32.mrf.mxu1 }
 0x1ce   : > { %9319 = vst [vmem:[#allocation16_spill] sm:$0xff] %v8812_v55  ;;  %v8814_v58 = vpop.f32.mrf.mxu0 }
 0x1cf   : > { %9320 = vst [vmem:[#allocation12_spill] sm:$0xff] %v8814_v58  ;;  %v8816_v59 = vpop.f32.mrf.mxu1 }
 0x1d0   : > { %9321 = vst [vmem:[#allocation26_spill] sm:$0xff] %v8816_v59  ;;  %v8818_v35 = vpop.f32.mrf.mxu0 }
 0x1d1   : > { %9322 = vst [vmem:[#allocation27_spill] sm:$0xff] %v8818_v35  ;;  %v8820_v42 = vpop.f32.mrf.mxu1 }
 0x1d2   : > { %9323 = vst [vmem:[#allocation28_spill] sm:$0xff] %v8820_v42  ;;  %v8822_v34 = vpop.f32.mrf.mxu0 }
 0x1d3   : > { %9324 = vst [vmem:[#allocation29_spill] sm:$0xff] %v8822_v34  ;;  %v8824_v30 = vpop.f32.mrf.mxu1 }
 0x1d4   : > { %9325 = vst [vmem:[#allocation30_spill] sm:$0xff] %v8824_v30  ;;  %v8826_v15 = vpop.f32.mrf.mxu0 }
 0x1d5   : > { %9326 = vst [vmem:[#allocation31_spill] sm:$0xff] %v8826_v15  ;;  %v8828_v22 = vpop.f32.mrf.mxu1 }
 0x1d6   : > { %9327 = vst [vmem:[#allocation32_spill] sm:$0xff] %v8828_v22  ;;  %v8830_v24 = vpop.f32.mrf.mxu0 }
 0x1d7   : > { %9328 = vst [vmem:[#allocation33_spill] sm:$0xff] %v8830_v24  ;;  %v8832_v56 = vpop.f32.mrf.mxu1  ;;  %v3212_v24 = vadd.f32 %v6104_v36, %v8639_v62  ;;  %v3211_v62 = vadd.f32 %v8744_v61, %v8648_v60  ;;  %v8874_v60 = vld [vmem:[%s9105_s3] ss:$0 sm:$0xff] }
 0x1d8   : > { %9329 = vst [vmem:[#allocation34_spill] sm:$0xff] %v8832_v56  ;;  %v8834_v55 = vpop.f32.mrf.mxu0 }
 0x1d9   : > { %9330 = vst [vmem:[#allocation35_spill] sm:$0xff] %v8834_v55  ;;  %v8836_v58 = vpop.f32.mrf.mxu1  ;;  %v3210_v55 = vadd.f32 %v3083_v45, %v8642_v0  ;;  %v8866_v0 = vld [vmem:[%s9104_s2] ss:$0 sm:$0xff] }
 0x1da   : > { %9331 = vst [vmem:[#allocation36_spill] sm:$0xff] %v8836_v58  ;;  %v8838_v59 = vpop.f32.mrf.mxu0 }
 0x1db   : > { %9332 = vst [vmem:[#allocation37_spill] sm:$0xff] %v8838_v59  ;;  %v8840_v35 = vpop.f32.mrf.mxu1 }
 0x1dc   : > { %9333 = vst [vmem:[#allocation38_spill] sm:$0xff] %v8840_v35  ;;  %v8842_v42 = vpop.f32.mrf.mxu0  ;;  %v3571_v35 = vadd.f32 %v8729_v6, %v3212_v24 }
 0x1dd   : > { %9334 = vst [vmem:[#allocation39_spill] sm:$0xff] %v8842_v42  ;;  %v8844_v34 = vpop.f32.mrf.mxu1  ;;  %v3213_v42 = vadd.f32 %v6105_v43, %v8645_v26 }
 0x1de   : > { %9335 = vst [vmem:[#allocation40_spill] sm:$0xff] %v8844_v34  ;;  %v8846_v30 = vpop.f32.mrf.mxu0 }
 0x1df   : > { %9336 = vst [vmem:[#allocation41_spill] sm:$0xff] %v8846_v30  ;;  %v8848_v15 = vpop.f32.mrf.mxu1  ;;  %v3569_v30 = vadd.f32 %v8734_v39, %v3210_v55  ;;  %v3572_v24 = vadd.f32 %v8738_v5, %v3213_v42  ;;  %v3216_v55 = vadd.f32 %v8748_v63, %v8651_v48  ;;  %v3570_v39 = vadd.f32 %v8740_v28, %v3211_v62 }
 0x1e0   : > { %v8851_v22 = vpop.f32.mrf.mxu0 }
 0x1e1   : > { %9337 = vst [vmem:[#allocation42_spill] sm:$0xff] %v8851_v22  ;;  %v8853_v56 = vpop.f32.mrf.mxu1  ;;  %v3575_v62 = vadd.f32 %v8742_v37, %v3216_v55 }
 0x1e2   : > { %9338 = vst [vmem:[#allocation43_spill] sm:$0xff] %v8853_v56  ;;  %v6206_v58 = vpop.f32.mrf.mxu0 }
 0x1e3   : > { %v8856_v59 = vpop.f32.mrf.mxu1 }
 0x1e4   : > { %9339 = vst [vmem:[#allocation44_spill] sm:$0xff] %v8856_v59  ;;  %v4638_v34 = vpop.f32.mrf.mxu0 }
 0x1e5   : > { %v6172_v20 = vpop.f32.mrf.mxu1 }
 0x1e6   : > { %v4297_v36 = vadd.f32 %v6172_v20, %v3571_v35  ;;  %v6207_v22 = vpop.f32.mrf.mxu0 }
 0x1e7   : > { %v4168_v45 = vpop.f32.mrf.mxu1 }
 0x1e8   : > { %v4767_v6 = vadd.f32 %v6206_v58, %v4297_v36  ;;  %v4295_v26 = vadd.f32 %v4168_v45, %v3569_v30  ;;  %v4641_v43 = vpop.f32.mrf.mxu0  ;;  %v3214_v58 = vadd.f32 %v8752_v54, %v8654_v31  ;;  %v3217_v30 = vadd.f32 %v8756_v25, %v8657_v38 }
 0x1e9   : > { %v6173_v35 = vpop.f32.mrf.mxu1 }
 0x1ea   : > { %v4806_v61 = vmul.f32 %v8866_v0, %v4767_v6  ;;  %v4765_v20 = vadd.f32 %v4638_v34, %v4295_v26  ;;  %v4298_v59 = vadd.f32 %v6173_v35, %v3572_v24  ;;  %v6210_v56 = vpop.f32.mrf.mxu0  ;;  %v3215_v34 = vadd.f32 %v8760_v4, %v8660_v2 }
 0x1eb   : > { %v4171_v48 = vpop.f32.mrf.mxu1  ;;  %v3573_v6 = vadd.f32 %v8746_v21, %v3214_v58 }
 0x1ec   : > { %v4845_v42 = vadd.f32 %v8874_v60, %v4806_v61  ;;  %v4804_v5 = vmul.f32 %v8866_v0, %v4765_v20  ;;  %v4768_v63 = vadd.f32 %v6207_v22, %v4298_v59  ;;  %v4296_v36 = vadd.f32 %v4171_v48, %v3570_v39  ;;  %v4654_v28 = vpop.f32.mrf.mxu0 }
 0x1ed   : > { %v6176_v45 = vpop.f32.mrf.mxu1  ;;  %v3576_v59 = vadd.f32 %v8750_v40, %v3217_v30  ;;  %v3220_v22 = vadd.f32 %v8764_v7, %v8663_v27  ;;  %v3574_v40 = vadd.f32 %v8754_v10, %v3215_v34  ;;  %v3218_v27 = vadd.f32 %v8768_v17, %v8666_v18 }
 0x1ee   : > { %v4877_v31 = vmax.f32 %v4845_v42, 0.0  ;;  %v4843_v54 = vadd.f32 %v8874_v60, %v4804_v5  ;;  %v4807_v38 = vmul.f32 %v8866_v0, %v4768_v63  ;;  %v4766_v25 = vadd.f32 %v4641_v43, %v4296_v36  ;;  %v6211_v24 = vpop.f32.mrf.mxu0 }
 0x1ef   : > { %v4301_v2 = vadd.f32 %v6176_v45, %v3575_v62  ;;  %v4184_v37 = vpop.f32.mrf.mxu1  ;;  %v3579_v42 = vadd.f32 %v8758_v46, %v3220_v22  ;;  %v3221_v10 = vadd.f32 %v8772_v23, %v8669_v13  ;;  %v3577_v45 = vadd.f32 %v8762_v50, %v3218_v27 }
 0x1f0   : > { %v5747_v4 = vpack.c.bf16 %v4877_v31, %v4877_v31  ;;  %v4875_v26 = vmax.f32 %v4843_v54, 0.0  ;;  %v4846_v43 = vadd.f32 %v8874_v60, %v4807_v38  ;;  %v4805_v55 = vmul.f32 %v8866_v0, %v4766_v25  ;;  %v4657_v21 = vpop.f32.mrf.mxu0 }
 0x1f1   : > { %v4771_v7 = vadd.f32 %v6210_v56, %v4301_v2  ;;  %v4299_v35 = vadd.f32 %v4184_v37, %v3573_v6  ;;  %v6177_v39 = vpop.f32.mrf.mxu1  ;;  %v3219_v46 = vadd.f32 %v8776_v33, %v8672_v8  ;;  %v3580_v6 = vadd.f32 %v8766_v1, %v3221_v10 }
 0x1f2   : > { %5038 = vst.msk [vmem:[%s8897_s25 + $0x8] sm:$0xf] %vm5035_vm8, %v5747_v4  ;;  %v5745_v61 = vpack.c.bf16 %v4875_v26, %v4875_v26  ;;  %v4878_v20 = vmax.f32 %v4846_v43, 0.0  ;;  %v4844_v58 = vadd.f32 %v8874_v60, %v4805_v55  ;;  %v4302_v30 = vadd.f32 %v6177_v39, %v3576_v59  ;;  %v6214_v48 = vpop.f32.mrf.mxu0 }
 0x1f3   : > { %v4810_v5 = vmul.f32 %v8866_v0, %v4771_v7  ;;  %v4769_v18 = vadd.f32 %v4654_v28, %v4299_v35  ;;  %v4187_v56 = vpop.f32.mrf.mxu1  ;;  %v3224_v50 = vadd.f32 %v8780_v41, %v8675_v53  ;;  %v3578_v43 = vadd.f32 %v8770_v51, %v3219_v46 }
 0x1f4   : > { %5036 = vst.msk [vmem:[%s8897_s25] sm:$0xf] %vm5035_vm8, %v5745_v61  ;;  %v5748_v17 = vpack.c.bf16 %v4878_v20, %v4878_v20  ;;  %v4876_v63 = vmax.f32 %v4844_v58, 0.0  ;;  %v4772_v36 = vadd.f32 %v6211_v24, %v4302_v30  ;;  %v4300_v62 = vadd.f32 %v4187_v56, %v3574_v40  ;;  %v4670_v34 = vpop.f32.mrf.mxu0 }
 0x1f5   : > { %v4849_v31 = vadd.f32 %v8874_v60, %v4810_v5  ;;  %v4808_v13 = vmul.f32 %v8866_v0, %v4769_v18  ;;  %v6180_v23 = vpop.f32.mrf.mxu1  ;;  %v3222_v1 = vadd.f32 %v8784_v52, %v8678_v12  ;;  %v3583_v39 = vadd.f32 %v8774_v19, %v3224_v50 }
 0x1f6   : > { %5039 = vst.msk [vmem:[%s8897_s25 + $0xc] sm:$0xf] %vm5035_vm8, %v5748_v17  ;;  %v5746_v28 = vpack.c.bf16 %v4876_v63, %v4876_v63  ;;  %v4811_v54 = vmul.f32 %v8866_v0, %v4772_v36  ;;  %v4770_v38 = vadd.f32 %v4657_v21, %v4300_v62  ;;  %v4305_v25 = vadd.f32 %v6180_v23, %v3579_v42  ;;  %v6215_v24 = vpop.f32.mrf.mxu0 }
 0x1f7   : > { %v4881_v59 = vmax.f32 %v4849_v31, 0.0  ;;  %v4847_v8 = vadd.f32 %v8874_v60, %v4808_v13  ;;  %v4200_v33 = vpop.f32.mrf.mxu1  ;;  %v3225_v61 = vadd.f32 %v8788_v14, %v8681_v16  ;;  %v3581_v10 = vadd.f32 %v8778_v57, %v3222_v1 }
 0x1f8   : > { %5037 = vst.msk [vmem:[%s8897_s25 + $0x4] sm:$0xf] %vm5035_vm8, %v5746_v28  ;;  %v4850_v22 = vadd.f32 %v8874_v60, %v4811_v54  ;;  %v4809_v2 = vmul.f32 %v8866_v0, %v4770_v38  ;;  %v4775_v37 = vadd.f32 %v6214_v48, %v4305_v25  ;;  %v4303_v4 = vadd.f32 %v4200_v33, %v3577_v45  ;;  %v4673_v26 = vpop.f32.mrf.mxu0  ;;  %v9342_v33 = vld [vmem:[#allocation22_spill] sm:$0xff] }
 0x1f9   : > { %v5751_v53 = vpack.c.bf16 %v4881_v59, %v4881_v59  ;;  %v4879_v41 = vmax.f32 %v4847_v8, 0.0  ;;  %v6181_v55 = vpop.f32.mrf.mxu1  ;;  %v3223_v19 = vadd.f32 %v8792_v32, %v8684_v11  ;;  %v3584_v62 = vadd.f32 %v8782_v47, %v3225_v61  ;;  %v9340_v59 = vld [vmem:[#allocation13_spill] sm:$0xff] }
 0x1fa   : > { %v4882_v21 = vmax.f32 %v4850_v22, 0.0  ;;  %v4848_v40 = vadd.f32 %v8874_v60, %v4809_v2  ;;  %v4814_v27 = vmul.f32 %v8866_v0, %v4775_v37  ;;  %v4773_v7 = vadd.f32 %v4670_v34, %v4303_v4  ;;  %v6218_v35 = vpop.f32.mrf.mxu0 }
 0x1fb   : > { %5042 = vst.msk [vmem:[%s8897_s25 + $0x18] sm:$0xf] %vm5035_vm8, %v5751_v53  ;;  %v5749_v12 = vpack.c.bf16 %v4879_v41, %v4879_v41  ;;  %v4306_v51 = vadd.f32 %v6181_v55, %v3580_v6  ;;  %v4203_v52 = vpop.f32.mrf.mxu1  ;;  %v3228_v11 = vadd.f32 %v8796_v44, %v8687_v29  ;;  %v3582_v28 = vadd.f32 %v8786_v49, %v3223_v19  ;;  %v9341_v49 = vld [vmem:[#allocation2_spill] sm:$0xff]  ;;  %v9343_v53 = vld [vmem:[#allocation15_spill] sm:$0xff] }
 0x1fc   : > { %v5752_v20 = vpack.c.bf16 %v4882_v21, %v4882_v21  ;;  %v4880_v58 = vmax.f32 %v4848_v40, 0.0  ;;  %v4853_v30 = vadd.f32 %v8874_v60, %v4814_v27  ;;  %v4812_v48 = vmul.f32 %v8866_v0, %v4773_v7  ;;  %v4686_v42 = vpop.f32.mrf.mxu0  ;;  %v9344_v55 = vld [vmem:[#allocation14_spill] sm:$0xff]  ;;  %v9345_v21 = vld [vmem:[#allocation11_spill] sm:$0xff] }
 0x1fd   : > { %5040 = vst.msk [vmem:[%s8897_s25 + $0x10] sm:$0xf] %vm5035_vm8, %v5749_v12  ;;  %v4776_v16 = vadd.f32 %v6215_v24, %v4306_v51  ;;  %v4304_v14 = vadd.f32 %v4203_v52, %v3578_v43  ;;  %v6184_v5 = vpop.f32.mrf.mxu1  ;;  %v3226_v47 = vadd.f32 %v8800_v3, %v8690_v9  ;;  %v3587_v8 = vadd.f32 %v9340_v59, %v3228_v11  ;;  %v9351_v11 = vld [vmem:[#allocation26_spill] sm:$0xff] }
 0x1fe   : > { %5043 = vst.msk [vmem:[%s8897_s25 + $0x1c] sm:$0xf] %vm5035_vm8, %v5752_v20  ;;  %v5750_v18 = vpack.c.bf16 %v4880_v58, %v4880_v58  ;;  %v4885_v56 = vmax.f32 %v4853_v30, 0.0  ;;  %v4851_v17 = vadd.f32 %v8874_v60, %v4812_v48  ;;  %v4309_v63 = vadd.f32 %v6184_v5, %v3583_v39  ;;  %v6219_v36 = vpop.f32.mrf.mxu0  ;;  %v9346_v20 = vld [vmem:[#allocation17_spill] sm:$0xff]  ;;  %v9347_v30 = vld [vmem:[#allocation19_spill] sm:$0xff]  ;;  %v9348_v48 = vld [vmem:[#allocation16_spill] sm:$0xff] }
 0x1ff   : > { %v4815_v32 = vmul.f32 %v8866_v0, %v4776_v16  ;;  %v4774_v57 = vadd.f32 %v4673_v26, %v4304_v14  ;;  %v4216_v34 = vpop.f32.mrf.mxu1  ;;  %v3229_v22 = vadd.f32 %v9342_v33, %v9341_v49  ;;  %v3585_v41 = vadd.f32 %v9343_v53, %v3226_v47  ;;  %v9352_v47 = vld [vmem:[#allocation24_spill] sm:$0xff] }
 0x200   : > { %5041 = vst.msk [vmem:[%s8897_s25 + $0x14] sm:$0xf] %vm5035_vm8, %v5750_v18  ;;  %v5755_v45 = vpack.c.bf16 %v4885_v56, %v4885_v56  ;;  %v4883_v46 = vmax.f32 %v4851_v17, 0.0  ;;  %v4779_v31 = vadd.f32 %v6218_v35, %v4309_v63  ;;  %v4307_v13 = vadd.f32 %v4216_v34, %v3581_v10  ;;  %v4689_v23 = vpop.f32.mrf.mxu0  ;;  %v9349_v63 = vld [vmem:[#allocation20_spill] sm:$0xff] }
 0x201   : > { %v4854_v54 = vadd.f32 %v8874_v60, %v4815_v32  ;;  %v4813_v29 = vmul.f32 %v8866_v0, %v4774_v57  ;;  %v6185_v44 = vpop.f32.mrf.mxu1  ;;  %v3227_v40 = vadd.f32 %v9345_v21, %v9344_v55  ;;  %v3588_v58 = vadd.f32 %v9346_v20, %v3229_v22  ;;  %v9355_v22 = vld [vmem:[#allocation8_spill] sm:$0xff] }
 0x202   : > { %5046 = vst.msk [vmem:[%s8897_s25 + $0x28] sm:$0xf] %vm5035_vm8, %v5755_v45  ;;  %v5753_v38 = vpack.c.bf16 %v4883_v46, %v4883_v46  ;;  %v4818_v25 = vmul.f32 %v8866_v0, %v4779_v31  ;;  %v4777_v24 = vadd.f32 %v4686_v42, %v4307_v13  ;;  %v4310_v6 = vadd.f32 %v6185_v44, %v3584_v62  ;;  %v6222_v50 = vpop.f32.mrf.mxu0  ;;  %v9350_v62 = vld [vmem:[#allocation9_spill] sm:$0xff]  ;;  %v9354_v44 = vld [vmem:[#allocation28_spill] sm:$0xff] }
 0x203   : > { %v4886_v2 = vmax.f32 %v4854_v54, 0.0  ;;  %v4852_v9 = vadd.f32 %v8874_v60, %v4813_v29  ;;  %v4219_v3 = vpop.f32.mrf.mxu1  ;;  %v3232_v42 = vadd.f32 %v9348_v48, %v9347_v30  ;;  %v3230_v32 = vadd.f32 %v9351_v11, %v9350_v62  ;;  %v9353_v29 = vld [vmem:[#allocation18_spill] sm:$0xff] }
 0x204   : > { %5044 = vst.msk [vmem:[%s8897_s25 + $0x20] sm:$0xf] %vm5035_vm8, %v5753_v38  ;;  %v4857_v37 = vadd.f32 %v8874_v60, %v4818_v25  ;;  %v4816_v4 = vmul.f32 %v8866_v0, %v4777_v24  ;;  %v4780_v26 = vadd.f32 %v6219_v36, %v4310_v6  ;;  %v4308_v43 = vadd.f32 %v4219_v3, %v3582_v28  ;;  %v4702_v1 = vpop.f32.mrf.mxu0  ;;  %v9357_v3 = vld [vmem:[#allocation30_spill] sm:$0xff] }
 0x205   : > { %v5756_v27 = vpack.c.bf16 %v4886_v2, %v4886_v2  ;;  %v4884_v7 = vmax.f32 %v4852_v9, 0.0  ;;  %v6188_v35 = vpop.f32.mrf.mxu1  ;;  %v3586_v36 = vadd.f32 %v9349_v63, %v3227_v40  ;;  %v3591_v54 = vadd.f32 %v9352_v47, %v3232_v42  ;;  %v9356_v9 = vld [vmem:[#allocation21_spill] sm:$0xff]  ;;  %v9358_v40 = vld [vmem:[#allocation12_spill] sm:$0xff]  ;;  %v9361_v42 = vld [vmem:[#allocation27_spill] sm:$0xff] }
 0x206   : > { %v4889_v39 = vmax.f32 %v4857_v37, 0.0  ;;  %v4855_v61 = vadd.f32 %v8874_v60, %v4816_v4  ;;  %v4819_v12 = vmul.f32 %v8866_v0, %v4780_v26  ;;  %v4778_v51 = vadd.f32 %v4689_v23, %v4308_v43  ;;  %v6223_v52 = vpop.f32.mrf.mxu0 }
 0x207   : > { %5047 = vst.msk [vmem:[%s8897_s25 + $0x2c] sm:$0xf] %vm5035_vm8, %v5756_v27  ;;  %v5754_v10 = vpack.c.bf16 %v4884_v7, %v4884_v7  ;;  %v4313_v19 = vadd.f32 %v6188_v35, %v3587_v8  ;;  %v4232_v16 = vpop.f32.mrf.mxu1  ;;  %v3233_v38 = vadd.f32 %v9354_v44, %v9353_v29  ;;  %v3589_v2 = vadd.f32 %v9355_v22, %v3230_v32  ;;  %v9359_v7 = vld [vmem:[#allocation23_spill] sm:$0xff]  ;;  %v9360_v35 = vld [vmem:[#allocation32_spill] sm:$0xff]  ;;  %v9364_v32 = vld [vmem:[#allocation29_spill] sm:$0xff] }
 0x208   : > { %v5759_v14 = vpack.c.bf16 %v4889_v39, %v4889_v39  ;;  %v4887_v5 = vmax.f32 %v4855_v61, 0.0  ;;  %v4858_v18 = vadd.f32 %v8874_v60, %v4819_v12  ;;  %v4817_v56 = vmul.f32 %v8866_v0, %v4778_v51  ;;  %v4705_v17 = vpop.f32.mrf.mxu0 }
 0x209   : > { %5045 = vst.msk [vmem:[%s8897_s25 + $0x24] sm:$0xf] %vm5035_vm8, %v5754_v10  ;;  %v4783_v57 = vadd.f32 %v6222_v50, %v4313_v19  ;;  %v4311_v34 = vadd.f32 %v4232_v16, %v3585_v41  ;;  %v6189_v45 = vpop.f32.mrf.mxu1  ;;  %v3231_v37 = vadd.f32 %v9357_v3, %v9356_v9  ;;  %v3592_v27 = vadd.f32 %v9358_v40, %v3233_v38  ;;  %v9362_v19 = vld [vmem:[#allocation25_spill] sm:$0xff]  ;;  %v9363_v16 = vld [vmem:[#allocation34_spill] sm:$0xff]  ;;  %v9367_v38 = vld [vmem:[#allocation31_spill] sm:$0xff] }
 0x20a   : > { %5050 = vst.msk [vmem:[%s8897_s25 + $0x38] sm:$0xf] %vm5035_vm8, %v5759_v14  ;;  %v5757_v46 = vpack.c.bf16 %v4887_v5, %v4887_v5  ;;  %v4890_v31 = vmax.f32 %v4858_v18, 0.0  ;;  %v4856_v13 = vadd.f32 %v8874_v60, %v4817_v56  ;;  %v4314_v23 = vadd.f32 %v6189_v45, %v3588_v58  ;;  %v9366_v45 = vld [vmem:[#allocation36_spill] sm:$0xff] }
 0x20b   : > { %v6226_v28 = vpop.f32.mrf.mxu0  ;;  %v4822_v25 = vmul.f32 %v8866_v0, %v4783_v57  ;;  %v4781_v24 = vadd.f32 %v4702_v1, %v4311_v34  ;;  %v4235_v6 = vpop.f32.mrf.mxu1  ;;  %v3236_v39 = vadd.f32 %v9360_v35, %v9359_v7  ;;  %v3590_v10 = vadd.f32 %v9361_v42, %v3231_v37  ;;  %v9365_v34 = vld [vmem:[#allocation4_spill] sm:$0xff]  ;;  %v9370_v37 = vld [vmem:[#allocation33_spill] sm:$0xff]  ;;  %v9372_v35 = vld [vmem:[#allocation6_spill] sm:$0xff] }
 0x20c   : > { %5048 = vst.msk [vmem:[%s8897_s25 + $0x30] sm:$0xf] %vm5035_vm8, %v5757_v46  ;;  %v5760_v50 = vpack.c.bf16 %v4890_v31, %v4890_v31  ;;  %v4888_v59 = vmax.f32 %v4856_v13, 0.0  ;;  %v4784_v8 = vadd.f32 %v6223_v52, %v4314_v23  ;;  %v4312_v49 = vadd.f32 %v4235_v6, %v3586_v36  ;;  %v9369_v6 = vld [vmem:[#allocation38_spill] sm:$0xff] }
 0x20d   : > { %v4718_v33 = vpop.f32.mrf.mxu0  ;;  %v4861_v4 = vadd.f32 %v8874_v60, %v4822_v25  ;;  %v4820_v26 = vmul.f32 %v8866_v0, %v4781_v24  ;;  %v6192_v43 = vpop.f32.mrf.mxu1  ;;  %v3234_v14 = vadd.f32 %v9363_v16, %v9362_v19  ;;  %v3595_v57 = vadd.f32 %v9364_v32, %v3236_v39  ;;  %v9368_v24 = vld [vmem:[#allocation3_spill] sm:$0xff]  ;;  %v9373_v39 = vld [vmem:[#allocation40_spill] sm:$0xff]  ;;  %v9377_v32 = vld [vmem:[#allocation37_spill] sm:$0xff] }
 0x20e   : > { %5051 = vst.msk [vmem:[%s8897_s25 + $0x3c] sm:$0xf] %vm5035_vm8, %v5760_v50  ;;  %v5758_v1 = vpack.c.bf16 %v4888_v59, %v4888_v59  ;;  %v4823_v53 = vmul.f32 %v8866_v0, %v4784_v8  ;;  %v4782_v41 = vadd.f32 %v4705_v17, %v4312_v49  ;;  %v4317_v55 = vadd.f32 %v6192_v43, %v3591_v54  ;;  %v9375_v16 = vld [vmem:[#allocation7_spill] sm:$0xff] }
 0x20f   : > { %v6227_v21 = vpop.f32.mrf.mxu0  ;;  %v4893_v61 = vmax.f32 %v4861_v4, 0.0  ;;  %v4859_v12 = vadd.f32 %v8874_v60, %v4820_v26  ;;  %v4248_v51 = vpop.f32.mrf.mxu1  ;;  %v3237_v46 = vadd.f32 %v9366_v45, %v9365_v34  ;;  %v3593_v25 = vadd.f32 %v9367_v38, %v3234_v14  ;;  %v9376_v14 = vld [vmem:[#allocation43_spill] sm:$0xff]  ;;  %v9378_v34 = vld [vmem:[#allocation10_spill] sm:$0xff] }
 0x210   : > { %5049 = vst.msk [vmem:[%s8897_s25 + $0x34] sm:$0xf] %vm5035_vm8, %v5758_v1  ;;  %v4862_v52 = vadd.f32 %v8874_v60, %v4823_v53  ;;  %v4821_v20 = vmul.f32 %v8866_v0, %v4782_v41  ;;  %v4787_v58 = vadd.f32 %v6226_v28, %v4317_v55  ;;  %v4315_v30 = vadd.f32 %v4248_v51, %v3589_v2 }
 0x211   : > { %v4721_v48 = vpop.f32.mrf.mxu0  ;;  %v5763_v5 = vpack.c.bf16 %v4893_v61, %v4893_v61  ;;  %v4891_v18 = vmax.f32 %v4859_v12, 0.0  ;;  %v6193_v56 = vpop.f32.mrf.mxu1  ;;  %v3235_v50 = vadd.f32 %v9369_v6, %v9368_v24  ;;  %v3596_v4 = vadd.f32 %v9370_v37, %v3237_v46 }
 0x212   : > { %v4894_v17 = vmax.f32 %v4862_v52, 0.0  ;;  %v4860_v63 = vadd.f32 %v8874_v60, %v4821_v20  ;;  %v4826_v36 = vmul.f32 %v8866_v0, %v4787_v58  ;;  %v4785_v62 = vadd.f32 %v4718_v33, %v4315_v30 }
 0x213   : > { %v6230_v11 = vpop.f32.mrf.mxu0  ;;  %5054 = vst.msk [vmem:[%s8897_s25 + $0x48] sm:$0xf] %vm5035_vm8, %v5763_v5  ;;  %v5761_v31 = vpack.c.bf16 %v4891_v18, %v4891_v18  ;;  %v4318_v13 = vadd.f32 %v6193_v56, %v3592_v27  ;;  %v4251_v23 = vpop.f32.mrf.mxu1  ;;  %v9371_v27 = vld [vmem:[#allocation35_spill] sm:$0xff]  ;;  %v3240_v61 = vadd.f32 %v9373_v39, %v9372_v35  ;;  %v3241_v5 = vadd.f32 %v9376_v14, %v9375_v16 }
 0x214   : > { %v5764_v28 = vpack.c.bf16 %v4894_v17, %v4894_v17  ;;  %v4892_v47 = vmax.f32 %v4860_v63, 0.0  ;;  %v4865_v54 = vadd.f32 %v8874_v60, %v4826_v36  ;;  %v4824_v29 = vmul.f32 %v8866_v0, %v4785_v62 }
 0x215   : > { %v4734_v44 = vpop.f32.mrf.mxu0  ;;  %5052 = vst.msk [vmem:[%s8897_s25 + $0x40] sm:$0xf] %vm5035_vm8, %v5761_v31  ;;  %v4788_v59 = vadd.f32 %v6227_v21, %v4318_v13  ;;  %v4316_v8 = vadd.f32 %v4251_v23, %v3590_v10  ;;  %v6196_v49 = vpop.f32.mrf.mxu1  ;;  %v3594_v7 = vadd.f32 %v9371_v27, %v3235_v50  ;;  %v9374_v10 = vld [vmem:[#allocation5_spill] sm:$0xff] }
 0x216   : > { %5055 = vst.msk [vmem:[%s8897_s25 + $0x4c] sm:$0xf] %vm5035_vm8, %v5764_v28  ;;  %v5762_v33 = vpack.c.bf16 %v4892_v47, %v4892_v47  ;;  %v4897_v22 = vmax.f32 %v4865_v54, 0.0  ;;  %v4863_v2 = vadd.f32 %v8874_v60, %v4824_v29  ;;  %v4321_v9 = vadd.f32 %v6196_v49, %v3595_v57 }
 0x217   : > { %v6231_v3 = vpop.f32.mrf.mxu0  ;;  %v4827_v26 = vmul.f32 %v8866_v0, %v4788_v59  ;;  %v4786_v43 = vadd.f32 %v4721_v48, %v4316_v8  ;;  %v4264_v1 = vpop.f32.mrf.mxu1  ;;  %v3238_v19 = vadd.f32 %v8848_v15, %v9374_v10  ;;  %v3599_v57 = vadd.f32 %v9377_v32, %v3240_v61  ;;  %v9379_v15 = vld [vmem:[#allocation44_spill] sm:$0xff] }
 0x218   : > { %5053 = vst.msk [vmem:[%s8897_s25 + $0x44] sm:$0xf] %vm5035_vm8, %v5762_v33  ;;  %v5767_v53 = vpack.c.bf16 %v4897_v22, %v4897_v22  ;;  %v4895_v41 = vmax.f32 %v4863_v2, 0.0  ;;  %v4791_v55 = vadd.f32 %v6230_v11, %v4321_v9  ;;  %v4319_v21 = vadd.f32 %v4264_v1, %v3593_v25  ;;  %v9381_v25 = vld [vmem:[#allocation41_spill] sm:$0xff]  ;;  %v9382_v2 = vld [vmem:[#allocation42_spill] sm:$0xff] }
 0x219   : > { %v4737_v40 = vpop.f32.mrf.mxu0  ;;  %v4866_v12 = vadd.f32 %v8874_v60, %v4827_v26  ;;  %v4825_v51 = vmul.f32 %v8866_v0, %v4786_v43  ;;  %v6197_v52 = vpop.f32.mrf.mxu1  ;;  %v3239_v45 = vadd.f32 %v9379_v15, %v9378_v34  ;;  %v3600_v24 = vadd.f32 %v9381_v25, %v3241_v5 }
 0x21a   : > { %5058 = vst.msk [vmem:[%s8897_s25 + $0x58] sm:$0xf] %vm5035_vm8, %v5767_v53  ;;  %v5765_v20 = vpack.c.bf16 %v4895_v41, %v4895_v41  ;;  %v4830_v58 = vmul.f32 %v8866_v0, %v4791_v55  ;;  %v4789_v30 = vadd.f32 %v4734_v44, %v4319_v21  ;;  %v4322_v48 = vadd.f32 %v6197_v52, %v3596_v4  ;;  %v9380_v44 = vld [vmem:[#allocation39_spill] sm:$0xff] }
 0x21b   : > { %v6234_v42 = vpop.f32.mrf.mxu0  ;;  %v4898_v18 = vmax.f32 %v4866_v12, 0.0  ;;  %v4864_v56 = vadd.f32 %v8874_v60, %v4825_v51  ;;  %v4267_v17 = vpop.f32.mrf.mxu1  ;;  %v3597_v38 = vadd.f32 %v9380_v44, %v3238_v19  ;;  %v3598_v9 = vadd.f32 %v9382_v2, %v3239_v45 }
 0x21c   : > { %5056 = vst.msk [vmem:[%s8897_s25 + $0x50] sm:$0xf] %vm5035_vm8, %v5765_v20  ;;  %v4869_v63 = vadd.f32 %v8874_v60, %v4830_v58  ;;  %v4828_v36 = vmul.f32 %v8866_v0, %v4789_v30  ;;  %v4792_v62 = vadd.f32 %v6231_v3, %v4322_v48  ;;  %v4320_v11 = vadd.f32 %v4267_v17, %v3594_v7 }
 0x21d   : > { %v5768_v46 = vpack.c.bf16 %v4898_v18, %v4898_v18  ;;  %v4896_v31 = vmax.f32 %v4864_v56, 0.0  ;;  %v6200_v13 = vpop.f32.mrf.mxu1  ;;  %v4750_v23 = vpop.f32.mrf.mxu0 }
 0x21e   : > { %v4901_v28 = vmax.f32 %v4869_v63, 0.0  ;;  %v4867_v47 = vadd.f32 %v8874_v60, %v4828_v36  ;;  %v4831_v54 = vmul.f32 %v8866_v0, %v4792_v62  ;;  %v4790_v29 = vadd.f32 %v4737_v40, %v4320_v11 }
 0x21f   : > { %5059 = vst.msk [vmem:[%s8897_s25 + $0x5c] sm:$0xf] %vm5035_vm8, %v5768_v46  ;;  %v5766_v6 = vpack.c.bf16 %v4896_v31, %v4896_v31  ;;  %v4325_v50 = vadd.f32 %v6200_v13, %v3599_v57  ;;  %v4280_v59 = vpop.f32.mrf.mxu1  ;;  %v6235_v26 = vpop.f32.mrf.mxu0 }
 0x220   : > { %v5771_v8 = vpack.c.bf16 %v4901_v28, %v4901_v28  ;;  %v4899_v49 = vmax.f32 %v4867_v47, 0.0  ;;  %v4870_v33 = vadd.f32 %v8874_v60, %v4831_v54  ;;  %v4829_v22 = vmul.f32 %v8866_v0, %v4790_v29 }
 0x221   : > { %5057 = vst.msk [vmem:[%s8897_s25 + $0x54] sm:$0xf] %vm5035_vm8, %v5766_v6  ;;  %v4795_v3 = vadd.f32 %v6234_v42, %v4325_v50  ;;  %v4323_v37 = vadd.f32 %v4280_v59, %v3597_v38  ;;  %v6201_v4 = vpop.f32.mrf.mxu1  ;;  %v4753_v51 = vpop.f32.mrf.mxu0 }
 0x222   : > { %5062 = vst.msk [vmem:[%s8897_s25 + $0x68] sm:$0xf] %vm5035_vm8, %v5771_v8  ;;  %v5769_v43 = vpack.c.bf16 %v4899_v49, %v4899_v49  ;;  %v4902_v1 = vmax.f32 %v4870_v33, 0.0  ;;  %v4868_v53 = vadd.f32 %v8874_v60, %v4829_v22  ;;  %v4326_v41 = vadd.f32 %v6201_v4, %v3600_v24 }
 0x223   : > { %v4834_v55 = vmul.f32 %v8866_v0, %v4795_v3  ;;  %v4793_v21 = vadd.f32 %v4750_v23, %v4323_v37  ;;  %v4283_v40 = vpop.f32.mrf.mxu1 }
 0x224   : > { %5060 = vst.msk [vmem:[%s8897_s25 + $0x60] sm:$0xf] %vm5035_vm8, %v5769_v43  ;;  %v5772_v27 = vpack.c.bf16 %v4902_v1, %v4902_v1  ;;  %v4900_v7 = vmax.f32 %v4868_v53, 0.0  ;;  %v4796_v35 = vadd.f32 %v6235_v26, %v4326_v41  ;;  %v4324_v39 = vadd.f32 %v4283_v40, %v3598_v9 }
 0x225   : > { %v4873_v61 = vadd.f32 %v8874_v60, %v4834_v55  ;;  %v4832_v12 = vmul.f32 %v8866_v0, %v4793_v21 }
 0x226   : > { %5063 = vst.msk [vmem:[%s8897_s25 + $0x6c] sm:$0xf] %vm5035_vm8, %v5772_v27  ;;  %v5770_v52 = vpack.c.bf16 %v4900_v7, %v4900_v7  ;;  %v4835_v20 = vmul.f32 %v8866_v0, %v4796_v35  ;;  %v4794_v58 = vadd.f32 %v4753_v51, %v4324_v39 }
 0x227   : > { %v4905_v30 = vmax.f32 %v4873_v61, 0.0  ;;  %v4871_v48 = vadd.f32 %v8874_v60, %v4832_v12 }
 0x228   : > { %5061 = vst.msk [vmem:[%s8897_s25 + $0x64] sm:$0xf] %vm5035_vm8, %v5770_v52  ;;  %v4874_v42 = vadd.f32 %v8874_v60, %v4835_v20  ;;  %v4833_v10 = vmul.f32 %v8866_v0, %v4794_v58 }
 0x229   : > { %v5775_v19 = vpack.c.bf16 %v4905_v30, %v4905_v30  ;;  %v4903_v16 = vmax.f32 %v4871_v48, 0.0 }
 0x22a   : > { %v4906_v14 = vmax.f32 %v4874_v42, 0.0  ;;  %v4872_v5 = vadd.f32 %v8874_v60, %v4833_v10 }
 0x22b   : > { %5066 = vst.msk [vmem:[%s8897_s25 + $0x78] sm:$0xf] %vm5035_vm8, %v5775_v19  ;;  %v5773_v18 = vpack.c.bf16 %v4903_v16, %v4903_v16 }
 0x22c   : > { %v5776_v56 = vpack.c.bf16 %v4906_v14, %v4906_v14  ;;  %v4904_v17 = vmax.f32 %v4872_v5, 0.0 }
 0x22d   : > { %5064 = vst.msk [vmem:[%s8897_s25 + $0x70] sm:$0xf] %vm5035_vm8, %v5773_v18 }
 0x22e   : > { %5067 = vst.msk [vmem:[%s8897_s25 + $0x7c] sm:$0xf] %vm5035_vm8, %v5776_v56  ;;  %v5774_v63 = vpack.c.bf16 %v4904_v17, %v4904_v17 }
 0x230   : > { %5065 = vst.msk [vmem:[%s8897_s25 + $0x74] sm:$0xf] %vm5035_vm8, %v5774_v63 }
 0x231 PF: > { %s14_s17 = sadd.s32 1, %s6345_s17   ;;  %s9383_s15 = smov %s6341_s16 }
 0x232   : > { %p11_p5 = scmp.ge.s32.totalorder %s14_s17, 4   ;;  %s9384_s16 = smov %s9386_s18 }
 0x234   :  { %13 = sbr.rel (!%p11_p5) target bundleno = 2 (0x2), region = 76 }

// kernel: up_forward.5
= control target key start
LH: loop header
LB: loop body
LE: loop exit
PB: predicated region body
PF: predicated region fallthrough
CT: control target
= control target key end

     0   :  { %s6179_s15 = smov 0   ;;  %s6181_s16 = smov 0   ;;  %s8909_s0 = inlined_call_operand.vmem [shape: bf16[2,1,18,18,4], index: 0, kind: input, shape index: {}]   ;;  %s8910_s1 = inlined_call_operand.vmem [shape: bf16[3,3,4,4], index: 1, kind: input, shape index: {}]   ;;  %s8911_s2 = inlined_call_operand.vmem [shape: f32[1,4], index: 2, kind: input, shape index: {}]   ;;  %s8912_s3 = inlined_call_operand.vmem [shape: f32[1,4], index: 3, kind: input, shape index: {}]   ;;  %s8913_s4 = inlined_call_operand.vmem [shape: f32[2,16,16,4], index: 4, kind: output, shape index: {}]  }
   0x1   :  { %s6183_s17 = smov 0  }
   0x2 LB: > { %s26_s18 = sadd.s32 1, %s6148_s16  ;;  %p5039_p0 = scmp.ge.s32.totalorder %s6152_s17, 1  ;;  %s6152_s17 = sphi %s6183_s17, %s14_s17   ;;  %s6148_s16 = sphi %s6181_s16, %s9189_s16   ;;  %s6144_s15 = sphi %s6179_s15, %s9188_s15  }
   0x3   : > { %p28_p1 = scmp.ge.s32.totalorder %s26_s18, 2  ;;  %p182_p2 = scmp.lt.s32.totalorder %s6152_s17, 3 }
   0x5   : > { %s9191_s18 = smov (%p28_p1, %s26_s18), 0  ;;  %p183_p3 = pnand %p5039_p0, %p182_p2 }
   0x7   : > { %186 = sbr.rel (%p183_p3) target bundleno = 559 (0x22f), region = 36 }
   0xc   : > { %v5043_v0 = vld [vmem:[%s8910_s1 + $0x2] sm:$0x3]  ;;  %vm773_vm0 = vcmask 1041408   ;;  %p217_p4 = scmp.lt.s32.totalorder %s6144_s15, 1  ;;  %v270_v2 = vld [vmem:[%s8910_s1] sm:$0x3] }
   0xd   : > { %6046 = vmatprep.subr.msk.bf16.mxu1 %vm773_vm0, %v5043_v0  ;;  %6045 = vmatprep.subr.msk.bf16.mxu0 %vm773_vm0, %v5043_v0  ;;  %v775_v1 = vsel %vm773_vm0, %v5043_v0, 0  ;;  %v5124_v3 = vld [vmem:[%s8910_s1 + $0x4] sm:$0x3]  ;;  %vm287_vm1 = vsmask.f32 3328  ;;  %v6220_v4 = vsel %vm773_vm0, %v270_v2, 0 }
   0xe   : > { %6044 = vmatpush3.bf16.msra.mxu1 %v775_v1  ;;  %5738 = vmatpush3.bf16.msra.mxu0 %v775_v1  ;;  %s9193_s15 = smov (!%p217_p4, %s6144_s15), 1  ;;  %vm288_vm2 = vsmask.f32 7440  ;;  %vm724_vm3 = vcmask 31744   ;;  %v6246_v16 = vsel %vm773_vm0, %v5124_v3, 0  ;;  %vm1278_vm5 = vcmask 1042432  }
   0xf   : > { %6047 = vmatprep.subr.msk.bf16.mxu1 %vm773_vm0, %v270_v2  ;;  %6048 = vmatprep.subr.msk.bf16.mxu0 %vm773_vm0, %v5124_v3  ;;  %s6055_s25 = smul.u32 216, %s9193_s15  ;;  %vm6261_vm4 = vmor %vm287_vm1, %vm288_vm2  ;;  %vm1279_vm6 = vcmask 1046532   ;;  %s5583_s23 = sshll.u32 %s9193_s15, 8 }
  0x10   : > { %vm6547_vm7 = vmor %vm1278_vm5, %vm1279_vm6 }
  0x11   : > { %s6217_s28 = scalar_lea.vmem %s8909_s0, %s6055_s25  ;;  %s8699_s25 = scalar_lea.vmem %s8913_s4, %s5583_s23 }
  0x12   : > { %v6223_v5 = vld [vmem:[%s6217_s28] sm:$0xf]  ;;  %v6226_v6 = vld [vmem:[%s6217_s28 + $0x4] sm:$0xf]  ;;  %v6229_v7 = vld [vmem:[%s6217_s28 + $0x8] sm:$0x1] }
  0x13   : > { %v291_v8 = vshrl.u32 %v6223_v5, 16  ;;  %v294_v9 = vshll.u32 %v6223_v5, 16  ;;  %v300_v10 = vshll.u32 %v6226_v6, 16  ;;  %v304_v11 = vshrl.u32 %v6226_v6, 16  ;;  %v6236_v12 = vld [vmem:[%s6217_s28 + $0x60] sm:$0xf] }
  0x14   : > { %v310_v13 = vshll.u32 %v6229_v7, 16  ;;  %v6240_v14 = vld [vmem:[%s6217_s28 + $0x64] sm:$0xf]  ;;  %v6243_v15 = vld [vmem:[%s6217_s28 + $0x68] sm:$0x1]  ;;  %v483_v22 = vshrl.u32 %v6236_v12, 16 }
  0x15   : > { %v293_v17 = vrot.slane %v291_v8, 4  ;;  %v296_v18 = vrot.slane %v294_v9, 5  ;;  %v302_v19 = vrot.slane %v300_v10, 5  ;;  %v306_v20 = vrot.slane %v304_v11, 4  ;;  %v6254_v29 = vld [vmem:[%s6217_s28 + $0xc] sm:$0xf] }
  0x16   : > { %v312_v21 = vrot.slane %v310_v13, 5  ;;  %v486_v23 = vshll.u32 %v6236_v12, 16  ;;  %v492_v24 = vshll.u32 %v6240_v14, 16  ;;  %v496_v27 = vshrl.u32 %v6240_v14, 16  ;;  %v6257_v30 = vld [vmem:[%s6217_s28 + $0x10] sm:$0xf] }
  0x17   : > { %v297_v25 = vor.u32 %v296_v18, %v293_v17  ;;  %v307_v26 = vor.u32 %v306_v20, %v302_v19  ;;  %v502_v28 = vshll.u32 %v6243_v15, 16  ;;  %v485_v33 = vrot.slane %v483_v22, 4  ;;  %v6267_v41 = vld [vmem:[%s6217_s28 + $0x14] sm:$0x1]  ;;  %v6278_v53 = vld [vmem:[%s6217_s28 + $0x6c] sm:$0xf] }
  0x18   : > { %v488_v34 = vrot.slane %v486_v23, 5  ;;  %v494_v35 = vrot.slane %v492_v24, 5  ;;  %v498_v38 = vrot.slane %v496_v27, 4  ;;  %v315_v42 = vshrl.u32 %v6254_v29, 16  ;;  %v6282_v58 = vld [vmem:[%s6217_s28 + $0x70] sm:$0xf] }
  0x19   : > { %v298_v36 = vrot.slane %v297_v25, 4  ;;  %v308_v37 = vrot.slane %v307_v26, 4  ;;  %v504_v39 = vrot.slane %v502_v28, 5  ;;  %v318_v43 = vshll.u32 %v6254_v29, 16  ;;  %v6290_v63 = vld [vmem:[%s6217_s28 + $0x74] sm:$0x1] }
  0x1a   : > { %v489_v40 = vor.u32 %v488_v34, %v485_v33  ;;  %v324_v44 = vshll.u32 %v6257_v30, 16  ;;  %v499_v47 = vor.u32 %v498_v38, %v494_v35  ;;  %v328_v48 = vshrl.u32 %v6257_v30, 16  ;;  %v6296_v8 = vld [vmem:[%s6217_s28 + $0x18] sm:$0xf]  ;;  %v6309_v25 = vld [vmem:[%s6217_s28 + $0x20] sm:$0x1] }
  0x1b   : > { %v303_v45 = vsel %vm6261_vm4, %v298_v36, %v302_v19  ;;  %v313_v46 = vsel %vm6261_vm4, %v308_v37, %v312_v21  ;;  %v317_v51 = vrot.slane %v315_v42, 4  ;;  %v320_v52 = vrot.slane %v318_v43, 5  ;;  %v6303_v21 = vld [vmem:[%s6217_s28 + $0x1c] sm:$0xf] }
  0x1c   : > { %v5044_v49 = vcombine.low %v303_v45, %v313_v46  ;;  %v490_v50 = vrot.slane %v489_v40, 4  ;;  %v500_v54 = vrot.slane %v499_v47, 4  ;;  %v326_v55 = vrot.slane %v324_v44, 5  ;;  %v6322_v40 = vld [vmem:[%s8910_s1 + $0x8] sm:$0x3] }
  0x1d   : > { %v330_v56 = vrot.slane %v328_v48, 4  ;;  %v334_v57 = vshll.u32 %v6267_v41, 16  ;;  %v321_v60 = vor.u32 %v320_v52, %v317_v51  ;;  %v507_v3 = vshrl.u32 %v6278_v53, 16  ;;  %v6327_v46 = vld [vmem:[%s6217_s28 + $0x7c] sm:$0xf] }
  0x1e   : > { %5739 = vmatprep.mubr.msk.bf16.mxu0 %vm724_vm3, %v5044_v49  ;;  %v495_v59 = vsel %vm6261_vm4, %v490_v50, %v494_v35  ;;  %v505_v0 = vsel %vm6261_vm4, %v500_v54, %v504_v39  ;;  %v510_v11 = vshll.u32 %v6278_v53, 16  ;;  %v516_v13 = vshll.u32 %v6282_v58, 16  ;;  %v6316_v35 = vld [vmem:[%s6217_s28 + $0x78] sm:$0xf] }
  0x1f   : > { %v331_v1 = vor.u32 %v330_v56, %v326_v55  ;;  %v336_v2 = vrot.slane %v334_v57, 5  ;;  %v5052_v9 = vcombine.low %v495_v59, %v505_v0  ;;  %v322_v10 = vrot.slane %v321_v60, 4  ;;  %v6334_v56 = vld [vmem:[%s6217_s28 + $0x80] sm:$0x1] }
  0x20   : > { %v509_v18 = vrot.slane %v507_v3, 4  ;;  %v520_v19 = vshrl.u32 %v6282_v58, 16  ;;  %v526_v20 = vshll.u32 %v6290_v63, 16  ;;  %v512_v23 = vrot.slane %v510_v11, 5  ;;  %8949 = vst [vmem:[#allocation2_spill] sm:$0xff] %v6334_v56 }
  0x21   : > { %v332_v17 = vrot.slane %v331_v1, 4  ;;  %5755 = vmatprep.mubr.msk.bf16.mxu1 %vm724_vm3, %v5052_v9  ;;  %v327_v22 = vsel %vm6261_vm4, %v322_v10, %v326_v55  ;;  %v518_v24 = vrot.slane %v516_v13, 5  ;;  %v339_v26 = vshrl.u32 %v6296_v8, 16  ;;  %v6340_v1 = vld [vmem:[%s6217_s28 + $0x24] sm:$0xf] }
  0x22   : > { %v522_v28 = vrot.slane %v520_v19, 4  ;;  %v528_v33 = vrot.slane %v526_v20, 5  ;;  %v342_v34 = vshll.u32 %v6296_v8, 16  ;;  %v513_v37 = vor.u32 %v512_v23, %v509_v18  ;;  %v6348_v10 = vld [vmem:[%s6217_s28 + $0x28] sm:$0xf] }
  0x23   : > { %v337_v27 = vsel %vm6261_vm4, %v332_v17, %v336_v2  ;;  %v341_v38 = vrot.slane %v339_v26, 4  ;;  %v348_v39 = vshll.u32 %v6303_v21, 16  ;;  %v352_v44 = vshrl.u32 %v6303_v21, 16  ;;  %v6354_v19 = vld [vmem:[%s8910_s1 + $0x6] sm:$0x3] }
  0x24   : > { %v5045_v36 = vcombine.low %v327_v22, %v337_v27  ;;  %v523_v42 = vor.u32 %v522_v28, %v518_v24  ;;  %v344_v43 = vrot.slane %v342_v34, 5  ;;  %v358_v45 = vshll.u32 %v6309_v25, 16 }
  0x25   : > { %v514_v47 = vrot.slane %v513_v37, 4  ;;  %v350_v48 = vrot.slane %v348_v39, 5  ;;  %v531_v49 = vshrl.u32 %v6316_v35, 16  ;;  %v534_v50 = vshll.u32 %v6316_v35, 16 }
  0x26   : > { %5740 = vmatmul.mubr.msk.bf16.vlgmr.msra.gmra.mxu0 %vm724_vm3, %v5045_v36  ;;  %v524_v51 = vrot.slane %v523_v42, 4  ;;  %v345_v52 = vor.u32 %v344_v43, %v341_v38  ;;  %v354_v54 = vrot.slane %v352_v44, 4  ;;  %v360_v55 = vrot.slane %v358_v45, 5  ;;  %v6366_v36 = vld [vmem:[%s6217_s28 + $0x84] sm:$0xf] }
  0x27   : > { %5806 = vmatpush3.bf16.msra.mxu0 %v6246_v16  ;;  %v519_v57 = vsel %vm6261_vm4, %v514_v47, %v518_v24  ;;  %v533_v59 = vrot.slane %v531_v49, 4  ;;  %v536_v60 = vrot.slane %v534_v50, 5  ;;  %v540_v0 = vshll.u32 %v6327_v46, 16  ;;  %v6359_v24 = vld [vmem:[%s6217_s28 + $0x2c] sm:$0x1] }
  0x28   : > { %6050 = vmatprep.subr.msk.bf16.mxu0 %vm773_vm0, %v6322_v40  ;;  %v529_v16 = vsel %vm6261_vm4, %v524_v51, %v528_v33  ;;  %v346_v2 = vrot.slane %v345_v52, 4  ;;  %v355_v3 = vor.u32 %v354_v54, %v350_v48  ;;  %v544_v9 = vshrl.u32 %v6327_v46, 16  ;;  %v6373_v43 = vld [vmem:[%s6217_s28 + $0x88] sm:$0xf]  ;;  %v6381_v51 = vld [vmem:[%s6217_s28 + $0x8c] sm:$0x1] }
  0x29   : > { %v5053_v11 = vcombine.low %v519_v57, %v529_v16  ;;  %v537_v13 = vor.u32 %v536_v60, %v533_v59  ;;  %v542_v17 = vrot.slane %v540_v0, 5  ;;  %v550_v18 = vshll.u32 %v6334_v56, 16  ;;  %8950 = vst [vmem:[#allocation3_spill] sm:$0xff] %v6381_v51  ;;  %v6389_v60 = vld [vmem:[%s6217_s28 + $0x30] sm:$0xf] }
  0x2a   : > { %v351_v20 = vsel %vm6261_vm4, %v346_v2, %v350_v48  ;;  %v356_v22 = vrot.slane %v355_v3, 4  ;;  %v546_v23 = vrot.slane %v544_v9, 4  ;;  %v363_v26 = vshrl.u32 %v6340_v1, 16  ;;  %v6394_v9 = vld [vmem:[%s6217_s28 + $0x34] sm:$0xf] }
  0x2b   : > { %5756 = vmatmul.mubr.msk.bf16.vlgmr.msra.gmra.mxu1 %vm724_vm3, %v5053_v11  ;;  %v538_v27 = vrot.slane %v537_v13, 4  ;;  %v552_v28 = vrot.slane %v550_v18, 5  ;;  %v366_v33 = vshll.u32 %v6340_v1, 16  ;;  %v372_v34 = vshll.u32 %v6348_v10, 16 }
  0x2c   : > { %5772 = vmatpush3.bf16.msra.mxu1 %v6220_v4  ;;  %v361_v37 = vsel %vm6261_vm4, %v356_v22, %v360_v55  ;;  %v547_v38 = vor.u32 %v546_v23, %v542_v17  ;;  %v365_v39 = vrot.slane %v363_v26, 4  ;;  %v376_v42 = vshrl.u32 %v6348_v10, 16 }
  0x2d   : > { %v5046_v44 = vcombine.low %v351_v20, %v361_v37  ;;  %v543_v45 = vsel %vm6261_vm4, %v538_v27, %v542_v17  ;;  %v368_v47 = vrot.slane %v366_v33, 5  ;;  %v374_v48 = vrot.slane %v372_v34, 5  ;;  %6049 = vmatprep.subr.msk.bf16.mxu1 %vm773_vm0, %v6354_v19  ;;  %v6402_v33 = vld [vmem:[%s6217_s28 + $0x38] sm:$0x1] }
  0x2e   : > { %v548_v4 = vrot.slane %v547_v38, 4  ;;  %v378_v49 = vrot.slane %v376_v42, 4  ;;  %v382_v50 = vshll.u32 %v6359_v24, 16  ;;  %v555_v52 = vshrl.u32 %v6366_v36, 16  ;;  %v6407_v38 = vld [vmem:[%s6217_s28 + $0x90] sm:$0xf] }
  0x2f   : > { %5743 = vmatprep.mubr.msk.bf16.mxu0 %vm724_vm3, %v5046_v44  ;;  %v369_v54 = vor.u32 %v368_v47, %v365_v39  ;;  %v558_v55 = vshll.u32 %v6366_v36, 16  ;;  %v564_v57 = vshll.u32 %v6373_v43, 16  ;;  %v568_v59 = vshrl.u32 %v6373_v43, 16  ;;  %8951 = vst [vmem:[#allocation4_spill] sm:$0xff] %v6407_v38  ;;  %v6412_v47 = vld [vmem:[%s6217_s28 + $0x94] sm:$0xf] }
  0x30   : > { %v553_v0 = vsel %vm6261_vm4, %v548_v4, %v552_v28  ;;  %v379_v16 = vor.u32 %v378_v49, %v374_v48  ;;  %v384_v2 = vrot.slane %v382_v50, 5  ;;  %v557_v3 = vrot.slane %v555_v52, 4  ;;  %8952 = vst [vmem:[#allocation5_spill] sm:$0xff] %v6412_v47 }
  0x31   : > { %v5054_v11 = vcombine.low %v543_v45, %v553_v0  ;;  %v370_v13 = vrot.slane %v369_v54, 4  ;;  %v560_v17 = vrot.slane %v558_v55, 5  ;;  %v566_v18 = vrot.slane %v564_v57, 5 }
  0x32   : > { %v380_v20 = vrot.slane %v379_v16, 4  ;;  %v570_v22 = vrot.slane %v568_v59, 4  ;;  %v574_v23 = vshll.u32 %v6381_v51, 16  ;;  %v387_v26 = vshrl.u32 %v6389_v60, 16  ;;  %v6421_v16 = vld [vmem:[%s6217_s28 + $0x98] sm:$0x1] }
  0x33   : > { %5759 = vmatprep.mubr.msk.bf16.mxu1 %vm724_vm3, %v5054_v11  ;;  %v375_v27 = vsel %vm6261_vm4, %v370_v13, %v374_v48  ;;  %v561_v28 = vor.u32 %v560_v17, %v557_v3  ;;  %v390_v34 = vshll.u32 %v6389_v60, 16  ;;  %v396_v37 = vshll.u32 %v6394_v9, 16  ;;  %8953 = vst [vmem:[#allocation6_spill] sm:$0xff] %v6421_v16  ;;  %v6426_v11 = vld [vmem:[%s6217_s28 + $0x3c] sm:$0xf] }
  0x34   : > { %v385_v39 = vsel %vm6261_vm4, %v380_v20, %v384_v2  ;;  %v571_v42 = vor.u32 %v570_v22, %v566_v18  ;;  %v576_v44 = vrot.slane %v574_v23, 5  ;;  %v389_v45 = vrot.slane %v387_v26, 4  ;;  %v6431_v23 = vld [vmem:[%s6217_s28 + $0x40] sm:$0xf]  ;;  %v1231_v51 = vld [vmem:[%s6217_s28 + $0xc] sm:$0xe] }
  0x35   : > { %v5047_v48 = vcombine.low %v375_v27, %v385_v39  ;;  %v562_v4 = vrot.slane %v561_v28, 4  ;;  %v392_v49 = vrot.slane %v390_v34, 5  ;;  %v398_v50 = vrot.slane %v396_v37, 5 }
  0x36   : > { %v572_v52 = vrot.slane %v571_v42, 4  ;;  %v400_v54 = vshrl.u32 %v6394_v9, 16  ;;  %v406_v55 = vshll.u32 %v6402_v33, 16  ;;  %v579_v57 = vshrl.u32 %v6407_v38, 16 }
  0x37   : > { %5744 = vmatmul.mubr.msk.bf16.gmra.mxu0 %vm724_vm3, %v5047_v48  ;;  %v567_v59 = vsel %vm6261_vm4, %v562_v4, %v566_v18  ;;  %v393_v0 = vor.u32 %v392_v49, %v389_v45  ;;  %v582_v2 = vshll.u32 %v6407_v38, 16  ;;  %v588_v3 = vshll.u32 %v6412_v47, 16  ;;  %v6440_v48 = vld [vmem:[%s6217_s28 + $0x44] sm:$0x1] }
  0x38   : > { %v577_v13 = vsel %vm6261_vm4, %v572_v52, %v576_v44  ;;  %v402_v17 = vrot.slane %v400_v54, 4  ;;  %v408_v20 = vrot.slane %v406_v55, 5  ;;  %v581_v22 = vrot.slane %v579_v57, 4  ;;  %v6445_v52 = vld [vmem:[%s6217_s28 + $0x9c] sm:$0xf] }
  0x39   : > { %v5055_v18 = vcombine.low %v567_v59, %v577_v13  ;;  %v394_v26 = vrot.slane %v393_v0, 4  ;;  %v584_v27 = vrot.slane %v582_v2, 5  ;;  %v590_v28 = vrot.slane %v588_v3, 5  ;;  %8954 = vst [vmem:[#allocation7_spill] sm:$0xff] %v6445_v52  ;;  %v6449_v13 = vld [vmem:[%s6217_s28 + $0xa0] sm:$0xf] }
  0x3a   : > { %v403_v34 = vor.u32 %v402_v17, %v398_v50  ;;  %v592_v37 = vshrl.u32 %v6412_v47, 16  ;;  %v598_v39 = vshll.u32 %v6421_v16, 16  ;;  %v411_v42 = vshrl.u32 %v6426_v11, 16  ;;  %8955 = vst [vmem:[#allocation8_spill] sm:$0xff] %v6449_v13 }
  0x3b   : > { %5760 = vmatmul.mubr.msk.bf16.gmra.mxu1 %vm724_vm3, %v5055_v18  ;;  %v399_v44 = vsel %vm6261_vm4, %v394_v26, %v398_v50  ;;  %v585_v45 = vor.u32 %v584_v27, %v581_v22  ;;  %v414_v4 = vshll.u32 %v6426_v11, 16  ;;  %v420_v49 = vshll.u32 %v6431_v23, 16  ;;  %v6455_v26 = vld [vmem:[%s6217_s28 + $0xa4] sm:$0x1] }
  0x3c   : > { %v404_v54 = vrot.slane %v403_v34, 4  ;;  %v594_v55 = vrot.slane %v592_v37, 4  ;;  %v600_v57 = vrot.slane %v598_v39, 5  ;;  %v413_v59 = vrot.slane %v411_v42, 4  ;;  %8956 = vst [vmem:[#allocation9_spill] sm:$0xff] %v6455_v26 }
  0x3d   : > { %v586_v0 = vrot.slane %v585_v45, 4  ;;  %v416_v2 = vrot.slane %v414_v4, 5  ;;  %v422_v3 = vrot.slane %v420_v49, 5  ;;  %v424_v50 = vshrl.u32 %v6431_v23, 16  ;;  %v6459_v34 = vld [vmem:[%s6217_s28 + $0x48] sm:$0xf] }
  0x3e   : > { %v409_v17 = vsel %vm6261_vm4, %v404_v54, %v408_v20  ;;  %v595_v22 = vor.u32 %v594_v55, %v590_v28  ;;  %v430_v18 = vshll.u32 %v6440_v48, 16  ;;  %v603_v27 = vshrl.u32 %v6445_v52, 16 }
  0x3f   : > { %v5048_v37 = vcombine.low %v399_v44, %v409_v17  ;;  %v591_v39 = vsel %vm6261_vm4, %v586_v0, %v590_v28  ;;  %v417_v42 = vor.u32 %v416_v2, %v413_v59  ;;  %v426_v45 = vrot.slane %v424_v50, 4  ;;  %v6468_v17 = vld [vmem:[%s6217_s28 + $0x4c] sm:$0xf]  ;;  %v6474_v2 = vld [vmem:[%s6217_s28 + $0x50] sm:$0x1] }
  0x40   : > { %v596_v4 = vrot.slane %v595_v22, 4  ;;  %v432_v49 = vrot.slane %v430_v18, 5  ;;  %v605_v20 = vrot.slane %v603_v27, 4  ;;  %v606_v54 = vshll.u32 %v6445_v52, 16 }
  0x41   : > { %5747 = vmatprep.mubr.msk.bf16.mxu0 %vm724_vm3, %v5048_v37  ;;  %v418_v55 = vrot.slane %v417_v42, 4  ;;  %v427_v62 = vor.u32 %v426_v45, %v422_v3  ;;  %v612_v32 = vshll.u32 %v6449_v13, 16  ;;  %v616_v44 = vshrl.u32 %v6449_v13, 16  ;;  %v6480_v42 = vld [vmem:[%s6217_s28 + $0xa8] sm:$0xf] }
  0x42   : > { %v601_v28 = vsel %vm6261_vm4, %v596_v4, %v600_v57  ;;  %v608_v59 = vrot.slane %v606_v54, 5  ;;  %v622_v0 = vshll.u32 %v6455_v26, 16  ;;  %v435_v50 = vshrl.u32 %v6459_v34, 16  ;;  %8957 = vst [vmem:[#allocation10_spill] sm:$0xff] %v6480_v42 }
  0x43   : > { %v5056_v22 = vcombine.low %v591_v39, %v601_v28  ;;  %v423_v18 = vsel %vm6261_vm4, %v418_v55, %v422_v3  ;;  %v428_v27 = vrot.slane %v427_v62, 4  ;;  %v614_v37 = vrot.slane %v612_v32, 5 }
  0x44   : > { %v609_v45 = vor.u32 %v608_v59, %v605_v20  ;;  %v618_v61 = vrot.slane %v616_v44, 4  ;;  %v624_v57 = vrot.slane %v622_v0, 5  ;;  %v437_v4 = vrot.slane %v435_v50, 4  ;;  %v6490_v44 = vld [vmem:[%s6217_s28 + $0xac] sm:$0xf] }
  0x45   : > { %5763 = vmatprep.mubr.msk.bf16.mxu1 %vm724_vm3, %v5056_v22  ;;  %v433_v54 = vsel %vm6261_vm4, %v428_v27, %v432_v49  ;;  %v438_v39 = vshll.u32 %v6459_v34, 16  ;;  %v444_v28 = vshll.u32 %v6468_v17, 16  ;;  %v448_v62 = vshrl.u32 %v6468_v17, 16  ;;  %8958 = vst [vmem:[#allocation11_spill] sm:$0xff] %v6490_v44  ;;  %v6493_v22 = vld [vmem:[%s6217_s28 + $0xb0] sm:$0x1] }
  0x46   : > { %v5049_v3 = vcombine.low %v423_v18, %v433_v54  ;;  %v610_v32 = vrot.slane %v609_v45, 4  ;;  %v619_v55 = vor.u32 %v618_v61, %v614_v37  ;;  %v454_v20 = vshll.u32 %v6474_v2, 16  ;;  %8959 = vst [vmem:[#allocation12_spill] sm:$0xff] %v6493_v22 }
  0x47   : > { %v440_v59 = vrot.slane %v438_v39, 5  ;;  %v446_v0 = vrot.slane %v444_v28, 5  ;;  %v450_v50 = vrot.slane %v448_v62, 4  ;;  %v627_v49 = vshrl.u32 %v6480_v42, 16  ;;  %v6502_v62 = vld [vmem:[%s6217_s28 + $0x54] sm:$0xf] }
  0x48   : > { %5748 = vmatmul.mubr.msk.bf16.gmra.mxu0 %vm724_vm3, %v5049_v3  ;;  %v615_v18 = vsel %vm6261_vm4, %v610_v32, %v614_v37  ;;  %v620_v27 = vrot.slane %v619_v55, 4  ;;  %v456_v61 = vrot.slane %v454_v20, 5  ;;  %v630_v45 = vshll.u32 %v6480_v42, 16  ;;  %v6509_v55 = vld [vmem:[%s6217_s28 + $0x58] sm:$0xf] }
  0x49   : > { %v441_v54 = vor.u32 %v440_v59, %v437_v4  ;;  %v451_v56 = vor.u32 %v450_v50, %v446_v0  ;;  %v629_v39 = vrot.slane %v627_v49, 4  ;;  %v636_v28 = vshll.u32 %v6490_v44, 16  ;;  %v6512_v49 = vld [vmem:[%s6217_s28 + $0x5c] sm:$0x1] }
  0x4a   : > { %v625_v3 = vsel %vm6261_vm4, %v620_v27, %v624_v57  ;;  %v632_v26 = vrot.slane %v630_v45, 5  ;;  %v640_v37 = vshrl.u32 %v6490_v44, 16  ;;  %v646_v32 = vshll.u32 %v6493_v22, 16  ;;  %v1230_v22 = vld [vmem:[%s6217_s28] sm:$0xe] }
  0x4b   : > { %v5057_v4 = vcombine.low %v615_v18, %v625_v3  ;;  %v442_v20 = vrot.slane %v441_v54, 4  ;;  %v452_v59 = vrot.slane %v451_v56, 4  ;;  %v638_v50 = vrot.slane %v636_v28, 5  ;;  %v6523_v54 = vld [vmem:[%s6217_s28 + $0xb4] sm:$0xf] }
  0x4c   : > { %v633_v42 = vor.u32 %v632_v26, %v629_v39  ;;  %v642_v52 = vrot.slane %v640_v37, 4  ;;  %v648_v13 = vrot.slane %v646_v32, 5  ;;  %v459_v57 = vshrl.u32 %v6502_v62, 16  ;;  %8960 = vst [vmem:[#allocation13_spill] sm:$0xff] %v6523_v54  ;;  %v6526_v37 = vld [vmem:[%s6217_s28 + $0xb8] sm:$0xf] }
  0x4d   : > { %5764 = vmatmul.mubr.msk.bf16.gmra.mxu1 %vm724_vm3, %v5057_v4  ;;  %v447_v27 = vsel %vm6261_vm4, %v442_v20, %v446_v0  ;;  %v457_v18 = vsel %vm6261_vm4, %v452_v59, %v456_v61  ;;  %v462_v56 = vshll.u32 %v6502_v62, 16  ;;  %v468_v45 = vshll.u32 %v6509_v55, 16  ;;  %v6531_v61 = vld [vmem:[%s6217_s28 + $0xbc] sm:$0x1] }
  0x4e   : > { %v5050_v26 = vcombine.low %v447_v27, %v457_v18  ;;  %v634_v39 = vrot.slane %v633_v42, 4  ;;  %v643_v28 = vor.u32 %v642_v52, %v638_v50  ;;  %v461_v3 = vrot.slane %v459_v57, 4 }
  0x4f   : > { %v464_v32 = vrot.slane %v462_v56, 5  ;;  %v470_v4 = vrot.slane %v468_v45, 5  ;;  %v472_v0 = vshrl.u32 %v6509_v55, 16  ;;  %v478_v20 = vshll.u32 %v6512_v49, 16 }
  0x50   : > { %5751 = vmatprep.mubr.msk.bf16.mxu0 %vm724_vm3, %v5050_v26  ;;  %v639_v59 = vsel %vm6261_vm4, %v634_v39, %v638_v50  ;;  %v644_v27 = vrot.slane %v643_v28, 4  ;;  %v651_v52 = vshrl.u32 %v6523_v54, 16  ;;  %v654_v42 = vshll.u32 %v6523_v54, 16 }
  0x51   : > { %v465_v57 = vor.u32 %v464_v32, %v461_v3  ;;  %v474_v18 = vrot.slane %v472_v0, 4  ;;  %v480_v56 = vrot.slane %v478_v20, 5  ;;  %v660_v45 = vshll.u32 %v6526_v37, 16 }
  0x52   : > { %v649_v44 = vsel %vm6261_vm4, %v644_v27, %v648_v13  ;;  %v653_v16 = vrot.slane %v651_v52, 4  ;;  %v656_v26 = vrot.slane %v654_v42, 5  ;;  %v664_v38 = vshrl.u32 %v6526_v37, 16 }
  0x53   : > { %v5058_v50 = vcombine.low %v639_v59, %v649_v44  ;;  %v466_v39 = vrot.slane %v465_v57, 4  ;;  %v475_v28 = vor.u32 %v474_v18, %v470_v4  ;;  %v662_v47 = vrot.slane %v660_v45, 5  ;;  %v1232_v57 = vld [vmem:[%s6217_s28 + $0x18] sm:$0xe] }
  0x54   : > { %v657_v54 = vor.u32 %v656_v26, %v653_v16  ;;  %v666_v3 = vrot.slane %v664_v38, 4  ;;  %v670_v32 = vshll.u32 %v6531_v61, 16  ;;  %v5108_v13 = vrot.slane %v1230_v22, 9 }
  0x55   : > { %5767 = vmatprep.mubr.msk.bf16.mxu1 %vm724_vm3, %v5058_v50  ;;  %v471_v44 = vsel %vm6261_vm4, %v466_v39, %v470_v4  ;;  %v476_v20 = vrot.slane %v475_v28, 4  ;;  %v1283_v59 = vrot.slane %v6226_v6, 5  ;;  %v5077_v38 = vcombine.low %v6254_v29, %v6257_v30 }
  0x56   : > { %v658_v16 = vrot.slane %v657_v54, 4  ;;  %v667_v27 = vor.u32 %v666_v3, %v662_v47  ;;  %v672_v52 = vrot.slane %v670_v32, 5  ;;  %v5109_v42 = vrot.slane %v1231_v51, 9 }
  0x57   : > { %v481_v18 = vsel %vm6261_vm4, %v476_v20, %v480_v56  ;;  %v1284_v22 = vsel %vm6547_vm7, %v5108_v13, %v1283_v59  ;;  %v1285_v45 = vrot.slane %v1283_v59, 4  ;;  %v8963_v4 = vrot.slane %v6257_v30, 5 }
  0x58   : > { %v5051_v50 = vcombine.low %v471_v44, %v481_v18  ;;  %v663_v54 = vsel %vm6261_vm4, %v658_v16, %v662_v47  ;;  %v668_v39 = vrot.slane %v667_v27, 4  ;;  %v5076_v51 = vcombine.low %v6223_v5, %v6226_v6  ;;  %v1233_v27 = vld [vmem:[%s6217_s28 + $0x24] sm:$0xe] }
  0x59   : > { %v1292_v26 = vrot.slane %v8963_v4, 4  ;;  %v8964_v28 = vrot.slane %v6229_v7, 5  ;;  %v8965_v3 = vmov %v8963_v4  ;;  %v5078_v13 = vcombine.low %v6296_v8, %v6303_v21  ;;  %v1235_v4 = vld [vmem:[%s6217_s28 + $0x3c] sm:$0xe] }
  0x5a   : > { %v1291_v32 = vsel %vm6547_vm7, %v5109_v42, %v8965_v3  ;;  %v5110_v44 = vrot.slane %v1232_v57, 9  ;;  %5752 = vmatmul.mubr.msk.bf16.gmra.mxu0 %vm724_vm3, %v5051_v50  ;;  %v673_v47 = vsel %vm6261_vm4, %v668_v39, %v672_v52  ;;  %v8966_v6 = vrot.slane %v6267_v41, 5  ;;  %v1234_v42 = vld [vmem:[%s6217_s28 + $0x30] sm:$0xe]  ;;  %v1236_v39 = vld [vmem:[%s6217_s28 + $0x48] sm:$0xe] }
  0x5b   : > { %v1287_v56 = vsel %vm6547_vm7, %v1285_v45, %v8964_v28  ;;  %v1297_v20 = vrot.slane %v6303_v21, 5  ;;  %v5059_v59 = vcombine.low %v663_v54, %v673_v47  ;;  %v1300_v16 = vrot.slane %v6309_v25, 5  ;;  %v1237_v47 = vld [vmem:[%s6217_s28 + $0x54] sm:$0xe]  ;;  %v6842_v21 = vld [vmem:[%s6217_s28 + $0x2c] sm:$0x1] }
  0x5c   : > { %v5125_v5 = vcombine.low %v1284_v22, %v1287_v56  ;;  %v1294_v7 = vsel %vm6547_vm7, %v1292_v26, %v8966_v6  ;;  %v1851_v52 = vsel %vm773_vm0, %v6354_v19, 0  ;;  %v1304_v18 = vrot.slane %v6348_v10, 5 }
  0x5d   : > { %v1298_v41 = vsel %vm6547_vm7, %v5110_v44, %v1297_v20  ;;  %v1299_v57 = vrot.slane %v1297_v20, 4  ;;  %5768 = vmatmul.mubr.msk.bf16.gmra.mxu1 %vm724_vm3, %v5059_v59  ;;  %v5126_v22 = vcombine.low %v1291_v32, %v1294_v7  ;;  %v2577_v25 = vsel %vm773_vm0, %v6322_v40, 0 }
  0x5e   : > { %5807 = vmatprep.mubr.msk.bf16.mxu0 %vm724_vm3, %v5125_v5  ;;  %v1311_v45 = vrot.slane %v6394_v9, 5  ;;  %5773 = vmatprep.mubr.msk.bf16.mxu1 %vm724_vm3, %v5076_v51  ;;  %v5111_v26 = vrot.slane %v1233_v27, 9  ;;  %v1307_v50 = vrot.slane %v6359_v24, 5  ;;  %v5112_v54 = vrot.slane %v1234_v42, 9  ;;  %v6614_v24 = vld [vmem:[%s8910_s1 + $0xc] sm:$0x3] }
  0x5f   : > { %v1301_v19 = vsel %vm6547_vm7, %v1299_v57, %v1300_v16  ;;  %v1306_v56 = vrot.slane %v1304_v18, 4  ;;  %v1314_v32 = vrot.slane %v6402_v33, 5  ;;  %v5113_v44 = vrot.slane %v1235_v4, 9 }
  0x60   : > { %v5127_v28 = vcombine.low %v1298_v41, %v1301_v19  ;;  %v1313_v3 = vrot.slane %v1311_v45, 4  ;;  %v1318_v40 = vrot.slane %v6431_v23, 5  ;;  %v1342_v5 = vrot.slane %v6243_v15, 5 }
  0x61   : > { %v1321_v51 = vrot.slane %v6440_v48, 5  ;;  %v5114_v6 = vrot.slane %v1236_v39, 9  ;;  %v1325_v7 = vrot.slane %v6468_v17, 5  ;;  %v5079_v33 = vcombine.low %v6340_v1, %v6348_v10  ;;  %v1238_v1 = vld [vmem:[%s6217_s28 + $0x60] sm:$0xe] }
  0x62   : > { %5808 = vmatmul.mubr.msk.bf16.vlgmr.msra.gmra.mxu0 %vm724_vm3, %v5126_v22  ;;  %v1305_v20 = vsel %vm6547_vm7, %v5111_v26, %v1304_v18  ;;  %v1320_v59 = vrot.slane %v1318_v40, 4  ;;  %v1328_v16 = vrot.slane %v6474_v2, 5  ;;  %v1308_v48 = vsel %vm6547_vm7, %v1306_v56, %v1307_v50  ;;  %v6642_v22 = vld [vmem:[%s8910_s1 + $0xa] sm:$0x3]  ;;  %v6667_v50 = vld [vmem:[%s6217_s28 + $0x6c] sm:$0xe] }
  0x63   : > { %5874 = vmatpush3.bf16.msra.mxu0 %v2577_v25  ;;  %5811 = vmatprep.mubr.msk.bf16.mxu0 %vm724_vm3, %v5127_v28  ;;  %v1312_v27 = vsel %vm6547_vm7, %v5112_v54, %v1311_v45  ;;  %v1315_v42 = vsel %vm6547_vm7, %v1313_v3, %v1314_v32  ;;  %v1327_v41 = vrot.slane %v1325_v7, 4  ;;  %v6632_v10 = vsel %vm6547_vm7, %v5113_v44, %v1318_v40  ;;  %v1241_v39 = vld [vmem:[%s6217_s28 + $0x84] sm:$0xe]  ;;  %v6696_v44 = vld [vmem:[%s6217_s28 + $0x78] sm:$0xe] }
  0x64   : > { %v6636_v2 = vsel %vm6547_vm7, %v5114_v6, %v1325_v7  ;;  %v5115_v57 = vrot.slane %v1237_v47, 9  ;;  %v1332_v18 = vrot.slane %v6509_v55, 5  ;;  %6052 = vmatprep.subr.msk.bf16.mxu0 %vm773_vm0, %v6614_v24  ;;  %v6652_v25 = vsel %vm6547_vm7, %v1320_v59, %v1321_v51  ;;  %v1242_v40 = vld [vmem:[%s6217_s28 + $0x90] sm:$0xe] }
  0x65   : > { %5774 = vmatmul.mubr.msk.bf16.vlgmr.msra.gmra.mxu1 %vm724_vm3, %v5077_v38  ;;  %v6656_v45 = vsel %vm6547_vm7, %v1327_v41, %v1328_v16  ;;  %v1335_v4 = vrot.slane %v6512_v49, 5  ;;  %v1339_v19 = vrot.slane %v6240_v14, 5  ;;  %v5128_v29 = vcombine.low %v1305_v20, %v1308_v48  ;;  %v8967_v48 = vld [vmem:[#allocation3_spill] sm:$0xff] }
  0x66   : > { %5840 = vmatpush3.bf16.msra.mxu1 %v1851_v52  ;;  %5777 = vmatprep.mubr.msk.bf16.mxu1 %vm724_vm3, %v5078_v13  ;;  %v5080_v30 = vcombine.low %v6389_v60, %v6394_v9  ;;  %v1334_v38 = vrot.slane %v1332_v18, 4  ;;  %v5116_v26 = vrot.slane %v1238_v1, 9  ;;  %v5129_v49 = vcombine.low %v1312_v27, %v1315_v42  ;;  %v1243_v42 = vld [vmem:[%s6217_s28 + $0x9c] sm:$0xe] }
  0x67   : > { %v5081_v52 = vcombine.low %v6426_v11, %v6431_v23  ;;  %v5082_v8 = vcombine.low %v6459_v34, %v6468_v17  ;;  %6051 = vmatprep.subr.msk.bf16.mxu1 %vm773_vm0, %v6642_v22  ;;  %v5130_v60 = vcombine.low %v6632_v10, %v6652_v25  ;;  %v5131_v9 = vcombine.low %v6636_v2, %v6656_v45  ;;  %v8968_v10 = vld [vmem:[#allocation5_spill] sm:$0xff]  ;;  %v8969_v2 = vld [vmem:[#allocation4_spill] sm:$0xff] }
  0x68   : > { %v1341_v54 = vrot.slane %v1339_v19, 4  ;;  %v6686_v28 = vsel %vm6547_vm7, %v5115_v57, %v1332_v18  ;;  %v6690_v56 = vsel %vm6547_vm7, %v1334_v38, %v1335_v4  ;;  %v5117_v32 = vrot.slane %v6667_v50, 9  ;;  %v1244_v18 = vld [vmem:[%s6217_s28 + $0xa8] sm:$0xe]  ;;  %v8971_v38 = vld [vmem:[#allocation8_spill] sm:$0xff] }
  0x69   : > { %v6702_v47 = vsel %vm6547_vm7, %v5116_v26, %v1339_v19  ;;  %v1346_v51 = vrot.slane %v6282_v58, 5  ;;  %v1349_v6 = vrot.slane %v6290_v63, 5  ;;  %v5119_v59 = vrot.slane %v1241_v39, 9  ;;  %v8970_v19 = vld [vmem:[#allocation6_spill] sm:$0xff]  ;;  %v8972_v26 = vld [vmem:[#allocation7_spill] sm:$0xff] }
  0x6a   : > { %5812 = vmatmul.mubr.msk.bf16.gmra.mxu0 %vm724_vm3, %v5128_v29  ;;  %v1360_v16 = vrot.slane %v6373_v43, 5  ;;  %v1363_v27 = vrot.slane %v8967_v48, 5  ;;  %v5132_v41 = vcombine.low %v6686_v28, %v6690_v56  ;;  %v6720_v63 = vsel %vm6547_vm7, %v1341_v54, %v1342_v5  ;;  %v8974_v48 = vld [vmem:[#allocation11_spill] sm:$0xff] }
  0x6b   : > { %5815 = vmatprep.mubr.msk.bf16.mxu0 %vm724_vm3, %v5129_v49  ;;  %v5118_v1 = vrot.slane %v6696_v44, 9  ;;  %v5120_v4 = vrot.slane %v1242_v40, 9  ;;  %v1367_v15 = vrot.slane %v8968_v10, 5  ;;  %v1348_v5 = vrot.slane %v1346_v51, 4  ;;  %v5222_v57 = vld [vmem:[%s6217_s28 + $0xc] sm:$0xf] }
  0x6c   : > { %v6729_v25 = vsel %vm6547_vm7, %v5119_v59, %v1360_v16  ;;  %v1362_v45 = vrot.slane %v1360_v16, 4  ;;  %v1370_v29 = vrot.slane %v8970_v19, 5  ;;  %v5121_v49 = vrot.slane %v1243_v42, 9  ;;  %v8973_v59 = vld [vmem:[#allocation9_spill] sm:$0xff]  ;;  %v8975_v42 = vld [vmem:[#allocation10_spill] sm:$0xff] }
  0x6d   : > { %5778 = vmatmul.mubr.msk.bf16.gmra.mxu1 %vm724_vm3, %v5079_v33  ;;  %v1353_v33 = vrot.slane %v6327_v46, 5  ;;  %v6743_v39 = vsel %vm6547_vm7, %v5120_v4, %v1367_v15  ;;  %v1369_v44 = vrot.slane %v1367_v15, 4  ;;  %v1374_v40 = vrot.slane %v8971_v38, 5  ;;  %v8976_v15 = vld [vmem:[#allocation12_spill] sm:$0xff] }
  0x6e   : > { %5781 = vmatprep.mubr.msk.bf16.mxu1 %vm724_vm3, %v5080_v30  ;;  %v6739_v54 = vsel %vm6547_vm7, %v1362_v45, %v1363_v27  ;;  %v1377_v16 = vrot.slane %v8973_v59, 5  ;;  %v5122_v45 = vrot.slane %v1244_v18, 9  ;;  %v1381_v4 = vrot.slane %v8974_v48, 5 }
  0x6f   : > { %v6753_v27 = vsel %vm6547_vm7, %v1369_v44, %v1370_v29  ;;  %v1384_v50 = vrot.slane %v8976_v15, 5  ;;  %v6763_v19 = vsel %vm6547_vm7, %v5121_v49, %v1374_v40  ;;  %v1376_v7 = vrot.slane %v1374_v40, 4  ;;  %v8977_v29 = vld [vmem:[#allocation13_spill] sm:$0xff]  ;;  %v8978_v15 = vld [vmem:[#allocation2_spill] sm:$0xff]  ;;  %v6778_v49 = vld [vmem:[%s6217_s28 + $0x10] sm:$0xf] }
  0x70   : > { %v6770_v18 = vsel %vm6547_vm7, %v5117_v32, %v1346_v51  ;;  %v6775_v59 = vsel %vm6547_vm7, %v5122_v45, %v1381_v4  ;;  %v1383_v30 = vrot.slane %v1381_v4, 4  ;;  %v5225_v40 = vld [vmem:[%s6217_s28 + $0x18] sm:$0xf]  ;;  %v1355_v20 = vrot.slane %v1353_v33, 4 }
  0x71   : > { %v2095_v44 = vshrl.u32 %v5222_v57, 16  ;;  %v2098_v32 = vshll.u32 %v5222_v57, 16  ;;  %v5133_v51 = vcombine.low %v6702_v47, %v6720_v63  ;;  %v6793_v45 = vsel %vm6547_vm7, %v1348_v5, %v1349_v6  ;;  %v1245_v57 = vld [vmem:[%s6217_s28 + $0xb4] sm:$0xe]  ;;  %v6814_v47 = vld [vmem:[%s6217_s28 + $0x14] sm:$0x1] }
  0x72   : > { %5816 = vmatmul.mubr.msk.bf16.gmra.mxu0 %vm724_vm3, %v5130_v60  ;;  %v1356_v60 = vrot.slane %v8978_v15, 5  ;;  %v6808_v11 = vsel %vm6547_vm7, %v5118_v1, %v1353_v33  ;;  %v2104_v6 = vshll.u32 %v6778_v49, 16  ;;  %v5226_v63 = vld [vmem:[%s6217_s28 + $0x1c] sm:$0xf]  ;;  %v2108_v17 = vshrl.u32 %v6778_v49, 16 }
  0x73   : > { %5819 = vmatprep.mubr.msk.bf16.mxu0 %vm724_vm3, %v5131_v9  ;;  %v6783_v9 = vsel %vm6547_vm7, %v1376_v7, %v1377_v16  ;;  %v6799_v7 = vsel %vm6547_vm7, %v1383_v30, %v1384_v50  ;;  %v2097_v5 = vrot.slane %v2095_v44, 4  ;;  %v2100_v34 = vrot.slane %v2098_v32, 5  ;;  %v5228_v15 = vld [vmem:[%s6217_s28 + $0x24] sm:$0xf]  ;;  %v6827_v44 = vld [vmem:[%s6217_s28 + $0x28] sm:$0xf] }
  0x74   : > { %v2119_v50 = vshrl.u32 %v5225_v40, 16  ;;  %v1357_v1 = vsel %vm6547_vm7, %v1355_v20, %v1356_v60  ;;  %v5123_v33 = vrot.slane %v1245_v57, 9  ;;  %v6822_v30 = vrot.slane %v2104_v6, 5 }
  0x75   : > { %5782 = vmatmul.mubr.msk.bf16.gmra.mxu1 %vm724_vm3, %v5081_v52  ;;  %v1388_v52 = vrot.slane %v6526_v37, 5  ;;  %v2122_v16 = vshll.u32 %v5225_v40, 16  ;;  %v1391_v23 = vrot.slane %v6531_v61, 5  ;;  %v2110_v4 = vrot.slane %v2108_v17, 4 }
  0x76   : > { %5785 = vmatprep.mubr.msk.bf16.mxu1 %vm724_vm3, %v5082_v8  ;;  %v5227_v8 = vld [vmem:[%s6217_s28 + $0x20] sm:$0x1]  ;;  %v2121_v3 = vrot.slane %v2119_v50, 4  ;;  %v2128_v13 = vshll.u32 %v5226_v63, 16  ;;  %v2114_v20 = vshll.u32 %v6814_v47, 16  ;;  %v2132_v57 = vshrl.u32 %v5226_v63, 16 }
  0x77   : > { %v1390_v32 = vrot.slane %v1388_v52, 4  ;;  %v2124_v60 = vrot.slane %v2122_v16, 5  ;;  %v5134_v61 = vcombine.low %v6770_v18, %v6793_v45  ;;  %v5135_v40 = vcombine.low %v6808_v11, %v1357_v1 }
  0x78   : > { %v2101_v6 = vor.u32 %v2100_v34, %v2097_v5  ;;  %v6838_v17 = vrot.slane %v2128_v13, 5  ;;  %v2111_v28 = vor.u32 %v2110_v4, %v6822_v30  ;;  %v2138_v50 = vshll.u32 %v5227_v8, 16  ;;  %v6865_v5 = vld [vmem:[%s6217_s28 + $0x34] sm:$0xf] }
  0x79   : > { %v2125_v56 = vor.u32 %v2124_v60, %v2121_v3  ;;  %v6850_v18 = vsel %vm6547_vm7, %v5123_v33, %v1388_v52  ;;  %v2143_v13 = vshrl.u32 %v5228_v15, 16  ;;  %v2146_v45 = vshll.u32 %v5228_v15, 16  ;;  %v5231_v52 = vld [vmem:[%s6217_s28 + $0x30] sm:$0xf] }
  0x7a   : > { %5820 = vmatmul.mubr.msk.bf16.gmra.mxu0 %vm724_vm3, %v5132_v41  ;;  %v2134_v41 = vrot.slane %v2132_v57, 4  ;;  %v2152_v11 = vshll.u32 %v6827_v44, 16  ;;  %v8980_v3 = vcombine.low %v6236_v12, %v6240_v14  ;;  %v6859_v4 = vsel %vm6547_vm7, %v1390_v32, %v1391_v23 }
  0x7b   : > { %5823 = vmatprep.mubr.msk.bf16.mxu0 %vm724_vm3, %v5133_v51  ;;  %v8979_v51 = vcombine.low %v6502_v62, %v6509_v55  ;;  %v2116_v62 = vrot.slane %v2114_v20, 5  ;;  %v2156_v63 = vshrl.u32 %v6827_v44, 16  ;;  %v2102_v34 = vrot.slane %v2101_v6, 4 }
  0x7c   : > { %v2135_v55 = vor.u32 %v2134_v41, %v6838_v17  ;;  %v2145_v8 = vrot.slane %v2143_v13, 4  ;;  %v2148_v1 = vrot.slane %v2146_v45, 5  ;;  %v6867_v33 = vrot.slane %v2152_v11, 5  ;;  %v6873_v41 = vld [vmem:[%s6217_s28 + $0x38] sm:$0x1] }
  0x7d   : > { %5786 = vmatmul.mubr.msk.bf16.gmra.mxu1 %vm724_vm3, %v8979_v51  ;;  %v2112_v12 = vrot.slane %v2111_v28, 4  ;;  %v2126_v14 = vrot.slane %v2125_v56, 4  ;;  %v2140_v16 = vrot.slane %v2138_v50, 5  ;;  %v2158_v23 = vrot.slane %v2156_v63, 4  ;;  %v5234_v13 = vld [vmem:[%s6217_s28 + $0x3c] sm:$0xf] }
  0x7e   : > { %5789 = vmatprep.mubr.msk.bf16.mxu1 %vm724_vm3, %v8980_v3  ;;  %v2136_v15 = vrot.slane %v2135_v55, 4  ;;  %v2162_v32 = vshll.u32 %v6842_v21, 16  ;;  %v2167_v20 = vshrl.u32 %v5231_v52, 16  ;;  %v2170_v60 = vshll.u32 %v5231_v52, 16 }
  0x7f   : > { %v2149_v57 = vor.u32 %v2148_v1, %v2145_v8  ;;  %v2159_v6 = vor.u32 %v2158_v23, %v6867_v33  ;;  %v2176_v28 = vshll.u32 %v6865_v5, 16  ;;  %v2180_v56 = vshrl.u32 %v6865_v5, 16  ;;  %v5237_v8 = vld [vmem:[%s6217_s28 + $0x48] sm:$0xf]  ;;  %v6900_v1 = vld [vmem:[%s6217_s28 + $0x4c] sm:$0xf] }
  0x80   : > { %v2169_v50 = vrot.slane %v2167_v20, 4  ;;  %v2172_v51 = vrot.slane %v2170_v60, 5  ;;  %v8981_v3 = vcombine.low %v6278_v53, %v6282_v58  ;;  %v5140_v55 = vcombine.low %v6850_v18, %v6859_v4 }
  0x81   : > { %v6879_v45 = vrot.slane %v2176_v28, 5  ;;  %v2182_v11 = vrot.slane %v2180_v56, 4  ;;  %v2117_v63 = vsel %vm6261_vm4, %v2112_v12, %v2116_v62  ;;  %v2131_v52 = vsel %vm6261_vm4, %v2126_v14, %v6838_v17 }
  0x82   : > { %5824 = vmatmul.mubr.msk.bf16.gmra.mxu0 %vm724_vm3, %v5134_v61  ;;  %v6882_v61 = vld [vmem:[%s6217_s28 + $0x40] sm:$0xf]  ;;  %v8982_v53 = vcombine.low %v6316_v35, %v6327_v46  ;;  %v2141_v58 = vsel %vm6261_vm4, %v2136_v15, %v2140_v16  ;;  %v2150_v23 = vrot.slane %v2149_v57, 4  ;;  %v2173_v20 = vor.u32 %v2172_v51, %v2169_v50  ;;  %v6934_v50 = vld [vmem:[%s6217_s28 + $0x44] sm:$0x1] }
  0x83   : > { %5827 = vmatprep.mubr.msk.bf16.mxu0 %vm724_vm3, %v5135_v40  ;;  %v2107_v40 = vsel %vm6261_vm4, %v2102_v34, %v6822_v30  ;;  %v2160_v30 = vrot.slane %v2159_v6, 4  ;;  %v2164_v34 = vrot.slane %v2162_v32, 5  ;;  %v2186_v62 = vshll.u32 %v6873_v41, 16  ;;  %v5240_v51 = vld [vmem:[%s6217_s28 + $0x54] sm:$0xf] }
  0x84   : > { %v2191_v12 = vshrl.u32 %v5234_v13, 16  ;;  %v2194_v17 = vshll.u32 %v5234_v13, 16  ;;  %v6911_v14 = vsel %vm773_vm0, %v6642_v22, 0  ;;  %v2183_v35 = vor.u32 %v2182_v11, %v6879_v45 }
  0x85   : > { %5790 = vmatmul.mubr.msk.bf16.gmra.mxu1 %vm724_vm3, %v8981_v3  ;;  %v2200_v46 = vshll.u32 %v6882_v61, 16  ;;  %v2204_v16 = vshrl.u32 %v6882_v61, 16  ;;  %v6916_v15 = vcombine.low %v2107_v40, %v2117_v63  ;;  %v6920_v32 = vsel %vm773_vm0, %v6614_v24, 0  ;;  %v6943_v40 = vld [vmem:[%s6217_s28 + $0x58] sm:$0xf] }
  0x86   : > { %5793 = vmatprep.mubr.msk.bf16.mxu1 %vm724_vm3, %v8982_v53  ;;  %v2215_v60 = vshrl.u32 %v5237_v8, 16  ;;  %v2218_v57 = vshll.u32 %v5237_v8, 16  ;;  %v8983_v6 = vcombine.low %v6729_v25, %v6739_v54  ;;  %v6926_v22 = vcombine.low %v2131_v52, %v2141_v58  ;;  %v6948_v8 = vld [vmem:[%s6217_s28 + $0x50] sm:$0x1] }
  0x87   : > { %v2155_v28 = vsel %vm6261_vm4, %v2150_v23, %v6867_v33  ;;  %v2165_v56 = vsel %vm6261_vm4, %v2160_v30, %v2164_v34  ;;  %v2224_v24 = vshll.u32 %v6900_v1, 16  ;;  %v8984_v25 = vcombine.low %v6743_v39, %v6753_v27  ;;  %v5243_v34 = vld [vmem:[%s6217_s28 + $0x60] sm:$0xf] }
  0x88   : > { %v2174_v54 = vrot.slane %v2173_v20, 4  ;;  %v2188_v13 = vrot.slane %v2186_v62, 5  ;;  %v2193_v11 = vrot.slane %v2191_v12, 4  ;;  %v2196_v3 = vrot.slane %v2194_v17, 5 }
  0x89   : > { %v2184_v33 = vrot.slane %v2183_v35, 4  ;;  %v6945_v63 = vrot.slane %v2200_v46, 5  ;;  %v2206_v52 = vrot.slane %v2204_v16, 4  ;;  %v2228_v53 = vshrl.u32 %v6900_v1, 16  ;;  %v6965_v35 = vld [vmem:[%s6217_s28 + $0x5c] sm:$0x1] }
  0x8a   : > { %5828 = vmatmul.mubr.msk.bf16.gmra.mxu0 %vm724_vm3, %v8983_v6  ;;  %v8985_v39 = vcombine.low %v6366_v36, %v6373_v43  ;;  %v2217_v27 = vrot.slane %v2215_v60, 4  ;;  %v2220_v58 = vrot.slane %v2218_v57, 5  ;;  %v2239_v23 = vshrl.u32 %v5240_v51, 16 }
  0x8b   : > { %5831 = vmatprep.mubr.msk.bf16.mxu0 %vm724_vm3, %v8984_v25  ;;  %v2242_v30 = vshll.u32 %v5240_v51, 16  ;;  %v8986_v20 = vcombine.low %v8969_v2, %v8968_v10  ;;  %v6960_v62 = vcombine.low %v2155_v28, %v2165_v56  ;;  %v6962_v12 = vrot.slane %v2224_v24, 5  ;;  %v6978_v28 = vld [vmem:[%s6217_s28 + $0x64] sm:$0xf] }
  0x8c   : > { %v2230_v17 = vrot.slane %v2228_v53, 4  ;;  %v2248_v36 = vshll.u32 %v6943_v40, 16  ;;  %v2210_v43 = vshll.u32 %v6934_v50, 16  ;;  %v2241_v46 = vrot.slane %v2239_v23, 4 }
  0x8d   : > { %5794 = vmatmul.mubr.msk.bf16.gmra.mxu1 %vm724_vm3, %v8985_v39  ;;  %v2244_v16 = vrot.slane %v2242_v30, 5  ;;  %v2252_v60 = vshrl.u32 %v6943_v40, 16  ;;  %v2179_v10 = vsel %vm6261_vm4, %v2174_v54, %v6879_v45  ;;  %v2189_v2 = vsel %vm6261_vm4, %v2184_v33, %v2188_v13  ;;  %v7000_v30 = vld [vmem:[%s6217_s28 + $0x68] sm:$0x1] }
  0x8e   : > { %5797 = vmatprep.mubr.msk.bf16.mxu1 %vm724_vm3, %v8986_v20  ;;  %v2197_v57 = vor.u32 %v2196_v3, %v2193_v11  ;;  %v6975_v6 = vrot.slane %v2248_v36, 5  ;;  %v2207_v56 = vor.u32 %v2206_v52, %v6945_v63  ;;  %v2221_v24 = vor.u32 %v2220_v58, %v2217_v27  ;;  %v5246_v3 = vld [vmem:[%s6217_s28 + $0x6c] sm:$0xf]  ;;  %v6997_v27 = vld [vmem:[%s6217_s28 + $0x70] sm:$0xf] }
  0x8f   : > { %v2234_v51 = vshll.u32 %v6948_v8, 16  ;;  %v2254_v25 = vrot.slane %v2252_v60, 4  ;;  %v8987_v53 = vcombine.low %v6763_v19, %v6783_v9  ;;  %v2231_v45 = vor.u32 %v2230_v17, %v6962_v12 }
  0x90   : > { %v2245_v54 = vor.u32 %v2244_v16, %v2241_v46  ;;  %v2263_v13 = vshrl.u32 %v5243_v34, 16  ;;  %v2266_v11 = vshll.u32 %v5243_v34, 16  ;;  %v8988_v33 = vcombine.low %v6775_v59, %v6799_v7  ;;  %v5249_v16 = vld [vmem:[%s6217_s28 + $0x78] sm:$0xf] }
  0x91   : > { %v2255_v52 = vor.u32 %v2254_v25, %v6975_v6  ;;  %v2258_v39 = vshll.u32 %v6965_v35, 16  ;;  %v2272_v19 = vshll.u32 %v6978_v28, 16  ;;  %v2276_v9 = vshrl.u32 %v6978_v28, 16 }
  0x92   : > { %5832 = vmatmul.mubr.msk.bf16.gmra.mxu0 %vm724_vm3, %v8987_v53  ;;  %v2198_v58 = vrot.slane %v2197_v57, 4  ;;  %v2212_v23 = vrot.slane %v2210_v43, 5  ;;  %v2265_v34 = vrot.slane %v2263_v13, 4  ;;  %v2268_v20 = vrot.slane %v2266_v11, 5 }
  0x93   : > { %5835 = vmatprep.mubr.msk.bf16.mxu0 %vm724_vm3, %v8988_v33  ;;  %v8989_v59 = vcombine.low %v8972_v26, %v8971_v38  ;;  %v7006_v7 = vcombine.low %v2179_v10, %v2189_v2  ;;  %v2208_v17 = vrot.slane %v2207_v56, 4  ;;  %v2222_v36 = vrot.slane %v2221_v24, 4  ;;  %v7016_v2 = vld [vmem:[%s6217_s28 + $0x7c] sm:$0xf] }
  0x94   : > { %v7008_v46 = vrot.slane %v2272_v19, 5  ;;  %v8990_v43 = vcombine.low %v8975_v42, %v8974_v48  ;;  %v2232_v60 = vrot.slane %v2231_v45, 4  ;;  %v2236_v57 = vrot.slane %v2234_v51, 5  ;;  %8991 = vst [vmem:[#allocation3_spill] sm:$0xff] %v7016_v2  ;;  %v5252_v19 = vld [vmem:[%s6217_s28 + $0x84] sm:$0xf] }
  0x95   : > { %5798 = vmatmul.mubr.msk.bf16.gmra.mxu1 %vm724_vm3, %v8989_v59  ;;  %v2246_v25 = vrot.slane %v2245_v54, 4  ;;  %v2278_v38 = vrot.slane %v2276_v9, 4  ;;  %v2256_v26 = vrot.slane %v2255_v52, 4  ;;  %v2260_v53 = vrot.slane %v2258_v39, 5 }
  0x96   : > { %5801 = vmatprep.mubr.msk.bf16.mxu1 %vm724_vm3, %v8990_v43  ;;  %v2269_v13 = vor.u32 %v2268_v20, %v2265_v34  ;;  %v2287_v10 = vshrl.u32 %v5246_v3, 16  ;;  %v2203_v56 = vsel %vm6261_vm4, %v2198_v58, %v6945_v63  ;;  %v2290_v24 = vshll.u32 %v5246_v3, 16  ;;  %v6096_v63 = vld [vmem:[%s6217_s28 + $0xc] sm:$0xff]   ;;  %v7050_v34 = vld [vmem:[%s6217_s28 + $0x88] sm:$0xf] }
  0x97   : > { %v2296_v48 = vshll.u32 %v6997_v27, 16  ;;  %v2300_v42 = vshrl.u32 %v6997_v27, 16  ;;  %v2213_v51 = vsel %vm6261_vm4, %v2208_v17, %v2212_v23  ;;  %v2227_v45 = vsel %vm6261_vm4, %v2222_v36, %v6962_v12  ;;  %8992 = vst [vmem:[#allocation5_spill] sm:$0xff] %v7050_v34  ;;  %v7059_v36 = vld [vmem:[%s6217_s28 + $0x74] sm:$0x1] }
  0x98   : > { %v2279_v54 = vor.u32 %v2278_v38, %v7008_v46  ;;  %v2282_v11 = vshll.u32 %v7000_v30, 16  ;;  %v2237_v3 = vsel %vm6261_vm4, %v2232_v60, %v2236_v57  ;;  %v2251_v33 = vsel %vm6261_vm4, %v2246_v25, %v6975_v6  ;;  %8994 = vst [vmem:[#allocation4_spill] sm:$0xff] %v7059_v36  ;;  %v7069_v38 = vld [vmem:[%s6217_s28 + $0x80] sm:$0x1] }
  0x99   : > { %v2311_v52 = vshrl.u32 %v5249_v16, 16  ;;  %v2314_v12 = vshll.u32 %v5249_v16, 16  ;;  %v2261_v18 = vsel %vm6261_vm4, %v2256_v26, %v2260_v53  ;;  %v2270_v4 = vrot.slane %v2269_v13, 4  ;;  %8995 = vst [vmem:[#allocation6_spill] sm:$0xff] %v7069_v38  ;;  %v7072_v26 = vld [vmem:[%s6217_s28 + $0x8c] sm:$0x1] }
  0x9a   : > { %5836 = vmatmul.mubr.msk.bf16.gmra.mxu0 %vm724_vm3, %v5140_v55  ;;  %v2289_v55 = vrot.slane %v2287_v10, 4  ;;  %v2320_v39 = vshll.u32 %v7016_v2, 16  ;;  %v2292_v9 = vrot.slane %v2290_v24, 5  ;;  %v7046_v58 = vrot.slane %v2296_v48, 5  ;;  %8996 = vst [vmem:[#allocation8_spill] sm:$0xff] %v7072_v26  ;;  %v6097_v10 = vld [vmem:[%s6217_s28 + $0x18] sm:$0xff]  }
  0x9b   : > { %5875 = vmatprep.mubr.msk.bf16.mxu0 %vm724_vm3, %v6916_v15  ;;  %v2302_v23 = vrot.slane %v2300_v42, 4  ;;  %v2324_v6 = vshrl.u32 %v7016_v2, 16  ;;  %v8993_v15 = vcombine.low %v8977_v29, %v6526_v37  ;;  %v7056_v20 = vcombine.low %v2203_v56, %v2213_v51  ;;  %v5255_v51 = vld [vmem:[%s6217_s28 + $0x90] sm:$0xf] }
  0x9c   : > { %v2280_v59 = vrot.slane %v2279_v54, 4  ;;  %v2284_v17 = vrot.slane %v2282_v11, 5  ;;  %v2313_v16 = vrot.slane %v2311_v52, 4  ;;  %v2316_v43 = vrot.slane %v2314_v12, 5 }
  0x9d   : > { %5802 = vmatmul.mubr.msk.bf16.gmra.mxu1 %vm724_vm3, %v8993_v15  ;;  %v7062_v60 = vrot.slane %v2320_v39, 5  ;;  %v2326_v57 = vrot.slane %v2324_v6, 4  ;;  %v2335_v25 = vshrl.u32 %v5252_v19, 16  ;;  %v7064_v37 = vcombine.low %v2227_v45, %v2237_v3  ;;  %v7083_v45 = vld [vmem:[%s6217_s28 + $0x94] sm:$0xf] }
  0x9e   : > { %5841 = vmatprep.mubr.msk.bf16.mxu1 %vm724_vm3, %v6096_v63  ;;  %v7066_v29 = vcombine.low %v2251_v33, %v2261_v18  ;;  %v2338_v53 = vshll.u32 %v5252_v19, 16  ;;  %v2344_v13 = vshll.u32 %v7050_v34, 16  ;;  %v2275_v56 = vsel %vm6261_vm4, %v2270_v4, %v7008_v46  ;;  %8997 = vst [vmem:[#allocation7_spill] sm:$0xff] %v7083_v45  ;;  %v7091_v33 = vld [vmem:[%s8910_s1 + $0x10] sm:$0x3]  ;;  %v6098_v46 = vld [vmem:[%s6217_s28 + $0x24] sm:$0xff]  }
  0x9f   : > { %v2293_v24 = vor.u32 %v2292_v9, %v2289_v55  ;;  %v2303_v48 = vor.u32 %v2302_v23, %v7046_v58  ;;  %v2306_v42 = vshll.u32 %v7059_v36, 16  ;;  %v2337_v54 = vrot.slane %v2335_v25, 4  ;;  %8998 = vst [vmem:[#allocation9_spill] sm:$0xff] %v7091_v33 }
  0xa0   : > { %v2340_v11 = vrot.slane %v2338_v53, 5  ;;  %v7085_v63 = vrot.slane %v2344_v13, 5  ;;  %v2348_v3 = vshrl.u32 %v7050_v34, 16  ;;  %v2285_v52 = vsel %vm6261_vm4, %v2280_v59, %v2284_v17 }
  0xa1   : > { %v2317_v12 = vor.u32 %v2316_v43, %v2313_v16  ;;  %v2327_v18 = vor.u32 %v2326_v57, %v7062_v60  ;;  %v2330_v4 = vshll.u32 %v7069_v38, 16  ;;  %v2359_v19 = vshrl.u32 %v5255_v51, 16  ;;  %v7125_v57 = vld [vmem:[%s6217_s28 + $0xa0] sm:$0xf] }
  0xa2   : > { %5876 = vmatmul.mubr.msk.bf16.vlgmr.msra.gmra.mxu0 %vm724_vm3, %v6926_v22  ;;  %v2341_v55 = vor.u32 %v2340_v11, %v2337_v54  ;;  %v2350_v39 = vrot.slane %v2348_v3, 4  ;;  %v2362_v9 = vshll.u32 %v5255_v51, 16  ;;  %v5258_v22 = vld [vmem:[%s6217_s28 + $0x9c] sm:$0xf]  ;;  %v7104_v23 = vrot.slane %v2293_v24, 4  ;;  %9000 = vst [vmem:[#allocation10_spill] sm:$0xff] %v7125_v57 }
  0xa3   : > { %5942 = vmatpush3.bf16.msra.mxu0 %v6920_v32  ;;  %5879 = vmatprep.mubr.msk.bf16.mxu0 %vm724_vm3, %v6960_v62  ;;  %v7106_v6 = vrot.slane %v2306_v42, 5  ;;  %v2354_v15 = vshll.u32 %v7072_v26, 16  ;;  %v2368_v59 = vshll.u32 %v7083_v45, 16  ;;  %v7113_v32 = vld [vmem:[%s8910_s1 + $0xe] sm:$0x3]  ;;  %v7118_v62 = vcombine.low %v2275_v56, %v2285_v52 }
  0xa4   : > { %8999 = vst [vmem:[#allocation11_spill] sm:$0xff] %v7113_v32  ;;  %6054 = vmatprep.subr.msk.bf16.mxu0 %vm773_vm0, %v7091_v33  ;;  %v7120_v17 = vrot.slane %v2303_v48, 4  ;;  %v2351_v16 = vor.u32 %v2350_v39, %v7085_v63  ;;  %v2372_v43 = vshrl.u32 %v7083_v45, 16  ;;  %v7129_v25 = vrot.slane %v2317_v12, 4  ;;  %v7138_v56 = vld [vmem:[%s6217_s28 + $0x98] sm:$0x1] }
  0xa5   : > { %5842 = vmatmul.mubr.msk.bf16.vlgmr.msra.gmra.mxu1 %vm724_vm3, %v6097_v10  ;;  %v7131_v53 = vrot.slane %v2327_v18, 4  ;;  %v7133_v13 = vrot.slane %v2330_v4, 5  ;;  %v7135_v10 = vrot.slane %v2341_v55, 4  ;;  %9001 = vst [vmem:[#allocation12_spill] sm:$0xff] %v7138_v56  ;;  %v2361_v24 = vrot.slane %v2359_v19, 4  ;;  %v6100_v19 = vld [vmem:[%s6217_s28 + $0x3c] sm:$0xff]  }
  0xa6   : > { %5908 = vmatpush3.bf16.msra.mxu1 %v6911_v14  ;;  %5845 = vmatprep.mubr.msk.bf16.mxu1 %vm724_vm3, %v6098_v46  ;;  %v2364_v48 = vrot.slane %v2362_v9, 5  ;;  %v2383_v42 = vshrl.u32 %v5258_v22, 16  ;;  %v2386_v51 = vshll.u32 %v5258_v22, 16  ;;  %v6099_v14 = vld [vmem:[%s6217_s28 + $0x30] sm:$0xff]   ;;  %v7147_v11 = vrot.slane %v2354_v15, 5 }
  0xa7   : > { %6053 = vmatprep.subr.msk.bf16.mxu1 %vm773_vm0, %v7113_v32  ;;  %v7149_v3 = vrot.slane %v2368_v59, 5  ;;  %v2392_v46 = vshll.u32 %v7125_v57, 16  ;;  %v5261_v52 = vld [vmem:[%s6217_s28 + $0xa8] sm:$0xf]  ;;  %v7153_v12 = vrot.slane %v2351_v16, 4  ;;  %v2374_v18 = vrot.slane %v2372_v43, 4 }
  0xa8   : > { %v2378_v4 = vshll.u32 %v7138_v56, 16  ;;  %v2396_v55 = vshrl.u32 %v7125_v57, 16  ;;  %v7158_v39 = vld [vmem:[%s6217_s28 + $0xac] sm:$0xf]  ;;  %v2365_v59 = vor.u32 %v2364_v48, %v2361_v24  ;;  %v7182_v16 = vld [vmem:[%s6217_s28 + $0xa4] sm:$0x1] }
  0xa9   : > { %9002 = vst [vmem:[#allocation13_spill] sm:$0xff] %v7158_v39  ;;  %9003 = vst [vmem:[#allocation2_spill] sm:$0xff] %v7182_v16  ;;  %v2385_v43 = vrot.slane %v2383_v42, 4  ;;  %v2388_v22 = vrot.slane %v2386_v51, 5  ;;  %v2407_v54 = vshrl.u32 %v5261_v52, 16  ;;  %v7184_v9 = vrot.slane %v2392_v46, 5 }
  0xaa   : > { %5880 = vmatmul.mubr.msk.bf16.gmra.mxu0 %vm724_vm3, %v7006_v7  ;;  %v2398_v32 = vrot.slane %v2396_v55, 4  ;;  %v2410_v15 = vshll.u32 %v5261_v52, 16  ;;  %v2416_v33 = vshll.u32 %v7158_v39, 16  ;;  %v5264_v57 = vld [vmem:[%s6217_s28 + $0xb4] sm:$0xf]  ;;  %v2375_v24 = vor.u32 %v2374_v18, %v7149_v3 }
  0xab   : > { %5883 = vmatprep.mubr.msk.bf16.mxu0 %vm724_vm3, %v7056_v20  ;;  %v2357_v20 = vsel %vm6261_vm4, %v7153_v12, %v7147_v11  ;;  %v7194_v48 = vrot.slane %v2378_v4, 5  ;;  %v7197_v42 = vld [vmem:[%s6217_s28 + $0xb0] sm:$0x1]  ;;  %v2409_v51 = vrot.slane %v2407_v54, 4  ;;  %v7200_v46 = vld [vmem:[%s6217_s28 + $0xb8] sm:$0xf]  ;;  %v2389_v18 = vor.u32 %v2388_v22, %v2385_v43 }
  0xac   : > { %9004 = vst [vmem:[#allocation14_spill] sm:$0xff] %v7197_v42  ;;  %9005 = vst [vmem:[#allocation15_spill] sm:$0xff] %v7200_v46  ;;  %v2412_v52 = vrot.slane %v2410_v15, 5  ;;  %v7204_v55 = vrot.slane %v2416_v33, 5  ;;  %v2420_v11 = vshrl.u32 %v7158_v39, 16  ;;  %v7207_v12 = vrot.slane %v2365_v59, 4 }
  0xad   : > { %5846 = vmatmul.mubr.msk.bf16.gmra.mxu1 %vm724_vm3, %v6099_v14  ;;  %v2402_v14 = vshll.u32 %v7182_v16, 16  ;;  %v7210_v4 = vld [vmem:[%s6217_s28 + $0xbc] sm:$0x1]  ;;  %v2431_v54 = vshrl.u32 %v5264_v57, 16  ;;  %v2434_v7 = vshll.u32 %v5264_v57, 16  ;;  %v2399_v56 = vor.u32 %v2398_v32, %v7184_v9  ;;  %v6101_v16 = vld [vmem:[%s6217_s28 + $0x48] sm:$0xff]  }
  0xae   : > { %5849 = vmatprep.mubr.msk.bf16.mxu1 %vm724_vm3, %v6100_v19  ;;  %v2422_v45 = vrot.slane %v2420_v11, 4  ;;  %v2426_v19 = vshll.u32 %v7197_v42, 16  ;;  %v2440_v15 = vshll.u32 %v7200_v46, 16  ;;  %v5267_v33 = vld [vmem:[%s6217_s28 + $0xc0] sm:$0xf]  ;;  %v2413_v26 = vor.u32 %v2412_v52, %v2409_v51  ;;  %v6102_v57 = vld [vmem:[%s6217_s28 + $0x54] sm:$0xff]  }
  0xaf   : > { %v2433_v39 = vrot.slane %v2431_v54, 4  ;;  %v2436_v34 = vrot.slane %v2434_v7, 5  ;;  %v2444_v59 = vshrl.u32 %v7200_v46, 16  ;;  %v7219_v22 = vld [vmem:[%s6217_s28 + $0xc4] sm:$0xf]  ;;  %v2376_v43 = vrot.slane %v2375_v24, 4 }
  0xb0   : > { %v2404_v32 = vrot.slane %v2402_v14, 5  ;;  %v2423_v11 = vor.u32 %v2422_v45, %v7204_v55  ;;  %v2442_v42 = vrot.slane %v2440_v15, 5  ;;  %v2450_v7 = vshll.u32 %v7210_v4, 16  ;;  %v7231_v45 = vld [vmem:[%s6217_s28 + $0xc8] sm:$0x1] }
  0xb1   : > { %v2437_v51 = vor.u32 %v2436_v34, %v2433_v39  ;;  %v2446_v52 = vrot.slane %v2444_v59, 4  ;;  %v2455_v54 = vshrl.u32 %v5267_v33, 16  ;;  %v2390_v46 = vrot.slane %v2389_v18, 4 }
  0xb2   : > { %5884 = vmatmul.mubr.msk.bf16.gmra.mxu0 %vm724_vm3, %v7064_v37  ;;  %v2400_v38 = vrot.slane %v2399_v56, 4  ;;  %v2458_v2 = vshll.u32 %v5267_v33, 16  ;;  %v2464_v37 = vshll.u32 %v7219_v22, 16  ;;  %v2414_v24 = vrot.slane %v2413_v26, 4 }
  0xb3   : > { %5887 = vmatprep.mubr.msk.bf16.mxu0 %vm724_vm3, %v7066_v29  ;;  %v2428_v14 = vrot.slane %v2426_v19, 5  ;;  %v2447_v36 = vor.u32 %v2446_v52, %v2442_v42  ;;  %v2457_v15 = vrot.slane %v2455_v54, 4  ;;  %v2424_v34 = vrot.slane %v2423_v11, 4 }
  0xb4   : > { %v2460_v29 = vrot.slane %v2458_v2, 5  ;;  %v7234_v39 = vrot.slane %v2464_v37, 5  ;;  %v2468_v56 = vshrl.u32 %v7219_v22, 16  ;;  %v9006_v26 = vsel %vm6261_vm4, %v7120_v17, %v7106_v6 }
  0xb5   : > { %5850 = vmatmul.mubr.msk.bf16.gmra.mxu1 %vm724_vm3, %v6101_v16  ;;  %v9007_v16 = vsel %vm6261_vm4, %v7104_v23, %v7046_v58  ;;  %v2438_v19 = vrot.slane %v2437_v51, 4  ;;  %v2448_v33 = vrot.slane %v2447_v36, 4  ;;  %v2452_v2 = vrot.slane %v2450_v7, 5  ;;  %v6103_v23 = vld [vmem:[%s6217_s28 + $0x60] sm:$0xff]  }
  0xb6   : > { %5853 = vmatprep.mubr.msk.bf16.mxu1 %vm724_vm3, %v6102_v57  ;;  %v5279_v18 = vcombine.low %v9007_v16, %v9006_v26  ;;  %v9008_v59 = vsel %vm6261_vm4, %v7131_v53, %v7133_v13  ;;  %v9009_v6 = vsel %vm6261_vm4, %v7129_v25, %v7062_v60  ;;  %v2461_v57 = vor.u32 %v2460_v29, %v2457_v15  ;;  %v5305_v13 = vld [vmem:[%s6217_s28 + $0x24] sm:$0xe]  ;;  %v5308_v26 = vld [vmem:[%s6217_s28 + $0x48] sm:$0xe] }
  0xb7   : > { %v5280_v17 = vcombine.low %v9009_v6, %v9008_v59  ;;  %v2470_v11 = vrot.slane %v2468_v56, 4  ;;  %v2474_v58 = vshll.u32 %v7231_v45, 16  ;;  %v9010_v36 = vsel %vm6261_vm4, %v7135_v10, %v7085_v63  ;;  %v6104_v63 = vld [vmem:[%s6217_s28 + $0x6c] sm:$0xff]   ;;  %v5309_v6 = vld [vmem:[%s6217_s28 + $0x54] sm:$0xe] }
  0xb8   : > { %v5281_v51 = vcombine.low %v9010_v36, %v2357_v20  ;;  %v2371_v53 = vsel %vm6261_vm4, %v7207_v12, %v7149_v3  ;;  %v2381_v60 = vsel %vm6261_vm4, %v2376_v43, %v7194_v48  ;;  %v2395_v25 = vsel %vm6261_vm4, %v2390_v46, %v7184_v9  ;;  %v7287_v12 = vld [vmem:[%s6217_s28 + $0xc] sm:$0xe] }
  0xb9   : > { %v2405_v10 = vsel %vm6261_vm4, %v2400_v38, %v2404_v32  ;;  %v2419_v3 = vsel %vm6261_vm4, %v2414_v24, %v7204_v55  ;;  %v2429_v20 = vsel %vm6261_vm4, %v2424_v34, %v2428_v14  ;;  %v2471_v48 = vor.u32 %v2470_v11, %v7234_v39  ;;  %v5306_v55 = vld [vmem:[%s6217_s28 + $0x30] sm:$0xe]  ;;  %v5307_v14 = vld [vmem:[%s6217_s28 + $0x3c] sm:$0xe] }
  0xba   : > { %5888 = vmatmul.mubr.msk.bf16.gmra.mxu0 %vm724_vm3, %v7118_v62  ;;  %v2443_v62 = vsel %vm6261_vm4, %v2438_v19, %v2442_v42  ;;  %v2453_v38 = vsel %vm6261_vm4, %v2448_v33, %v2452_v2  ;;  %v7294_v9 = vrot.slane %v2461_v57, 4  ;;  %v2838_v46 = vrot.slane %v6778_v49, 5  ;;  %v6105_v57 = vld [vmem:[%s6217_s28 + $0x78] sm:$0xff]  }
  0xbb   : > { %5891 = vmatprep.mubr.msk.bf16.mxu0 %vm724_vm3, %v5279_v18  ;;  %v7298_v43 = vcombine.low %v2371_v53, %v2381_v60  ;;  %v7300_v32 = vrot.slane %v2471_v48, 4  ;;  %v7302_v52 = vrot.slane %v2474_v58, 5  ;;  %v5321_v7 = vrot.slane %v5305_v13, 9  ;;  %v6106_v53 = vld [vmem:[%s6217_s28 + $0x84] sm:$0xff]   ;;  %v5310_v13 = vld [vmem:[%s6217_s28 + $0x60] sm:$0xe] }
  0xbc   : > { %v7305_v54 = vcombine.low %v2395_v25, %v2405_v10  ;;  %v7307_v42 = vcombine.low %v2419_v3, %v2429_v20  ;;  %v5319_v37 = vrot.slane %v7287_v12, 9  ;;  %v2852_v24 = vrot.slane %v6827_v44, 5  ;;  %v6112_v49 = vld [vmem:[%s6217_s28 + $0x18] sm:$0xff]  }
  0xbd   : > { %5854 = vmatmul.mubr.msk.bf16.gmra.mxu1 %vm724_vm3, %v6103_v23  ;;  %v7313_v15 = vcombine.low %v2443_v62, %v2453_v38  ;;  %v2841_v34 = vrot.slane %v6814_v47, 5  ;;  %v2855_v29 = vrot.slane %v6842_v21, 5  ;;  %v5322_v56 = vrot.slane %v5306_v55, 9  ;;  %v5312_v55 = vld [vmem:[%s6217_s28 + $0x78] sm:$0xe] }
  0xbe   : > { %5857 = vmatprep.mubr.msk.bf16.mxu1 %vm724_vm3, %v6104_v63  ;;  %v2467_v16 = vsel %vm6261_vm4, %v7294_v9, %v7234_v39  ;;  %v7324_v44 = vrot.slane %v2838_v46, 4  ;;  %v7328_v18 = vsel %vm6547_vm7, %v5321_v7, %v2852_v24  ;;  %v2854_v19 = vrot.slane %v2852_v24, 4 }
  0xbf   : > { %v2477_v21 = vsel %vm6261_vm4, %v7300_v32, %v7302_v52  ;;  %v2859_v33 = vrot.slane %v6865_v5, 5  ;;  %v2862_v2 = vrot.slane %v6873_v41, 5  ;;  %v5323_v59 = vrot.slane %v5307_v14, 9  ;;  %v6111_v52 = vld [vmem:[%s6217_s28 + $0xc0] sm:$0xff]  }
  0xc0   : > { %v7340_v11 = vsel %vm6547_vm7, %v2854_v19, %v2855_v29  ;;  %v2866_v58 = vrot.slane %v6882_v61, 5  ;;  %v2869_v23 = vrot.slane %v6934_v50, 5  ;;  %v5324_v36 = vrot.slane %v5308_v26, 9  ;;  %v5313_v19 = vld [vmem:[%s6217_s28 + $0x84] sm:$0xe] }
  0xc1   : > { %v5338_v5 = vcombine.low %v7328_v18, %v7340_v11  ;;  %v7350_v41 = vsel %vm6547_vm7, %v5322_v56, %v2859_v33  ;;  %v2861_v60 = vrot.slane %v2859_v33, 4  ;;  %v2873_v25 = vrot.slane %v6900_v1, 5 }
  0xc2   : > { %5892 = vmatmul.mubr.msk.bf16.gmra.mxu0 %vm724_vm3, %v5280_v17  ;;  %v7357_v61 = vsel %vm6547_vm7, %v5323_v59, %v2866_v58  ;;  %v2868_v50 = vrot.slane %v2866_v58, 4  ;;  %v2876_v17 = vrot.slane %v6948_v8, 5  ;;  %v5325_v63 = vrot.slane %v5309_v6, 9  ;;  %v9011_v59 = vld [vmem:[#allocation4_spill] sm:$0xff] }
  0xc3   : > { %5895 = vmatprep.mubr.msk.bf16.mxu0 %vm724_vm3, %v5281_v51  ;;  %v7362_v10 = vsel %vm6547_vm7, %v2861_v60, %v2862_v2  ;;  %v7366_v3 = vsel %vm6547_vm7, %v5324_v36, %v2873_v25  ;;  %v2875_v1 = vrot.slane %v2873_v25, 4  ;;  %v2880_v20 = vrot.slane %v6943_v40, 5  ;;  %v5311_v51 = vld [vmem:[%s6217_s28 + $0x6c] sm:$0xe]  ;;  %v6107_v58 = vld [vmem:[%s6217_s28 + $0x90] sm:$0xff]  }
  0xc4   : > { %v5339_v48 = vcombine.low %v7350_v41, %v7362_v10  ;;  %v7375_v8 = vsel %vm6547_vm7, %v2868_v50, %v2869_v23  ;;  %v2883_v62 = vrot.slane %v6965_v35, 5  ;;  %v5326_v38 = vrot.slane %v5310_v13, 9  ;;  %v9012_v36 = vld [vmem:[#allocation3_spill] sm:$0xff]  ;;  %v5314_v60 = vld [vmem:[%s6217_s28 + $0x90] sm:$0xe]  ;;  %v9013_v50 = vld [vmem:[#allocation6_spill] sm:$0xff] }
  0xc5   : > { %5858 = vmatmul.mubr.msk.bf16.gmra.mxu1 %vm724_vm3, %v6105_v57  ;;  %v5340_v40 = vcombine.low %v7357_v61, %v7375_v8  ;;  %v7384_v7 = vsel %vm6547_vm7, %v2875_v1, %v2876_v17  ;;  %v7388_v24 = vsel %vm6547_vm7, %v5325_v63, %v2880_v20  ;;  %v2882_v14 = vrot.slane %v2880_v20, 4 }
  0xc6   : > { %5861 = vmatprep.mubr.msk.bf16.mxu1 %vm724_vm3, %v6106_v53  ;;  %v5341_v35 = vcombine.low %v7366_v3, %v7384_v7  ;;  %v2887_v29 = vrot.slane %v6978_v28, 5  ;;  %v2890_v56 = vrot.slane %v7000_v30, 5  ;;  %v5327_v26 = vrot.slane %v5311_v51, 9  ;;  %v9014_v51 = vld [vmem:[#allocation5_spill] sm:$0xff]  ;;  %v5445_v3 = vld [vmem:[%s6217_s28 + $0x48] sm:$0xf] }
  0xc7   : > { %v7397_v33 = vsel %vm6547_vm7, %v2882_v14, %v2883_v62  ;;  %v2894_v2 = vrot.slane %v6997_v27, 5  ;;  %v2897_v6 = vrot.slane %v9011_v59, 5  ;;  %v5328_v57 = vrot.slane %v5312_v55, 9  ;;  %v6108_v27 = vld [vmem:[%s6217_s28 + $0x9c] sm:$0xff]   ;;  %v9022_v55 = vld [vmem:[#allocation15_spill] sm:$0xff] }
  0xc8   : > { %v5342_v23 = vcombine.low %v7388_v24, %v7397_v33  ;;  %v7406_v28 = vsel %vm6547_vm7, %v5326_v38, %v2887_v29  ;;  %v2889_v30 = vrot.slane %v2887_v29, 4  ;;  %v2901_v53 = vrot.slane %v9012_v36, 5  ;;  %v5315_v38 = vld [vmem:[%s6217_s28 + $0x9c] sm:$0xe]  ;;  %v9017_v36 = vld [vmem:[#allocation12_spill] sm:$0xff] }
  0xc9   : > { %v7415_v25 = vsel %vm6547_vm7, %v5327_v26, %v2894_v2  ;;  %v2896_v13 = vrot.slane %v2894_v2, 4  ;;  %v2904_v17 = vrot.slane %v9013_v50, 5  ;;  %v5329_v63 = vrot.slane %v5313_v19, 9  ;;  %v5316_v26 = vld [vmem:[%s6217_s28 + $0xa8] sm:$0xe] }
  0xca   : > { %5896 = vmatmul.mubr.msk.bf16.gmra.mxu0 %vm724_vm3, %v7298_v43  ;;  %v7422_v1 = vsel %vm6547_vm7, %v2889_v30, %v2890_v56  ;;  %v7426_v43 = vsel %vm6547_vm7, %v5328_v57, %v2901_v53  ;;  %v2903_v20 = vrot.slane %v2901_v53, 4  ;;  %v2908_v62 = vrot.slane %v9014_v51, 5  ;;  %v5318_v57 = vld [vmem:[%s6217_s28 + $0xc0] sm:$0xe]  ;;  %v6109_v19 = vld [vmem:[%s6217_s28 + $0xa8] sm:$0xff]  }
  0xcb   : > { %5899 = vmatprep.mubr.msk.bf16.mxu0 %vm724_vm3, %v7305_v54  ;;  %v7434_v14 = vsel %vm6547_vm7, %v2896_v13, %v2897_v6  ;;  %v9015_v54 = vld [vmem:[#allocation8_spill] sm:$0xff]  ;;  %v5330_v56 = vrot.slane %v5314_v60, 9  ;;  %v2918_v53 = vrot.slane %v9017_v36, 5  ;;  %v5331_v60 = vrot.slane %v5315_v38, 9  ;;  %v9020_v38 = vld [vmem:[#allocation13_spill] sm:$0xff] }
  0xcc   : > { %v2911_v29 = vrot.slane %v9015_v54, 5  ;;  %v7443_v2 = vsel %vm6547_vm7, %v2903_v20, %v2904_v17  ;;  %v7447_v59 = vsel %vm6547_vm7, %v5329_v63, %v2908_v62  ;;  %v2910_v6 = vrot.slane %v2908_v62, 4  ;;  %v5317_v13 = vld [vmem:[%s6217_s28 + $0xb4] sm:$0xe]  ;;  %v9018_v17 = vld [vmem:[#allocation10_spill] sm:$0xff] }
  0xcd   : > { %5862 = vmatmul.mubr.msk.bf16.gmra.mxu1 %vm724_vm3, %v6107_v58  ;;  %v9016_v58 = vld [vmem:[#allocation7_spill] sm:$0xff]  ;;  %v2922_v63 = vrot.slane %v9018_v17, 5  ;;  %v9019_v20 = vld [vmem:[#allocation2_spill] sm:$0xff]  ;;  %v5332_v62 = vrot.slane %v5316_v26, 9  ;;  %v2929_v36 = vrot.slane %v9020_v38, 5  ;;  %v5333_v26 = vrot.slane %v5317_v13, 9 }
  0xce   : > { %5865 = vmatprep.mubr.msk.bf16.mxu1 %vm724_vm3, %v6108_v27  ;;  %v2915_v30 = vrot.slane %v9016_v58, 5  ;;  %v7457_v50 = vsel %vm6547_vm7, %v2910_v6, %v2911_v29  ;;  %v2925_v51 = vrot.slane %v9019_v20, 5  ;;  %v9021_v17 = vld [vmem:[#allocation14_spill] sm:$0xff]  ;;  %v6110_v27 = vld [vmem:[%s6217_s28 + $0xb4] sm:$0xff]   ;;  %v2842_v39 = vsel %vm6547_vm7, %v7324_v44, %v2841_v34  ;;  %v7674_v7 = vld [vmem:[%s6217_s28 + $0x4c] sm:$0xf] }
  0xcf   : > { %v7472_v29 = vsel %vm6547_vm7, %v5331_v60, %v2922_v63  ;;  %v2924_v6 = vrot.slane %v2922_v63, 4  ;;  %v2932_v20 = vrot.slane %v9021_v17, 5  ;;  %v2931_v38 = vrot.slane %v2929_v36, 4  ;;  %v6129_v44 = vld [vmem:[%s6217_s28 + $0x20] sm:$0x1] }
  0xd0   : > { %v7465_v54 = vsel %vm6547_vm7, %v5330_v56, %v2915_v30  ;;  %v2917_v58 = vrot.slane %v2915_v30, 4  ;;  %v7484_v30 = vsel %vm6547_vm7, %v5332_v62, %v2929_v36  ;;  %v2936_v60 = vrot.slane %v9022_v55, 5 }
  0xd1   : > { %v5334_v63 = vrot.slane %v5318_v57, 9  ;;  %v7500_v55 = vsel %vm6547_vm7, %v2931_v38, %v2932_v20  ;;  %v2943_v57 = vrot.slane %v7219_v22, 5  ;;  %v2839_v22 = vsel %vm6547_vm7, %v5319_v37, %v2838_v46  ;;  %v6114_v38 = vld [vmem:[%s6217_s28 + $0x30] sm:$0xff]  }
  0xd2   : > { %5900 = vmatmul.mubr.msk.bf16.gmra.mxu0 %vm724_vm3, %v7307_v42  ;;  %v7480_v56 = vsel %vm6547_vm7, %v2917_v58, %v2918_v53  ;;  %v7493_v42 = vsel %vm6547_vm7, %v2924_v6, %v2925_v51  ;;  %v2939_v53 = vrot.slane %v7210_v4, 5  ;;  %v2938_v58 = vrot.slane %v2936_v60, 4 }
  0xd3   : > { %5903 = vmatprep.mubr.msk.bf16.mxu0 %vm724_vm3, %v7313_v15  ;;  %v7504_v15 = vsel %vm6547_vm7, %v5333_v26, %v2936_v60  ;;  %v2946_v51 = vrot.slane %v7231_v45, 5  ;;  %v5304_v45 = vld [vmem:[%s6217_s28 + $0x18] sm:$0xe]  ;;  %v7544_v9 = vsel %vm6547_vm7, %v5334_v63, %v2943_v57  ;;  %v2945_v46 = vrot.slane %v2943_v57, 4  ;;  %v6113_v26 = vld [vmem:[%s6217_s28 + $0x24] sm:$0xff]  }
  0xd4   : > { %v7532_v32 = vsel %vm6547_vm7, %v2938_v58, %v2939_v53  ;;  %v5320_v37 = vrot.slane %v5304_v45, 9  ;;  %v5336_v34 = vcombine.low %v2839_v22, %v2842_v39  ;;  %v9023_v60 = vld [vmem:[#allocation9_spill] sm:$0xff] }
  0xd5   : > { %5866 = vmatmul.mubr.msk.bf16.gmra.mxu1 %vm724_vm3, %v6109_v19  ;;  %v5286_v19 = vcombine.low %v2467_v16, %v2477_v21  ;;  %v7549_v47 = vsel %vm6547_vm7, %v2945_v46, %v2946_v51  ;;  %v2848_v21 = vrot.slane %v6129_v44, 5  ;;  %v4602_v53 = vsel %vm773_vm0, %v9023_v60, 0  ;;  %v5433_v63 = vld [vmem:[%s6217_s28 + $0x18] sm:$0xf]  ;;  %v5434_v57 = vld [vmem:[%s6217_s28 + $0x1c] sm:$0xf] }
  0xd6   : > { %5869 = vmatprep.mubr.msk.bf16.mxu1 %vm724_vm3, %v6110_v27  ;;  %v6128_v27 = vld [vmem:[%s6217_s28 + $0x1c] sm:$0xf]  ;;  %v5436_v51 = vld [vmem:[%s6217_s28 + $0x24] sm:$0xf]  ;;  %v3650_v45 = vshrl.u32 %v5433_v63, 16  ;;  %v3659_v39 = vshll.u32 %v5434_v57, 16 }
  0xd7   : > { %v2845_v36 = vrot.slane %v6128_v27, 5  ;;  %v3653_v27 = vshll.u32 %v5433_v63, 16  ;;  %v3674_v46 = vshrl.u32 %v5436_v51, 16  ;;  %v6116_v44 = vld [vmem:[%s6217_s28 + $0x48] sm:$0xff]   ;;  %v5514_v60 = vld [vmem:[%s6217_s28 + $0x18] sm:$0xe] }
  0xd8   : > { %v7590_v63 = vld [vmem:[%s6217_s28 + $0x2c] sm:$0x1] }
  0xd9   : > { %v2847_v16 = vrot.slane %v2845_v36, 4  ;;  %v2846_v17 = vsel %vm6547_vm7, %v5320_v37, %v2845_v36  ;;  %v7574_v36 = vld [vmem:[%s6217_s28 + $0x28] sm:$0xf]  ;;  %v6115_v37 = vld [vmem:[%s6217_s28 + $0x3c] sm:$0xff]   ;;  %v3676_v18 = vrot.slane %v3674_v46, 4 }
  0xda   : > { %5904 = vmatmul.mubr.msk.bf16.gmra.mxu0 %vm724_vm3, %v5286_v19  ;;  %v9024_v19 = vld [vmem:[#allocation11_spill] sm:$0xff] }
  0xdb   : > { %5943 = vmatprep.mubr.msk.bf16.mxu0 %vm724_vm3, %v6112_v49  ;;  %v2849_v20 = vsel %vm6547_vm7, %v2847_v16, %v2848_v21  ;;  %v4132_v22 = vsel %vm773_vm0, %v9024_v19, 0  ;;  %v3663_v49 = vshrl.u32 %v5434_v57, 16  ;;  %v3687_v16 = vshrl.u32 %v7574_v36, 16  ;;  %v5435_v21 = vld [vmem:[%s6217_s28 + $0x20] sm:$0x1] }
  0xdc   : > { %v5337_v58 = vcombine.low %v2846_v17, %v2849_v20  ;;  %v3652_v17 = vrot.slane %v3650_v45, 4  ;;  %v3655_v20 = vrot.slane %v3653_v27, 5  ;;  %v5439_v19 = vld [vmem:[%s6217_s28 + $0x30] sm:$0xf]  ;;  %v3669_v45 = vshll.u32 %v5435_v21, 16 }
  0xdd   : > { %5870 = vmatmul.mubr.msk.bf16.gmra.mxu1 %vm724_vm3, %v6111_v52  ;;  %v3677_v52 = vshll.u32 %v5436_v51, 16  ;;  %v3689_v51 = vrot.slane %v3687_v16, 4  ;;  %v5530_v27 = vrot.slane %v5514_v60, 9  ;;  %v4396_v46 = vrot.slane %v5435_v21, 5  ;;  %v5515_v16 = vld [vmem:[%s6217_s28 + $0x24] sm:$0xe] }
  0xde   : > { %5909 = vmatprep.mubr.msk.bf16.mxu1 %vm724_vm3, %v5336_v34  ;;  %v3683_v34 = vshll.u32 %v7574_v36, 16  ;;  %v6117_v21 = vld [vmem:[%s6217_s28 + $0x54] sm:$0xff]   ;;  %v3701_v10 = vshll.u32 %v5439_v19, 16  ;;  %v6118_v60 = vld [vmem:[%s6217_s28 + $0x60] sm:$0xff]  }
  0xdf   : > { %v3679_v11 = vrot.slane %v3677_v52, 5  ;;  %v3693_v52 = vshll.u32 %v7590_v63, 16 }
  0xe2   : > { %5944 = vmatmul.mubr.msk.bf16.vlgmr.msra.gmra.mxu0 %vm724_vm3, %v6113_v26  ;;  %v7586_v26 = vrot.slane %v3659_v39, 5 }
  0xe3   : > { %6010 = vmatpush3.bf16.msra.mxu0 %v4602_v53  ;;  %5947 = vmatprep.mubr.msk.bf16.mxu0 %vm724_vm3, %v6114_v38  ;;  %v3665_v38 = vrot.slane %v3663_v49, 4  ;;  %v4393_v53 = vrot.slane %v5434_v57, 5  ;;  %v7600_v57 = vld [vmem:[%s6217_s28 + $0x34] sm:$0xf] }
  0xe5   : > { %5910 = vmatmul.mubr.msk.bf16.vlgmr.msra.gmra.mxu1 %vm724_vm3, %v5337_v58  ;;  %v7595_v58 = vrot.slane %v3683_v34, 5  ;;  %v3666_v39 = vor.u32 %v3665_v38, %v7586_v26  ;;  %v4395_v49 = vrot.slane %v4393_v53, 4  ;;  %v3680_v34 = vor.u32 %v3679_v11, %v3676_v18 }
  0xe6   : > { %5976 = vmatpush3.bf16.msra.mxu1 %v4132_v22  ;;  %5913 = vmatprep.mubr.msk.bf16.mxu1 %vm724_vm3, %v5338_v5  ;;  %v7593_v5 = vpop.f32.mrf.mxu0  ;;  %v3656_v22 = vor.u32 %v3655_v20, %v3652_v17  ;;  %v3698_v17 = vshrl.u32 %v5439_v19, 16  ;;  %v3711_v38 = vshrl.u32 %v7600_v57, 16  ;;  %v7625_v61 = vsel %vm6547_vm7, %v5530_v27, %v4393_v53  ;;  %v5442_v19 = vld [vmem:[%s6217_s28 + $0x3c] sm:$0xf] }
  0xe7   : > { %v3690_v41 = vor.u32 %v3689_v51, %v7595_v58  ;;  %v3667_v8 = vrot.slane %v3666_v39, 4  ;;  %v3695_v11 = vrot.slane %v3693_v52, 5  ;;  %v5531_v51 = vrot.slane %v5515_v16, 9  ;;  %v7639_v39 = vld [vmem:[%s6217_s28 + $0x38] sm:$0x1] }
  0xe8   : > { %v7617_v20 = vpop.f32.mrf.mxu0  ;;  %v3657_v18 = vrot.slane %v3656_v22, 4  ;;  %v3681_v12 = vrot.slane %v3680_v34, 4  ;;  %v4403_v22 = vrot.slane %v7590_v63, 5  ;;  %v3713_v52 = vrot.slane %v3711_v38, 4 }
  0xe9   : > { %v3691_v27 = vrot.slane %v3690_v41, 4  ;;  %v3722_v34 = vshrl.u32 %v5442_v19, 16  ;;  %v3725_v16 = vshll.u32 %v5442_v19, 16  ;;  %v7652_v41 = vld [vmem:[%s6217_s28 + $0x40] sm:$0xf] }
  0xea   : > { %5948 = vmatmul.mubr.msk.bf16.gmra.mxu0 %vm724_vm3, %v6115_v37  ;;  %v7636_v53 = vpop.f32.mrf.mxu0  ;;  %v3662_v63 = vsel %vm6261_vm4, %v3657_v18, %v7586_v26  ;;  %v3686_v26 = vsel %vm6261_vm4, %v3681_v12, %v7595_v58  ;;  %v5516_v18 = vld [vmem:[%s6217_s28 + $0x30] sm:$0xe]  ;;  %v3731_v24 = vshll.u32 %v7652_v41, 16  ;;  %v3735_v33 = vshrl.u32 %v7652_v41, 16 }
  0xeb   : > { %5951 = vmatprep.mubr.msk.bf16.mxu0 %vm724_vm3, %v6116_v44  ;;  %v7608_v37 = vpop.f32.mrf.mxu1  ;;  %v4400_v44 = vrot.slane %v7574_v36, 5  ;;  %v3671_v36 = vrot.slane %v3669_v45, 5  ;;  %v3700_v45 = vrot.slane %v3698_v17, 4  ;;  %v3696_v58 = vsel %vm6261_vm4, %v3691_v27, %v3695_v11 }
  0xec   : > { %9025 = vst [vmem:[#allocation4_spill] sm:$0xff] %v7608_v37  ;;  %v7681_v12 = vpop.f32.mrf.mxu0  ;;  %v3727_v19 = vrot.slane %v3725_v16, 5  ;;  %v3759_v11 = vshrl.u32 %v7674_v7, 16 }
  0xed   : > { %5914 = vmatmul.mubr.msk.bf16.gmra.mxu1 %vm724_vm3, %v5339_v48  ;;  %v3707_v48 = vshll.u32 %v7600_v57, 16  ;;  %v7632_v6 = vpop.f32.mrf.mxu1  ;;  %v4402_v4 = vrot.slane %v4400_v44, 4  ;;  %v3672_v17 = vsel %vm6261_vm4, %v3667_v8, %v3671_v36  ;;  %v4407_v36 = vrot.slane %v7600_v57, 5  ;;  %v6120_v8 = vld [vmem:[%s6217_s28 + $0x78] sm:$0xff]  }
  0xee   : > { %5917 = vmatprep.mubr.msk.bf16.mxu1 %vm724_vm3, %v5340_v40  ;;  %v7629_v40 = vsel %vm6547_vm7, %v4395_v49, %v4396_v46  ;;  %9026 = vst [vmem:[#allocation3_spill] sm:$0xff] %v7632_v6  ;;  %v3703_v49 = vrot.slane %v3701_v10, 5  ;;  %v7695_v27 = vcombine.low %v3662_v63, %v3672_v17  ;;  %v7697_v57 = vcombine.low %v3686_v26, %v3696_v58  ;;  %v7711_v17 = vld [vmem:[%s6217_s28 + $0x58] sm:$0xf]  ;;  %v7717_v58 = vld [vmem:[%s6217_s28 + $0x44] sm:$0x1] }
  0xef   : > { %v7641_v46 = vrot.slane %v3707_v48, 5  ;;  %v7658_v10 = vpop.f32.mrf.mxu1  ;;  %v7665_v48 = vsel %vm6547_vm7, %v5531_v51, %v4400_v44  ;;  %v7669_v38 = vsel %vm6547_vm7, %v4402_v4, %v4403_v22  ;;  %v3724_v51 = vrot.slane %v3722_v34, 4  ;;  %v5448_v34 = vld [vmem:[%s6217_s28 + $0x54] sm:$0xf] }
  0xf0   : > { %9027 = vst [vmem:[#allocation6_spill] sm:$0xff] %v7658_v10  ;;  %v3704_v44 = vor.u32 %v3703_v49, %v3700_v45  ;;  %v3749_v22 = vshll.u32 %v5445_v3, 16  ;;  %v4409_v13 = vrot.slane %v4407_v36, 4  ;;  %v4410_v63 = vrot.slane %v7639_v39, 5  ;;  %v5517_v49 = vld [vmem:[%s6217_s28 + $0x3c] sm:$0xe] }
  0xf1   : > { %v3714_v4 = vor.u32 %v3713_v52, %v7641_v46  ;;  %v7693_v45 = vpop.f32.mrf.mxu1  ;;  %v5532_v52 = vrot.slane %v5516_v18, 9  ;;  %v3728_v18 = vor.u32 %v3727_v19, %v3724_v51  ;;  %v9030_v6 = vcombine.low %v7406_v28, %v7422_v1 }
  0xf2   : > { %5952 = vmatmul.mubr.msk.bf16.gmra.mxu0 %vm724_vm3, %v6117_v21  ;;  %v3755_v21 = vshll.u32 %v7674_v7, 16  ;;  %9028 = vst [vmem:[#allocation5_spill] sm:$0xff] %v7693_v45  ;;  %v3751_v45 = vrot.slane %v3749_v22, 5  ;;  %v3770_v51 = vshrl.u32 %v5448_v34, 16  ;;  %v3773_v19 = vshll.u32 %v5448_v34, 16 }
  0xf3   : > { %5955 = vmatprep.mubr.msk.bf16.mxu0 %vm724_vm3, %v6118_v60  ;;  %v3717_v60 = vshll.u32 %v7639_v39, 16  ;;  %v7714_v26 = vrot.slane %v3714_v4, 4  ;;  %v3761_v39 = vrot.slane %v3759_v11, 4  ;;  %v7752_v22 = vsel %vm6547_vm7, %v4409_v13, %v4410_v63 }
  0xf4   : > { %v7722_v10 = vrot.slane %v3755_v21, 5  ;;  %v9032_v21 = vcombine.low %v7415_v25, %v7434_v14  ;;  %v4414_v25 = vrot.slane %v7652_v41, 5  ;;  %v6122_v14 = vld [vmem:[%s6217_s28 + $0x90] sm:$0xff]   ;;  %v5533_v1 = vrot.slane %v5517_v49, 9  ;;  %v5451_v41 = vld [vmem:[%s6217_s28 + $0x60] sm:$0xf] }
  0xf5   : > { %5918 = vmatmul.mubr.msk.bf16.gmra.mxu1 %vm724_vm3, %v5341_v35  ;;  %v6119_v35 = vld [vmem:[%s6217_s28 + $0x6c] sm:$0xff]   ;;  %v7707_v62 = vrot.slane %v3717_v60, 5  ;;  %v3772_v37 = vrot.slane %v3770_v51, 4 }
  0xf6   : > { %5921 = vmatprep.mubr.msk.bf16.mxu1 %vm724_vm3, %v5342_v23  ;;  %v3746_v23 = vshrl.u32 %v5445_v3, 16  ;;  %v7705_v3 = vrot.slane %v3704_v44, 4  ;;  %v3737_v44 = vrot.slane %v3735_v33, 4  ;;  %v3783_v33 = vshrl.u32 %v7711_v17, 16 }
  0xf7   : > { %v7703_v16 = vpop.f32.mrf.mxu0  ;;  %v3762_v13 = vor.u32 %v3761_v39, %v7722_v10  ;;  %v4421_v39 = vrot.slane %v7674_v7, 5  ;;  %v9036_v7 = vcombine.low %v7426_v43, %v7443_v2  ;;  %v9038_v43 = vcombine.low %v7447_v59, %v7457_v50  ;;  %v6123_v2 = vld [vmem:[%s6217_s28 + $0x9c] sm:$0xff]  }
  0xf8   : > { %9029 = vst [vmem:[#allocation8_spill] sm:$0xff] %v7703_v16  ;;  %v3748_v60 = vrot.slane %v3746_v23, 4  ;;  %v6121_v23 = vld [vmem:[%s6217_s28 + $0x84] sm:$0xff]   ;;  %v7779_v16 = vld [vmem:[%s6217_s28 + $0x5c] sm:$0x1]  ;;  %v4428_v59 = vrot.slane %v7711_v17, 5 }
  0xf9   : > { %v7740_v28 = vpop.f32.mrf.mxu0 }
  0xfa   : > { %5956 = vmatmul.mubr.msk.bf16.gmra.mxu0 %vm724_vm3, %v6119_v35  ;;  %v7719_v35 = vrot.slane %v3731_v24, 5  ;;  %v3779_v24 = vshll.u32 %v7711_v17, 16  ;;  %9033 = vst [vmem:[#allocation12_spill] sm:$0xff] %v7740_v28  ;;  %v3775_v28 = vrot.slane %v3773_v19, 5 }
  0xfb   : > { %5959 = vmatprep.mubr.msk.bf16.mxu0 %vm724_vm3, %v6120_v8  ;;  %v7728_v4 = vpop.f32.mrf.mxu1  ;;  %v7731_v8 = vld [vmem:[%s6217_s28 + $0x50] sm:$0x1]  ;;  %v7772_v49 = vpop.f32.mrf.mxu0 }
  0xfc   : > { %9031 = vst [vmem:[#allocation7_spill] sm:$0xff] %v7728_v4  ;;  %v3738_v34 = vor.u32 %v3737_v44, %v7719_v35  ;;  %v7762_v4 = vrot.slane %v3728_v18, 4  ;;  %v7769_v11 = vrot.slane %v3779_v24, 5  ;;  %v3785_v44 = vrot.slane %v3783_v33, 4  ;;  %9035 = vst [vmem:[#allocation2_spill] sm:$0xff] %v7772_v49 }
  0xfd   : > { %5922 = vmatmul.mubr.msk.bf16.gmra.mxu1 %vm724_vm3, %v9030_v6  ;;  %v7748_v6 = vsel %vm6547_vm7, %v5532_v52, %v4407_v36  ;;  %v3752_v36 = vor.u32 %v3751_v45, %v3748_v60  ;;  %v3765_v52 = vshll.u32 %v7731_v8, 16  ;;  %v7767_v63 = vpop.f32.mrf.mxu1  ;;  %v4416_v18 = vrot.slane %v4414_v25, 4  ;;  %v5518_v24 = vld [vmem:[%s6217_s28 + $0x48] sm:$0xe] }
  0xfe   : > { %5925 = vmatprep.mubr.msk.bf16.mxu1 %vm724_vm3, %v9032_v21  ;;  %v3741_v21 = vshll.u32 %v7717_v58, 16  ;;  %9034 = vst [vmem:[#allocation10_spill] sm:$0xff] %v7767_v63  ;;  %v4417_v60 = vrot.slane %v7717_v58, 5  ;;  %v3739_v51 = vrot.slane %v3738_v34, 4  ;;  %v3794_v33 = vshrl.u32 %v5451_v41, 16 }
  0xff   : > { %v7785_v63 = vsel %vm6547_vm7, %v5533_v1, %v4414_v25  ;;  %v3753_v45 = vrot.slane %v3752_v36, 4  ;;  %v3763_v49 = vrot.slane %v3762_v13, 4  ;;  %v3767_v58 = vrot.slane %v3765_v52, 5  ;;  %v7800_v36 = vld [vmem:[%s6217_s28 + $0x64] sm:$0xf]  ;;  %v7807_v13 = vpop.f32.mrf.mxu0 }
 0x100   : > { %v3743_v19 = vrot.slane %v3741_v21, 5  ;;  %v3734_v34 = vsel %vm6261_vm4, %v7762_v4, %v7719_v35  ;;  %v3776_v21 = vor.u32 %v3775_v28, %v3772_v37  ;;  %v3786_v1 = vor.u32 %v3785_v44, %v7769_v11  ;;  %9039 = vst [vmem:[#allocation14_spill] sm:$0xff] %v7807_v13  ;;  %v5519_v28 = vld [vmem:[%s6217_s28 + $0x54] sm:$0xe]  ;;  %v6127_v13 = vld [vmem:[%s6217_s28 + $0xcc] sm:$0xff]  }
 0x101   : > { %v3789_v25 = vshll.u32 %v7779_v16, 16  ;;  %v7811_v52 = vsel %vm6547_vm7, %v4416_v18, %v4417_v60  ;;  %v5534_v35 = vrot.slane %v5518_v24, 9  ;;  %v4423_v37 = vrot.slane %v4421_v39, 4 }
 0x102   : > { %5960 = vmatmul.mubr.msk.bf16.gmra.mxu0 %vm724_vm3, %v6121_v23  ;;  %v3797_v23 = vshll.u32 %v5451_v41, 16  ;;  %v4424_v4 = vrot.slane %v7731_v8, 5  ;;  %v6124_v41 = vld [vmem:[%s6217_s28 + $0xa8] sm:$0xff]   ;;  %v3744_v44 = vsel %vm6261_vm4, %v3739_v51, %v3743_v19  ;;  %v3796_v50 = vrot.slane %v3794_v33, 4 }
 0x103   : > { %5963 = vmatprep.mubr.msk.bf16.mxu0 %vm724_vm3, %v6122_v14  ;;  %v7791_v14 = vpop.f32.mrf.mxu1  ;;  %v3768_v18 = vsel %vm6261_vm4, %v3763_v49, %v3767_v58  ;;  %v3803_v60 = vshll.u32 %v7800_v36, 16  ;;  %v3807_v8 = vshrl.u32 %v7800_v36, 16  ;;  %v3787_v51 = vrot.slane %v3786_v1, 4  ;;  %v7829_v33 = vld [vmem:[%s6217_s28 + $0x68] sm:$0x1] }
 0x104   : > { %9037 = vst [vmem:[#allocation13_spill] sm:$0xff] %v7791_v14  ;;  %v3777_v14 = vrot.slane %v3776_v21, 4  ;;  %v3791_v17 = vrot.slane %v3789_v25, 5  ;;  %v5535_v19 = vrot.slane %v5519_v28, 9  ;;  %v9042_v49 = vsel %vm6261_vm4, %v7714_v26, %v7707_v62  ;;  %v5454_v25 = vld [vmem:[%s6217_s28 + $0x6c] sm:$0xf] }
 0x105   : > { %5926 = vmatmul.mubr.msk.bf16.gmra.mxu1 %vm724_vm3, %v9036_v7  ;;  %v3799_v7 = vrot.slane %v3797_v23, 5  ;;  %v7826_v24 = vpop.f32.mrf.mxu1  ;;  %v7850_v21 = vsel %vm6547_vm7, %v5534_v35, %v4421_v39  ;;  %v7854_v1 = vsel %vm6547_vm7, %v4423_v37, %v4424_v4  ;;  %v7857_v62 = vcombine.low %v3734_v34, %v3744_v44  ;;  %v5520_v4 = vld [vmem:[%s6217_s28 + $0x60] sm:$0xe]  ;;  %v5460_v44 = vld [vmem:[%s6217_s28 + $0x84] sm:$0xf] }
 0x106   : > { %5929 = vmatprep.mubr.msk.bf16.mxu1 %vm724_vm3, %v9038_v43  ;;  %v3758_v43 = vsel %vm6261_vm4, %v3753_v45, %v7722_v10  ;;  %9040 = vst [vmem:[#allocation15_spill] sm:$0xff] %v7826_v24  ;;  %v9043_v45 = vsel %vm6261_vm4, %v7705_v3, %v7641_v46  ;;  %v4430_v46 = vrot.slane %v4428_v59, 4  ;;  %v4431_v3 = vrot.slane %v7779_v16, 5 }
 0x107   : > { %v7844_v23 = vcombine.low %v9043_v45, %v9042_v49  ;;  %9044 = vst [vmem:[#allocation11_spill] sm:$0xff] %v7857_v62  ;;  %v3800_v26 = vor.u32 %v3799_v7, %v3796_v50  ;;  %v7864_v28 = vcombine.low %v3758_v43, %v3768_v18  ;;  %v7866_v39 = vrot.slane %v3803_v60, 5 }
 0x108   : > { %v7832_v10 = vpop.f32.mrf.mxu0  ;;  %v7868_v35 = vrot.slane %v3807_v8, 4  ;;  %v3813_v37 = vshll.u32 %v7829_v33, 16  ;;  %v9046_v34 = vcombine.low %v7465_v54, %v7480_v56  ;;  %v3782_v50 = vsel %vm6261_vm4, %v3777_v14, %v7769_v11  ;;  %v5457_v54 = vld [vmem:[%s6217_s28 + $0x78] sm:$0xf] }
 0x109   : > { %9041 = vst [vmem:[#allocation9_spill] sm:$0xff] %v7832_v10  ;;  %9045 = vst [vmem:[#allocation16_spill] sm:$0xff] %v7864_v28  ;;  %v3792_v7 = vsel %vm6261_vm4, %v3787_v51, %v3791_v17  ;;  %v7888_v43 = vsel %vm6547_vm7, %v5535_v19, %v4428_v59  ;;  %v9048_v56 = vcombine.low %v7472_v29, %v7493_v42  ;;  %v3818_v60 = vshrl.u32 %v5454_v25, 16  ;;  %v7900_v51 = vld [vmem:[%s6217_s28 + $0x7c] sm:$0xf]  ;;  %v6126_v59 = vld [vmem:[%s6217_s28 + $0xc0] sm:$0xff]  }
 0x10a   : > { %5964 = vmatmul.mubr.msk.bf16.gmra.mxu0 %vm724_vm3, %v6123_v2  ;;  %v7862_v2 = vld [vmem:[%s6217_s28 + $0x70] sm:$0xf]  ;;  %v7895_v18 = vpop.f32.mrf.mxu0  ;;  %v3821_v8 = vshll.u32 %v5454_v25, 16  ;;  %v7905_v17 = vsel %vm6547_vm7, %v4430_v46, %v4431_v3  ;;  %v7907_v29 = vrot.slane %v3800_v26, 4  ;;  %v5536_v42 = vrot.slane %v5520_v4, 9 }
 0x10b   : > { %5967 = vmatprep.mubr.msk.bf16.mxu0 %vm724_vm3, %v6124_v41  ;;  %v6125_v41 = vld [vmem:[%s6217_s28 + $0xb4] sm:$0xff]   ;;  %9049 = vst [vmem:[#allocation18_spill] sm:$0xff] %v7895_v18  ;;  %v3827_v11 = vshll.u32 %v7862_v2, 16  ;;  %v3831_v14 = vshrl.u32 %v7862_v2, 16  ;;  %v4435_v19 = vrot.slane %v7800_v36, 5  ;;  %v7910_v49 = vcombine.low %v3782_v50, %v3792_v7 }
 0x10c   : > { %v3810_v45 = vor.u32 %v7868_v35, %v7866_v39  ;;  %v7914_v25 = vrot.slane %v3813_v37, 5  ;;  %v3842_v46 = vshrl.u32 %v5457_v54, 16  ;;  %v3845_v3 = vshll.u32 %v5457_v54, 16  ;;  %v7926_v4 = vld [vmem:[%s6217_s28 + $0x88] sm:$0xf]  ;;  %v7929_v35 = vpop.f32.mrf.mxu0 }
 0x10d   : > { %5930 = vmatmul.mubr.msk.bf16.gmra.mxu1 %vm724_vm3, %v9046_v34  ;;  %v7876_v16 = vpop.f32.mrf.mxu1  ;;  %9050 = vst [vmem:[#allocation19_spill] sm:$0xff] %v7910_v49  ;;  %v4438_v34 = vrot.slane %v7829_v33, 5  ;;  %v3851_v36 = vshll.u32 %v7900_v51, 16  ;;  %v3855_v26 = vshrl.u32 %v7900_v51, 16  ;;  %9052 = vst [vmem:[#allocation21_spill] sm:$0xff] %v7929_v35  ;;  %v3820_v33 = vrot.slane %v3818_v60, 4 }
 0x10e   : > { %9047 = vst [vmem:[#allocation17_spill] sm:$0xff] %v7876_v16  ;;  %5933 = vmatprep.mubr.msk.bf16.mxu1 %vm724_vm3, %v9048_v56  ;;  %v7918_v56 = vld [vmem:[%s6217_s28 + $0x74] sm:$0x1]  ;;  %v3823_v37 = vrot.slane %v3821_v8, 5  ;;  %v7931_v50 = vrot.slane %v3827_v11, 5  ;;  %v3833_v7 = vrot.slane %v3831_v14, 4  ;;  %v9053_v54 = vcombine.low %v7484_v30, %v7500_v55  ;;  %v7959_v49 = vpop.f32.mrf.mxu0 }
 0x10f   : > { %v7921_v58 = vpop.f32.mrf.mxu1  ;;  %v4437_v16 = vrot.slane %v4435_v19, 4  ;;  %v7944_v60 = vld [vmem:[%s6217_s28 + $0x80] sm:$0x1]  ;;  %v7947_v8 = vld [vmem:[%s6217_s28 + $0x6c] sm:$0xe]  ;;  %v3866_v11 = vshrl.u32 %v5460_v44, 16 }
 0x110   : > { %9051 = vst [vmem:[#allocation20_spill] sm:$0xff] %v7921_v58  ;;  %v7940_v58 = vsel %vm6547_vm7, %v5536_v42, %v4435_v19  ;;  %v3869_v14 = vshll.u32 %v5460_v44, 16  ;;  %v3879_v24 = vshrl.u32 %v7926_v4, 16  ;;  %v3844_v19 = vrot.slane %v3842_v46, 4  ;;  %9055 = vst [vmem:[#allocation23_spill] sm:$0xff] %v7959_v49 }
 0x111   : > { %v7955_v42 = vpop.f32.mrf.mxu1  ;;  %v3847_v35 = vrot.slane %v3845_v3, 5  ;;  %v7957_v18 = vrot.slane %v3851_v36, 5  ;;  %v3857_v10 = vrot.slane %v3855_v26, 4  ;;  %v9056_v44 = vcombine.low %v7504_v15, %v7532_v32  ;;  %v7978_v32 = vld [vmem:[%s6217_s28 + $0x8c] sm:$0x1] }
 0x112   : > { %5968 = vmatmul.mubr.msk.bf16.gmra.mxu0 %vm724_vm3, %v6125_v41  ;;  %v3837_v41 = vshll.u32 %v7918_v56, 16  ;;  %9054 = vst [vmem:[#allocation22_spill] sm:$0xff] %v7955_v42  ;;  %v3824_v30 = vor.u32 %v3823_v37, %v3820_v33  ;;  %v3834_v55 = vor.u32 %v3833_v7, %v7931_v50  ;;  %v3861_v46 = vshll.u32 %v7944_v60, 16  ;;  %v5522_v33 = vld [vmem:[%s6217_s28 + $0x78] sm:$0xe] }
 0x113   : > { %5971 = vmatprep.mubr.msk.bf16.mxu0 %vm724_vm3, %v6126_v59  ;;  %v3875_v59 = vshll.u32 %v7926_v4, 16  ;;  %v7969_v3 = vrot.slane %v3810_v45, 4  ;;  %v7973_v36 = vsel %vm6547_vm7, %v4437_v16, %v4438_v34  ;;  %v5537_v26 = vrot.slane %v7947_v8, 9  ;;  %v7983_v42 = vpop.f32.mrf.mxu1  ;;  %v5463_v8 = vld [vmem:[%s6217_s28 + $0x90] sm:$0xf] }
 0x114   : > { %v4449_v15 = vrot.slane %v7900_v51, 5  ;;  %v3868_v37 = vrot.slane %v3866_v11, 4  ;;  %v3871_v7 = vrot.slane %v3869_v14, 5  ;;  %9057 = vst [vmem:[#allocation24_spill] sm:$0xff] %v7983_v42  ;;  %v3839_v45 = vrot.slane %v3837_v41, 5 }
 0x115   : > { %5934 = vmatmul.mubr.msk.bf16.gmra.mxu1 %vm724_vm3, %v9053_v54  ;;  %v4442_v54 = vrot.slane %v7862_v2, 5  ;;  %v7981_v2 = vrot.slane %v3875_v59, 5  ;;  %v4445_v49 = vrot.slane %v7918_v56, 5  ;;  %v3848_v16 = vor.u32 %v3847_v35, %v3844_v19  ;;  %v7992_v59 = vld [vmem:[%s6217_s28 + $0x94] sm:$0xf] }
 0x116   : > { %5937 = vmatprep.mubr.msk.bf16.mxu1 %vm724_vm3, %v9056_v44  ;;  %v3881_v44 = vrot.slane %v3879_v24, 4  ;;  %v3858_v34 = vor.u32 %v3857_v10, %v7957_v18  ;;  %v3825_v51 = vrot.slane %v3824_v30, 4  ;;  %v3835_v11 = vrot.slane %v3834_v55, 4 }
 0x117   : > { %v4444_v62 = vrot.slane %v4442_v54, 4  ;;  %v3863_v14 = vrot.slane %v3861_v46, 5  ;;  %v9058_v24 = vcombine.low %v7625_v61, %v7629_v40  ;;  %v5538_v56 = vrot.slane %v5522_v33, 9 }
 0x118   : > { %v4451_v35 = vrot.slane %v4449_v15, 4  ;;  %v4452_v10 = vrot.slane %v7944_v60, 5  ;;  %v3885_v41 = vshll.u32 %v7978_v32, 16  ;;  %v3882_v30 = vor.u32 %v3881_v44, %v7981_v2 }
 0x119   : > { %v3890_v55 = vshrl.u32 %v5463_v8, 16  ;;  %v3893_v46 = vshll.u32 %v5463_v8, 16  ;;  %v9060_v61 = vcombine.low %v7544_v9, %v7549_v47  ;;  %v3849_v40 = vrot.slane %v3848_v16, 4 }
 0x11a   : > { %v7988_v28 = vpop.f32.mrf.mxu0  ;;  %5972 = vmatmul.mubr.msk.bf16.gmra.mxu0 %vm724_vm3, %v6127_v13  ;;  %v3872_v13 = vor.u32 %v3871_v7, %v3868_v37  ;;  %v3859_v33 = vrot.slane %v3858_v34, 4  ;;  %v3899_v60 = vshll.u32 %v7992_v59, 16  ;;  %v3816_v37 = vsel %vm6261_vm4, %v7969_v3, %v7914_v25 }
 0x11b   : > { %6011 = vmatprep.mubr.msk.bf16.mxu0 %vm724_vm3, %v9058_v24  ;;  %v3903_v24 = vshrl.u32 %v7992_v59, 16  ;;  %v3830_v9 = vsel %vm6261_vm4, %v3825_v51, %v7931_v50  ;;  %v8024_v47 = vsel %vm6547_vm7, %v5537_v26, %v4442_v54  ;;  %v8028_v7 = vsel %vm6547_vm7, %v4444_v62, %v4445_v49  ;;  %v5523_v54 = vld [vmem:[%s6217_s28 + $0x84] sm:$0xe]  ;;  %v9099_v31 = vld [vmem:[#allocation24_spill] sm:$0xff] }
 0x11c   : > { %v8000_v19 = vpop.f32.mrf.mxu0  ;;  %v8036_v25 = vsel %vm6547_vm7, %v5538_v56, %v4449_v15  ;;  %v8040_v50 = vsel %vm6547_vm7, %v4451_v35, %v4452_v10  ;;  %v3887_v3 = vrot.slane %v3885_v41, 5  ;;  %v3873_v62 = vrot.slane %v3872_v13, 4  ;;  %v8064_v13 = vld [vmem:[%s6217_s28 + $0x98] sm:$0x1] }
 0x11d   : > { %9059 = vst [vmem:[#allocation25_spill] sm:$0xff] %v8000_v19  ;;  %v8003_v42 = vpop.f32.mrf.mxu1  ;;  %5938 = vmatmul.mubr.msk.bf16.gmra.mxu1 %vm724_vm3, %v9060_v61  ;;  %v3883_v49 = vrot.slane %v3882_v30, 4  ;;  %v3892_v16 = vrot.slane %v3890_v55, 4  ;;  %v3895_v34 = vrot.slane %v3893_v46, 5  ;;  %v3854_v15 = vsel %vm6261_vm4, %v3849_v40, %v7957_v18  ;;  %v5466_v30 = vld [vmem:[%s6217_s28 + $0x9c] sm:$0xf] }
 0x11e   : > { %v8011_v19 = vpop.f32.mrf.mxu0  ;;  %5977 = vmatprep.mubr.msk.bf16.mxu1 %vm724_vm3, %v7695_v27  ;;  %v3840_v27 = vsel %vm6261_vm4, %v3835_v11, %v3839_v45  ;;  %v3864_v45 = vsel %vm6261_vm4, %v3859_v33, %v3863_v14  ;;  %v8052_v51 = vrot.slane %v3899_v60, 5  ;;  %v3905_v11 = vrot.slane %v3903_v24, 4  ;;  %v8095_v24 = vld [vmem:[%s6217_s28 + $0xa0] sm:$0xf] }
 0x11f   : > { %v8030_v44 = vpop.f32.mrf.mxu1  ;;  %v9061_v35 = vcombine.low %v7665_v48, %v7669_v38  ;;  %v5552_v10 = vcombine.low %v7888_v43, %v7905_v17  ;;  %v5553_v41 = vcombine.low %v7940_v58, %v7973_v36  ;;  %v5539_v18 = vrot.slane %v5523_v54, 9 }
 0x120   : > { %v8043_v26 = vpop.f32.mrf.mxu0  ;;  %v4456_v14 = vrot.slane %v7926_v4, 5  ;;  %v9062_v48 = vcombine.low %v7748_v6, %v7752_v22  ;;  %v9063_v38 = vsel %vm6261_vm4, %v7907_v29, %v7866_v39  ;;  %v8080_v61 = vcombine.low %v3830_v9, %v3840_v27  ;;  %v5524_v29 = vld [vmem:[%s6217_s28 + $0x90] sm:$0xe]  ;;  %v9070_v4 = vld [vmem:[#allocation2_spill] sm:$0xff] }
 0x121   : > { %v8045_v8 = vpop.f32.mrf.mxu1  ;;  %v8078_v46 = vcombine.low %v9063_v38, %v3816_v37  ;;  %v8086_v60 = vcombine.low %v3854_v15, %v3864_v45  ;;  %v3878_v6 = vsel %vm6261_vm4, %v3873_v62, %v7981_v2  ;;  %v3888_v22 = vsel %vm6261_vm4, %v3883_v49, %v3887_v3 }
 0x122   : > { %v5809_v56 = vpop.f32.mrf.mxu0  ;;  %6012 = vmatmul.mubr.msk.bf16.vlgmr.msra.gmra.mxu0 %vm724_vm3, %v9061_v35  ;;  %v3896_v39 = vor.u32 %v3895_v34, %v3892_v16  ;;  %v3906_v9 = vor.u32 %v3905_v11, %v8052_v51  ;;  %v3909_v27 = vshll.u32 %v8064_v13, 16  ;;  %v3914_v54 = vshrl.u32 %v5466_v30, 16 }
 0x123   : > { %v8067_v55 = vpop.f32.mrf.mxu1  ;;  %6015 = vmatprep.mubr.msk.bf16.mxu0 %vm724_vm3, %v9062_v48  ;;  %v3917_v15 = vshll.u32 %v5466_v30, 16  ;;  %v8106_v3 = vsel %vm6547_vm7, %v5539_v18, %v4456_v14  ;;  %v4458_v62 = vrot.slane %v4456_v14, 4  ;;  %v4459_v49 = vrot.slane %v7978_v32, 5 }
 0x124   : > { %v1528_v33 = vpop.f32.mrf.mxu0  ;;  %v5540_v16 = vrot.slane %v5524_v29, 9  ;;  %v4463_v34 = vrot.slane %v7992_v59, 5  ;;  %v3923_v11 = vshll.u32 %v8095_v24, 16  ;;  %v3927_v35 = vshrl.u32 %v8095_v24, 16 }
 0x125   : > { %v5775_v37 = vpop.f32.mrf.mxu1  ;;  %5978 = vmatmul.mubr.msk.bf16.vlgmr.msra.gmra.mxu1 %vm724_vm3, %v7697_v57  ;;  %v8115_v48 = vcombine.low %v3878_v6, %v3888_v22  ;;  %v8117_v18 = vrot.slane %v3896_v39, 4  ;;  %v3907_v32 = vrot.slane %v3906_v9, 4  ;;  %v3911_v38 = vrot.slane %v3909_v27, 5  ;;  %v5469_v22 = vld [vmem:[%s6217_s28 + $0xa8] sm:$0xf] }
 0x126   : > { %v1112_v45 = vadd.f32 %v5775_v37, %v7593_v5  ;;  %v5810_v2 = vpop.f32.mrf.mxu0  ;;  %5981 = vmatprep.mubr.msk.bf16.mxu1 %vm724_vm3, %v7844_v23  ;;  %v3916_v29 = vrot.slane %v3914_v54, 4  ;;  %v3919_v59 = vrot.slane %v3917_v15, 5  ;;  %v4466_v6 = vrot.slane %v8064_v13, 5  ;;  %v8143_v27 = vld [vmem:[%s6217_s28 + $0xac] sm:$0xf] }
 0x127   : > { %v1103_v57 = vpop.f32.mrf.mxu1  ;;  %v3929_v9 = vrot.slane %v3927_v35, 4  ;;  %v9067_v35 = vld [vmem:[#allocation8_spill] sm:$0xff] }
 0x128   : > { %v8112_v5 = vadd.f32 %v5809_v56, %v1112_v45  ;;  %v1104_v23 = vadd.f32 %v1103_v57, %v7617_v20  ;;  %v1531_v30 = vpop.f32.mrf.mxu0  ;;  %v9064_v45 = vcombine.low %v7785_v63, %v7811_v52  ;;  %v8128_v20 = vsel %vm6547_vm7, %v4458_v62, %v4459_v49  ;;  %v5525_v62 = vld [vmem:[%s6217_s28 + $0x9c] sm:$0xe] }
 0x129   : > { %v5776_v14 = vpop.f32.mrf.mxu1  ;;  %v4465_v63 = vrot.slane %v4463_v34, 4  ;;  %v8140_v52 = vrot.slane %v3923_v11, 5  ;;  %v4470_v49 = vrot.slane %v8095_v24, 5  ;;  %v3947_v24 = vshll.u32 %v8143_v27, 16 }
 0x12a   : > { %v8119_v37 = vadd.f32 %v1528_v33, %v1104_v23  ;;  %v1115_v40 = vadd.f32 %v5776_v14, %v7636_v53  ;;  %v5813_v56 = vpop.f32.mrf.mxu0  ;;  %6016 = vmatmul.mubr.msk.bf16.gmra.mxu0 %vm724_vm3, %v9064_v45  ;;  %v9065_v33 = vcombine.low %v7850_v21, %v7854_v1  ;;  %v8138_v53 = vsel %vm6547_vm7, %v5540_v16, %v4463_v34  ;;  %v5468_v1 = vld [vmem:[%s6217_s28 + $0xa4] sm:$0x1]  ;;  %v9066_v16 = vld [vmem:[#allocation11_spill] sm:$0xff] }
 0x12b   : > { %v1106_v39 = vpop.f32.mrf.mxu1  ;;  %v3902_v21 = vsel %vm6261_vm4, %v8117_v18, %v8052_v51  ;;  %v3938_v34 = vshrl.u32 %v5469_v22, 16  ;;  %v9068_v51 = vld [vmem:[#allocation16_spill] sm:$0xff]  ;;  %v3951_v18 = vshrl.u32 %v8143_v27, 16 }
 0x12c   : > { %6019 = vmatprep.mubr.msk.bf16.mxu0 %vm724_vm3, %v9065_v33  ;;  %v8145_v54 = vadd.f32 %v5810_v2, %v1115_v40  ;;  %v1107_v13 = vadd.f32 %v1106_v39, %v7681_v12  ;;  %v1544_v15 = vpop.f32.mrf.mxu0  ;;  %v3912_v40 = vsel %vm6261_vm4, %v3907_v32, %v3911_v38  ;;  %v3920_v2 = vor.u32 %v3919_v59, %v3916_v29  ;;  %v9069_v59 = vld [vmem:[#allocation12_spill] sm:$0xff] }
 0x12d   : > { %v5779_v57 = vpop.f32.mrf.mxu1  ;;  %5982 = vmatmul.mubr.msk.bf16.gmra.mxu1 %vm724_vm3, %v9066_v16  ;;  %v3941_v12 = vshll.u32 %v5469_v22, 16  ;;  %v8168_v39 = vsel %vm6547_vm7, %v4465_v63, %v4466_v6  ;;  %v3930_v32 = vor.u32 %v3929_v9, %v8140_v52  ;;  %v3933_v38 = vshll.u32 %v5468_v1, 16 }
 0x12e   : > { %v8159_v11 = vadd.f32 %v1531_v30, %v1107_v13  ;;  %v1128_v23 = vadd.f32 %v5779_v57, %v9067_v35  ;;  %v5814_v14 = vpop.f32.mrf.mxu0  ;;  %5985 = vmatprep.mubr.msk.bf16.mxu1 %vm724_vm3, %v9068_v51  ;;  %v5541_v30 = vrot.slane %v5525_v62, 9  ;;  %v4472_v13 = vrot.slane %v4470_v49, 4 }
 0x12f   : > { %v1119_v45 = vpop.f32.mrf.mxu1  ;;  %v4473_v57 = vrot.slane %v5468_v1, 5  ;;  %v8176_v51 = vrot.slane %v3920_v2, 4  ;;  %v3940_v6 = vrot.slane %v3938_v34, 4  ;;  %v3943_v63 = vrot.slane %v3941_v12, 5  ;;  %v8186_v1 = vld [vmem:[%s6217_s28 + $0xb0] sm:$0x1] }
 0x130   : > { %v8171_v29 = vadd.f32 %v5813_v56, %v1128_v23  ;;  %v1120_v22 = vadd.f32 %v1119_v45, %v9069_v59  ;;  %v1547_v33 = vpop.f32.mrf.mxu0  ;;  %v8188_v23 = vrot.slane %v3947_v24, 5  ;;  %v3953_v2 = vrot.slane %v3951_v18, 4  ;;  %v9071_v12 = vld [vmem:[#allocation14_spill] sm:$0xff] }
 0x131   : > { %v5780_v16 = vpop.f32.mrf.mxu1  ;;  %v8198_v43 = vrot.slane %v3930_v32, 4  ;;  %v8200_v17 = vrot.slane %v3933_v38, 5  ;;  %v8208_v58 = vsel %vm6547_vm7, %v5541_v30, %v4470_v49  ;;  %v8212_v36 = vsel %vm6547_vm7, %v4472_v13, %v4473_v57  ;;  %v8224_v30 = vld [vmem:[%s6217_s28 + $0xb8] sm:$0xf] }
 0x132   : > { %v8178_v9 = vadd.f32 %v1544_v15, %v1120_v22  ;;  %v1131_v62 = vadd.f32 %v5780_v16, %v9070_v4  ;;  %v5817_v56 = vpop.f32.mrf.mxu0  ;;  %6020 = vmatmul.mubr.msk.bf16.gmra.mxu0 %vm724_vm3, %v5552_v10  ;;  %v8194_v15 = vcombine.low %v3902_v21, %v3912_v40  ;;  %v5526_v10 = vld [vmem:[%s6217_s28 + $0xa8] sm:$0xe]  ;;  %v3944_v32 = vor.u32 %v3943_v63, %v3940_v6  ;;  %v9073_v22 = vld [vmem:[#allocation9_spill] sm:$0xff] }
 0x133   : > { %v1122_v45 = vpop.f32.mrf.mxu1  ;;  %6023 = vmatprep.mubr.msk.bf16.mxu0 %vm724_vm3, %v5553_v41  ;;  %v5472_v41 = vld [vmem:[%s6217_s28 + $0xb4] sm:$0xf]  ;;  %v9072_v40 = vld [vmem:[#allocation19_spill] sm:$0xff]  ;;  %v3957_v38 = vshll.u32 %v8186_v1, 16  ;;  %v4477_v49 = vrot.slane %v8143_v27, 5  ;;  %v3954_v16 = vor.u32 %v3953_v2, %v8188_v23  ;;  %v3936_v27 = vsel %vm6261_vm4, %v8198_v43, %v8200_v17 }
 0x134   : > { %v8203_v34 = vadd.f32 %v5814_v14, %v1131_v62  ;;  %v1123_v24 = vadd.f32 %v1122_v45, %v9071_v12  ;;  %v1560_v18 = vpop.f32.mrf.mxu0  ;;  %v5542_v62 = vrot.slane %v5526_v10, 9  ;;  %v3962_v6 = vshrl.u32 %v5472_v41, 16 }
 0x135   : > { %v5783_v21 = vpop.f32.mrf.mxu1  ;;  %5986 = vmatmul.mubr.msk.bf16.gmra.mxu1 %vm724_vm3, %v9072_v40  ;;  %v3965_v63 = vshll.u32 %v5472_v41, 16  ;;  %v3971_v2 = vshll.u32 %v8224_v30, 16  ;;  %v3975_v10 = vshrl.u32 %v8224_v30, 16  ;;  %v5475_v40 = vld [vmem:[%s6217_s28 + $0xc0] sm:$0xf]  ;;  %v3945_v4 = vrot.slane %v3944_v32, 4 }
 0x136   : > { %v8226_v59 = vadd.f32 %v1547_v33, %v1123_v24  ;;  %v1144_v13 = vadd.f32 %v5783_v21, %v9073_v22  ;;  %v5818_v57 = vpop.f32.mrf.mxu0  ;;  %5989 = vmatprep.mubr.msk.bf16.mxu1 %vm724_vm3, %v8078_v46  ;;  %v9075_v24 = vld [vmem:[#allocation18_spill] sm:$0xff]  ;;  %v3959_v43 = vrot.slane %v3957_v38, 5  ;;  %v4479_v17 = vrot.slane %v4477_v49, 4 }
 0x137   : > { %v1135_v45 = vpop.f32.mrf.mxu1  ;;  %v4480_v33 = vrot.slane %v8186_v1, 5  ;;  %v8254_v14 = vsel %vm6547_vm7, %v5542_v62, %v4477_v49  ;;  %v8257_v32 = vld [vmem:[%s6217_s28 + $0xc4] sm:$0xf]  ;;  %v9079_v1 = vcombine.low %v8036_v25, %v8040_v50  ;;  %v8269_v62 = vrot.slane %v3971_v2, 5 }
 0x138   : > { %v8238_v12 = vadd.f32 %v5817_v56, %v1144_v13  ;;  %v1136_v21 = vadd.f32 %v1135_v45, %v9075_v24  ;;  %v1563_v46 = vpop.f32.mrf.mxu0  ;;  %v9077_v56 = vld [vmem:[#allocation21_spill] sm:$0xff]  ;;  %v9078_v45 = vcombine.low %v8024_v47, %v8028_v7  ;;  %v3955_v24 = vrot.slane %v3954_v16, 4  ;;  %v9080_v16 = vld [vmem:[#allocation23_spill] sm:$0xff] }
 0x139   : > { %v5784_v22 = vpop.f32.mrf.mxu1  ;;  %v3986_v47 = vshrl.u32 %v5475_v40, 16  ;;  %v3989_v7 = vshll.u32 %v5475_v40, 16  ;;  %v3950_v25 = vsel %vm6261_vm4, %v3945_v4, %v8188_v23  ;;  %v8278_v50 = vsel %vm6547_vm7, %v4479_v17, %v4480_v33  ;;  %v5527_v40 = vld [vmem:[%s6217_s28 + $0xb4] sm:$0xe] }
 0x13a   : > { %9074 = vst [vmem:[#allocation11_spill] sm:$0xff] %v8238_v12  ;;  %v8245_v35 = vadd.f32 %v1560_v18, %v1136_v21  ;;  %v1147_v41 = vadd.f32 %v5784_v22, %v9077_v56  ;;  %v5821_v13 = vpop.f32.mrf.mxu0  ;;  %6024 = vmatmul.mubr.msk.bf16.gmra.mxu0 %vm724_vm3, %v9078_v45  ;;  %v8264_v18 = vld [vmem:[%s6217_s28 + $0xbc] sm:$0x1]  ;;  %v3964_v21 = vrot.slane %v3962_v6, 4  ;;  %v3967_v22 = vrot.slane %v3965_v63, 5 }
 0x13b   : > { %v1138_v38 = vpop.f32.mrf.mxu1  ;;  %6027 = vmatprep.mubr.msk.bf16.mxu0 %vm724_vm3, %v9079_v1  ;;  %v3999_v6 = vshrl.u32 %v8257_v32, 16  ;;  %v3981_v23 = vshll.u32 %v8264_v18, 16  ;;  %v4484_v17 = vrot.slane %v8224_v30, 5  ;;  %v9081_v1 = vld [vmem:[#allocation25_spill] sm:$0xff] }
 0x13c   : > { %9076 = vst [vmem:[#allocation8_spill] sm:$0xff] %v8245_v35  ;;  %v8266_v56 = vadd.f32 %v5818_v57, %v1147_v41  ;;  %v1139_v45 = vadd.f32 %v1138_v38, %v9080_v16  ;;  %v1576_v49 = vpop.f32.mrf.mxu0  ;;  %v3977_v35 = vrot.slane %v3975_v10, 4  ;;  %v3995_v57 = vshll.u32 %v8257_v32, 16 }
 0x13d   : > { %v5787_v12 = vpop.f32.mrf.mxu1  ;;  %5990 = vmatmul.mubr.msk.bf16.gmra.mxu1 %vm724_vm3, %v8080_v61  ;;  %v3960_v61 = vsel %vm6261_vm4, %v3955_v24, %v3959_v43  ;;  %v3968_v33 = vor.u32 %v3967_v22, %v3964_v21  ;;  %v3988_v41 = vrot.slane %v3986_v47, 4  ;;  %v3991_v38 = vrot.slane %v3989_v7, 5 }
 0x13e   : > { %v8282_v63 = vadd.f32 %v1563_v46, %v1139_v45  ;;  %v1160_v2 = vadd.f32 %v5787_v12, %v7988_v28  ;;  %v5822_v10 = vpop.f32.mrf.mxu0  ;;  %5993 = vmatprep.mubr.msk.bf16.mxu1 %vm724_vm3, %v8086_v60  ;;  %v9082_v60 = vsel %vm6261_vm4, %v8176_v51, %v8140_v52  ;;  %v3978_v24 = vor.u32 %v3977_v35, %v8269_v62 }
 0x13f   : > { %v1151_v4 = vpop.f32.mrf.mxu1  ;;  %v8300_v43 = vcombine.low %v9082_v60, %v3936_v27  ;;  %v8303_v30 = vcombine.low %v3950_v25, %v3960_v61  ;;  %v8307_v22 = vrot.slane %v3995_v57, 5  ;;  %v4001_v47 = vrot.slane %v3999_v6, 4  ;;  %v5477_v27 = vld [vmem:[%s6217_s28 + $0xc8] sm:$0x1] }
 0x140   : > { %v8292_v46 = vadd.f32 %v5821_v13, %v1160_v2  ;;  %v1152_v28 = vadd.f32 %v1151_v4, %v9081_v1  ;;  %v1579_v12 = vpop.f32.mrf.mxu0  ;;  %v5559_v13 = vcombine.low %v8254_v14, %v8278_v50  ;;  %v9083_v52 = vcombine.low %v8106_v3, %v8128_v20  ;;  %v5478_v14 = vld [vmem:[%s6217_s28 + $0xcc] sm:$0xf]  ;;  %v8328_v20 = vld [vmem:[%s6217_s28 + $0xd0] sm:$0xf]  ;;  %v5528_v4 = vld [vmem:[%s6217_s28 + $0xc0] sm:$0xe] }
 0x141   : > { %v5788_v21 = vpop.f32.mrf.mxu1  ;;  %v8316_v35 = vrot.slane %v3981_v23, 5  ;;  %v5543_v51 = vrot.slane %v5527_v40, 9  ;;  %v9084_v50 = vcombine.low %v8138_v53, %v8168_v39  ;;  %v4487_v57 = vrot.slane %v8264_v18, 5 }
 0x142   : > { %v8309_v7 = vadd.f32 %v1576_v49, %v1152_v28  ;;  %v1163_v16 = vadd.f32 %v5788_v21, %v8011_v19  ;;  %v5825_v45 = vpop.f32.mrf.mxu0  ;;  %6028 = vmatmul.mubr.msk.bf16.gmra.mxu0 %vm724_vm3, %v9083_v52  ;;  %v8324_v49 = vrot.slane %v3968_v33, 4  ;;  %v4486_v19 = vrot.slane %v4484_v17, 4 }
 0x143   : > { %v1154_v25 = vpop.f32.mrf.mxu1  ;;  %6031 = vmatprep.mubr.msk.bf16.mxu0 %vm724_vm3, %v9084_v50  ;;  %v3992_v3 = vor.u32 %v3991_v38, %v3988_v41  ;;  %v8333_v23 = vrot.slane %v3978_v24, 4  ;;  %v4491_v53 = vrot.slane %v8257_v32, 5  ;;  %v4002_v33 = vor.u32 %v4001_v47, %v8307_v22 }
 0x144   : > { %v8330_v6 = vadd.f32 %v5822_v10, %v1163_v16  ;;  %v1155_v2 = vadd.f32 %v1154_v25, %v8043_v26  ;;  %v1592_v61 = vpop.f32.mrf.mxu0  ;;  %v4005_v18 = vshll.u32 %v5477_v27, 16  ;;  %v4010_v40 = vshrl.u32 %v5478_v14, 16  ;;  %v9087_v10 = vld [vmem:[#allocation4_spill] sm:$0xff]  ;;  %v9088_v16 = vld [vmem:[#allocation3_spill] sm:$0xff] }
 0x145   : > { %v5791_v39 = vpop.f32.mrf.mxu1  ;;  %5994 = vmatmul.mubr.msk.bf16.gmra.mxu1 %vm724_vm3, %v8115_v48  ;;  %v4013_v41 = vshll.u32 %v5478_v14, 16  ;;  %v4019_v28 = vshll.u32 %v8328_v20, 16  ;;  %v4023_v32 = vshrl.u32 %v8328_v20, 16  ;;  %v4485_v48 = vsel %vm6547_vm7, %v5543_v51, %v4484_v17  ;;  %v9089_v17 = vld [vmem:[#allocation6_spill] sm:$0xff] }
 0x146   : > { %9085 = vst [vmem:[#allocation16_spill] sm:$0xff] %v8330_v6  ;;  %v8340_v38 = vadd.f32 %v1579_v12, %v1155_v2  ;;  %v1176_v1 = vadd.f32 %v5791_v39, %v9087_v10  ;;  %v5826_v26 = vpop.f32.mrf.mxu0  ;;  %5997 = vmatprep.mubr.msk.bf16.mxu1 %vm724_vm3, %v8194_v15  ;;  %v4488_v24 = vsel %vm6547_vm7, %v4486_v19, %v4487_v57  ;;  %v3993_v21 = vrot.slane %v3992_v3, 4 }
 0x147   : > { %v1167_v60 = vpop.f32.mrf.mxu1  ;;  %v5544_v12 = vrot.slane %v5528_v4, 9  ;;  %v4493_v25 = vrot.slane %v4491_v53, 4  ;;  %v4494_v15 = vrot.slane %v5477_v27, 5  ;;  %v4003_v2 = vrot.slane %v4002_v33, 4  ;;  %v5480_v33 = vld [vmem:[%s6217_s28 + $0xd4] sm:$0x1] }
 0x148   : > { %9086 = vst [vmem:[#allocation12_spill] sm:$0xff] %v8340_v38  ;;  %v8351_v47 = vadd.f32 %v5825_v45, %v1176_v1  ;;  %v1168_v52 = vadd.f32 %v1167_v60, %v9088_v16  ;;  %v1595_v14 = vpop.f32.mrf.mxu0  ;;  %v4007_v39 = vrot.slane %v4005_v18, 5  ;;  %v4012_v10 = vrot.slane %v4010_v40, 4  ;;  %v9091_v18 = vld [vmem:[#allocation5_spill] sm:$0xff] }
 0x149   : > { %v5792_v50 = vpop.f32.mrf.mxu1  ;;  %v4015_v38 = vrot.slane %v4013_v41, 5  ;;  %v9090_v45 = vcombine.low %v8208_v58, %v8212_v36  ;;  %v8361_v57 = vrot.slane %v4019_v28, 5  ;;  %v4025_v27 = vrot.slane %v4023_v32, 4 }
 0x14a   : > { %v8354_v6 = vadd.f32 %v1592_v61, %v1168_v52  ;;  %v1179_v51 = vadd.f32 %v5792_v50, %v9089_v17  ;;  %v5829_v19 = vpop.f32.mrf.mxu0  ;;  %v3974_v61 = vsel %vm6261_vm4, %v8324_v49, %v8269_v62  ;;  %v3984_v4 = vsel %vm6261_vm4, %v8333_v23, %v8316_v35  ;;  %v5529_v62 = vld [vmem:[%s6217_s28 + $0xcc] sm:$0xe] }
 0x14b   : > { %6032 = vmatmul.mubr.msk.bf16.gmra.mxu0 %vm724_vm3, %v9090_v45  ;;  %v1170_v3 = vpop.f32.mrf.mxu1  ;;  %v4498_v58 = vrot.slane %v8328_v20, 5  ;;  %v4495_v1 = vsel %vm6547_vm7, %v4493_v25, %v4494_v15  ;;  %v5560_v35 = vcombine.low %v4485_v48, %v4488_v24  ;;  %v3998_v20 = vsel %vm6261_vm4, %v3993_v21, %v8307_v22  ;;  %v9093_v25 = vld [vmem:[#allocation10_spill] sm:$0xff] }
 0x14c   : > { %6035 = vmatprep.mubr.msk.bf16.mxu0 %vm724_vm3, %v5559_v13  ;;  %v8374_v36 = vadd.f32 %v5826_v26, %v1179_v51  ;;  %v1171_v40 = vadd.f32 %v1170_v3, %v9091_v18  ;;  %v1608_v41 = vpop.f32.mrf.mxu0  ;;  %v4492_v13 = vsel %vm6547_vm7, %v5544_v12, %v4491_v53  ;;  %v4008_v23 = vsel %vm6261_vm4, %v4003_v2, %v4007_v39  ;;  %v9092_v53 = vld [vmem:[#allocation7_spill] sm:$0xff] }
 0x14d   : > { %v5795_v49 = vpop.f32.mrf.mxu1  ;;  %5998 = vmatmul.mubr.msk.bf16.gmra.mxu1 %vm724_vm3, %v8300_v43  ;;  %v4016_v26 = vor.u32 %v4015_v38, %v4012_v10  ;;  %v4026_v12 = vor.u32 %v4025_v27, %v8361_v57  ;;  %v4029_v43 = vshll.u32 %v5480_v33, 16  ;;  %v5561_v24 = vcombine.low %v4492_v13, %v4495_v1 }
 0x14e   : > { %v8389_v28 = vadd.f32 %v1595_v14, %v1171_v40  ;;  %v1192_v32 = vadd.f32 %v5795_v49, %v9092_v53  ;;  %v5830_v60 = vpop.f32.mrf.mxu0  ;;  %6001 = vmatprep.mubr.msk.bf16.mxu1 %vm724_vm3, %v8303_v30  ;;  %v5545_v16 = vrot.slane %v5529_v62, 9  ;;  %v4500_v52 = vrot.slane %v4498_v58, 4  ;;  %v9094_v30 = vld [vmem:[#allocation13_spill] sm:$0xff] }
 0x14f   : > { %v1183_v48 = vpop.f32.mrf.mxu1  ;;  %v4501_v22 = vrot.slane %v5480_v33, 5  ;;  %v5495_v50 = vcombine.low %v3974_v61, %v3984_v4  ;;  %v5496_v2 = vcombine.low %v3998_v20, %v4008_v23  ;;  %v4017_v39 = vrot.slane %v4016_v26, 4  ;;  %v9095_v33 = vld [vmem:[#allocation15_spill] sm:$0xff]  ;;  %v9096_v62 = vld [vmem:[#allocation17_spill] sm:$0xff]  ;;  %v9097_v26 = vld [vmem:[#allocation20_spill] sm:$0xff] }
 0x150   : > { %v8395_v21 = vadd.f32 %v5829_v19, %v1192_v32  ;;  %v1184_v38 = vadd.f32 %v1183_v48, %v9093_v25  ;;  %v1611_v14 = vpop.f32.mrf.mxu0  ;;  %v4027_v45 = vrot.slane %v4026_v12, 4  ;;  %v4031_v27 = vrot.slane %v4029_v43, 5  ;;  %v9098_v43 = vld [vmem:[#allocation22_spill] sm:$0xff] }
 0x151   : > { %v5796_v15 = vpop.f32.mrf.mxu1  ;;  %v4499_v19 = vsel %vm6547_vm7, %v5545_v16, %v4498_v58  ;;  %v4502_v61 = vsel %vm6547_vm7, %v4500_v52, %v4501_v22  ;;  %v4022_v13 = vsel %vm6261_vm4, %v4017_v39, %v8361_v57 }
 0x152   : > { %v8398_v10 = vadd.f32 %v1608_v41, %v1184_v38  ;;  %v1195_v17 = vadd.f32 %v5796_v15, %v9094_v30  ;;  %v5833_v51 = vpop.f32.mrf.mxu0  ;;  %v4032_v0 = vsel %vm6261_vm4, %v4027_v45, %v4031_v27 }
 0x153   : > { %6036 = vmatmul.mubr.msk.bf16.gmra.mxu0 %vm724_vm3, %v5560_v35  ;;  %v1186_v3 = vpop.f32.mrf.mxu1  ;;  %v5562_v35 = vcombine.low %v4499_v19, %v4502_v61  ;;  %v5497_v12 = vcombine.low %v4022_v13, %v4032_v0 }
 0x154   : > { %6039 = vmatprep.mubr.msk.bf16.mxu0 %vm724_vm3, %v5561_v24  ;;  %v8407_v4 = vadd.f32 %v5830_v60, %v1195_v17  ;;  %v1187_v18 = vadd.f32 %v1186_v3, %v9095_v33  ;;  %v1624_v40 = vpop.f32.mrf.mxu0 }
 0x155   : > { %v5799_v41 = vpop.f32.mrf.mxu1  ;;  %6002 = vmatmul.mubr.msk.bf16.gmra.mxu1 %vm724_vm3, %v5495_v50 }
 0x156   : > { %v8414_v1 = vadd.f32 %v1611_v14, %v1187_v18  ;;  %v1208_v49 = vadd.f32 %v5799_v41, %v9096_v62  ;;  %v5834_v58 = vpop.f32.mrf.mxu0  ;;  %6005 = vmatprep.mubr.msk.bf16.mxu1 %vm724_vm3, %v5496_v2 }
 0x157   : > { %v1199_v20 = vpop.f32.mrf.mxu1 }
 0x158   : > { %v8420_v23 = vadd.f32 %v5833_v51, %v1208_v49  ;;  %v1200_v53 = vadd.f32 %v1199_v20, %v9097_v26  ;;  %v1627_v32 = vpop.f32.mrf.mxu0 }
 0x159   : > { %v5800_v60 = vpop.f32.mrf.mxu1 }
 0x15a   : > { %v8423_v57 = vadd.f32 %v1624_v40, %v1200_v53  ;;  %v1211_v48 = vadd.f32 %v5800_v60, %v9098_v43  ;;  %v5837_v24 = vpop.f32.mrf.mxu0 }
 0x15b   : > { %6040 = vmatmul.mubr.msk.bf16.gmra.mxu0 %vm724_vm3, %v5562_v35  ;;  %v1202_v16 = vpop.f32.mrf.mxu1 }
 0x15c   : > { %v8427_v52 = vadd.f32 %v5834_v58, %v1211_v48  ;;  %v1203_v22 = vadd.f32 %v1202_v16, %v9099_v31  ;;  %v1640_v25 = vpop.f32.mrf.mxu0 }
 0x15d   : > { %v5803_v38 = vpop.f32.mrf.mxu1  ;;  %6006 = vmatmul.mubr.msk.bf16.gmra.mxu1 %vm724_vm3, %v5497_v12 }
 0x15e   : > { %v8431_v14 = vadd.f32 %v1627_v32, %v1203_v22  ;;  %v1224_v15 = vadd.f32 %v5803_v38, %v8003_v42  ;;  %v5838_v50 = vpop.f32.mrf.mxu0 }
 0x15f   : > { %v1215_v2 = vpop.f32.mrf.mxu1 }
 0x160   : > { %v8434_v39 = vadd.f32 %v5837_v24, %v1224_v15  ;;  %v1216_v30 = vadd.f32 %v1215_v2, %v8030_v44  ;;  %v1643_v17 = vpop.f32.mrf.mxu0 }
 0x161   : > { %v5804_v51 = vpop.f32.mrf.mxu1 }
 0x162   : > { %v8437_v45 = vadd.f32 %v1640_v25, %v1216_v30  ;;  %v1227_v27 = vadd.f32 %v5804_v51, %v8045_v8  ;;  %v5877_v3 = vpop.f32.mrf.mxu0  ;;  %v9100_v30 = vld [vmem:[#allocation11_spill] sm:$0xff] }
 0x163   : > { %v1218_v19 = vpop.f32.mrf.mxu1 }
 0x164   : > { %v8440_v61 = vadd.f32 %v5838_v50, %v1227_v27  ;;  %v1219_v33 = vadd.f32 %v1218_v19, %v8067_v55  ;;  %v2613_v18 = vpop.f32.mrf.mxu0 }
 0x165   : > { %v5843_v42 = vpop.f32.mrf.mxu1 }
 0x166   : > { %v8443_v40 = vadd.f32 %v1643_v17, %v1219_v33  ;;  %v2016_v41 = vadd.f32 %v5843_v42, %v8112_v5  ;;  %v5878_v13 = vpop.f32.mrf.mxu0 }
 0x167   : > { %v1887_v44 = vpop.f32.mrf.mxu1 }
 0x168   : > { %v8446_v62 = vadd.f32 %v5877_v3, %v2016_v41  ;;  %v2014_v49 = vadd.f32 %v1887_v44, %v8119_v37  ;;  %v2616_v58 = vpop.f32.mrf.mxu0  ;;  %v9101_v3 = vld [vmem:[#allocation8_spill] sm:$0xff] }
 0x169   : > { %v5844_v8 = vpop.f32.mrf.mxu1 }
 0x16a   : > { %v8449_v0 = vadd.f32 %v2613_v18, %v2014_v49  ;;  %v2017_v35 = vadd.f32 %v5844_v8, %v8145_v54  ;;  %v5881_v20 = vpop.f32.mrf.mxu0 }
 0x16b   : > { %v1890_v55 = vpop.f32.mrf.mxu1 }
 0x16c   : > { %v8452_v26 = vadd.f32 %v5878_v13, %v2017_v35  ;;  %v2015_v53 = vadd.f32 %v1890_v55, %v8159_v11  ;;  %v2629_v32 = vpop.f32.mrf.mxu0 }
 0x16d   : > { %v5847_v5 = vpop.f32.mrf.mxu1 }
 0x16e   : > { %v8455_v60 = vadd.f32 %v2616_v58, %v2015_v53  ;;  %v2020_v12 = vadd.f32 %v5847_v5, %v8171_v29  ;;  %v5882_v43 = vpop.f32.mrf.mxu0 }
 0x16f   : > { %v1903_v37 = vpop.f32.mrf.mxu1 }
 0x170   : > { %v8458_v48 = vadd.f32 %v5881_v20, %v2020_v12  ;;  %v2018_v24 = vadd.f32 %v1903_v37, %v8178_v9  ;;  %v2632_v16 = vpop.f32.mrf.mxu0 }
 0x171   : > { %v5848_v54 = vpop.f32.mrf.mxu1 }
 0x172   : > { %v8461_v31 = vadd.f32 %v2629_v32, %v2018_v24  ;;  %v2021_v22 = vadd.f32 %v5848_v54, %v8203_v34  ;;  %v5885_v25 = vpop.f32.mrf.mxu0  ;;  %v9103_v54 = vld [vmem:[#allocation12_spill] sm:$0xff] }
 0x173   : > { %v1906_v11 = vpop.f32.mrf.mxu1 }
 0x174   : > { %v8464_v38 = vadd.f32 %v5882_v43, %v2021_v22  ;;  %v2019_v15 = vadd.f32 %v1906_v11, %v8226_v59  ;;  %v2645_v50 = vpop.f32.mrf.mxu0  ;;  %v9102_v43 = vld [vmem:[#allocation16_spill] sm:$0xff] }
 0x175   : > { %v5851_v29 = vpop.f32.mrf.mxu1 }
 0x176   : > { %v8467_v2 = vadd.f32 %v2632_v16, %v2019_v15  ;;  %v2024_v17 = vadd.f32 %v5851_v29, %v9100_v30  ;;  %v5886_v51 = vpop.f32.mrf.mxu0 }
 0x177   : > { %v1919_v9 = vpop.f32.mrf.mxu1 }
 0x178   : > { %v8470_v27 = vadd.f32 %v5885_v25, %v2024_v17  ;;  %v2022_v19 = vadd.f32 %v1919_v9, %v9101_v3  ;;  %v2648_v33 = vpop.f32.mrf.mxu0 }
 0x179   : > { %v5852_v34 = vpop.f32.mrf.mxu1 }
 0x17a   : > { %v8473_v18 = vadd.f32 %v2645_v50, %v2022_v19  ;;  %v2025_v42 = vadd.f32 %v5852_v34, %v8266_v56  ;;  %v5889_v41 = vpop.f32.mrf.mxu0 }
 0x17b   : > { %v1922_v59 = vpop.f32.mrf.mxu1 }
 0x17c   : > { %v8476_v13 = vadd.f32 %v5886_v51, %v2025_v42  ;;  %v2023_v44 = vadd.f32 %v1922_v59, %v8282_v63  ;;  %v2661_v49 = vpop.f32.mrf.mxu0 }
 0x17d   : > { %v5855_v58 = vpop.f32.mrf.mxu1 }
 0x17e   : > { %v8479_v8 = vadd.f32 %v2648_v33, %v2023_v44  ;;  %v2028_v35 = vadd.f32 %v5855_v58, %v8292_v46  ;;  %v5890_v20 = vpop.f32.mrf.mxu0 }
 0x17f   : > { %v1935_v55 = vpop.f32.mrf.mxu1 }
 0x180   : > { %v8482_v53 = vadd.f32 %v5889_v41, %v2028_v35  ;;  %v2026_v32 = vadd.f32 %v1935_v55, %v8309_v7  ;;  %v2664_v5 = vpop.f32.mrf.mxu0 }
 0x181   : > { %v5856_v56 = vpop.f32.mrf.mxu1 }
 0x182   : > { %v8485_v12 = vadd.f32 %v2661_v49, %v2026_v32  ;;  %v2029_v37 = vadd.f32 %v5856_v56, %v9102_v43  ;;  %v5893_v24 = vpop.f32.mrf.mxu0 }
 0x183   : > { %v1938_v63 = vpop.f32.mrf.mxu1 }
 0x184   : > { %v8488_v16 = vadd.f32 %v5890_v20, %v2029_v37  ;;  %v2027_v22 = vadd.f32 %v1938_v63, %v9103_v54  ;;  %v2677_v25 = vpop.f32.mrf.mxu0 }
 0x185   : > { %v5859_v46 = vpop.f32.mrf.mxu1 }
 0x186   : > { %v8491_v11 = vadd.f32 %v2664_v5, %v2027_v22  ;;  %v2032_v15 = vadd.f32 %v5859_v46, %v8351_v47  ;;  %v5894_v50 = vpop.f32.mrf.mxu0 }
 0x187   : > { %v1951_v7 = vpop.f32.mrf.mxu1 }
 0x188   : > { %v8494_v29 = vadd.f32 %v5893_v24, %v2032_v15  ;;  %v2030_v30 = vadd.f32 %v1951_v7, %v8354_v6  ;;  %v2680_v17 = vpop.f32.mrf.mxu0 }
 0x189   : > { %v5860_v51 = vpop.f32.mrf.mxu1 }
 0x18a   : > { %v8497_v9 = vadd.f32 %v2677_v25, %v2030_v30  ;;  %v2033_v3 = vadd.f32 %v5860_v51, %v8374_v36  ;;  %v5897_v19 = vpop.f32.mrf.mxu0 }
 0x18b   : > { %v1954_v33 = vpop.f32.mrf.mxu1 }
 0x18c   : > { %v8500_v34 = vadd.f32 %v5894_v50, %v2033_v3  ;;  %v2031_v42 = vadd.f32 %v1954_v33, %v8389_v28  ;;  %v2693_v41 = vpop.f32.mrf.mxu0 }
 0x18d   : > { %v5863_v47 = vpop.f32.mrf.mxu1 }
 0x18e   : > { %9104 = vst [vmem:[#allocation2_spill] sm:$0xff] %v8500_v34  ;;  %v8503_v59 = vadd.f32 %v2680_v17, %v2031_v42  ;;  %v2036_v44 = vadd.f32 %v5863_v47, %v8395_v21  ;;  %v5898_v49 = vpop.f32.mrf.mxu0 }
 0x18f   : > { %v1967_v6 = vpop.f32.mrf.mxu1 }
 0x190   : > { %9105 = vst [vmem:[#allocation14_spill] sm:$0xff] %v8503_v59  ;;  %v8506_v58 = vadd.f32 %v5897_v19, %v2036_v44  ;;  %v2034_v35 = vadd.f32 %v1967_v6, %v8398_v10  ;;  %v2696_v20 = vpop.f32.mrf.mxu0 }
 0x191   : > { %v5864_v36 = vpop.f32.mrf.mxu1 }
 0x192   : > { %9106 = vst [vmem:[#allocation19_spill] sm:$0xff] %v8506_v58  ;;  %v8509_v55 = vadd.f32 %v2693_v41, %v2034_v35  ;;  %v2037_v32 = vadd.f32 %v5864_v36, %v8407_v4  ;;  %v5901_v5 = vpop.f32.mrf.mxu0 }
 0x193   : > { %v1970_v28 = vpop.f32.mrf.mxu1 }
 0x194   : > { %9107 = vst [vmem:[#allocation9_spill] sm:$0xff] %v8509_v55  ;;  %v8512_v56 = vadd.f32 %v5898_v49, %v2037_v32  ;;  %v2035_v43 = vadd.f32 %v1970_v28, %v8414_v1  ;;  %v2709_v37 = vpop.f32.mrf.mxu0 }
 0x195   : > { %v5867_v21 = vpop.f32.mrf.mxu1 }
 0x196   : > { %9108 = vst [vmem:[#allocation18_spill] sm:$0xff] %v8512_v56  ;;  %v8515_v24 = vadd.f32 %v2696_v20, %v2035_v43  ;;  %v2040_v63 = vadd.f32 %v5867_v21, %v8420_v23  ;;  %v5902_v54 = vpop.f32.mrf.mxu0 }
 0x197   : > { %v1983_v10 = vpop.f32.mrf.mxu1 }
 0x198   : > { %9109 = vst [vmem:[#allocation21_spill] sm:$0xff] %v8515_v24  ;;  %v8518_v22 = vadd.f32 %v5901_v5, %v2040_v63  ;;  %v2038_v25 = vadd.f32 %v1983_v10, %v8423_v57  ;;  %v2712_v46 = vpop.f32.mrf.mxu0 }
 0x199   : > { %v5868_v4 = vpop.f32.mrf.mxu1 }
 0x19a   : > { %9110 = vst [vmem:[#allocation23_spill] sm:$0xff] %v8518_v22  ;;  %v8521_v15 = vadd.f32 %v2709_v37, %v2038_v25  ;;  %v2041_v50 = vadd.f32 %v5868_v4, %v8427_v52  ;;  %v5905_v7 = vpop.f32.mrf.mxu0 }
 0x19b   : > { %v1986_v1 = vpop.f32.mrf.mxu1 }
 0x19c   : > { %9111 = vst [vmem:[#allocation25_spill] sm:$0xff] %v8521_v15  ;;  %v8524_v30 = vadd.f32 %v5902_v54, %v2041_v50  ;;  %v2039_v17 = vadd.f32 %v1986_v1, %v8431_v14  ;;  %v2725_v51 = vpop.f32.mrf.mxu0 }
 0x19d   : > { %v5871_v23 = vpop.f32.mrf.mxu1 }
 0x19e   : > { %9112 = vst [vmem:[#allocation4_spill] sm:$0xff] %v8524_v30  ;;  %v8527_v3 = vadd.f32 %v2712_v46, %v2039_v17  ;;  %v2044_v19 = vadd.f32 %v5871_v23, %v8434_v39  ;;  %v5906_v33 = vpop.f32.mrf.mxu0 }
 0x19f   : > { %v1999_v57 = vpop.f32.mrf.mxu1 }
 0x1a0   : > { %9113 = vst [vmem:[#allocation3_spill] sm:$0xff] %v8527_v3  ;;  %v8530_v42 = vadd.f32 %v5905_v7, %v2044_v19  ;;  %v2042_v41 = vadd.f32 %v1999_v57, %v8437_v45  ;;  %v2728_v47 = vpop.f32.mrf.mxu0 }
 0x1a1   : > { %v5872_v52 = vpop.f32.mrf.mxu1 }
 0x1a2   : > { %9114 = vst [vmem:[#allocation6_spill] sm:$0xff] %v8530_v42  ;;  %v8533_v44 = vadd.f32 %v2725_v51, %v2042_v41  ;;  %v2045_v49 = vadd.f32 %v5872_v52, %v8440_v61  ;;  %v8536_v6 = vpop.f32.mrf.mxu0 }
 0x1a3   : > { %v2002_v14 = vpop.f32.mrf.mxu1 }
 0x1a4   : > { %9115 = vst [vmem:[#allocation5_spill] sm:$0xff] %v8533_v44  ;;  %v8538_v35 = vadd.f32 %v5906_v33, %v2045_v49  ;;  %v2043_v20 = vadd.f32 %v2002_v14, %v8443_v40  ;;  %v8541_v39 = vpop.f32.mrf.mxu0 }
 0x1a5   : > { %v5911_v36 = vpop.f32.mrf.mxu1 }
 0x1a6   : > { %9116 = vst [vmem:[#allocation7_spill] sm:$0xff] %v8538_v35  ;;  %v8543_v32 = vadd.f32 %v2728_v47, %v2043_v20  ;;  %v8545_v5 = vpop.f32.mrf.mxu0 }
 0x1a7   : > { %v3083_v45 = vpop.f32.mrf.mxu1 }
 0x1a8   : > { %9117 = vst [vmem:[#allocation10_spill] sm:$0xff] %v8543_v32  ;;  %v8547_v28 = vpop.f32.mrf.mxu0 }
 0x1a9   : > { %v5912_v43 = vpop.f32.mrf.mxu1 }
 0x1aa   : > { %v8549_v37 = vpop.f32.mrf.mxu0 }
 0x1ab   : > { %v8551_v61 = vpop.f32.mrf.mxu1 }
 0x1ac   : > { %v8553_v21 = vpop.f32.mrf.mxu0 }
 0x1ad   : > { %v8555_v63 = vpop.f32.mrf.mxu1 }
 0x1ae   : > { %v8557_v40 = vpop.f32.mrf.mxu0 }
 0x1af   : > { %v8559_v54 = vpop.f32.mrf.mxu1 }
 0x1b0   : > { %v8561_v10 = vpop.f32.mrf.mxu0 }
 0x1b1   : > { %v8563_v25 = vpop.f32.mrf.mxu1 }
 0x1b2   : > { %v8565_v46 = vpop.f32.mrf.mxu0 }
 0x1b3   : > { %v8567_v4 = vpop.f32.mrf.mxu1 }
 0x1b4   : > { %v8569_v50 = vpop.f32.mrf.mxu0 }
 0x1b5   : > { %v8571_v7 = vpop.f32.mrf.mxu1 }
 0x1b6   : > { %v8573_v1 = vpop.f32.mrf.mxu0 }
 0x1b7   : > { %v8575_v17 = vpop.f32.mrf.mxu1 }
 0x1b8   : > { %v8577_v51 = vpop.f32.mrf.mxu0 }
 0x1b9   : > { %v8579_v23 = vpop.f32.mrf.mxu1 }
 0x1ba   : > { %v8581_v19 = vpop.f32.mrf.mxu0 }
 0x1bb   : > { %v8583_v33 = vpop.f32.mrf.mxu1 }
 0x1bc   : > { %v8585_v57 = vpop.f32.mrf.mxu0 }
 0x1bd   : > { %v8587_v41 = vpop.f32.mrf.mxu1 }
 0x1be   : > { %v8589_v47 = vpop.f32.mrf.mxu0 }
 0x1bf   : > { %v8591_v52 = vpop.f32.mrf.mxu1 }
 0x1c0   : > { %v8593_v49 = vpop.f32.mrf.mxu0 }
 0x1c1   : > { %v8595_v14 = vpop.f32.mrf.mxu1 }
 0x1c2   : > { %v8597_v20 = vpop.f32.mrf.mxu0 }
 0x1c3   : > { %9118 = vst [vmem:[#allocation13_spill] sm:$0xff] %v8597_v20  ;;  %v8599_v32 = vpop.f32.mrf.mxu1 }
 0x1c4   : > { %v8601_v35 = vpop.f32.mrf.mxu0 }
 0x1c5   : > { %9119 = vst [vmem:[#allocation15_spill] sm:$0xff] %v8601_v35  ;;  %v8603_v44 = vpop.f32.mrf.mxu1 }
 0x1c6   : > { %v8605_v42 = vpop.f32.mrf.mxu0 }
 0x1c7   : > { %9120 = vst [vmem:[#allocation17_spill] sm:$0xff] %v8605_v42  ;;  %v8607_v3 = vpop.f32.mrf.mxu1 }
 0x1c8   : > { %v8609_v30 = vpop.f32.mrf.mxu0 }
 0x1c9   : > { %9121 = vst [vmem:[#allocation20_spill] sm:$0xff] %v8609_v30  ;;  %v8611_v15 = vpop.f32.mrf.mxu1 }
 0x1ca   : > { %9122 = vst [vmem:[#allocation22_spill] sm:$0xff] %v8611_v15  ;;  %v8613_v22 = vpop.f32.mrf.mxu0 }
 0x1cb   : > { %9123 = vst [vmem:[#allocation24_spill] sm:$0xff] %v8613_v22  ;;  %v8615_v24 = vpop.f32.mrf.mxu1 }
 0x1cc   : > { %9124 = vst [vmem:[#allocation11_spill] sm:$0xff] %v8615_v24  ;;  %v8617_v56 = vpop.f32.mrf.mxu0 }
 0x1cd   : > { %9125 = vst [vmem:[#allocation8_spill] sm:$0xff] %v8617_v56  ;;  %v8619_v55 = vpop.f32.mrf.mxu1 }
 0x1ce   : > { %9126 = vst [vmem:[#allocation16_spill] sm:$0xff] %v8619_v55  ;;  %v8621_v58 = vpop.f32.mrf.mxu0 }
 0x1cf   : > { %9127 = vst [vmem:[#allocation12_spill] sm:$0xff] %v8621_v58  ;;  %v8623_v59 = vpop.f32.mrf.mxu1 }
 0x1d0   : > { %9128 = vst [vmem:[#allocation26_spill] sm:$0xff] %v8623_v59  ;;  %v8625_v35 = vpop.f32.mrf.mxu0 }
 0x1d1   : > { %9129 = vst [vmem:[#allocation27_spill] sm:$0xff] %v8625_v35  ;;  %v8627_v42 = vpop.f32.mrf.mxu1 }
 0x1d2   : > { %9130 = vst [vmem:[#allocation28_spill] sm:$0xff] %v8627_v42  ;;  %v8629_v34 = vpop.f32.mrf.mxu0 }
 0x1d3   : > { %9131 = vst [vmem:[#allocation29_spill] sm:$0xff] %v8629_v34  ;;  %v8631_v30 = vpop.f32.mrf.mxu1 }
 0x1d4   : > { %9132 = vst [vmem:[#allocation30_spill] sm:$0xff] %v8631_v30  ;;  %v8633_v15 = vpop.f32.mrf.mxu0 }
 0x1d5   : > { %9133 = vst [vmem:[#allocation31_spill] sm:$0xff] %v8633_v15  ;;  %v8635_v22 = vpop.f32.mrf.mxu1 }
 0x1d6   : > { %9134 = vst [vmem:[#allocation32_spill] sm:$0xff] %v8635_v22  ;;  %v8637_v24 = vpop.f32.mrf.mxu0 }
 0x1d7   : > { %9135 = vst [vmem:[#allocation33_spill] sm:$0xff] %v8637_v24  ;;  %v8639_v56 = vpop.f32.mrf.mxu1  ;;  %v3212_v24 = vadd.f32 %v5911_v36, %v8446_v62  ;;  %v3211_v62 = vadd.f32 %v8551_v61, %v8455_v60  ;;  %v8683_v60 = vld [vmem:[%s8912_s3] ss:$0 sm:$0xff] }
 0x1d8   : > { %9136 = vst [vmem:[#allocation34_spill] sm:$0xff] %v8639_v56  ;;  %v8641_v55 = vpop.f32.mrf.mxu0 }
 0x1d9   : > { %9137 = vst [vmem:[#allocation35_spill] sm:$0xff] %v8641_v55  ;;  %v8643_v58 = vpop.f32.mrf.mxu1  ;;  %v3210_v55 = vadd.f32 %v3083_v45, %v8449_v0  ;;  %v8673_v0 = vld [vmem:[%s8911_s2] ss:$0 sm:$0xff] }
 0x1da   : > { %9138 = vst [vmem:[#allocation36_spill] sm:$0xff] %v8643_v58  ;;  %v8645_v59 = vpop.f32.mrf.mxu0 }
 0x1db   : > { %9139 = vst [vmem:[#allocation37_spill] sm:$0xff] %v8645_v59  ;;  %v8647_v35 = vpop.f32.mrf.mxu1 }
 0x1dc   : > { %9140 = vst [vmem:[#allocation38_spill] sm:$0xff] %v8647_v35  ;;  %v8649_v42 = vpop.f32.mrf.mxu0  ;;  %v3571_v35 = vadd.f32 %v8536_v6, %v3212_v24 }
 0x1dd   : > { %9141 = vst [vmem:[#allocation39_spill] sm:$0xff] %v8649_v42  ;;  %v8651_v34 = vpop.f32.mrf.mxu1  ;;  %v3213_v42 = vadd.f32 %v5912_v43, %v8452_v26 }
 0x1de   : > { %9142 = vst [vmem:[#allocation40_spill] sm:$0xff] %v8651_v34  ;;  %v8653_v30 = vpop.f32.mrf.mxu0 }
 0x1df   : > { %9143 = vst [vmem:[#allocation41_spill] sm:$0xff] %v8653_v30  ;;  %v8655_v15 = vpop.f32.mrf.mxu1  ;;  %v3569_v30 = vadd.f32 %v8541_v39, %v3210_v55  ;;  %v3572_v24 = vadd.f32 %v8545_v5, %v3213_v42  ;;  %v3214_v55 = vadd.f32 %v8559_v54, %v8461_v31  ;;  %v3570_v39 = vadd.f32 %v8547_v28, %v3211_v62 }
 0x1e0   : > { %v8658_v22 = vpop.f32.mrf.mxu0 }
 0x1e1   : > { %9144 = vst [vmem:[#allocation42_spill] sm:$0xff] %v8658_v22  ;;  %v8660_v56 = vpop.f32.mrf.mxu1  ;;  %v3573_v28 = vadd.f32 %v8553_v21, %v3214_v55 }
 0x1e2   : > { %v6013_v58 = vpop.f32.mrf.mxu0 }
 0x1e3   : > { %v8663_v59 = vpop.f32.mrf.mxu1 }
 0x1e4   : > { %9145 = vst [vmem:[#allocation43_spill] sm:$0xff] %v8663_v59  ;;  %v4638_v34 = vpop.f32.mrf.mxu0  ;;  %v3216_v59 = vadd.f32 %v8555_v63, %v8458_v48  ;;  %v3217_v48 = vadd.f32 %v8563_v25, %v8464_v38 }
 0x1e5   : > { %v5979_v20 = vpop.f32.mrf.mxu1 }
 0x1e6   : > { %v4297_v36 = vadd.f32 %v5979_v20, %v3571_v35  ;;  %v6014_v22 = vpop.f32.mrf.mxu0 }
 0x1e7   : > { %v4168_v45 = vpop.f32.mrf.mxu1 }
 0x1e8   : > { %v4767_v6 = vadd.f32 %v6013_v58, %v4297_v36  ;;  %v4295_v26 = vadd.f32 %v4168_v45, %v3569_v30  ;;  %v4641_v43 = vpop.f32.mrf.mxu0  ;;  %v3575_v45 = vadd.f32 %v8549_v37, %v3216_v59  ;;  %v3576_v37 = vadd.f32 %v8557_v40, %v3217_v48 }
 0x1e9   : > { %v5980_v35 = vpop.f32.mrf.mxu1 }
 0x1ea   : > { %v4806_v42 = vmul.f32 %v8673_v0, %v4767_v6  ;;  %v4765_v58 = vadd.f32 %v4638_v34, %v4295_v26  ;;  %v4298_v30 = vadd.f32 %v5980_v35, %v3572_v24  ;;  %v6017_v5 = vpop.f32.mrf.mxu0  ;;  %v3215_v34 = vadd.f32 %v8567_v4, %v8467_v2 }
 0x1eb   : > { %v4171_v61 = vpop.f32.mrf.mxu1  ;;  %v3220_v2 = vadd.f32 %v8571_v7, %v8470_v27 }
 0x1ec   : > { %v4845_v31 = vadd.f32 %v8683_v60, %v4806_v42  ;;  %v4804_v63 = vmul.f32 %v8673_v0, %v4765_v58  ;;  %v4768_v54 = vadd.f32 %v6014_v22, %v4298_v30  ;;  %v4296_v20 = vadd.f32 %v4171_v61, %v3570_v39  ;;  %v4654_v36 = vpop.f32.mrf.mxu0 }
 0x1ed   : > { %v5983_v38 = vpop.f32.mrf.mxu1  ;;  %v3579_v61 = vadd.f32 %v8565_v46, %v3220_v2  ;;  %v3219_v46 = vadd.f32 %v8583_v33, %v8479_v8  ;;  %v3224_v8 = vadd.f32 %v8587_v41, %v8482_v53 }
 0x1ee   : > { %v4877_v25 = vmax.f32 %v4845_v31, 0.0  ;;  %v4843_v62 = vadd.f32 %v8683_v60, %v4804_v63  ;;  %v4807_v22 = vmul.f32 %v8673_v0, %v4768_v54  ;;  %v4766_v24 = vadd.f32 %v4641_v43, %v4296_v20  ;;  %v6018_v59 = vpop.f32.mrf.mxu0 }
 0x1ef   : > { %v4301_v21 = vadd.f32 %v5983_v38, %v3575_v45  ;;  %v4184_v4 = vpop.f32.mrf.mxu1  ;;  %v3574_v43 = vadd.f32 %v8561_v10, %v3215_v34  ;;  %v3218_v31 = vadd.f32 %v8575_v17, %v8473_v18  ;;  %v3221_v63 = vadd.f32 %v8579_v23, %v8476_v13 }
 0x1f0   : > { %4909 = vst.msk [vmem:[%s8699_s25 + $0x10] sm:$0xff] %vm724_vm3, %v4877_v25  ;;  %v4875_v6 = vmax.f32 %v4843_v62, 0.0  ;;  %v4846_v26 = vadd.f32 %v8683_v60, %v4807_v22  ;;  %v4805_v55 = vmul.f32 %v8673_v0, %v4766_v24  ;;  %v4299_v35 = vadd.f32 %v4184_v4, %v3573_v28  ;;  %v4657_v39 = vpop.f32.mrf.mxu0 }
 0x1f1   : > { %v4771_v42 = vadd.f32 %v6017_v5, %v4301_v21  ;;  %v5984_v58 = vpop.f32.mrf.mxu1  ;;  %v3577_v62 = vadd.f32 %v8569_v50, %v3218_v31  ;;  %v3580_v22 = vadd.f32 %v8573_v1, %v3221_v63  ;;  %v3222_v50 = vadd.f32 %v8591_v52, %v8485_v12 }
 0x1f2   : > { %4907 = vst.msk [vmem:[%s8699_s25] sm:$0xff] %vm724_vm3, %v4875_v6  ;;  %v4878_v40 = vmax.f32 %v4846_v26, 0.0  ;;  %v4844_v27 = vadd.f32 %v8683_v60, %v4805_v55  ;;  %v4769_v7 = vadd.f32 %v4654_v36, %v4299_v35  ;;  %v4302_v30 = vadd.f32 %v5984_v58, %v3576_v37  ;;  %v6021_v48 = vpop.f32.mrf.mxu0 }
 0x1f3   : > { %v4810_v10 = vmul.f32 %v8673_v0, %v4771_v42  ;;  %v4187_v5 = vpop.f32.mrf.mxu1  ;;  %v3578_v6 = vadd.f32 %v8577_v51, %v3219_v46 }
 0x1f4   : > { %4910 = vst.msk [vmem:[%s8699_s25 + $0x18] sm:$0xff] %vm724_vm3, %v4878_v40  ;;  %v4876_v54 = vmax.f32 %v4844_v27, 0.0  ;;  %v4808_v20 = vmul.f32 %v8673_v0, %v4769_v7  ;;  %v4772_v36 = vadd.f32 %v6018_v59, %v4302_v30  ;;  %v4300_v45 = vadd.f32 %v4187_v5, %v3574_v43  ;;  %v4670_v28 = vpop.f32.mrf.mxu0 }
 0x1f5   : > { %v4849_v34 = vadd.f32 %v8683_v60, %v4810_v10  ;;  %v5987_v18 = vpop.f32.mrf.mxu1  ;;  %v3583_v43 = vadd.f32 %v8581_v19, %v3224_v8  ;;  %v3581_v7 = vadd.f32 %v8585_v57, %v3222_v50  ;;  %v3225_v30 = vadd.f32 %v8595_v14, %v8488_v16  ;;  %v9148_v8 = vld [vmem:[#allocation22_spill] sm:$0xff] }
 0x1f6   : > { %4908 = vst.msk [vmem:[%s8699_s25 + $0x8] sm:$0xff] %vm724_vm3, %v4876_v54  ;;  %v4847_v13 = vadd.f32 %v8683_v60, %v4808_v20  ;;  %v4811_v17 = vmul.f32 %v8673_v0, %v4772_v36  ;;  %v4770_v23 = vadd.f32 %v4657_v39, %v4300_v45  ;;  %v4305_v38 = vadd.f32 %v5987_v18, %v3579_v61  ;;  %v6022_v25 = vpop.f32.mrf.mxu0 }
 0x1f7   : > { %v4881_v33 = vmax.f32 %v4849_v34, 0.0  ;;  %v4200_v24 = vpop.f32.mrf.mxu1  ;;  %v3228_v57 = vadd.f32 %v8603_v44, %v8494_v29  ;;  %v3226_v29 = vadd.f32 %v8607_v3, %v8497_v9 }
 0x1f8   : > { %v4879_v59 = vmax.f32 %v4847_v13, 0.0  ;;  %v4850_v37 = vadd.f32 %v8683_v60, %v4811_v17  ;;  %v4809_v2 = vmul.f32 %v8673_v0, %v4770_v23  ;;  %v4775_v21 = vadd.f32 %v6021_v48, %v4305_v38  ;;  %v4673_v4 = vpop.f32.mrf.mxu0 }
 0x1f9   : > { %4913 = vst.msk [vmem:[%s8699_s25 + $0x30] sm:$0xff] %vm724_vm3, %v4881_v33  ;;  %v4303_v1 = vadd.f32 %v4200_v24, %v3577_v62  ;;  %v5988_v26 = vpop.f32.mrf.mxu1  ;;  %v3223_v48 = vadd.f32 %v8599_v32, %v8491_v11 }
 0x1fa   : > { %4911 = vst.msk [vmem:[%s8699_s25 + $0x20] sm:$0xff] %vm724_vm3, %v4879_v59  ;;  %v4882_v53 = vmax.f32 %v4850_v37, 0.0  ;;  %v4848_v41 = vadd.f32 %v8683_v60, %v4809_v2  ;;  %v4814_v55 = vmul.f32 %v8673_v0, %v4775_v21  ;;  %v4306_v35 = vadd.f32 %v5988_v26, %v3580_v22  ;;  %v6025_v39 = vpop.f32.mrf.mxu0  ;;  %v9147_v22 = vld [vmem:[#allocation2_spill] sm:$0xff]  ;;  %v9149_v2 = vld [vmem:[#allocation15_spill] sm:$0xff] }
 0x1fb   : > { %v4773_v51 = vadd.f32 %v4670_v28, %v4303_v1  ;;  %v4203_v42 = vpop.f32.mrf.mxu1  ;;  %v3584_v28 = vadd.f32 %v8589_v47, %v3225_v30  ;;  %v3582_v46 = vadd.f32 %v8593_v49, %v3223_v48  ;;  %v3229_v47 = vadd.f32 %v9148_v8, %v9147_v22  ;;  %v9162_v22 = vld [vmem:[#allocation21_spill] sm:$0xff]  ;;  %v9163_v8 = vld [vmem:[#allocation30_spill] sm:$0xff] }
 0x1fc   : > { %4914 = vst.msk [vmem:[%s8699_s25 + $0x38] sm:$0xff] %vm724_vm3, %v4882_v53  ;;  %v4880_v12 = vmax.f32 %v4848_v41, 0.0  ;;  %v4853_v52 = vadd.f32 %v8683_v60, %v4814_v55  ;;  %v4776_v58 = vadd.f32 %v6022_v25, %v4306_v35  ;;  %v4304_v40 = vadd.f32 %v4203_v42, %v3578_v6  ;;  %v4686_v27 = vpop.f32.mrf.mxu0  ;;  %v9146_v25 = vld [vmem:[#allocation13_spill] sm:$0xff]  ;;  %v9153_v42 = vld [vmem:[#allocation19_spill] sm:$0xff] }
 0x1fd   : > { %v4812_v19 = vmul.f32 %v8673_v0, %v4773_v51  ;;  %v5991_v61 = vpop.f32.mrf.mxu1  ;;  %v3587_v62 = vadd.f32 %v9146_v25, %v3228_v57  ;;  %v3585_v21 = vadd.f32 %v9149_v2, %v3226_v29  ;;  %v9150_v55 = vld [vmem:[#allocation17_spill] sm:$0xff]  ;;  %v9161_v25 = vld [vmem:[#allocation8_spill] sm:$0xff] }
 0x1fe   : > { %4912 = vst.msk [vmem:[%s8699_s25 + $0x28] sm:$0xff] %vm724_vm3, %v4880_v12  ;;  %v4885_v31 = vmax.f32 %v4853_v52, 0.0  ;;  %v4815_v63 = vmul.f32 %v8673_v0, %v4776_v58  ;;  %v4774_v10 = vadd.f32 %v4673_v4, %v4304_v40  ;;  %v4309_v5 = vadd.f32 %v5991_v61, %v3583_v43  ;;  %v6026_v54 = vpop.f32.mrf.mxu0  ;;  %v9152_v43 = vld [vmem:[#allocation11_spill] sm:$0xff]  ;;  %v9154_v12 = vld [vmem:[#allocation16_spill] sm:$0xff]  ;;  %v9155_v61 = vld [vmem:[#allocation9_spill] sm:$0xff] }
 0x1ff   : > { %v4851_v20 = vadd.f32 %v8683_v60, %v4812_v19  ;;  %v4216_v16 = vpop.f32.mrf.mxu1  ;;  %v3588_v35 = vadd.f32 %v9150_v55, %v3229_v47  ;;  %v3232_v52 = vadd.f32 %v9154_v12, %v9153_v42  ;;  %v3231_v47 = vadd.f32 %v9163_v8, %v9162_v22  ;;  %v9164_v2 = vld [vmem:[#allocation12_spill] sm:$0xff]  ;;  %v9165_v55 = vld [vmem:[#allocation27_spill] sm:$0xff]  ;;  %v9168_v42 = vld [vmem:[#allocation25_spill] sm:$0xff] }
 0x200   : > { %4917 = vst.msk [vmem:[%s8699_s25 + $0x50] sm:$0xff] %vm724_vm3, %v4885_v31  ;;  %v4854_v11 = vadd.f32 %v8683_v60, %v4815_v63  ;;  %v4813_v32 = vmul.f32 %v8673_v0, %v4774_v10  ;;  %v4779_v14 = vadd.f32 %v6025_v39, %v4309_v5  ;;  %v4307_v36 = vadd.f32 %v4216_v16, %v3581_v7  ;;  %v4689_v45 = vpop.f32.mrf.mxu0  ;;  %v9151_v39 = vld [vmem:[#allocation14_spill] sm:$0xff]  ;;  %v9178_v8 = vld [vmem:[#allocation40_spill] sm:$0xff] }
 0x201   : > { %v4883_v44 = vmax.f32 %v4851_v20, 0.0  ;;  %v5992_v34 = vpop.f32.mrf.mxu1  ;;  %v3227_v51 = vadd.f32 %v9152_v43, %v9151_v39  ;;  %v9156_v31 = vld [vmem:[#allocation26_spill] sm:$0xff]  ;;  %v9166_v39 = vld [vmem:[#allocation23_spill] sm:$0xff]  ;;  %v9167_v43 = vld [vmem:[#allocation32_spill] sm:$0xff] }
 0x202   : > { %v4886_v18 = vmax.f32 %v4854_v11, 0.0  ;;  %v4852_v13 = vadd.f32 %v8683_v60, %v4813_v32  ;;  %v4818_v17 = vmul.f32 %v8673_v0, %v4779_v14  ;;  %v4777_v23 = vadd.f32 %v4686_v27, %v4307_v36  ;;  %v6029_v38 = vpop.f32.mrf.mxu0  ;;  %v9157_v32 = vld [vmem:[#allocation20_spill] sm:$0xff]  ;;  %v9169_v12 = vld [vmem:[#allocation34_spill] sm:$0xff] }
 0x203   : > { %4915 = vst.msk [vmem:[%s8699_s25 + $0x40] sm:$0xff] %vm724_vm3, %v4883_v44  ;;  %v4310_v49 = vadd.f32 %v5992_v34, %v3584_v28  ;;  %v4219_v33 = vpop.f32.mrf.mxu1  ;;  %v3230_v63 = vadd.f32 %v9156_v31, %v9155_v61  ;;  %v3586_v14 = vadd.f32 %v9157_v32, %v3227_v51  ;;  %v9158_v36 = vld [vmem:[#allocation24_spill] sm:$0xff]  ;;  %v9159_v28 = vld [vmem:[#allocation18_spill] sm:$0xff]  ;;  %v3236_v51 = vadd.f32 %v9167_v43, %v9166_v39  ;;  %v9172_v32 = vld [vmem:[#allocation29_spill] sm:$0xff] }
 0x204   : > { %4918 = vst.msk [vmem:[%s8699_s25 + $0x58] sm:$0xff] %vm724_vm3, %v4886_v18  ;;  %v4884_v9 = vmax.f32 %v4852_v13, 0.0  ;;  %v4857_v3 = vadd.f32 %v8683_v60, %v4818_v17  ;;  %v4816_v24 = vmul.f32 %v8673_v0, %v4777_v23  ;;  %v4308_v59 = vadd.f32 %v4219_v33, %v3582_v46  ;;  %v4702_v37 = vpop.f32.mrf.mxu0  ;;  %v9160_v46 = vld [vmem:[#allocation28_spill] sm:$0xff]  ;;  %v9177_v22 = vld [vmem:[#allocation6_spill] sm:$0xff]  ;;  %v9181_v39 = vld [vmem:[#allocation5_spill] sm:$0xff] }
 0x205   : > { %v4780_v4 = vadd.f32 %v6026_v54, %v4310_v49  ;;  %v5995_v6 = vpop.f32.mrf.mxu1  ;;  %v3233_v29 = vadd.f32 %v9160_v46, %v9159_v28  ;;  %v9170_v61 = vld [vmem:[#allocation4_spill] sm:$0xff]  ;;  %v9174_v28 = vld [vmem:[#allocation3_spill] sm:$0xff]  ;;  %v9175_v46 = vld [vmem:[#allocation38_spill] sm:$0xff]  ;;  %v3238_v43 = vadd.f32 %v8655_v15, %v9181_v39 }
 0x206   : > { %4916 = vst.msk [vmem:[%s8699_s25 + $0x48] sm:$0xff] %vm724_vm3, %v4884_v9  ;;  %v4889_v50 = vmax.f32 %v4857_v3, 0.0  ;;  %v4855_v1 = vadd.f32 %v8683_v60, %v4816_v24  ;;  %v4778_v26 = vadd.f32 %v4689_v45, %v4308_v59  ;;  %v4313_v53 = vadd.f32 %v5995_v6, %v3587_v62  ;;  %v6030_v41 = vpop.f32.mrf.mxu0  ;;  %v9171_v31 = vld [vmem:[#allocation36_spill] sm:$0xff] }
 0x207   : > { %v4819_v58 = vmul.f32 %v8673_v0, %v4780_v4  ;;  %v4232_v40 = vpop.f32.mrf.mxu1  ;;  %v3591_v45 = vadd.f32 %v9158_v36, %v3232_v52  ;;  %v3589_v62 = vadd.f32 %v9161_v25, %v3230_v63  ;;  %v3234_v52 = vadd.f32 %v9169_v12, %v9168_v42  ;;  %v9173_v36 = vld [vmem:[#allocation31_spill] sm:$0xff]  ;;  %v9176_v25 = vld [vmem:[#allocation33_spill] sm:$0xff] }
 0x208   : > { %4921 = vst.msk [vmem:[%s8699_s25 + $0x70] sm:$0xff] %vm724_vm3, %v4889_v50  ;;  %v4887_v27 = vmax.f32 %v4855_v1, 0.0  ;;  %v4817_v7 = vmul.f32 %v8673_v0, %v4778_v26  ;;  %v4783_v30 = vadd.f32 %v6029_v38, %v4313_v53  ;;  %v4311_v48 = vadd.f32 %v4232_v40, %v3585_v21  ;;  %v4705_v19 = vpop.f32.mrf.mxu0 }
 0x209   : > { %v4858_v10 = vadd.f32 %v8683_v60, %v4819_v58  ;;  %v5996_v5 = vpop.f32.mrf.mxu1  ;;  %v3592_v21 = vadd.f32 %v9164_v2, %v3233_v29  ;;  %v3237_v63 = vadd.f32 %v9171_v31, %v9170_v61  ;;  %v3235_v29 = vadd.f32 %v9175_v46, %v9174_v28  ;;  %v9179_v2 = vld [vmem:[#allocation35_spill] sm:$0xff]  ;;  %v9187_v46 = vld [vmem:[#allocation42_spill] sm:$0xff] }
 0x20a   : > { %4919 = vst.msk [vmem:[%s8699_s25 + $0x60] sm:$0xff] %vm724_vm3, %v4887_v27  ;;  %v4856_v54 = vadd.f32 %v8683_v60, %v4817_v7  ;;  %v4822_v57 = vmul.f32 %v8673_v0, %v4783_v30  ;;  %v4781_v20 = vadd.f32 %v4702_v37, %v4311_v48  ;;  %v4314_v16 = vadd.f32 %v5996_v5, %v3588_v35 }
 0x20b   : > { %v6033_v11 = vpop.f32.mrf.mxu0  ;;  %v4890_v44 = vmax.f32 %v4858_v10, 0.0  ;;  %v4235_v34 = vpop.f32.mrf.mxu1  ;;  %v3590_v35 = vadd.f32 %v9165_v55, %v3231_v47  ;;  %v3240_v47 = vadd.f32 %v9178_v8, %v9177_v22  ;;  %v9180_v55 = vld [vmem:[#allocation37_spill] sm:$0xff] }
 0x20c   : > { %v4888_v18 = vmax.f32 %v4856_v54, 0.0  ;;  %v4861_v13 = vadd.f32 %v8683_v60, %v4822_v57  ;;  %v4820_v17 = vmul.f32 %v8673_v0, %v4781_v20  ;;  %v4784_v23 = vadd.f32 %v6030_v41, %v4314_v16 }
 0x20d   : > { %v4718_v38 = vpop.f32.mrf.mxu0  ;;  %4922 = vst.msk [vmem:[%s8699_s25 + $0x78] sm:$0xff] %vm724_vm3, %v4890_v44  ;;  %v4312_v49 = vadd.f32 %v4235_v34, %v3586_v14  ;;  %v5999_v33 = vpop.f32.mrf.mxu1  ;;  %v3595_v14 = vadd.f32 %v9172_v32, %v3236_v51  ;;  %v9182_v51 = vld [vmem:[#allocation7_spill] sm:$0xff] }
 0x20e   : > { %4920 = vst.msk [vmem:[%s8699_s25 + $0x68] sm:$0xff] %vm724_vm3, %v4888_v18  ;;  %v4893_v9 = vmax.f32 %v4861_v13, 0.0  ;;  %v4859_v3 = vadd.f32 %v8683_v60, %v4820_v17  ;;  %v4823_v24 = vmul.f32 %v8673_v0, %v4784_v23  ;;  %v4317_v59 = vadd.f32 %v5999_v33, %v3591_v45 }
 0x20f   : > { %v6034_v37 = vpop.f32.mrf.mxu0  ;;  %v4782_v4 = vadd.f32 %v4705_v19, %v4312_v49  ;;  %v4248_v6 = vpop.f32.mrf.mxu1  ;;  %v3593_v45 = vadd.f32 %v9173_v36, %v3234_v52  ;;  %v3241_v42 = vadd.f32 %v8660_v56, %v9182_v51 }
 0x210   : > { %4925 = vst.msk [vmem:[%s8699_s25 + $0x90] sm:$0xff] %vm724_vm3, %v4893_v9  ;;  %v4891_v50 = vmax.f32 %v4859_v3, 0.0  ;;  %v4862_v1 = vadd.f32 %v8683_v60, %v4823_v24  ;;  %v4787_v26 = vadd.f32 %v6033_v11, %v4317_v59  ;;  %v4315_v53 = vadd.f32 %v4248_v6, %v3589_v62 }
 0x211   : > { %v4721_v41 = vpop.f32.mrf.mxu0  ;;  %v4821_v58 = vmul.f32 %v8673_v0, %v4782_v4  ;;  %v6000_v40 = vpop.f32.mrf.mxu1  ;;  %v3596_v62 = vadd.f32 %v9176_v25, %v3237_v63 }
 0x212   : > { %4923 = vst.msk [vmem:[%s8699_s25 + $0x80] sm:$0xff] %vm724_vm3, %v4891_v50  ;;  %v4894_v27 = vmax.f32 %v4862_v1, 0.0  ;;  %v4826_v7 = vmul.f32 %v8673_v0, %v4787_v26  ;;  %v4785_v30 = vadd.f32 %v4718_v38, %v4315_v53  ;;  %v4318_v48 = vadd.f32 %v6000_v40, %v3592_v21 }
 0x213   : > { %v6037_v19 = vpop.f32.mrf.mxu0  ;;  %v4860_v10 = vadd.f32 %v8683_v60, %v4821_v58  ;;  %v4251_v5 = vpop.f32.mrf.mxu1  ;;  %v3594_v21 = vadd.f32 %v9179_v2, %v3235_v29 }
 0x214   : > { %4926 = vst.msk [vmem:[%s8699_s25 + $0x98] sm:$0xff] %vm724_vm3, %v4894_v27  ;;  %v4865_v54 = vadd.f32 %v8683_v60, %v4826_v7  ;;  %v4824_v57 = vmul.f32 %v8673_v0, %v4785_v30  ;;  %v4788_v20 = vadd.f32 %v6034_v37, %v4318_v48  ;;  %v4316_v16 = vadd.f32 %v4251_v5, %v3590_v35  ;;  %v9183_v30 = vld [vmem:[#allocation10_spill] sm:$0xff]  ;;  %v9184_v48 = vld [vmem:[#allocation43_spill] sm:$0xff] }
 0x215   : > { %v4734_v11 = vpop.f32.mrf.mxu0  ;;  %v4892_v44 = vmax.f32 %v4860_v10, 0.0  ;;  %v6003_v34 = vpop.f32.mrf.mxu1  ;;  %v3599_v35 = vadd.f32 %v9180_v55, %v3240_v47 }
 0x216   : > { %v4897_v18 = vmax.f32 %v4865_v54, 0.0  ;;  %v4863_v13 = vadd.f32 %v8683_v60, %v4824_v57  ;;  %v4827_v17 = vmul.f32 %v8673_v0, %v4788_v20  ;;  %v4786_v23 = vadd.f32 %v4721_v41, %v4316_v16  ;;  %v9185_v54 = vld [vmem:[#allocation39_spill] sm:$0xff]  ;;  %v9186_v20 = vld [vmem:[#allocation41_spill] sm:$0xff] }
 0x217   : > { %v6038_v38 = vpop.f32.mrf.mxu0  ;;  %4924 = vst.msk [vmem:[%s8699_s25 + $0x88] sm:$0xff] %vm724_vm3, %v4892_v44  ;;  %v4321_v49 = vadd.f32 %v6003_v34, %v3595_v14  ;;  %v4264_v33 = vpop.f32.mrf.mxu1  ;;  %v3597_v57 = vadd.f32 %v9185_v54, %v3238_v43  ;;  %v3600_v16 = vadd.f32 %v9186_v20, %v3241_v42 }
 0x218   : > { %4929 = vst.msk [vmem:[%s8699_s25 + $0xb0] sm:$0xff] %vm724_vm3, %v4897_v18  ;;  %v4895_v9 = vmax.f32 %v4863_v13, 0.0  ;;  %v4866_v3 = vadd.f32 %v8683_v60, %v4827_v17  ;;  %v4825_v24 = vmul.f32 %v8673_v0, %v4786_v23  ;;  %v4319_v59 = vadd.f32 %v4264_v33, %v3593_v45 }
 0x219   : > { %v4737_v37 = vpop.f32.mrf.mxu0  ;;  %v4791_v4 = vadd.f32 %v6037_v19, %v4321_v49  ;;  %v6004_v6 = vpop.f32.mrf.mxu1  ;;  %v3239_v19 = vadd.f32 %v9184_v48, %v9183_v30 }
 0x21a   : > { %4927 = vst.msk [vmem:[%s8699_s25 + $0xa0] sm:$0xff] %vm724_vm3, %v4895_v9  ;;  %v4898_v50 = vmax.f32 %v4866_v3, 0.0  ;;  %v4864_v1 = vadd.f32 %v8683_v60, %v4825_v24  ;;  %v4789_v26 = vadd.f32 %v4734_v11, %v4319_v59  ;;  %v4322_v53 = vadd.f32 %v6004_v6, %v3596_v62 }
 0x21b   : > { %v6041_v41 = vpop.f32.mrf.mxu0  ;;  %v4830_v12 = vmul.f32 %v8673_v0, %v4791_v4  ;;  %v4267_v52 = vpop.f32.mrf.mxu1  ;;  %v3598_v29 = vadd.f32 %v9187_v46, %v3239_v19 }
 0x21c   : > { %4930 = vst.msk [vmem:[%s8699_s25 + $0xb8] sm:$0xff] %vm724_vm3, %v4898_v50  ;;  %v4896_v58 = vmax.f32 %v4864_v1, 0.0  ;;  %v4828_v40 = vmul.f32 %v8673_v0, %v4789_v26  ;;  %v4792_v27 = vadd.f32 %v6038_v38, %v4322_v53  ;;  %v4320_v7 = vadd.f32 %v4267_v52, %v3594_v21 }
 0x21d   : > { %v4869_v61 = vadd.f32 %v8683_v60, %v4830_v12  ;;  %v6007_v31 = vpop.f32.mrf.mxu1  ;;  %v4750_v15 = vpop.f32.mrf.mxu0 }
 0x21e   : > { %4928 = vst.msk [vmem:[%s8699_s25 + $0xa8] sm:$0xff] %vm724_vm3, %v4896_v58  ;;  %v4867_v56 = vadd.f32 %v8683_v60, %v4828_v40  ;;  %v4831_v63 = vmul.f32 %v8673_v0, %v4792_v27  ;;  %v4790_v10 = vadd.f32 %v4737_v37, %v4320_v7  ;;  %v4325_v5 = vadd.f32 %v6007_v31, %v3599_v35 }
 0x21f   : > { %v4901_v11 = vmax.f32 %v4869_v61, 0.0  ;;  %v4280_v32 = vpop.f32.mrf.mxu1  ;;  %v6042_v18 = vpop.f32.mrf.mxu0 }
 0x220   : > { %v4899_v14 = vmax.f32 %v4867_v56, 0.0  ;;  %v4870_v36 = vadd.f32 %v8683_v60, %v4831_v63  ;;  %v4829_v45 = vmul.f32 %v8673_v0, %v4790_v10  ;;  %v4795_v28 = vadd.f32 %v6041_v41, %v4325_v5 }
 0x221   : > { %4933 = vst.msk [vmem:[%s8699_s25 + $0xd0] sm:$0xff] %vm724_vm3, %v4901_v11  ;;  %v4323_v44 = vadd.f32 %v4280_v32, %v3597_v57  ;;  %v6008_v34 = vpop.f32.mrf.mxu1  ;;  %v4753_v9 = vpop.f32.mrf.mxu0 }
 0x222   : > { %4931 = vst.msk [vmem:[%s8699_s25 + $0xc0] sm:$0xff] %vm724_vm3, %v4899_v14  ;;  %v4902_v13 = vmax.f32 %v4870_v36, 0.0  ;;  %v4868_v17 = vadd.f32 %v8683_v60, %v4829_v45  ;;  %v4834_v23 = vmul.f32 %v8673_v0, %v4795_v28  ;;  %v4326_v38 = vadd.f32 %v6008_v34, %v3600_v16 }
 0x223   : > { %v4793_v25 = vadd.f32 %v4750_v15, %v4323_v44  ;;  %v4283_v62 = vpop.f32.mrf.mxu1 }
 0x224   : > { %4934 = vst.msk [vmem:[%s8699_s25 + $0xd8] sm:$0xff] %vm724_vm3, %v4902_v13  ;;  %v4900_v22 = vmax.f32 %v4868_v17, 0.0  ;;  %v4873_v8 = vadd.f32 %v8683_v60, %v4834_v23  ;;  %v4796_v47 = vadd.f32 %v6042_v18, %v4326_v38  ;;  %v4324_v49 = vadd.f32 %v4283_v62, %v3598_v29 }
 0x225   : > { %v4832_v33 = vmul.f32 %v8673_v0, %v4793_v25 }
 0x226   : > { %4932 = vst.msk [vmem:[%s8699_s25 + $0xc8] sm:$0xff] %vm724_vm3, %v4900_v22  ;;  %v4905_v3 = vmax.f32 %v4873_v8, 0.0  ;;  %v4835_v24 = vmul.f32 %v8673_v0, %v4796_v47  ;;  %v4794_v59 = vadd.f32 %v4753_v9, %v4324_v49 }
 0x227   : > { %v4871_v37 = vadd.f32 %v8683_v60, %v4832_v33 }
 0x228   : > { %4937 = vst.msk [vmem:[%s8699_s25 + $0xf0] sm:$0xff] %vm724_vm3, %v4905_v3  ;;  %v4874_v2 = vadd.f32 %v8683_v60, %v4835_v24  ;;  %v4833_v21 = vmul.f32 %v8673_v0, %v4794_v59 }
 0x229   : > { %v4903_v4 = vmax.f32 %v4871_v37, 0.0 }
 0x22a   : > { %v4906_v6 = vmax.f32 %v4874_v2, 0.0  ;;  %v4872_v50 = vadd.f32 %v8683_v60, %v4833_v21 }
 0x22b   : > { %4935 = vst.msk [vmem:[%s8699_s25 + $0xe0] sm:$0xff] %vm724_vm3, %v4903_v4 }
 0x22c   : > { %4938 = vst.msk [vmem:[%s8699_s25 + $0xf8] sm:$0xff] %vm724_vm3, %v4906_v6  ;;  %v4904_v1 = vmax.f32 %v4872_v50, 0.0 }
 0x22e   : > { %4936 = vst.msk [vmem:[%s8699_s25 + $0xe8] sm:$0xff] %vm724_vm3, %v4904_v1 }
 0x22f PF: > { %s14_s17 = sadd.s32 1, %s6152_s17   ;;  %s9188_s15 = smov %s6148_s16 }
 0x230   : > { %p11_p5 = scmp.ge.s32.totalorder %s14_s17, 4   ;;  %s9189_s16 = smov %s9191_s18 }
 0x232   :  { %13 = sbr.rel (!%p11_p5) target bundleno = 2 (0x2), region = 76 }

</bundles_post_ra>
